<compile_context>
chip_gen: v5e
topology: v5e:2x2
jax: 0.10.0
libtpu: 0.0.40
codegen_flags: <defaults>
</compile_context>

<pallas_src>
import jax
import jax.numpy as jnp
import numpy as np
from jax.experimental import pallas as pl
from jax.experimental.pallas import tpu as pltpu

L_IN = 360          # (360-5)/5+1 = 72 ; (72-3)/3+1 = 24 ; maxpool(2,2) -> 12 ; 64*12 = 768
C = 64


def source_cnn_kernel(x_ref,
                      w1_ref, b1_ref,
                      w2_ref, b2_ref, s2_ref, t2_ref,
                      wf1_ref, bf1_ref, wf2_ref, bf2_ref,
                      wf3_ref, bf3_ref, wp_ref, bp_ref,
                      out_ref, inter_ref):
    S = x_ref.shape[0]            # pool-window groups per example (12 or 6)
    TB = x_ref.shape[1]           # batch tile
    NP = s2_ref.shape[1]          # pooled lanes per group = 64 * G
    md = w1_ref.dtype             # matmul operand dtype (bf16 fast path or f32)

    # (S, TB, 30G) -> (S*TB, 30G): pure leading-dim collapse (TB % 8 == 0), free.
    # x was pre-cast to `md` in the wrapper, so no in-kernel cast / f32 copy.
    xr = x_ref[...].reshape(S * TB, x_ref.shape[2])

    # --- conv1 (k=5,s=5) + folded BN1 + ReLU (cast fused into epilogue) -------
    h1 = jnp.dot(xr, w1_ref[...], preferred_element_type=jnp.float32)
    h1 = jnp.maximum(h1 + b1_ref[...], 0.0).astype(md)            # (S*TB, 384G)

    # --- conv2 (k=3,s=3): both MaxPool candidates of every window -------------
    h2 = jnp.dot(h1, w2_ref[...], preferred_element_type=jnp.float32)
    h2 = h2 + b2_ref[...]                                          # (S*TB, 128G)

    # --- MaxPool1d(2,2) as aligned lane-half max, then BN2 (eval) + ReLU ------
    h2p = jnp.maximum(h2[:, :NP], h2[:, NP:])                      # (S*TB, 64G)
    h2p = jnp.maximum(h2p * s2_ref[...] + t2_ref[...], 0.0).astype(md)

    # --- fc1: tree-reduced sum of S aligned (TB,64G)@(64G,384) matmuls --------
    parts = [jnp.dot(h2p[s * TB:(s + 1) * TB, :],
                     wf1_ref[s * NP:(s + 1) * NP, :],
                     preferred_element_type=jnp.float32)
             for s in range(S)]
    while len(parts) > 1:                                          # pairwise tree
        nxt = [parts[i] + parts[i + 1] for i in range(0, len(parts) - 1, 2)]
        if len(parts) % 2:
            nxt.append(parts[-1])
        parts = nxt
    inter = jnp.maximum(parts[0] + bf1_ref[...], 0.0)              # (TB, 384) f32
    inter_ref[...] = inter.astype(inter_ref.dtype)

    # --- fc2 / fc3 / predict ---------------------------------------------------
    z2 = jnp.maximum(
        jnp.dot(inter.astype(md), wf2_ref[...],
                preferred_element_type=jnp.float32) + bf2_ref[...], 0.0)
    z3 = jnp.maximum(
        jnp.dot(z2.astype(md), wf3_ref[...],
                preferred_element_type=jnp.float32) + bf3_ref[...], 0.0)
    # predict weight zero-padded to 128 lanes -> lane-dense (TB, 128) store.
    out_ref[...] = (jnp.dot(z3.astype(md), wp_ref[...],
                            preferred_element_type=jnp.float32)
                    + bp_ref[...]).astype(out_ref.dtype)


def make_params(key):
    ks = jax.random.split(key, 24)
    p = {}
    p["W1"] = 0.1 * jax.random.normal(ks[0], (C, 1, 5), jnp.float32)
    p["b1"] = 0.1 * jax.random.normal(ks[1], (C,), jnp.float32)
    p["g1"] = 1.0 + 0.1 * jax.random.normal(ks[2], (C,), jnp.float32)
    p["be1"] = 0.1 * jax.random.normal(ks[3], (C,), jnp.float32)
    p["m1"] = 0.1 * jax.random.normal(ks[4], (C,), jnp.float32)
    p["v1"] = jax.random.uniform(ks[5], (C,), jnp.float32, 0.5, 1.5)
    p["W2"] = 0.1 * jax.random.normal(ks[6], (C, C, 3), jnp.float32)
    p["b2"] = 0.1 * jax.random.normal(ks[7], (C,), jnp.float32)
    p["g2"] = 1.0 + 0.1 * jax.random.normal(ks[8], (C,), jnp.float32)
    p["be2"] = 0.1 * jax.random.normal(ks[9], (C,), jnp.float32)
    p["m2"] = 0.1 * jax.random.normal(ks[10], (C,), jnp.float32)
    p["v2"] = jax.random.uniform(ks[11], (C,), jnp.float32, 0.5, 1.5)
    p["Wfc1"] = 0.05 * jax.random.normal(ks[12], (384, 768), jnp.float32)
    p["bfc1"] = 0.05 * jax.random.normal(ks[13], (384,), jnp.float32)
    p["Wfc2"] = 0.05 * jax.random.normal(ks[14], (64, 384), jnp.float32)
    p["bfc2"] = 0.05 * jax.random.normal(ks[15], (64,), jnp.float32)
    p["Wfc3"] = 0.05 * jax.random.normal(ks[16], (16, 64), jnp.float32)
    p["bfc3"] = 0.05 * jax.random.normal(ks[17], (16,), jnp.float32)
    p["Wp"] = 0.05 * jax.random.normal(ks[18], (1, 16), jnp.float32)
    p["bp"] = 0.05 * jax.random.normal(ks[19], (1,), jnp.float32)
    return p


def fold_bn(gamma, beta, mean, var, eps=1e-5):
    s = gamma / jnp.sqrt(var + eps)
    return s, beta - mean * s


def _mxu_is_256_wide():
    """True on v6e/v7x-class chips (256-wide MXU); False on v5e and older."""
    try:
        kind = jax.devices()[0].device_kind.lower()
    except Exception:
        return True
    return not any(t in kind for t in ("v2", "v3", "v4", "v5"))


def source_cnn_pallas(x_ncl, p, *, tb=256, matmul_dtype=jnp.bfloat16,
                      out_dtype=None, pair_windows=None):
    """x_ncl: (B, 1, 360) f32 -> (result (B, 1), inter_x (B, 384)).

    tb: batch tile, multiple of 16.  Keep in 256..512; ~256 on v7x so live
        intermediates stay well inside its 64 MiB VMEM and the grid has >=2
        steps for its two TensorCores.
    pair_windows: process pool windows in pairs (matched to 256-wide MXUs).
        Default auto: True on v6e/v7x, False on v5e/older (128-wide MXU).
    out_dtype: dtype of stored outputs (default: matmul_dtype).
    """
    B = x_ncl.shape[0]
    assert x_ncl.shape[1:] == (1, L_IN)
    assert tb % 16 == 0, "tb must be a multiple of 16 (sublane/bf16-pack align)"
    md = matmul_dtype
    od = matmul_dtype if out_dtype is None else out_dtype
    if pair_windows is None:
        pair_windows = _mxu_is_256_wide()
    G = 2 if pair_windows else 1
    S = 12 // G                    # window groups per example
    KIN = 30 * G                   # input samples per group
    NP = C * G                     # pooled lanes per group

    # ---- batch padding + group-major-over-batch input layout (plumbing only) --
    pB = ((B + tb - 1) // tb) * tb
    x2d = x_ncl[:, 0, :]                                          # (B, 360)
    if pB != B:
        x2d = jnp.pad(x2d, ((0, pB - B), (0, 0)))
    # (pB, 360) -> (S groups, pB, 30G samples); pre-cast to the matmul dtype so
    # the bf16 path halves the input DMA and the x double-buffer.
    xT = jnp.transpose(x2d.reshape(pB, S, KIN), (1, 0, 2)).astype(md)

    # ---- glue: fold BN1, block-diagonal conv weights, FC restack --------------
    s1, t1 = fold_bn(p["g1"], p["be1"], p["m1"], p["v1"])
    s2, t2 = fold_bn(p["g2"], p["be2"], p["m2"], p["v2"])

    w1f = (p["W1"][:, 0, :] * s1[:, None]).T                      # (5, 64), BN1 folded
    b1f = p["b1"] * s1 + t1
    w1blk = jnp.kron(jnp.eye(6 * G, dtype=jnp.float32), w1f)      # (30G, 384G)
    b1blk = jnp.tile(b1f, 6 * G).reshape(1, 6 * G * C)

    # conv2 block-diag; column blocks permuted so MaxPool candidate 0 of every
    # window in the group fills lanes [:NP] and candidate 1 fills [NP:].
    w2r = jnp.transpose(p["W2"], (2, 1, 0)).reshape(3 * C, C)     # (192, 64)
    w2k = jnp.kron(jnp.eye(2 * G, dtype=jnp.float32), w2r)        # (384G, 128G)
    perm = [2 * i for i in range(G)] + [2 * i + 1 for i in range(G)]
    w2blk = w2k.reshape(6 * G * C, 2 * G, C)[:, perm, :].reshape(6 * G * C, 2 * G * C)
    b2blk = jnp.tile(p["b2"], 2 * G).reshape(1, 2 * G * C)

    # PyTorch flatten is channel-major (feature j = c*12 + s); restacked rows are
    # pool-window-major then channel, so group g's row slice matches h2p's lanes.
    wf1 = jnp.transpose(p["Wfc1"].reshape(384, C, 12), (2, 1, 0)).reshape(12 * C, 384)
    wf2 = p["Wfc2"].T                                             # (384, 64)
    wf3 = p["Wfc3"].T                                             # (64, 16)
    wp = jnp.zeros((16, 128), jnp.float32).at[:, 0:1].set(p["Wp"].T)
    bp = jnp.zeros((1, 128), jnp.float32).at[0, 0].set(p["bp"][0])

    weights = (w1blk.astype(md), b1blk,
               w2blk.astype(md), b2blk,
               jnp.tile(s2, G).reshape(1, NP), jnp.tile(t2, G).reshape(1, NP),
               wf1.astype(md), p["bfc1"].reshape(1, 384),
               wf2.astype(md), p["bfc2"].reshape(1, 64),
               wf3.astype(md), p["bfc3"].reshape(1, 16),
               wp.astype(md), bp)

    grid = (pB // tb,)
    x_spec = pl.BlockSpec((S, tb, KIN), lambda i: (0, i, 0))
    out_specs = (pl.BlockSpec((tb, 128), lambda i: (i, 0)),
                 pl.BlockSpec((tb, 384), lambda i: (i, 0)))
    out_shape = (jax.ShapeDtypeStruct((pB, 128), od),
                 jax.ShapeDtypeStruct((pB, 384), od))

    flops = 2 * pB * (S * KIN * (6 * G * C) + S * (6 * G * C) * (2 * G * C)
                      + S * NP * 384 + 384 * 64 + 64 * 16 + 16 * 128)
    w_bytes = sum(int(np.prod(w.shape)) * w.dtype.itemsize for w in weights)
    bytes_accessed = (pB * L_IN * np.dtype(md).itemsize
                      + pB * (128 + 384) * np.dtype(od).itemsize + w_bytes)
    cost = pl.CostEstimate(flops=flops, transcendentals=0,
                           bytes_accessed=bytes_accessed)

    def call(single_buffer_weights):
        if single_buffer_weights:
            # Grid-invariant weights never change block index -> the default
            # second pipeline buffer is pure VMEM waste; single-buffer them.
            w_specs = [pl.BlockSpec(w.shape, lambda i: (0, 0),
                                    pipeline_mode=pl.Buffered(1))
                       for w in weights]
        else:
            w_specs = [pl.BlockSpec(w.shape, lambda i: (0, 0)) for w in weights]
        return pl.pallas_call(
            source_cnn_kernel,
            out_shape=out_shape,
            grid_spec=pltpu.PrefetchScalarGridSpec(
                num_scalar_prefetch=0, grid=grid,
                in_specs=[x_spec] + w_specs, out_specs=out_specs),
            compiler_params=pltpu.CompilerParams(
                dimension_semantics=("parallel",),
                vmem_limit_bytes=40 * 1024 * 1024),
            cost_estimate=cost,
        )(xT, *weights)

    try:
        out, inter = call(True)
    except Exception:
        # pipeline_mode single-buffering unsupported on this jax build; fall
        # back to default (double-buffered) weight specs.
        out, inter = call(False)
    return out[:B, 0:1], inter[:B]


def source_cnn_reference(x_ncl, p):
    """Pure-JAX reference in the PyTorch NCL convention (eval-mode BatchNorm)."""
    B = x_ncl.shape[0]
    s1, t1 = fold_bn(p["g1"], p["be1"], p["m1"], p["v1"])
    s2, t2 = fold_bn(p["g2"], p["be2"], p["m2"], p["v2"])

    xr = x_ncl[:, 0, :].reshape(B, 72, 5)
    h = jnp.einsum("btk,ok->bot", xr, p["W1"][:, 0, :]) + p["b1"][None, :, None]
    h = h * s1[None, :, None] + t1[None, :, None]
    h = jnp.maximum(h, 0.0)                                       # (B, 64, 72)

    hr = h.reshape(B, C, 24, 3)
    h2 = jnp.einsum("bcsk,ock->bos", hr, p["W2"]) + p["b2"][None, :, None]
    h2 = jnp.max(h2.reshape(B, C, 12, 2), axis=3)                 # maxpool before bn2 (spec order)
    h2 = h2 * s2[None, :, None] + t2[None, :, None]
    h2 = jnp.maximum(h2, 0.0)                                     # (B, 64, 12)

    f = h2.reshape(B, 768)                                        # channel-major flatten
    z1 = f @ p["Wfc1"].T + p["bfc1"]
    inter = jnp.maximum(z1, 0.0)
    z2 = jnp.maximum(inter @ p["Wfc2"].T + p["bfc2"], 0.0)
    z3 = jnp.maximum(z2 @ p["Wfc3"].T + p["bfc3"], 0.0)
    result = z3 @ p["Wp"].T + p["bp"]
    return result, inter


if __name__ == "__main__":
    key = jax.random.PRNGKey(0)
    k_par, k_x = jax.random.split(key)
    params = make_params(k_par)

    B = 40                                  # deliberately not a tile multiple
    x = jax.random.normal(k_x, (B, 1, L_IN), jnp.float32)         # PyTorch NCL input

    ref_result, ref_inter = jax.block_until_ready(source_cnn_reference(x, params))

    # exact-semantics f32 path, both layouts (G=1 v5e-style and paired G=2)
    for pair in (False, True):
        r32, i32 = jax.block_until_ready(
            source_cnn_pallas(x, params, tb=16, matmul_dtype=jnp.float32,
                              out_dtype=jnp.float32, pair_windows=pair))
        np.testing.assert_allclose(np.asarray(r32), np.asarray(ref_result),
                                   rtol=2e-4, atol=2e-4)
        np.testing.assert_allclose(np.asarray(i32), np.asarray(ref_inter),
                                   rtol=2e-4, atol=2e-4)
        assert r32.shape == (B, 1) and i32.shape == (B, 384)

    # default fast path: bf16 matmul operands + bf16 stores, auto layout
    rbf, ibf = jax.block_until_ready(source_cnn_pallas(x, params, tb=16))
    np.testing.assert_allclose(np.asarray(rbf).astype(np.float32),
                               np.asarray(ref_result), rtol=5e-2, atol=5e-2)
    np.testing.assert_allclose(np.asarray(ibf).astype(np.float32),
                               np.asarray(ref_inter), rtol=5e-2, atol=5e-2)
    assert rbf.shape == (B, 1) and ibf.shape == (B, 384)
    print("KERNEL_OK")
</pallas_src>

<mosaic_0001>
module attributes {stable_mosaic.version = 11 : i64} {
  func.func @source_cnn_kernel(%arg0: i32, %arg1: memref<12x16x30xf32, #tpu.memory_space<vmem>>, %arg2: memref<30x384xf32, #tpu.memory_space<vmem>>, %arg3: memref<1x384xf32, #tpu.memory_space<vmem>>, %arg4: memref<384x128xf32, #tpu.memory_space<vmem>>, %arg5: memref<1x128xf32, #tpu.memory_space<vmem>>, %arg6: memref<1x64xf32, #tpu.memory_space<vmem>>, %arg7: memref<1x64xf32, #tpu.memory_space<vmem>>, %arg8: memref<768x384xf32, #tpu.memory_space<vmem>>, %arg9: memref<1x384xf32, #tpu.memory_space<vmem>>, %arg10: memref<384x64xf32, #tpu.memory_space<vmem>>, %arg11: memref<1x64xf32, #tpu.memory_space<vmem>>, %arg12: memref<64x16xf32, #tpu.memory_space<vmem>>, %arg13: memref<1x16xf32, #tpu.memory_space<vmem>>, %arg14: memref<16x128xf32, #tpu.memory_space<vmem>>, %arg15: memref<1x128xf32, #tpu.memory_space<vmem>>, %arg16: memref<16x128xf32, #tpu.memory_space<vmem>>, %arg17: memref<16x384xf32, #tpu.memory_space<vmem>>) attributes {dimension_semantics = [#tpu.dimension_semantics<parallel>], iteration_bounds = array<i64: 3>, scalar_prefetch = 0 : i64, scratch_operands = 0 : i64, tpu.core_type = #tpu.core_type<tc>, window_params = [{transform_indices = @transform_0, window_bounds = array<i64: 12, 16, 30>}, {pipeline_mode = #tpu.pipeline_mode<synchronous>, transform_indices = @transform_1, window_bounds = array<i64: 30, 384>}, {pipeline_mode = #tpu.pipeline_mode<synchronous>, transform_indices = @transform_2, window_bounds = array<i64: 1, 384>}, {pipeline_mode = #tpu.pipeline_mode<synchronous>, transform_indices = @transform_3, window_bounds = array<i64: 384, 128>}, {pipeline_mode = #tpu.pipeline_mode<synchronous>, transform_indices = @transform_4, window_bounds = array<i64: 1, 128>}, {pipeline_mode = #tpu.pipeline_mode<synchronous>, transform_indices = @transform_5, window_bounds = array<i64: 1, 64>}, {pipeline_mode = #tpu.pipeline_mode<synchronous>, transform_indices = @transform_6, window_bounds = array<i64: 1, 64>}, {pipeline_mode = #tpu.pipeline_mode<synchronous>, transform_indices = @transform_7, window_bounds = array<i64: 768, 384>}, {pipeline_mode = #tpu.pipeline_mode<synchronous>, transform_indices = @transform_8, window_bounds = array<i64: 1, 384>}, {pipeline_mode = #tpu.pipeline_mode<synchronous>, transform_indices = @transform_9, window_bounds = array<i64: 384, 64>}, {pipeline_mode = #tpu.pipeline_mode<synchronous>, transform_indices = @transform_10, window_bounds = array<i64: 1, 64>}, {pipeline_mode = #tpu.pipeline_mode<synchronous>, transform_indices = @transform_11, window_bounds = array<i64: 64, 16>}, {pipeline_mode = #tpu.pipeline_mode<synchronous>, transform_indices = @transform_12, window_bounds = array<i64: 1, 16>}, {pipeline_mode = #tpu.pipeline_mode<synchronous>, transform_indices = @transform_13, window_bounds = array<i64: 16, 128>}, {pipeline_mode = #tpu.pipeline_mode<synchronous>, transform_indices = @transform_14, window_bounds = array<i64: 1, 128>}, {transform_indices = @transform_15, window_bounds = array<i64: 16, 128>}, {transform_indices = @transform_16, window_bounds = array<i64: 16, 384>}]} {
    %c0 = arith.constant 0 : index
    %c0_0 = arith.constant 0 : index
    %c0_1 = arith.constant 0 : index
    %0 = vector.load %arg1[%c0, %c0_0, %c0_1] : memref<12x16x30xf32, #tpu.memory_space<vmem>>, vector<12x16x30xf32>
    %1 = vector.shape_cast %0 : vector<12x16x30xf32> to vector<192x30xf32>
    %c0_2 = arith.constant 0 : index
    %c0_3 = arith.constant 0 : index
    %2 = vector.load %arg2[%c0_2, %c0_3] : memref<30x384xf32, #tpu.memory_space<vmem>>, vector<30x384xf32>
    %cst = arith.constant dense<0.000000e+00> : vector<192x384xf32>
    %3 = tpu.matmul %1, %2, %cst {dimension_numbers = #tpu.dot_dimension_numbers<[1], [0], [0], [1], [0, 0, 1, 1], [], []>} : vector<192x30xf32>, vector<30x384xf32>, vector<192x384xf32> -> vector<192x384xf32>
    %c0_4 = arith.constant 0 : index
    %c0_5 = arith.constant 0 : index
    %4 = vector.load %arg3[%c0_4, %c0_5] : memref<1x384xf32, #tpu.memory_space<vmem>>, vector<1x384xf32>
    %5 = vector.broadcast %4 : vector<1x384xf32> to vector<192x384xf32>
    %6 = arith.addf %3, %5 : vector<192x384xf32>
    %cst_6 = arith.constant 0.000000e+00 : f32
    %7 = vector.broadcast %cst_6 : f32 to vector<192x384xf32>
    %8 = arith.maximumf %6, %7 : vector<192x384xf32>
    %c0_7 = arith.constant 0 : index
    %c0_8 = arith.constant 0 : index
    %9 = vector.load %arg4[%c0_7, %c0_8] : memref<384x128xf32, #tpu.memory_space<vmem>>, vector<384x128xf32>
    %cst_9 = arith.constant dense<0.000000e+00> : vector<192x128xf32>
    %10 = tpu.matmul %8, %9, %cst_9 {dimension_numbers = #tpu.dot_dimension_numbers<[1], [0], [0], [1], [0, 0, 1, 1], [], []>} : vector<192x384xf32>, vector<384x128xf32>, vector<192x128xf32> -> vector<192x128xf32>
    %c0_10 = arith.constant 0 : index
    %c0_11 = arith.constant 0 : index
    %11 = vector.load %arg5[%c0_10, %c0_11] : memref<1x128xf32, #tpu.memory_space<vmem>>, vector<1x128xf32>
    %12 = vector.broadcast %11 : vector<1x128xf32> to vector<192x128xf32>
    %13 = arith.addf %10, %12 : vector<192x128xf32>
    %14 = vector.extract_strided_slice %13 {offsets = [0, 0], sizes = [192, 64], strides = [1, 1]} : vector<192x128xf32> to vector<192x64xf32>
    %15 = vector.extract_strided_slice %13 {offsets = [0, 64], sizes = [192, 64], strides = [1, 1]} : vector<192x128xf32> to vector<192x64xf32>
    %16 = arith.maximumf %14, %15 : vector<192x64xf32>
    %c0_12 = arith.constant 0 : index
    %c0_13 = arith.constant 0 : index
    %17 = vector.load %arg6[%c0_12, %c0_13] : memref<1x64xf32, #tpu.memory_space<vmem>>, vector<1x64xf32>
    %18 = vector.broadcast %17 : vector<1x64xf32> to vector<192x64xf32>
    %19 = arith.mulf %16, %18 : vector<192x64xf32>
    %c0_14 = arith.constant 0 : index
    %c0_15 = arith.constant 0 : index
    %20 = vector.load %arg7[%c0_14, %c0_15] : memref<1x64xf32, #tpu.memory_space<vmem>>, vector<1x64xf32>
    %21 = vector.broadcast %20 : vector<1x64xf32> to vector<192x64xf32>
    %22 = arith.addf %19, %21 : vector<192x64xf32>
    %cst_16 = arith.constant 0.000000e+00 : f32
    %23 = vector.broadcast %cst_16 : f32 to vector<192x64xf32>
    %24 = arith.maximumf %22, %23 : vector<192x64xf32>
    %25 = vector.extract_strided_slice %24 {offsets = [0, 0], sizes = [16, 64], strides = [1, 1]} : vector<192x64xf32> to vector<16x64xf32>
    %c0_17 = arith.constant 0 : index
    %c0_18 = arith.constant 0 : index
    %26 = vector.load %arg8[%c0_17, %c0_18] : memref<768x384xf32, #tpu.memory_space<vmem>>, vector<64x384xf32>
    %cst_19 = arith.constant dense<0.000000e+00> : vector<16x384xf32>
    %27 = tpu.matmul %25, %26, %cst_19 {dimension_numbers = #tpu.dot_dimension_numbers<[1], [0], [0], [1], [0, 0, 1, 1], [], []>} : vector<16x64xf32>, vector<64x384xf32>, vector<16x384xf32> -> vector<16x384xf32>
    %28 = vector.extract_strided_slice %24 {offsets = [16, 0], sizes = [16, 64], strides = [1, 1]} : vector<192x64xf32> to vector<16x64xf32>
    %c64 = arith.constant 64 : index
    %c0_20 = arith.constant 0 : index
    %29 = vector.load %arg8[%c64, %c0_20] : memref<768x384xf32, #tpu.memory_space<vmem>>, vector<64x384xf32>
    %cst_21 = arith.constant dense<0.000000e+00> : vector<16x384xf32>
    %30 = tpu.matmul %28, %29, %cst_21 {dimension_numbers = #tpu.dot_dimension_numbers<[1], [0], [0], [1], [0, 0, 1, 1], [], []>} : vector<16x64xf32>, vector<64x384xf32>, vector<16x384xf32> -> vector<16x384xf32>
    %31 = vector.extract_strided_slice %24 {offsets = [32, 0], sizes = [16, 64], strides = [1, 1]} : vector<192x64xf32> to vector<16x64xf32>
    %c128 = arith.constant 128 : index
    %c0_22 = arith.constant 0 : index
    %32 = vector.load %arg8[%c128, %c0_22] : memref<768x384xf32, #tpu.memory_space<vmem>>, vector<64x384xf32>
    %cst_23 = arith.constant dense<0.000000e+00> : vector<16x384xf32>
    %33 = tpu.matmul %31, %32, %cst_23 {dimension_numbers = #tpu.dot_dimension_numbers<[1], [0], [0], [1], [0, 0, 1, 1], [], []>} : vector<16x64xf32>, vector<64x384xf32>, vector<16x384xf32> -> vector<16x384xf32>
    %34 = vector.extract_strided_slice %24 {offsets = [48, 0], sizes = [16, 64], strides = [1, 1]} : vector<192x64xf32> to vector<16x64xf32>
    %c192 = arith.constant 192 : index
    %c0_24 = arith.constant 0 : index
    %35 = vector.load %arg8[%c192, %c0_24] : memref<768x384xf32, #tpu.memory_space<vmem>>, vector<64x384xf32>
    %cst_25 = arith.constant dense<0.000000e+00> : vector<16x384xf32>
    %36 = tpu.matmul %34, %35, %cst_25 {dimension_numbers = #tpu.dot_dimension_numbers<[1], [0], [0], [1], [0, 0, 1, 1], [], []>} : vector<16x64xf32>, vector<64x384xf32>, vector<16x384xf32> -> vector<16x384xf32>
    %37 = vector.extract_strided_slice %24 {offsets = [64, 0], sizes = [16, 64], strides = [1, 1]} : vector<192x64xf32> to vector<16x64xf32>
    %c256 = arith.constant 256 : index
    %c0_26 = arith.constant 0 : index
    %38 = vector.load %arg8[%c256, %c0_26] : memref<768x384xf32, #tpu.memory_space<vmem>>, vector<64x384xf32>
    %cst_27 = arith.constant dense<0.000000e+00> : vector<16x384xf32>
    %39 = tpu.matmul %37, %38, %cst_27 {dimension_numbers = #tpu.dot_dimension_numbers<[1], [0], [0], [1], [0, 0, 1, 1], [], []>} : vector<16x64xf32>, vector<64x384xf32>, vector<16x384xf32> -> vector<16x384xf32>
    %40 = vector.extract_strided_slice %24 {offsets = [80, 0], sizes = [16, 64], strides = [1, 1]} : vector<192x64xf32> to vector<16x64xf32>
    %c320 = arith.constant 320 : index
    %c0_28 = arith.constant 0 : index
    %41 = vector.load %arg8[%c320, %c0_28] : memref<768x384xf32, #tpu.memory_space<vmem>>, vector<64x384xf32>
    %cst_29 = arith.constant dense<0.000000e+00> : vector<16x384xf32>
    %42 = tpu.matmul %40, %41, %cst_29 {dimension_numbers = #tpu.dot_dimension_numbers<[1], [0], [0], [1], [0, 0, 1, 1], [], []>} : vector<16x64xf32>, vector<64x384xf32>, vector<16x384xf32> -> vector<16x384xf32>
    %43 = vector.extract_strided_slice %24 {offsets = [96, 0], sizes = [16, 64], strides = [1, 1]} : vector<192x64xf32> to vector<16x64xf32>
    %c384 = arith.constant 384 : index
    %c0_30 = arith.constant 0 : index
    %44 = vector.load %arg8[%c384, %c0_30] : memref<768x384xf32, #tpu.memory_space<vmem>>, vector<64x384xf32>
    %cst_31 = arith.constant dense<0.000000e+00> : vector<16x384xf32>
    %45 = tpu.matmul %43, %44, %cst_31 {dimension_numbers = #tpu.dot_dimension_numbers<[1], [0], [0], [1], [0, 0, 1, 1], [], []>} : vector<16x64xf32>, vector<64x384xf32>, vector<16x384xf32> -> vector<16x384xf32>
    %46 = vector.extract_strided_slice %24 {offsets = [112, 0], sizes = [16, 64], strides = [1, 1]} : vector<192x64xf32> to vector<16x64xf32>
    %c448 = arith.constant 448 : index
    %c0_32 = arith.constant 0 : index
    %47 = vector.load %arg8[%c448, %c0_32] : memref<768x384xf32, #tpu.memory_space<vmem>>, vector<64x384xf32>
    %cst_33 = arith.constant dense<0.000000e+00> : vector<16x384xf32>
    %48 = tpu.matmul %46, %47, %cst_33 {dimension_numbers = #tpu.dot_dimension_numbers<[1], [0], [0], [1], [0, 0, 1, 1], [], []>} : vector<16x64xf32>, vector<64x384xf32>, vector<16x384xf32> -> vector<16x384xf32>
    %49 = vector.extract_strided_slice %24 {offsets = [128, 0], sizes = [16, 64], strides = [1, 1]} : vector<192x64xf32> to vector<16x64xf32>
    %c512 = arith.constant 512 : index
    %c0_34 = arith.constant 0 : index
    %50 = vector.load %arg8[%c512, %c0_34] : memref<768x384xf32, #tpu.memory_space<vmem>>, vector<64x384xf32>
    %cst_35 = arith.constant dense<0.000000e+00> : vector<16x384xf32>
    %51 = tpu.matmul %49, %50, %cst_35 {dimension_numbers = #tpu.dot_dimension_numbers<[1], [0], [0], [1], [0, 0, 1, 1], [], []>} : vector<16x64xf32>, vector<64x384xf32>, vector<16x384xf32> -> vector<16x384xf32>
    %52 = vector.extract_strided_slice %24 {offsets = [144, 0], sizes = [16, 64], strides = [1, 1]} : vector<192x64xf32> to vector<16x64xf32>
    %c576 = arith.constant 576 : index
    %c0_36 = arith.constant 0 : index
    %53 = vector.load %arg8[%c576, %c0_36] : memref<768x384xf32, #tpu.memory_space<vmem>>, vector<64x384xf32>
    %cst_37 = arith.constant dense<0.000000e+00> : vector<16x384xf32>
    %54 = tpu.matmul %52, %53, %cst_37 {dimension_numbers = #tpu.dot_dimension_numbers<[1], [0], [0], [1], [0, 0, 1, 1], [], []>} : vector<16x64xf32>, vector<64x384xf32>, vector<16x384xf32> -> vector<16x384xf32>
    %55 = vector.extract_strided_slice %24 {offsets = [160, 0], sizes = [16, 64], strides = [1, 1]} : vector<192x64xf32> to vector<16x64xf32>
    %c640 = arith.constant 640 : index
    %c0_38 = arith.constant 0 : index
    %56 = vector.load %arg8[%c640, %c0_38] : memref<768x384xf32, #tpu.memory_space<vmem>>, vector<64x384xf32>
    %cst_39 = arith.constant dense<0.000000e+00> : vector<16x384xf32>
    %57 = tpu.matmul %55, %56, %cst_39 {dimension_numbers = #tpu.dot_dimension_numbers<[1], [0], [0], [1], [0, 0, 1, 1], [], []>} : vector<16x64xf32>, vector<64x384xf32>, vector<16x384xf32> -> vector<16x384xf32>
    %58 = vector.extract_strided_slice %24 {offsets = [176, 0], sizes = [16, 64], strides = [1, 1]} : vector<192x64xf32> to vector<16x64xf32>
    %c704 = arith.constant 704 : index
    %c0_40 = arith.constant 0 : index
    %59 = vector.load %arg8[%c704, %c0_40] : memref<768x384xf32, #tpu.memory_space<vmem>>, vector<64x384xf32>
    %cst_41 = arith.constant dense<0.000000e+00> : vector<16x384xf32>
    %60 = tpu.matmul %58, %59, %cst_41 {dimension_numbers = #tpu.dot_dimension_numbers<[1], [0], [0], [1], [0, 0, 1, 1], [], []>} : vector<16x64xf32>, vector<64x384xf32>, vector<16x384xf32> -> vector<16x384xf32>
    %61 = arith.addf %27, %30 : vector<16x384xf32>
    %62 = arith.addf %33, %36 : vector<16x384xf32>
    %63 = arith.addf %39, %42 : vector<16x384xf32>
    %64 = arith.addf %45, %48 : vector<16x384xf32>
    %65 = arith.addf %51, %54 : vector<16x384xf32>
    %66 = arith.addf %57, %60 : vector<16x384xf32>
    %67 = arith.addf %61, %62 : vector<16x384xf32>
    %68 = arith.addf %63, %64 : vector<16x384xf32>
    %69 = arith.addf %65, %66 : vector<16x384xf32>
    %70 = arith.addf %67, %68 : vector<16x384xf32>
    %71 = arith.addf %70, %69 : vector<16x384xf32>
    %c0_42 = arith.constant 0 : index
    %c0_43 = arith.constant 0 : index
    %72 = vector.load %arg9[%c0_42, %c0_43] : memref<1x384xf32, #tpu.memory_space<vmem>>, vector<1x384xf32>
    %73 = vector.broadcast %72 : vector<1x384xf32> to vector<16x384xf32>
    %74 = arith.addf %71, %73 : vector<16x384xf32>
    %cst_44 = arith.constant 0.000000e+00 : f32
    %75 = vector.broadcast %cst_44 : f32 to vector<16x384xf32>
    %76 = arith.maximumf %74, %75 : vector<16x384xf32>
    %c0_45 = arith.constant 0 : index
    %c0_46 = arith.constant 0 : index
    %77 = vector.load %arg17[%c0_45, %c0_46] : memref<16x384xf32, #tpu.memory_space<vmem>>, vector<16x384xf32>
    tpu.vector_store %arg17[%c0_45, %c0_46], %76 {strides = array<i32>} : memref<16x384xf32, #tpu.memory_space<vmem>>, vector<16x384xf32>,
    %c0_47 = arith.constant 0 : index
    %c0_48 = arith.constant 0 : index
    %78 = vector.load %arg10[%c0_47, %c0_48] : memref<384x64xf32, #tpu.memory_space<vmem>>, vector<384x64xf32>
    %cst_49 = arith.constant dense<0.000000e+00> : vector<16x64xf32>
    %79 = tpu.matmul %76, %78, %cst_49 {dimension_numbers = #tpu.dot_dimension_numbers<[1], [0], [0], [1], [0, 0, 1, 1], [], []>} : vector<16x384xf32>, vector<384x64xf32>, vector<16x64xf32> -> vector<16x64xf32>
    %c0_50 = arith.constant 0 : index
    %c0_51 = arith.constant 0 : index
    %80 = vector.load %arg11[%c0_50, %c0_51] : memref<1x64xf32, #tpu.memory_space<vmem>>, vector<1x64xf32>
    %81 = vector.broadcast %80 : vector<1x64xf32> to vector<16x64xf32>
    %82 = arith.addf %79, %81 : vector<16x64xf32>
    %cst_52 = arith.constant 0.000000e+00 : f32
    %83 = vector.broadcast %cst_52 : f32 to vector<16x64xf32>
    %84 = arith.maximumf %82, %83 : vector<16x64xf32>
    %c0_53 = arith.constant 0 : index
    %c0_54 = arith.constant 0 : index
    %85 = vector.load %arg12[%c0_53, %c0_54] : memref<64x16xf32, #tpu.memory_space<vmem>>, vector<64x16xf32>
    %cst_55 = arith.constant dense<0.000000e+00> : vector<16x16xf32>
    %86 = tpu.matmul %84, %85, %cst_55 {dimension_numbers = #tpu.dot_dimension_numbers<[1], [0], [0], [1], [0, 0, 1, 1], [], []>} : vector<16x64xf32>, vector<64x16xf32>, vector<16x16xf32> -> vector<16x16xf32>
    %c0_56 = arith.constant 0 : index
    %c0_57 = arith.constant 0 : index
    %87 = vector.load %arg13[%c0_56, %c0_57] : memref<1x16xf32, #tpu.memory_space<vmem>>, vector<1x16xf32>
    %88 = vector.broadcast %87 : vector<1x16xf32> to vector<16x16xf32>
    %89 = arith.addf %86, %88 : vector<16x16xf32>
    %cst_58 = arith.constant 0.000000e+00 : f32
    %90 = vector.broadcast %cst_58 : f32 to vector<16x16xf32>
    %91 = arith.maximumf %89, %90 : vector<16x16xf32>
    %c0_59 = arith.constant 0 : index
    %c0_60 = arith.constant 0 : index
    %92 = vector.load %arg14[%c0_59, %c0_60] : memref<16x128xf32, #tpu.memory_space<vmem>>, vector<16x128xf32>
    %cst_61 = arith.constant dense<0.000000e+00> : vector<16x128xf32>
    %93 = tpu.matmul %91, %92, %cst_61 {dimension_numbers = #tpu.dot_dimension_numbers<[1], [0], [0], [1], [0, 0, 1, 1], [], []>} : vector<16x16xf32>, vector<16x128xf32>, vector<16x128xf32> -> vector<16x128xf32>
    %c0_62 = arith.constant 0 : index
    %c0_63 = arith.constant 0 : index
    %94 = vector.load %arg15[%c0_62, %c0_63] : memref<1x128xf32, #tpu.memory_space<vmem>>, vector<1x128xf32>
    %95 = vector.broadcast %94 : vector<1x128xf32> to vector<16x128xf32>
    %96 = arith.addf %93, %95 : vector<16x128xf32>
    %c0_64 = arith.constant 0 : index
    %c0_65 = arith.constant 0 : index
    %97 = vector.load %arg16[%c0_64, %c0_65] : memref<16x128xf32, #tpu.memory_space<vmem>>, vector<16x128xf32>
    tpu.vector_store %arg16[%c0_64, %c0_65], %96 {strides = array<i32>} : memref<16x128xf32, #tpu.memory_space<vmem>>, vector<16x128xf32>,
    return
  }
  func.func @transform_0(%arg0: i32) -> (i32, i32, i32) {
    %c0_i32 = arith.constant 0 : i32
    %c0_i32_0 = arith.constant 0 : i32
    %c0_i32_1 = arith.constant 0 : i32
    return %c0_i32, %arg0, %c0_i32_0 : i32, i32, i32
  }
  func.func @transform_1(%arg0: i32) -> (i32, i32) {
    %c0_i32 = arith.constant 0 : i32
    %c0_i32_0 = arith.constant 0 : i32
    %c0_i32_1 = arith.constant 0 : i32
    return %c0_i32, %c0_i32_0 : i32, i32
  }
  func.func @transform_2(%arg0: i32) -> (i32, i32) {
    %c0_i32 = arith.constant 0 : i32
    %c0_i32_0 = arith.constant 0 : i32
    %c0_i32_1 = arith.constant 0 : i32
    return %c0_i32, %c0_i32_0 : i32, i32
  }
  func.func @transform_3(%arg0: i32) -> (i32, i32) {
    %c0_i32 = arith.constant 0 : i32
    %c0_i32_0 = arith.constant 0 : i32
    %c0_i32_1 = arith.constant 0 : i32
    return %c0_i32, %c0_i32_0 : i32, i32
  }
  func.func @transform_4(%arg0: i32) -> (i32, i32) {
    %c0_i32 = arith.constant 0 : i32
    %c0_i32_0 = arith.constant 0 : i32
    %c0_i32_1 = arith.constant 0 : i32
    return %c0_i32, %c0_i32_0 : i32, i32
  }
  func.func @transform_5(%arg0: i32) -> (i32, i32) {
    %c0_i32 = arith.constant 0 : i32
    %c0_i32_0 = arith.constant 0 : i32
    %c0_i32_1 = arith.constant 0 : i32
    return %c0_i32, %c0_i32_0 : i32, i32
  }
  func.func @transform_6(%arg0: i32) -> (i32, i32) {
    %c0_i32 = arith.constant 0 : i32
    %c0_i32_0 = arith.constant 0 : i32
    %c0_i32_1 = arith.constant 0 : i32
    return %c0_i32, %c0_i32_0 : i32, i32
  }
  func.func @transform_7(%arg0: i32) -> (i32, i32) {
    %c0_i32 = arith.constant 0 : i32
    %c0_i32_0 = arith.constant 0 : i32
    %c0_i32_1 = arith.constant 0 : i32
    return %c0_i32, %c0_i32_0 : i32, i32
  }
  func.func @transform_8(%arg0: i32) -> (i32, i32) {
    %c0_i32 = arith.constant 0 : i32
    %c0_i32_0 = arith.constant 0 : i32
    %c0_i32_1 = arith.constant 0 : i32
    return %c0_i32, %c0_i32_0 : i32, i32
  }
  func.func @transform_9(%arg0: i32) -> (i32, i32) {
    %c0_i32 = arith.constant 0 : i32
    %c0_i32_0 = arith.constant 0 : i32
    %c0_i32_1 = arith.constant 0 : i32
    return %c0_i32, %c0_i32_0 : i32, i32
  }
  func.func @transform_10(%arg0: i32) -> (i32, i32) {
    %c0_i32 = arith.constant 0 : i32
    %c0_i32_0 = arith.constant 0 : i32
    %c0_i32_1 = arith.constant 0 : i32
    return %c0_i32, %c0_i32_0 : i32, i32
  }
  func.func @transform_11(%arg0: i32) -> (i32, i32) {
    %c0_i32 = arith.constant 0 : i32
    %c0_i32_0 = arith.constant 0 : i32
    %c0_i32_1 = arith.constant 0 : i32
    return %c0_i32, %c0_i32_0 : i32, i32
  }
  func.func @transform_12(%arg0: i32) -> (i32, i32) {
    %c0_i32 = arith.constant 0 : i32
    %c0_i32_0 = arith.constant 0 : i32
    %c0_i32_1 = arith.constant 0 : i32
    return %c0_i32, %c0_i32_0 : i32, i32
  }
  func.func @transform_13(%arg0: i32) -> (i32, i32) {
    %c0_i32 = arith.constant 0 : i32
    %c0_i32_0 = arith.constant 0 : i32
    %c0_i32_1 = arith.constant 0 : i32
    return %c0_i32, %c0_i32_0 : i32, i32
  }
  func.func @transform_14(%arg0: i32) -> (i32, i32) {
    %c0_i32 = arith.constant 0 : i32
    %c0_i32_0 = arith.constant 0 : i32
    %c0_i32_1 = arith.constant 0 : i32
    return %c0_i32, %c0_i32_0 : i32, i32
  }
  func.func @transform_15(%arg0: i32) -> (i32, i32) {
    %c0_i32 = arith.constant 0 : i32
    %c0_i32_0 = arith.constant 0 : i32
    return %arg0, %c0_i32 : i32, i32
  }
  func.func @transform_16(%arg0: i32) -> (i32, i32) {
    %c0_i32 = arith.constant 0 : i32
    %c0_i32_0 = arith.constant 0 : i32
    return %arg0, %c0_i32 : i32, i32
  }
}

module attributes {stable_mosaic.version = 11 : i64} {
  func.func @source_cnn_kernel(%arg0: i32, %arg1: memref<12x16x30xf32, #tpu.memory_space<vmem>>, %arg2: memref<30x384xf32, #tpu.memory_space<vmem>>, %arg3: memref<1x384xf32, #tpu.memory_space<vmem>>, %arg4: memref<384x128xf32, #tpu.memory_space<vmem>>, %arg5: memref<1x128xf32, #tpu.memory_space<vmem>>, %arg6: memref<1x64xf32, #tpu.memory_space<vmem>>, %arg7: memref<1x64xf32, #tpu.memory_space<vmem>>, %arg8: memref<768x384xf32, #tpu.memory_space<vmem>>, %arg9: memref<1x384xf32, #tpu.memory_space<vmem>>, %arg10: memref<384x64xf32, #tpu.memory_space<vmem>>, %arg11: memref<1x64xf32, #tpu.memory_space<vmem>>, %arg12: memref<64x16xf32, #tpu.memory_space<vmem>>, %arg13: memref<1x16xf32, #tpu.memory_space<vmem>>, %arg14: memref<16x128xf32, #tpu.memory_space<vmem>>, %arg15: memref<1x128xf32, #tpu.memory_space<vmem>>, %arg16: memref<16x128xf32, #tpu.memory_space<vmem>>, %arg17: memref<16x384xf32, #tpu.memory_space<vmem>>) attributes {dimension_semantics = [#tpu.dimension_semantics<parallel>], iteration_bounds = array<i64: 3>, scalar_prefetch = 0 : i64, scratch_operands = 0 : i64, tpu.core_type = #tpu.core_type<tc>, window_params = [{transform_indices = @transform_0, window_bounds = array<i64: 12, 16, 30>}, {pipeline_mode = #tpu.pipeline_mode<synchronous>, transform_indices = @transform_1, window_bounds = array<i64: 30, 384>}, {pipeline_mode = #tpu.pipeline_mode<synchronous>, transform_indices = @transform_2, window_bounds = array<i64: 1, 384>}, {pipeline_mode = #tpu.pipeline_mode<synchronous>, transform_indices = @transform_3, window_bounds = array<i64: 384, 128>}, {pipeline_mode = #tpu.pipeline_mode<synchronous>, transform_indices = @transform_4, window_bounds = array<i64: 1, 128>}, {pipeline_mode = #tpu.pipeline_mode<synchronous>, transform_indices = @transform_5, window_bounds = array<i64: 1, 64>}, {pipeline_mode = #tpu.pipeline_mode<synchronous>, transform_indices = @transform_6, window_bounds = array<i64: 1, 64>}, {pipeline_mode = #tpu.pipeline_mode<synchronous>, transform_indices = @transform_7, window_bounds = array<i64: 768, 384>}, {pipeline_mode = #tpu.pipeline_mode<synchronous>, transform_indices = @transform_8, window_bounds = array<i64: 1, 384>}, {pipeline_mode = #tpu.pipeline_mode<synchronous>, transform_indices = @transform_9, window_bounds = array<i64: 384, 64>}, {pipeline_mode = #tpu.pipeline_mode<synchronous>, transform_indices = @transform_10, window_bounds = array<i64: 1, 64>}, {pipeline_mode = #tpu.pipeline_mode<synchronous>, transform_indices = @transform_11, window_bounds = array<i64: 64, 16>}, {pipeline_mode = #tpu.pipeline_mode<synchronous>, transform_indices = @transform_12, window_bounds = array<i64: 1, 16>}, {pipeline_mode = #tpu.pipeline_mode<synchronous>, transform_indices = @transform_13, window_bounds = array<i64: 16, 128>}, {pipeline_mode = #tpu.pipeline_mode<synchronous>, transform_indices = @transform_14, window_bounds = array<i64: 1, 128>}, {transform_indices = @transform_15, window_bounds = array<i64: 16, 128>}, {transform_indices = @transform_16, window_bounds = array<i64: 16, 384>}]} {
    %c0 = arith.constant 0 : index
    %c0_0 = arith.constant 0 : index
    %c0_1 = arith.constant 0 : index
    %0 = vector.load %arg1[%c0, %c0_0, %c0_1] : memref<12x16x30xf32, #tpu.memory_space<vmem>>, vector<12x16x30xf32>
    %1 = vector.shape_cast %0 : vector<12x16x30xf32> to vector<192x30xf32>
    %c0_2 = arith.constant 0 : index
    %c0_3 = arith.constant 0 : index
    %2 = vector.load %arg2[%c0_2, %c0_3] : memref<30x384xf32, #tpu.memory_space<vmem>>, vector<30x384xf32>
    %cst = arith.constant dense<0.000000e+00> : vector<192x384xf32>
    %3 = tpu.matmul %1, %2, %cst {dimension_numbers = #tpu.dot_dimension_numbers<[1], [0], [0], [1], [0, 0, 1, 1], [], []>} : vector<192x30xf32>, vector<30x384xf32>, vector<192x384xf32> -> vector<192x384xf32>
    %c0_4 = arith.constant 0 : index
    %c0_5 = arith.constant 0 : index
    %4 = vector.load %arg3[%c0_4, %c0_5] : memref<1x384xf32, #tpu.memory_space<vmem>>, vector<1x384xf32>
    %5 = vector.broadcast %4 : vector<1x384xf32> to vector<192x384xf32>
    %6 = arith.addf %3, %5 : vector<192x384xf32>
    %cst_6 = arith.constant 0.000000e+00 : f32
    %7 = vector.broadcast %cst_6 : f32 to vector<192x384xf32>
    %8 = arith.maximumf %6, %7 : vector<192x384xf32>
    %c0_7 = arith.constant 0 : index
    %c0_8 = arith.constant 0 : index
    %9 = vector.load %arg4[%c0_7, %c0_8] : memref<384x128xf32, #tpu.memory_space<vmem>>, vector<384x128xf32>
    %cst_9 = arith.constant dense<0.000000e+00> : vector<192x128xf32>
    %10 = tpu.matmul %8, %9, %cst_9 {dimension_numbers = #tpu.dot_dimension_numbers<[1], [0], [0], [1], [0, 0, 1, 1], [], []>} : vector<192x384xf32>, vector<384x128xf32>, vector<192x128xf32> -> vector<192x128xf32>
    %c0_10 = arith.constant 0 : index
    %c0_11 = arith.constant 0 : index
    %11 = vector.load %arg5[%c0_10, %c0_11] : memref<1x128xf32, #tpu.memory_space<vmem>>, vector<1x128xf32>
    %12 = vector.broadcast %11 : vector<1x128xf32> to vector<192x128xf32>
    %13 = arith.addf %10, %12 : vector<192x128xf32>
    %14 = vector.extract_strided_slice %13 {offsets = [0, 0], sizes = [192, 64], strides = [1, 1]} : vector<192x128xf32> to vector<192x64xf32>
    %15 = vector.extract_strided_slice %13 {offsets = [0, 64], sizes = [192, 64], strides = [1, 1]} : vector<192x128xf32> to vector<192x64xf32>
    %16 = arith.maximumf %14, %15 : vector<192x64xf32>
    %c0_12 = arith.constant 0 : index
    %c0_13 = arith.constant 0 : index
    %17 = vector.load %arg6[%c0_12, %c0_13] : memref<1x64xf32, #tpu.memory_space<vmem>>, vector<1x64xf32>
    %18 = vector.broadcast %17 : vector<1x64xf32> to vector<192x64xf32>
    %19 = arith.mulf %16, %18 : vector<192x64xf32>
    %c0_14 = arith.constant 0 : index
    %c0_15 = arith.constant 0 : index
    %20 = vector.load %arg7[%c0_14, %c0_15] : memref<1x64xf32, #tpu.memory_space<vmem>>, vector<1x64xf32>
    %21 = vector.broadcast %20 : vector<1x64xf32> to vector<192x64xf32>
    %22 = arith.addf %19, %21 : vector<192x64xf32>
    %cst_16 = arith.constant 0.000000e+00 : f32
    %23 = vector.broadcast %cst_16 : f32 to vector<192x64xf32>
    %24 = arith.maximumf %22, %23 : vector<192x64xf32>
    %25 = vector.extract_strided_slice %24 {offsets = [0, 0], sizes = [16, 64], strides = [1, 1]} : vector<192x64xf32> to vector<16x64xf32>
    %c0_17 = arith.constant 0 : index
    %c0_18 = arith.constant 0 : index
    %26 = vector.load %arg8[%c0_17, %c0_18] : memref<768x384xf32, #tpu.memory_space<vmem>>, vector<64x384xf32>
    %cst_19 = arith.constant dense<0.000000e+00> : vector<16x384xf32>
    %27 = tpu.matmul %25, %26, %cst_19 {dimension_numbers = #tpu.dot_dimension_numbers<[1], [0], [0], [1], [0, 0, 1, 1], [], []>} : vector<16x64xf32>, vector<64x384xf32>, vector<16x384xf32> -> vector<16x384xf32>
    %28 = vector.extract_strided_slice %24 {offsets = [16, 0], sizes = [16, 64], strides = [1, 1]} : vector<192x64xf32> to vector<16x64xf32>
    %c64 = arith.constant 64 : index
    %c0_20 = arith.constant 0 : index
    %29 = vector.load %arg8[%c64, %c0_20] : memref<768x384xf32, #tpu.memory_space<vmem>>, vector<64x384xf32>
    %cst_21 = arith.constant dense<0.000000e+00> : vector<16x384xf32>
    %30 = tpu.matmul %28, %29, %cst_21 {dimension_numbers = #tpu.dot_dimension_numbers<[1], [0], [0], [1], [0, 0, 1, 1], [], []>} : vector<16x64xf32>, vector<64x384xf32>, vector<16x384xf32> -> vector<16x384xf32>
    %31 = vector.extract_strided_slice %24 {offsets = [32, 0], sizes = [16, 64], strides = [1, 1]} : vector<192x64xf32> to vector<16x64xf32>
    %c128 = arith.constant 128 : index
    %c0_22 = arith.constant 0 : index
    %32 = vector.load %arg8[%c128, %c0_22] : memref<768x384xf32, #tpu.memory_space<vmem>>, vector<64x384xf32>
    %cst_23 = arith.constant dense<0.000000e+00> : vector<16x384xf32>
    %33 = tpu.matmul %31, %32, %cst_23 {dimension_numbers = #tpu.dot_dimension_numbers<[1], [0], [0], [1], [0, 0, 1, 1], [], []>} : vector<16x64xf32>, vector<64x384xf32>, vector<16x384xf32> -> vector<16x384xf32>
    %34 = vector.extract_strided_slice %24 {offsets = [48, 0], sizes = [16, 64], strides = [1, 1]} : vector<192x64xf32> to vector<16x64xf32>
    %c192 = arith.constant 192 : index
    %c0_24 = arith.constant 0 : index
    %35 = vector.load %arg8[%c192, %c0_24] : memref<768x384xf32, #tpu.memory_space<vmem>>, vector<64x384xf32>
    %cst_25 = arith.constant dense<0.000000e+00> : vector<16x384xf32>
    %36 = tpu.matmul %34, %35, %cst_25 {dimension_numbers = #tpu.dot_dimension_numbers<[1], [0], [0], [1], [0, 0, 1, 1], [], []>} : vector<16x64xf32>, vector<64x384xf32>, vector<16x384xf32> -> vector<16x384xf32>
    %37 = vector.extract_strided_slice %24 {offsets = [64, 0], sizes = [16, 64], strides = [1, 1]} : vector<192x64xf32> to vector<16x64xf32>
    %c256 = arith.constant 256 : index
    %c0_26 = arith.constant 0 : index
    %38 = vector.load %arg8[%c256, %c0_26] : memref<768x384xf32, #tpu.memory_space<vmem>>, vector<64x384xf32>
    %cst_27 = arith.constant dense<0.000000e+00> : vector<16x384xf32>
    %39 = tpu.matmul %37, %38, %cst_27 {dimension_numbers = #tpu.dot_dimension_numbers<[1], [0], [0], [1], [0, 0, 1, 1], [], []>} : vector<16x64xf32>, vector<64x384xf32>, vector<16x384xf32> -> vector<16x384xf32>
    %40 = vector.extract_strided_slice %24 {offsets = [80, 0], sizes = [16, 64], strides = [1, 1]} : vector<192x64xf32> to vector<16x64xf32>
    %c320 = arith.constant 320 : index
    %c0_28 = arith.constant 0 : index
    %41 = vector.load %arg8[%c320, %c0_28] : memref<768x384xf32, #tpu.memory_space<vmem>>, vector<64x384xf32>
    %cst_29 = arith.constant dense<0.000000e+00> : vector<16x384xf32>
    %42 = tpu.matmul %40, %41, %cst_29 {dimension_numbers = #tpu.dot_dimension_numbers<[1], [0], [0], [1], [0, 0, 1, 1], [], []>} : vector<16x64xf32>, vector<64x384xf32>, vector<16x384xf32> -> vector<16x384xf32>
    %43 = vector.extract_strided_slice %24 {offsets = [96, 0], sizes = [16, 64], strides = [1, 1]} : vector<192x64xf32> to vector<16x64xf32>
    %c384 = arith.constant 384 : index
    %c0_30 = arith.constant 0 : index
    %44 = vector.load %arg8[%c384, %c0_30] : memref<768x384xf32, #tpu.memory_space<vmem>>, vector<64x384xf32>
    %cst_31 = arith.constant dense<0.000000e+00> : vector<16x384xf32>
    %45 = tpu.matmul %43, %44, %cst_31 {dimension_numbers = #tpu.dot_dimension_numbers<[1], [0], [0], [1], [0, 0, 1, 1], [], []>} : vector<16x64xf32>, vector<64x384xf32>, vector<16x384xf32> -> vector<16x384xf32>
    %46 = vector.extract_strided_slice %24 {offsets = [112, 0], sizes = [16, 64], strides = [1, 1]} : vector<192x64xf32> to vector<16x64xf32>
    %c448 = arith.constant 448 : index
    %c0_32 = arith.constant 0 : index
    %47 = vector.load %arg8[%c448, %c0_32] : memref<768x384xf32, #tpu.memory_space<vmem>>, vector<64x384xf32>
    %cst_33 = arith.constant dense<0.000000e+00> : vector<16x384xf32>
    %48 = tpu.matmul %46, %47, %cst_33 {dimension_numbers = #tpu.dot_dimension_numbers<[1], [0], [0], [1], [0, 0, 1, 1], [], []>} : vector<16x64xf32>, vector<64x384xf32>, vector<16x384xf32> -> vector<16x384xf32>
    %49 = vector.extract_strided_slice %24 {offsets = [128, 0], sizes = [16, 64], strides = [1, 1]} : vector<192x64xf32> to vector<16x64xf32>
    %c512 = arith.constant 512 : index
    %c0_34 = arith.constant 0 : index
    %50 = vector.load %arg8[%c512, %c0_34] : memref<768x384xf32, #tpu.memory_space<vmem>>, vector<64x384xf32>
    %cst_35 = arith.constant dense<0.000000e+00> : vector<16x384xf32>
    %51 = tpu.matmul %49, %50, %cst_35 {dimension_numbers = #tpu.dot_dimension_numbers<[1], [0], [0], [1], [0, 0, 1, 1], [], []>} : vector<16x64xf32>, vector<64x384xf32>, vector<16x384xf32> -> vector<16x384xf32>
    %52 = vector.extract_strided_slice %24 {offsets = [144, 0], sizes = [16, 64], strides = [1, 1]} : vector<192x64xf32> to vector<16x64xf32>
    %c576 = arith.constant 576 : index
    %c0_36 = arith.constant 0 : index
    %53 = vector.load %arg8[%c576, %c0_36] : memref<768x384xf32, #tpu.memory_space<vmem>>, vector<64x384xf32>
    %cst_37 = arith.constant dense<0.000000e+00> : vector<16x384xf32>
    %54 = tpu.matmul %52, %53, %cst_37 {dimension_numbers = #tpu.dot_dimension_numbers<[1], [0], [0], [1], [0, 0, 1, 1], [], []>} : vector<16x64xf32>, vector<64x384xf32>, vector<16x384xf32> -> vector<16x384xf32>
    %55 = vector.extract_strided_slice %24 {offsets = [160, 0], sizes = [16, 64], strides = [1, 1]} : vector<192x64xf32> to vector<16x64xf32>
    %c640 = arith.constant 640 : index
    %c0_38 = arith.constant 0 : index
    %56 = vector.load %arg8[%c640, %c0_38] : memref<768x384xf32, #tpu.memory_space<vmem>>, vector<64x384xf32>
    %cst_39 = arith.constant dense<0.000000e+00> : vector<16x384xf32>
    %57 = tpu.matmul %55, %56, %cst_39 {dimension_numbers = #tpu.dot_dimension_numbers<[1], [0], [0], [1], [0, 0, 1, 1], [], []>} : vector<16x64xf32>, vector<64x384xf32>, vector<16x384xf32> -> vector<16x384xf32>
    %58 = vector.extract_strided_slice %24 {offsets = [176, 0], sizes = [16, 64], strides = [1, 1]} : vector<192x64xf32> to vector<16x64xf32>
    %c704 = arith.constant 704 : index
    %c0_40 = arith.constant 0 : index
    %59 = vector.load %arg8[%c704, %c0_40] : memref<768x384xf32, #tpu.memory_space<vmem>>, vector<64x384xf32>
    %cst_41 = arith.constant dense<0.000000e+00> : vector<16x384xf32>
    %60 = tpu.matmul %58, %59, %cst_41 {dimension_numbers = #tpu.dot_dimension_numbers<[1], [0], [0], [1], [0, 0, 1, 1], [], []>} : vector<16x64xf32>, vector<64x384xf32>, vector<16x384xf32> -> vector<16x384xf32>
    %61 = arith.addf %27, %30 : vector<16x384xf32>
    %62 = arith.addf %33, %36 : vector<16x384xf32>
    %63 = arith.addf %39, %42 : vector<16x384xf32>
    %64 = arith.addf %45, %48 : vector<16x384xf32>
    %65 = arith.addf %51, %54 : vector<16x384xf32>
    %66 = arith.addf %57, %60 : vector<16x384xf32>
    %67 = arith.addf %61, %62 : vector<16x384xf32>
    %68 = arith.addf %63, %64 : vector<16x384xf32>
    %69 = arith.addf %65, %66 : vector<16x384xf32>
    %70 = arith.addf %67, %68 : vector<16x384xf32>
    %71 = arith.addf %70, %69 : vector<16x384xf32>
    %c0_42 = arith.constant 0 : index
    %c0_43 = arith.constant 0 : index
    %72 = vector.load %arg9[%c0_42, %c0_43] : memref<1x384xf32, #tpu.memory_space<vmem>>, vector<1x384xf32>
    %73 = vector.broadcast %72 : vector<1x384xf32> to vector<16x384xf32>
    %74 = arith.addf %71, %73 : vector<16x384xf32>
    %cst_44 = arith.constant 0.000000e+00 : f32
    %75 = vector.broadcast %cst_44 : f32 to vector<16x384xf32>
    %76 = arith.maximumf %74, %75 : vector<16x384xf32>
    %c0_45 = arith.constant 0 : index
    %c0_46 = arith.constant 0 : index
    %77 = vector.load %arg17[%c0_45, %c0_46] : memref<16x384xf32, #tpu.memory_space<vmem>>, vector<16x384xf32>
    tpu.vector_store %arg17[%c0_45, %c0_46], %76 {strides = array<i32>} : memref<16x384xf32, #tpu.memory_space<vmem>>, vector<16x384xf32>,
    %c0_47 = arith.constant 0 : index
    %c0_48 = arith.constant 0 : index
    %78 = vector.load %arg10[%c0_47, %c0_48] : memref<384x64xf32, #tpu.memory_space<vmem>>, vector<384x64xf32>
    %cst_49 = arith.constant dense<0.000000e+00> : vector<16x64xf32>
    %79 = tpu.matmul %76, %78, %cst_49 {dimension_numbers = #tpu.dot_dimension_numbers<[1], [0], [0], [1], [0, 0, 1, 1], [], []>} : vector<16x384xf32>, vector<384x64xf32>, vector<16x64xf32> -> vector<16x64xf32>
    %c0_50 = arith.constant 0 : index
    %c0_51 = arith.constant 0 : index
    %80 = vector.load %arg11[%c0_50, %c0_51] : memref<1x64xf32, #tpu.memory_space<vmem>>, vector<1x64xf32>
    %81 = vector.broadcast %80 : vector<1x64xf32> to vector<16x64xf32>
    %82 = arith.addf %79, %81 : vector<16x64xf32>
    %cst_52 = arith.constant 0.000000e+00 : f32
    %83 = vector.broadcast %cst_52 : f32 to vector<16x64xf32>
    %84 = arith.maximumf %82, %83 : vector<16x64xf32>
    %c0_53 = arith.constant 0 : index
    %c0_54 = arith.constant 0 : index
    %85 = vector.load %arg12[%c0_53, %c0_54] : memref<64x16xf32, #tpu.memory_space<vmem>>, vector<64x16xf32>
    %cst_55 = arith.constant dense<0.000000e+00> : vector<16x16xf32>
    %86 = tpu.matmul %84, %85, %cst_55 {dimension_numbers = #tpu.dot_dimension_numbers<[1], [0], [0], [1], [0, 0, 1, 1], [], []>} : vector<16x64xf32>, vector<64x16xf32>, vector<16x16xf32> -> vector<16x16xf32>
    %c0_56 = arith.constant 0 : index
    %c0_57 = arith.constant 0 : index
    %87 = vector.load %arg13[%c0_56, %c0_57] : memref<1x16xf32, #tpu.memory_space<vmem>>, vector<1x16xf32>
    %88 = vector.broadcast %87 : vector<1x16xf32> to vector<16x16xf32>
    %89 = arith.addf %86, %88 : vector<16x16xf32>
    %cst_58 = arith.constant 0.000000e+00 : f32
    %90 = vector.broadcast %cst_58 : f32 to vector<16x16xf32>
    %91 = arith.maximumf %89, %90 : vector<16x16xf32>
    %c0_59 = arith.constant 0 : index
    %c0_60 = arith.constant 0 : index
    %92 = vector.load %arg14[%c0_59, %c0_60] : memref<16x128xf32, #tpu.memory_space<vmem>>, vector<16x128xf32>
    %cst_61 = arith.constant dense<0.000000e+00> : vector<16x128xf32>
    %93 = tpu.matmul %91, %92, %cst_61 {dimension_numbers = #tpu.dot_dimension_numbers<[1], [0], [0], [1], [0, 0, 1, 1], [], []>} : vector<16x16xf32>, vector<16x128xf32>, vector<16x128xf32> -> vector<16x128xf32>
    %c0_62 = arith.constant 0 : index
    %c0_63 = arith.constant 0 : index
    %94 = vector.load %arg15[%c0_62, %c0_63] : memref<1x128xf32, #tpu.memory_space<vmem>>, vector<1x128xf32>
    %95 = vector.broadcast %94 : vector<1x128xf32> to vector<16x128xf32>
    %96 = arith.addf %93, %95 : vector<16x128xf32>
    %c0_64 = arith.constant 0 : index
    %c0_65 = arith.constant 0 : index
    %97 = vector.load %arg16[%c0_64, %c0_65] : memref<16x128xf32, #tpu.memory_space<vmem>>, vector<16x128xf32>
    tpu.vector_store %arg16[%c0_64, %c0_65], %96 {strides = array<i32>} : memref<16x128xf32, #tpu.memory_space<vmem>>, vector<16x128xf32>,
    return
  }
  func.func @transform_0(%arg0: i32) -> (i32, i32, i32) {
    %c0_i32 = arith.constant 0 : i32
    %c0_i32_0 = arith.constant 0 : i32
    %c0_i32_1 = arith.constant 0 : i32
    return %c0_i32, %arg0, %c0_i32_0 : i32, i32, i32
  }
  func.func @transform_1(%arg0: i32) -> (i32, i32) {
    %c0_i32 = arith.constant 0 : i32
    %c0_i32_0 = arith.constant 0 : i32
    %c0_i32_1 = arith.constant 0 : i32
    return %c0_i32, %c0_i32_0 : i32, i32
  }
  func.func @transform_2(%arg0: i32) -> (i32, i32) {
    %c0_i32 = arith.constant 0 : i32
    %c0_i32_0 = arith.constant 0 : i32
    %c0_i32_1 = arith.constant 0 : i32
    return %c0_i32, %c0_i32_0 : i32, i32
  }
  func.func @transform_3(%arg0: i32) -> (i32, i32) {
    %c0_i32 = arith.constant 0 : i32
    %c0_i32_0 = arith.constant 0 : i32
    %c0_i32_1 = arith.constant 0 : i32
    return %c0_i32, %c0_i32_0 : i32, i32
  }
  func.func @transform_4(%arg0: i32) -> (i32, i32) {
    %c0_i32 = arith.constant 0 : i32
    %c0_i32_0 = arith.constant 0 : i32
    %c0_i32_1 = arith.constant 0 : i32
    return %c0_i32, %c0_i32_0 : i32, i32
  }
  func.func @transform_5(%arg0: i32) -> (i32, i32) {
    %c0_i32 = arith.constant 0 : i32
    %c0_i32_0 = arith.constant 0 : i32
    %c0_i32_1 = arith.constant 0 : i32
    return %c0_i32, %c0_i32_0 : i32, i32
  }
  func.func @transform_6(%arg0: i32) -> (i32, i32) {
    %c0_i32 = arith.constant 0 : i32
    %c0_i32_0 = arith.constant 0 : i32
    %c0_i32_1 = arith.constant 0 : i32
    return %c0_i32, %c0_i32_0 : i32, i32
  }
  func.func @transform_7(%arg0: i32) -> (i32, i32) {
    %c0_i32 = arith.constant 0 : i32
    %c0_i32_0 = arith.constant 0 : i32
    %c0_i32_1 = arith.constant 0 : i32
    return %c0_i32, %c0_i32_0 : i32, i32
  }
  func.func @transform_8(%arg0: i32) -> (i32, i32) {
    %c0_i32 = arith.constant 0 : i32
    %c0_i32_0 = arith.constant 0 : i32
    %c0_i32_1 = arith.constant 0 : i32
    return %c0_i32, %c0_i32_0 : i32, i32
  }
  func.func @transform_9(%arg0: i32) -> (i32, i32) {
    %c0_i32 = arith.constant 0 : i32
    %c0_i32_0 = arith.constant 0 : i32
    %c0_i32_1 = arith.constant 0 : i32
    return %c0_i32, %c0_i32_0 : i32, i32
  }
  func.func @transform_10(%arg0: i32) -> (i32, i32) {
    %c0_i32 = arith.constant 0 : i32
    %c0_i32_0 = arith.constant 0 : i32
    %c0_i32_1 = arith.constant 0 : i32
    return %c0_i32, %c0_i32_0 : i32, i32
  }
  func.func @transform_11(%arg0: i32) -> (i32, i32) {
    %c0_i32 = arith.constant 0 : i32
    %c0_i32_0 = arith.constant 0 : i32
    %c0_i32_1 = arith.constant 0 : i32
    return %c0_i32, %c0_i32_0 : i32, i32
  }
  func.func @transform_12(%arg0: i32) -> (i32, i32) {
    %c0_i32 = arith.constant 0 : i32
    %c0_i32_0 = arith.constant 0 : i32
    %c0_i32_1 = arith.constant 0 : i32
    return %c0_i32, %c0_i32_0 : i32, i32
  }
  func.func @transform_13(%arg0: i32) -> (i32, i32) {
    %c0_i32 = arith.constant 0 : i32
    %c0_i32_0 = arith.constant 0 : i32
    %c0_i32_1 = arith.constant 0 : i32
    return %c0_i32, %c0_i32_0 : i32, i32
  }
  func.func @transform_14(%arg0: i32) -> (i32, i32) {
    %c0_i32 = arith.constant 0 : i32
    %c0_i32_0 = arith.constant 0 : i32
    %c0_i32_1 = arith.constant 0 : i32
    return %c0_i32, %c0_i32_0 : i32, i32
  }
  func.func @transform_15(%arg0: i32) -> (i32, i32) {
    %c0_i32 = arith.constant 0 : i32
    %c0_i32_0 = arith.constant 0 : i32
    return %arg0, %c0_i32 : i32, i32
  }
  func.func @transform_16(%arg0: i32) -> (i32, i32) {
    %c0_i32 = arith.constant 0 : i32
    %c0_i32_0 = arith.constant 0 : i32
    return %arg0, %c0_i32 : i32, i32
  }
}

</mosaic_0001>

<bundles_post_ra>
// kernel: tpu_custom_call.1
= control target key start
LH: loop header
LB: loop body
LE: loop exit
PB: predicated region body
PF: predicated region fallthrough
CT: control target
= control target key end

     0   :  { %s5849_s0 = inlined_call_operand.vmem [shape: f32[12,48,30], index: 0, kind: input, shape index: {}]   ;;  %s5850_s1 = inlined_call_operand.hbm [shape: f32[30,384], index: 1, kind: input, shape index: {}]   ;;  %s5851_s2 = inlined_call_operand.hbm [shape: f32[1,384], index: 2, kind: input, shape index: {}]   ;;  %s5852_s3 = inlined_call_operand.hbm [shape: f32[384,128], index: 3, kind: input, shape index: {}]   ;;  %s5853_s4 = inlined_call_operand.hbm [shape: f32[1,128], index: 4, kind: input, shape index: {}]   ;;  %s5854_s5 = inlined_call_operand.hbm [shape: f32[1,64], index: 5, kind: input, shape index: {}]   ;;  %s5855_s6 = inlined_call_operand.hbm [shape: f32[1,64], index: 6, kind: input, shape index: {}]   ;;  %s5856_s7 = inlined_call_operand.hbm [shape: f32[768,384], index: 7, kind: input, shape index: {}]   ;;  %s5857_s8 = inlined_call_operand.hbm [shape: f32[1,384], index: 8, kind: input, shape index: {}]   ;;  %s5858_s9 = inlined_call_operand.vmem [shape: f32[384,64], index: 9, kind: input, shape index: {}]   ;;  %s5859_s10 = inlined_call_operand.hbm [shape: f32[1,64], index: 10, kind: input, shape index: {}]   ;;  %s5860_s11 = inlined_call_operand.vmem [shape: f32[64,16], index: 11, kind: input, shape index: {}]   ;;  %s5861_s12 = inlined_call_operand.hbm [shape: f32[1,16], index: 12, kind: input, shape index: {}]   ;;  %s5862_s13 = inlined_call_operand.hbm [shape: f32[16,128], index: 13, kind: input, shape index: {}]   ;;  %s5863_s14 = inlined_call_operand.hbm [shape: f32[1,128], index: 14, kind: input, shape index: {}]   ;;  %s5864_s15 = inlined_call_operand.hbm [shape: f32[48,128], index: 15, kind: output, shape index: {0}]   ;;  %s5865_s16 = inlined_call_operand.hbm [shape: f32[48,384], index: 16, kind: output, shape index: {1}]  }
   0x1   :  { %5875 = sst [smem:[#allocation40_spill]] %s5849_s0 }
   0x2   :  { %5876 = sst [smem:[#allocation41_spill]] %s5850_s1 }
   0x3   :  { %5877 = sst [smem:[#allocation42_spill]] %s5851_s2 }
   0x4   :  { %5878 = sst [smem:[#allocation43_spill]] %s5852_s3 }
   0x5   :  { %5879 = sst [smem:[#allocation44_spill]] %s5853_s4 }
   0x6   :  { %5880 = sst [smem:[#allocation45_spill]] %s5854_s5 }
   0x7   :  { %5881 = sst [smem:[#allocation46_spill]] %s5855_s6 }
   0x8   :  { %5882 = sst [smem:[#allocation47_spill]] %s5860_s11 }
   0x9   :  { %5883 = sst [smem:[#allocation48_spill]] %s5864_s15 }
   0xa   :  { %5884 = sst [smem:[#allocation49_spill]] %s5865_s16 }
   0xb   :  { %22 = vsyncpa [#allocation4], 0 }
   0xc   :  { %23 = vsyncpa [#allocation7], 0 }
   0xd   :  { %24 = vsyncpa [#allocation10], 0 }
   0xe   :  { %25 = vsyncpa [#allocation13], 0 }
   0xf   :  { %26 = vsyncpa [#allocation16], 0 }
  0x10   :  { %27 = vsyncpa [#allocation19], 0 }
  0x11   :  { %28 = vsyncpa [#allocation22], 0 }
  0x12   :  { %29 = vsyncpa [#allocation5], 0 }
  0x13   :  { %31 = vsyncpa [#allocation5 + $0x1], 0 }
  0x14   :  { %32 = vsyncpa [#allocation25], 0 }
  0x15   :  { %34 = vsyncpa [#allocation25 + $0x1], 0  ;;  %s4508_s21 = smov 0   ;;  %s4510_s22 = smov 0  }
  0x16   :  { %s4512_s23 = smov 0   ;;  %s4514_s24 = smov 0  }
  0x17 LB: > { %5885 = sst [smem:[#allocation35_spill]] %s4388_s21  ;;  %s4529_s25 = sadd.s32 4294967295, %s4400_s24   ;;  %s4400_s24 = sphi %s4514_s24, %s5908_s24   ;;  %s4396_s23 = sphi %s4512_s23, %s5912_s23   ;;  %s4392_s22 = sphi %s4510_s22, %s5911_s22   ;;  %s4388_s21 = sphi %s4508_s21, %s5910_s21  }
  0x18   : > { %s3536_s26 = sadd.s32 4294967294, %s4400_s24   ;;  %s4533_s27 = sadd.s32 1, %s4400_s24  }
  0x19   : > { %5886 = sst [smem:[#allocation36_spill]] %s4533_s27  ;;  %s47_s28 = sadd.s32 1, %s4396_s23 }
  0x1a   : > { %s44_s29 = ssub.s32 %s4400_s24, %s4533_s27  ;;  %p54_p0 = scmp.ne.s32.totalorder %s4396_s23, %s4392_s22 }
  0x1b   : > { %p45_p1 = scmp.eq.s32.totalorder %s44_s29, 0  ;;  %p55_p2 = scmp.eq.s32.totalorder %s4400_s24, 0 }
  0x1c   : > { %p378_p3 = scmp.eq.s32.totalorder %s4529_s25, 2  ;;  %p383_p4 = scmp.ne.s32.totalorder %s4392_s22, %s4388_s21 }
  0x1d   : > { %s4545_s30 = scalar_select %p45_p1, %s4396_s23, %s47_s28  }
  0x1e   : > { %p4547_p5 = por %p55_p2, %p54_p0  ;;  %p4551_p6 = por %p378_p3, %p54_p0 }
  0x1f   : > { %5887 = sst [smem:[#allocation37_spill]] %s4545_s30  ;;  %p384_p7 = scmp.eq.s32.totalorder %s3536_s26, 2 }
  0x20   : > { %s5889_s17 = scalar_select %p4551_p6, 1, 0 }
  0x21   : > { %p3537_p8 = scmp.ge.s32.totalorder %s4400_s24, 1  ;;  %p417_p9 = scmp.lt.s32.totalorder %s4400_s24, 4 }
  0x22   : > { %5890 = sst [smem:[#allocation38_spill]] %s5889_s17  ;;  %p4557_p10 = por %p384_p7, %p383_p4 }
  0x23   : > { %p3832_p11 = scmp.eq.s32.totalorder %s4529_s25, 0  ;;  %p4562_p12 = pnand %p3537_p8, %p417_p9 }
  0x24   : > { %s5891_s18 = scalar_select %p4557_p10, 1, 0 }
  0x25   : > { %s5894_s2 = sld [smem:[#allocation42_spill]]  ;;  %p3788_p13 = pneg %p4562_p12 }
  0x26   : > { %5892 = sst [smem:[#allocation39_spill]] %s5891_s18  ;;  %s4402_s26 = smov [#allocation6]  }
  0x27   : > { %s445_s30 = sshll.u32 %s4402_s26, 4  ;;  %s5895_s4 = sld [smem:[#allocation44_spill]]  ;;  %s446_s30 = int_to_ptr.vmem [resolvable:$true] %s445_s30 }
  0x28   : > { %p4576_p0 = pnand %p3832_p11, %p3788_p13  ;;  %s5897_s6 = sld [smem:[#allocation46_spill]] }
  0x29   : > { %s4403_s16 = smov [#allocation9]   ;;  %s4404_s17 = smov [#allocation12]  }
  0x2a   : > { %s471_s26 = sshll.u32 %s4403_s16, 4  ;;  %s495_s11 = sshll.u32 %s4404_s17, 4  ;;  %s472_s26 = int_to_ptr.vmem [resolvable:$true] %s471_s26  ;;  %s496_s11 = int_to_ptr.vmem [resolvable:$true] %s495_s11 }
  0x2b   : > { %s443_s29 = sshll.u32 %s5894_s2, 4  ;;  %s4405_s20 = smov [#allocation15]   ;;  %s444_s29 = int_to_ptr.hbm [resolvable:$true] %s443_s29 }
  0x2c   : > { %3794 = dma.hbm_to_vmem [thread:$0]  (!%p4576_p0), %s444_s29, 48, %s446_s30, [#allocation7]  }
  0x2d   : > { %s469_s18 = sshll.u32 %s5895_s4, 4  ;;  %s519_s4 = sshll.u32 %s5857_s8, 4  ;;  %s470_s18 = int_to_ptr.hbm [resolvable:$true] %s469_s18  ;;  %s520_s4 = int_to_ptr.hbm [resolvable:$true] %s519_s4 }
  0x2e   : > { %s493_s2 = sshll.u32 %s5897_s6, 4  ;;  %s521_s16 = sshll.u32 %s4405_s20, 4  ;;  %s494_s2 = int_to_ptr.hbm [resolvable:$true] %s493_s2  ;;  %s522_s16 = int_to_ptr.vmem [resolvable:$true] %s521_s16 }
  0x2f   : > { %3800 = dma.hbm_to_vmem [thread:$0]  (!%p4576_p0), %s470_s18, 16, %s472_s26, [#allocation10]  }
  0x30   : > { %3806 = dma.hbm_to_vmem [thread:$0]  (!%p4576_p0), %s494_s2, 16, %s496_s11, [#allocation13]  }
  0x31   : > { %s549_s30 = sshll.u32 %s5861_s12, 4  ;;  %s5898_s1 = sld [smem:[#allocation41_spill]]  ;;  %s550_s30 = int_to_ptr.hbm [resolvable:$true] %s549_s30 }
  0x32   : > { %3812 = dma.hbm_to_vmem [thread:$0]  (!%p4576_p0), %s520_s4, 48, %s522_s16, [#allocation16]  }
  0x33   : > { %s4406_s17 = smov [#allocation18]   ;;  %s4407_s2 = smov [#allocation3]  }
  0x34   : > { %s551_s21 = sshll.u32 %s4406_s17, 4  ;;  %s430_s11 = sshll.u32 %s4407_s2, 4  ;;  %s552_s21 = int_to_ptr.vmem [resolvable:$true] %s551_s21  ;;  %s431_s11 = int_to_ptr.vmem [resolvable:$true] %s430_s11 }
  0x35   : > { %3818 = dma.hbm_to_vmem [thread:$0]  (!%p4576_p0), %s550_s30, 16, %s552_s21, [#allocation19]  }
  0x36   : > { %s4408_s6 = smov 384   ;;  %s4409_s27 = smov 24  }
  0x37   : > { %s428_s26 = sshll.u32 %s5898_s1, 4  ;;  %s5899_s3 = sld [smem:[#allocation43_spill]]  ;;  %s429_s26 = int_to_ptr.hbm [resolvable:$true] %s428_s26 }
  0x38   : > { %3791 = dma.hbm_to_vmem [thread:$0]  (!%p4576_p0), %s429_s26, 1536, %s431_s11, [#allocation4], %s4408_s6, %s4408_s6, %s4409_s27  }
  0x39   : > { %s4410_s28 = smov [#allocation8]   ;;  %s5900_s5 = sld [smem:[#allocation45_spill]] }
  0x3a   : > { %s456_s18 = sshll.u32 %s4410_s28, 4  ;;  %s4411_s21 = smov 128   ;;  %s457_s18 = int_to_ptr.vmem [resolvable:$true] %s456_s18 }
  0x3b   : > { %s4412_s2 = smov 8   ;;  %s4413_s26 = smov [#allocation11]  }
  0x3c   : > { %s483_s11 = sshll.u32 %s4413_s26, 4  ;;  %s504_s28 = sshll.u32 %s5856_s7, 4  ;;  %s484_s11 = int_to_ptr.vmem [resolvable:$true] %s483_s11  ;;  %s505_s28 = int_to_ptr.hbm [resolvable:$true] %s504_s28 }
  0x3d   : > { %s454_s16 = sshll.u32 %s5899_s3, 4  ;;  %s534_s1 = sshll.u32 %s5859_s10, 4  ;;  %s455_s16 = int_to_ptr.hbm [resolvable:$true] %s454_s16  ;;  %s535_s1 = int_to_ptr.hbm [resolvable:$true] %s534_s1 }
  0x3e   : > { %3797 = dma.hbm_to_vmem [thread:$0]  (!%p4576_p0), %s455_s16, 6144, %s457_s18, [#allocation7], %s4411_s21, %s4411_s21, %s4412_s2  }
  0x3f   : > { %s481_s30 = sshll.u32 %s5900_s5, 4  ;;  %s4414_s3 = smov [#allocation14]   ;;  %s482_s30 = int_to_ptr.hbm [resolvable:$true] %s481_s30 }
  0x40   : > { %3803 = dma.hbm_to_vmem [thread:$0]  (!%p4576_p0), %s482_s30, 16, %s484_s11, [#allocation10]  }
  0x41   : > { %s506_s5 = sshll.u32 %s4414_s3, 4  ;;  %s4415_s16 = smov [#allocation17]   ;;  %s507_s5 = int_to_ptr.vmem [resolvable:$true] %s506_s5 }
  0x42   : > { %3809 = dma.hbm_to_vmem [thread:$0]  (!%p4576_p0), %s505_s28, 36864, %s507_s5, [#allocation13], %s4408_s6, %s4408_s6, %s4409_s27  }
  0x43   : > { %s536_s18 = sshll.u32 %s4415_s16, 4  ;;  %s560_s4 = sshll.u32 %s5862_s13, 4  ;;  %s537_s18 = int_to_ptr.vmem [resolvable:$true] %s536_s18  ;;  %s561_s4 = int_to_ptr.hbm [resolvable:$true] %s560_s4 }
  0x44   : > { %3815 = dma.hbm_to_vmem [thread:$0]  (!%p4576_p0), %s535_s1, 16, %s537_s18, [#allocation16]  }
  0x45   : > { %s575_s29 = sshll.u32 %s5863_s14, 4  ;;  %s4416_s3 = smov [#allocation20]   ;;  %s576_s29 = int_to_ptr.hbm [resolvable:$true] %s575_s29 }
  0x46   : > { %s562_s17 = sshll.u32 %s4416_s3, 4  ;;  %s4417_s5 = smov [#allocation21]   ;;  %s563_s17 = int_to_ptr.vmem [resolvable:$true] %s562_s17 }
  0x47   : > { %3821 = dma.hbm_to_vmem [thread:$0]  (!%p4576_p0), %s561_s4, 256, %s563_s17, [#allocation19], %s4411_s21, %s4411_s21, %s4412_s2  }
  0x48   : > { %s577_s6 = sshll.u32 %s4417_s5, 4  ;;  %p3550_p1 = scmp.ge.s32.totalorder %s4400_s24, 3  ;;  %s578_s6 = int_to_ptr.vmem [resolvable:$true] %s577_s6 }
  0x49   : > { %3824 = dma.hbm_to_vmem [thread:$0]  (!%p4576_p0), %s576_s29, 16, %s578_s6, [#allocation22]  }
  0x4a   : > { %584 = sbr.rel (%p3550_p1) target bundleno = 113 (0x71), region = 72 }
  0x4f   : > { %587 = sbr.rel (!%p4547_p5) target bundleno = 113 (0x71), region = 76  ;;  %s589_s1 = sand.u32 (%p4547_p5), 1, %s4396_s23  }
  0x50   : > { %s3726_s27 = sshll.u32 (%p4547_p5), %s4400_s24, 4  ;;  %s3732_s28 = smul.u32 (%p4547_p5), 192, %s589_s1 }
  0x51   : > { %s5901_s26 = sld [smem:[#allocation40_spill]] (%p4547_p5) }
  0x52   : > { %s4653_s15 = scalar_lea.vmem (%p4547_p5), [#allocation2], %s3732_s28 }
  0x57   : > { %s4648_s21 = scalar_lea.vmem %s5901_s26, %s3726_s27 }
  0x58   : > { %v669_v0 = vld [vmem:[%s4648_s21] sm:$0xff]  ;;  %v671_v1 = vld [vmem:[%s4648_s21 + $0x8] sm:$0xff]  ;;  %v673_v2 = vld [vmem:[%s4648_s21 + $0x30] sm:$0xff] }
  0x59   : > { %670 = vst [vmem:[%s4653_s15] sm:$0xff] %v669_v0  ;;  %v675_v3 = vld [vmem:[%s4648_s21 + $0x38] sm:$0xff]  ;;  %v677_v4 = vld [vmem:[%s4648_s21 + $0x60] sm:$0xff]  ;;  %v679_v5 = vld [vmem:[%s4648_s21 + $0x68] sm:$0xff] }
  0x5a   : > { %672 = vst [vmem:[%s4653_s15 + $0x8] sm:$0xff] %v671_v1  ;;  %v681_v6 = vld [vmem:[%s4648_s21 + $0x90] sm:$0xff]  ;;  %v683_v7 = vld [vmem:[%s4648_s21 + $0x98] sm:$0xff]  ;;  %v685_v8 = vld [vmem:[%s4648_s21 + $0xc0] sm:$0xff] }
  0x5b   : > { %674 = vst [vmem:[%s4653_s15 + $0x10] sm:$0xff] %v673_v2  ;;  %v687_v9 = vld [vmem:[%s4648_s21 + $0xc8] sm:$0xff]  ;;  %v689_v10 = vld [vmem:[%s4648_s21 + $0xf0] sm:$0xff]  ;;  %v691_v11 = vld [vmem:[%s4648_s21 + $0xf8] sm:$0xff] }
  0x5c   : > { %676 = vst [vmem:[%s4653_s15 + $0x18] sm:$0xff] %v675_v3  ;;  %v693_v12 = vld [vmem:[%s4648_s21 + $0x120] sm:$0xff]  ;;  %v695_v13 = vld [vmem:[%s4648_s21 + $0x128] sm:$0xff]  ;;  %v697_v14 = vld [vmem:[%s4648_s21 + $0x150] sm:$0xff] }
  0x5d   : > { %678 = vst [vmem:[%s4653_s15 + $0x20] sm:$0xff] %v677_v4  ;;  %v699_v15 = vld [vmem:[%s4648_s21 + $0x158] sm:$0xff]  ;;  %v701_v16 = vld [vmem:[%s4648_s21 + $0x180] sm:$0xff]  ;;  %v703_v17 = vld [vmem:[%s4648_s21 + $0x188] sm:$0xff] }
  0x5e   : > { %680 = vst [vmem:[%s4653_s15 + $0x28] sm:$0xff] %v679_v5  ;;  %v705_v18 = vld [vmem:[%s4648_s21 + $0x1b0] sm:$0xff]  ;;  %v707_v19 = vld [vmem:[%s4648_s21 + $0x1b8] sm:$0xff]  ;;  %v709_v20 = vld [vmem:[%s4648_s21 + $0x1e0] sm:$0xff] }
  0x5f   : > { %682 = vst [vmem:[%s4653_s15 + $0x30] sm:$0xff] %v681_v6  ;;  %v711_v21 = vld [vmem:[%s4648_s21 + $0x1e8] sm:$0xff]  ;;  %v713_v22 = vld [vmem:[%s4648_s21 + $0x210] sm:$0xff]  ;;  %v715_v23 = vld [vmem:[%s4648_s21 + $0x218] sm:$0xff] }
  0x60   : > { %684 = vst [vmem:[%s4653_s15 + $0x38] sm:$0xff] %v683_v7 }
  0x61   : > { %686 = vst [vmem:[%s4653_s15 + $0x40] sm:$0xff] %v685_v8 }
  0x62   : > { %688 = vst [vmem:[%s4653_s15 + $0x48] sm:$0xff] %v687_v9 }
  0x63   : > { %690 = vst [vmem:[%s4653_s15 + $0x50] sm:$0xff] %v689_v10 }
  0x64   : > { %692 = vst [vmem:[%s4653_s15 + $0x58] sm:$0xff] %v691_v11 }
  0x65   : > { %694 = vst [vmem:[%s4653_s15 + $0x60] sm:$0xff] %v693_v12 }
  0x66   : > { %696 = vst [vmem:[%s4653_s15 + $0x68] sm:$0xff] %v695_v13 }
  0x67   : > { %698 = vst [vmem:[%s4653_s15 + $0x70] sm:$0xff] %v697_v14 }
  0x68   : > { %700 = vst [vmem:[%s4653_s15 + $0x78] sm:$0xff] %v699_v15 }
  0x69   : > { %702 = vst [vmem:[%s4653_s15 + $0x80] sm:$0xff] %v701_v16 }
  0x6a   : > { %704 = vst [vmem:[%s4653_s15 + $0x88] sm:$0xff] %v703_v17 }
  0x6b   : > { %706 = vst [vmem:[%s4653_s15 + $0x90] sm:$0xff] %v705_v18 }
  0x6c   : > { %708 = vst [vmem:[%s4653_s15 + $0x98] sm:$0xff] %v707_v19 }
  0x6d   : > { %710 = vst [vmem:[%s4653_s15 + $0xa0] sm:$0xff] %v709_v20 }
  0x6e   : > { %712 = vst [vmem:[%s4653_s15 + $0xa8] sm:$0xff] %v711_v21 }
  0x6f   : > { %714 = vst [vmem:[%s4653_s15 + $0xb0] sm:$0xff] %v713_v22 }
  0x70   : > { %716 = vst [vmem:[%s4653_s15 + $0xb8] sm:$0xff] %v715_v23 }
  0x71 PF: > { %725 = sbr.rel (%p4562_p12) target bundleno = 1415 (0x587), region = 114  ;;  %s4703_s0 = sand.u32 (!%p4562_p12), 1, %s4392_s22  }
  0x72   : > { %s3733_s2 = smul.u32 (!%p4562_p12), 192, %s4703_s0 }
  0x74   : > { %s4706_s20 = scalar_lea.vmem (!%p4562_p12), [#allocation2], %s3733_s2 }
  0x76   : > { %4351 = dma.done.wait (%p3832_p11), [#allocation4], 1536  }
  0x77   : > { %4353 = vsyncadd (%p3832_p11), [#allocation4], 4294965760 }
  0x78   : > { %4355 = dma.done.wait (%p3832_p11), [#allocation7], 6192  }
  0x79   : > { %4357 = vsyncadd (%p3832_p11), [#allocation7], 4294961104 }
  0x7a   : > { %4359 = dma.done.wait (%p3832_p11), [#allocation10], 32  }
  0x7b   : > { %4361 = vsyncadd (%p3832_p11), [#allocation10], 4294967264 }
  0x7c   : > { %4363 = dma.done.wait (%p3832_p11), [#allocation13], 36880  }
  0x7d   : > { %4365 = vsyncadd (%p3832_p11), [#allocation13], 4294930416 }
  0x7e   : > { %4367 = dma.done.wait (%p3832_p11), [#allocation16], 64  }
  0x7f   : > { %4369 = vsyncadd (%p3832_p11), [#allocation16], 4294967232 }
  0x80   : > { %4371 = dma.done.wait (%p3832_p11), [#allocation19], 272  }
  0x81   : > { %4373 = vsyncadd (%p3832_p11), [#allocation19], 4294967024 }
  0x82   : > { %4375 = dma.done.wait (%p3832_p11), [#allocation22], 16  }
  0x83   : > { %4377 = vsyncadd (%p3832_p11), [#allocation22], 4294967280  ;;  %vm962_vm0 = vcmask 1045504   ;;  %v878_v24 = vld [vmem:[#allocation3 + $0x48] sm:$0x3f]  ;;  %v875_v25 = vld [vmem:[#allocation3 + $0x30] sm:$0xff] }
  0x84   : > { %3567 = vmatpush.msk.msra.mxu0 %vm962_vm0, %v878_v24  ;;  %3728 = vmatpush.msk.msra.mxu1 %vm962_vm0, %v878_v24  ;;  %v872_v26 = vld [vmem:[#allocation3 + $0x18] sm:$0xff]  ;;  %v869_v27 = vld [vmem:[#allocation3] sm:$0xff]  ;;  %vm889_vm1 = vcmask 244736   ;;  %v879_v30 = vld [vmem:[#allocation3 + $0x50] sm:$0x3f]  ;;  %s4418_s19 = smov 64  }
  0x85   : > { %v845_v28 = vld [vmem:[%s4706_s20] sm:$0xff]  ;;  %v4740_v29 = vld [vmem:[%s4706_s20 + $0xb8] sm:$0xff]  ;;  %v1340_v35 = vld [vmem:[#allocation8 + $0xe8] sm:$0xff]  ;;  %vm1878_vm2 = vcmask 523264   ;;  %s3734_s30 = smul.u32 48, %s4703_s0  ;;  %s5902_s17 = sld [smem:[#allocation47_spill]] }
  0x86   : > { %985 = vmatpush.msra.mxu0 %v875_v25  ;;  %3729 = vmatpush.msra.mxu1 %v875_v25  ;;  %v1342_v31 = vld [vmem:[#allocation8 + $0xf8] sm:$0xff]  ;;  %v1341_v33 = vld [vmem:[#allocation8 + $0xf0] sm:$0xff]  ;;  %v870_v36 = vld [vmem:[#allocation3 + $0x8] sm:$0xff]  ;;  %vm3247_vm3 = vcmask 130048   ;;  %s3735_s29 = smul.u32 48, %s4529_s25  ;;  %s5904_s6 = sld [smem:[#allocation49_spill]] }
  0x87   : > { %v876_v32 = vld [vmem:[#allocation3 + $0x38] sm:$0xff]  ;;  %v873_v34 = vld [vmem:[#allocation3 + $0x20] sm:$0xff]  ;;  %v846_v37 = vld [vmem:[%s4706_s20 + $0x8] sm:$0xff]  ;;  %s5735_s11 = scalar_lea.vmem [#allocation24], %s3734_s30  ;;  %s3285_s16 = scalar_lea.sflag [#allocation25], %s4703_s0 }
  0x88   : > { %986 = vmatpush.msra.mxu0 %v872_v26  ;;  %3730 = vmatpush.msra.mxu1 %v872_v26  ;;  %v1358_v38 = vld [vmem:[#allocation8 + $0x178] sm:$0xff]  ;;  %v1357_v39 = vld [vmem:[#allocation8 + $0x170] sm:$0xff]  ;;  %v1356_v40 = vld [vmem:[#allocation8 + $0x168] sm:$0xff]  ;;  %s3315_s27 = sshll.u32 %s5735_s11, 4  ;;  %s3316_s27 = int_to_ptr.vmem [resolvable:$true] %s3315_s27 }
  0x89   : > { %v1355_v41 = vld [vmem:[#allocation8 + $0x160] sm:$0xff]  ;;  %v847_v42 = vld [vmem:[%s4706_s20 + $0x10] sm:$0xff]  ;;  %v848_v44 = vld [vmem:[%s4706_s20 + $0x18] sm:$0xff] }
  0x8a   : > { %987 = vmatpush.msra.mxu0 %v869_v27  ;;  %3731 = vmatpush.msra.mxu1 %v869_v27  ;;  %v1339_v43 = vld [vmem:[#allocation8 + $0xe0] sm:$0xff]  ;;  %v1354_v45 = vld [vmem:[#allocation8 + $0x158] sm:$0xff]  ;;  %v871_v50 = vld [vmem:[#allocation3 + $0x10] sm:$0xff] }
  0x8b   : > { %3568 = vmatmul.msk.f32.vlgmr.msra.gmra.mxu0 %vm889_vm1, %v845_v28  ;;  %3591 = vmatmul.msk.f32.vlgmr.msra.gmra.mxu1 %vm889_vm1, %v4740_v29  ;;  %v880_v46 = vld [vmem:[#allocation3 + $0x58] sm:$0x3f]  ;;  %v877_v47 = vld [vmem:[#allocation3 + $0x40] sm:$0xff]  ;;  %v874_v49 = vld [vmem:[#allocation3 + $0x28] sm:$0xff] }
  0x8c   : > { %3592 = vmatpush.msk.msrb.mxu1 %vm962_vm0, %v879_v30  ;;  %1452 = vmatpush.msrb.mxu0 %v1342_v31  ;;  %v1338_v48 = vld [vmem:[#allocation8 + $0xd8] sm:$0xff]  ;;  %v1353_v52 = vld [vmem:[#allocation8 + $0x150] sm:$0xff]  ;;  %v850_v53 = vld [vmem:[%s4706_s20 + $0x28] sm:$0xff]  ;;  %s3314_s1 = scalar_lea.hbm %s5904_s6, %s3735_s29  ;;  %s4298_s2 = scalar_lea.hbm %s5904_s6, 144 }
  0x8d   : > { %3617 = vmatpush.msk.msra.mxu2 %vm962_vm0, %v880_v46  ;;  %v849_v51 = vld [vmem:[%s4706_s20 + $0x20] sm:$0xff]  ;;  %v1337_v54 = vld [vmem:[#allocation8 + $0xd0] sm:$0xff]  ;;  %v1352_v56 = vld [vmem:[#allocation8 + $0x148] sm:$0xff]  ;;  %s3317_s28 = sshll.u32 %s3314_s1, 4  ;;  %s3318_s28 = int_to_ptr.hbm [resolvable:$true] %s3317_s28 }
  0x8e   : > { %1074 = vmatpush.msrb.mxu1 %v876_v32  ;;  %1453 = vmatpush.msrb.mxu0 %v1341_v33  ;;  %v851_v55 = vld [vmem:[%s4706_s20 + $0x30] sm:$0xff]  ;;  %v852_v58 = vld [vmem:[%s4706_s20 + $0x38] sm:$0xff]  ;;  %v1351_v59 = vld [vmem:[#allocation8 + $0x140] sm:$0xff]  ;;  %s4292_s18 = sshra.s32 %s3318_s28, 4  ;;  %s4293_s18 = int_to_ptr.hbm [resolvable:$true] %s4292_s18 }
  0x8f   : > { %1163 = vmatpush.msra.mxu2 %v877_v47  ;;  %v1336_v57 = vld [vmem:[#allocation8 + $0xc8] sm:$0xff]  ;;  %v1335_v60 = vld [vmem:[#allocation8 + $0xc0] sm:$0xff]  ;;  %v1326_v62 = vld [vmem:[#allocation8 + $0x78] sm:$0xff]  ;;  %s4294_s26 = scalar_lea.hbm %s4293_s18, 48  ;;  %p4299_p5 = scmp.lt.s32.totalorder %s4293_s18, %s5904_s6 }
  0x90   : > { %1075 = vmatpush.msrb.mxu1 %v873_v34  ;;  %1454 = vmatpush.msrb.mxu0 %v1340_v35  ;;  %v853_v61 = vld [vmem:[%s4706_s20 + $0x40] sm:$0xff]  ;;  %v1325_v63 = vld [vmem:[#allocation8 + $0x70] sm:$0xff]  ;;  %v1324_v0 = vld [vmem:[#allocation8 + $0x68] sm:$0xff]  ;;  %p4295_p2 = scmp.ne.s32.totalorder %s4293_s18, %s4294_s26  ;;  %p4300_p7 = scmp.lt.s32.totalorder %s4298_s2, %s4294_s26 }
  0x91   : > { %1164 = vmatpush.msra.mxu2 %v874_v49  ;;  %1363 = vmatpush.msra.mxu3 %v1326_v62  ;;  %v854_v1 = vld [vmem:[%s4706_s20 + $0x48] sm:$0xff]  ;;  %v1350_v2 = vld [vmem:[#allocation8 + $0x138] sm:$0xff]  ;;  %v1321_v6 = vld [vmem:[#allocation8 + $0x50] sm:$0xff] }
  0x92   : > { %1076 = vmatpush.msrb.mxu1 %v870_v36  ;;  %1455 = vmatpush.msrb.mxu0 %v1339_v43  ;;  %v1323_v3 = vld [vmem:[#allocation8 + $0x60] sm:$0xff]  ;;  %v1334_v4 = vld [vmem:[#allocation8 + $0xb8] sm:$0xff]  ;;  %v855_v7 = vld [vmem:[%s4706_s20 + $0x50] sm:$0xff]  ;;  %p4296_p3 = pnand %p4295_p2, %p4551_p6  ;;  %p4301_p8 = por %p4300_p7, %p4299_p5 }
  0x93   : > { %3569 = vmatmul.msk.f32.gmra.mxu0 %vm889_vm1, %v846_v37  ;;  %3593 = vmatmul.msk.f32.vlgmr.msrb.gmra.mxu1 %vm889_vm1, %v845_v28  ;;  %v1322_v5 = vld [vmem:[#allocation8 + $0x58] sm:$0xff]  ;;  %v1320_v8 = vld [vmem:[#allocation8 + $0x48] sm:$0xff]  ;;  %v1319_v9 = vld [vmem:[#allocation8 + $0x40] sm:$0xff] }
  0x94   : > { %1541 = vmatpush.msra.mxu1 %v1358_v38  ;;  %1456 = vmatpush.msrb.mxu0 %v1338_v48  ;;  %v1349_v10 = vld [vmem:[#allocation8 + $0x130] sm:$0xff]  ;;  %v1318_v12 = vld [vmem:[#allocation8 + $0x38] sm:$0xff]  ;;  %v1316_v15 = vld [vmem:[#allocation8 + $0x28] sm:$0xff]  ;;  %p4297_p4 = pneg %p4296_p3 }
  0x95   : > { %1165 = vmatpush.msra.mxu2 %v871_v50  ;;  %1364 = vmatpush.msra.mxu3 %v1325_v63  ;;  %v1333_v11 = vld [vmem:[#allocation8 + $0xb0] sm:$0xff]  ;;  %v1315_v16 = vld [vmem:[#allocation8 + $0x20] sm:$0xff]  ;;  %v1314_v17 = vld [vmem:[#allocation8 + $0x18] sm:$0xff] }
  0x96   : > { %1542 = vmatpush.msra.mxu1 %v1357_v39  ;;  %3618 = vmatmul.msk.f32.vlgmr.msra.gmra.mxu2 %vm889_vm1, %v845_v28  ;;  %v1317_v13 = vld [vmem:[#allocation8 + $0x30] sm:$0xff]  ;;  %v857_v19 = vld [vmem:[%s4706_s20 + $0x60] sm:$0xff]  ;;  %v1312_v20 = vld [vmem:[#allocation8 + $0x8] sm:$0xff]  ;;  %p4302_p9 = pnand %p4301_p8, %p4297_p4 }
  0x97   : > { %1457 = vmatpush.msrb.mxu0 %v1337_v54  ;;  %1365 = vmatpush.msra.mxu3 %v1324_v0  ;;  %v856_v14 = vld [vmem:[%s4706_s20 + $0x58] sm:$0xff]  ;;  %v1348_v21 = vld [vmem:[#allocation8 + $0x128] sm:$0xff]  ;;  %v1311_v22 = vld [vmem:[#allocation8] sm:$0xff] }
  0x98   : > { %1543 = vmatpush.msra.mxu1 %v1356_v40  ;;  %v1313_v18 = vld [vmem:[#allocation8 + $0x10] sm:$0xff]  ;;  %v1332_v23 = vld [vmem:[#allocation8 + $0xa8] sm:$0xff]  ;;  %v1347_v25 = vld [vmem:[#allocation8 + $0x120] sm:$0xff] }
  0x99   : > { %1458 = vmatpush.msrb.mxu0 %v1336_v57  ;;  %1366 = vmatpush.msra.mxu3 %v1323_v3  ;;  %v858_v24 = vld [vmem:[%s4706_s20 + $0x68] sm:$0xff]  ;;  %v859_v26 = vld [vmem:[%s4706_s20 + $0x70] sm:$0xff]  ;;  %v860_v28 = vld [vmem:[%s4706_s20 + $0x78] sm:$0xff] }
  0x9a   : > { %1544 = vmatpush.msra.mxu1 %v1355_v41  ;;  %v1331_v27 = vld [vmem:[#allocation8 + $0xa0] sm:$0xff]  ;;  %v4801_v30 = vld [vmem:[#allocation6] sm:$0x7]  ;;  %v1329_v39 = vld [vmem:[#allocation8 + $0x90] sm:$0xff] }
  0x9b   : > { %3570 = vmatmul.msk.f32.gmra.mxu0 %vm889_vm1, %v847_v42  ;;  %3594 = vmatmul.msk.f32.gmra.mxu1 %vm889_vm1, %v846_v37  ;;  %v1330_v31 = vld [vmem:[#allocation8 + $0x98] sm:$0xff]  ;;  %v4807_v33 = vperm.slane %v4801_v30, 0  ;;  %v1345_v40 = vld [vmem:[#allocation8 + $0x110] sm:$0xff]  ;;  %v862_v43 = vld [vmem:[%s4706_s20 + $0x88] sm:$0xff] }
  0x9c   : > { %1545 = vmatpush.msra.mxu1 %v1354_v45  ;;  %1459 = vmatpush.msrb.mxu0 %v1335_v60  ;;  %v1346_v32 = vld [vmem:[#allocation8 + $0x118] sm:$0xff]  ;;  %v863_v48 = vld [vmem:[%s4706_s20 + $0x90] sm:$0xff]  ;;  %v1327_v57 = vld [vmem:[#allocation8 + $0x80] sm:$0xff] }
  0x9d   : > { %1367 = vmatpush.msra.mxu3 %v1322_v5  ;;  %v861_v36 = vld [vmem:[%s4706_s20 + $0x80] sm:$0xff] }
  0x9e   : > { %1546 = vmatpush.msra.mxu1 %v1353_v52  ;;  %3619 = vmatmul.msk.f32.gmra.mxu2 %vm889_vm1, %v846_v37  ;;  %v1344_v52 = vld [vmem:[#allocation8 + $0x108] sm:$0xff]  ;;  %v865_v62 = vld [vmem:[%s4706_s20 + $0xa0] sm:$0xff] }
  0x9f   : > { %1460 = vmatpush.msrb.mxu0 %v1334_v4  ;;  %1368 = vmatpush.msra.mxu3 %v1321_v6  ;;  %v866_v4 = vld [vmem:[%s4706_s20 + $0xa8] sm:$0xff] }
  0xa0   : > { %1547 = vmatpush.msra.mxu1 %v1352_v56 }
  0xa1   : > { %1369 = vmatpush.msra.mxu3 %v1320_v8  ;;  %1461 = vmatpush.msrb.mxu0 %v1333_v11  ;;  %v4855_v11 = vperm.slane %v4801_v30, 1 }
  0xa2   : > { %1548 = vmatpush.msra.mxu1 %v1351_v59  ;;  %v1343_v59 = vld [vmem:[#allocation8 + $0x100] sm:$0xff] }
  0xa3   : > { %3571 = vmatmul.msk.f32.gmra.mxu0 %vm889_vm1, %v848_v44  ;;  %3595 = vmatmul.msk.f32.gmra.mxu1 %vm889_vm1, %v847_v42 }
  0xa4   : > { %1549 = vmatpush.msra.mxu1 %v1350_v2  ;;  %1370 = vmatpush.msra.mxu3 %v1319_v9 }
  0xa5   : > { %1462 = vmatpush.msrb.mxu0 %v1332_v23 }
  0xa6   : > { %3620 = vmatmul.msk.f32.gmra.mxu2 %vm889_vm1, %v847_v42  ;;  %1550 = vmatpush.msra.mxu1 %v1349_v10  ;;  %v867_v10 = vld [vmem:[%s4706_s20 + $0xb0] sm:$0xff] }
  0xa7   : > { %1371 = vmatpush.msra.mxu3 %v1318_v12  ;;  %1463 = vmatpush.msrb.mxu0 %v1331_v27 }
  0xa8   : > { %1551 = vmatpush.msra.mxu1 %v1348_v21 }
  0xa9   : > { %1372 = vmatpush.msra.mxu3 %v1317_v13  ;;  %1464 = vmatpush.msrb.mxu0 %v1330_v31 }
  0xaa   : > { %1552 = vmatpush.msra.mxu1 %v1347_v25 }
  0xab   : > { %3572 = vmatmul.msk.f32.gmra.mxu0 %vm889_vm1, %v849_v51  ;;  %3596 = vmatmul.msk.f32.gmra.mxu1 %vm889_vm1, %v848_v44 }
  0xac   : > { %1373 = vmatpush.msra.mxu3 %v1316_v15  ;;  %1553 = vmatpush.msra.mxu1 %v1346_v32 }
  0xad   : > { %1465 = vmatpush.msrb.mxu0 %v1329_v39 }
  0xae   : > { %3621 = vmatmul.msk.f32.gmra.mxu2 %vm889_vm1, %v848_v44  ;;  %1374 = vmatpush.msra.mxu3 %v1315_v16 }
  0xaf   : > { %1554 = vmatpush.msra.mxu1 %v1345_v40 }
  0xb0   : > { %1375 = vmatpush.msra.mxu3 %v1314_v17 }
  0xb1   : > { %1555 = vmatpush.msra.mxu1 %v1344_v52 }
  0xb2   : > { %1376 = vmatpush.msra.mxu3 %v1313_v18 }
  0xb3   : > { %3573 = vmatmul.msk.f32.gmra.mxu0 %vm889_vm1, %v850_v53  ;;  %3597 = vmatmul.msk.f32.gmra.mxu1 %vm889_vm1, %v849_v51 }
  0xb4   : > { %1377 = vmatpush.msra.mxu3 %v1312_v20  ;;  %1556 = vmatpush.msra.mxu1 %v1343_v59 }
  0xb6   : > { %3622 = vmatmul.msk.f32.gmra.mxu2 %vm889_vm1, %v849_v51  ;;  %1378 = vmatpush.msra.mxu3 %v1311_v22  ;;  %v1328_v51 = vld [vmem:[#allocation8 + $0x88] sm:$0xff]  ;;  %v4871_v22 = vperm.slane %v4801_v30, 2 }
  0xb7   : > { %1466 = vmatpush.msrb.mxu0 %v1328_v51 }
  0xb9   : > { %1467 = vmatpush.msrb.mxu0 %v1327_v57 }
  0xbb   : > { %3574 = vmatmul.msk.f32.gmra.mxu0 %vm889_vm1, %v851_v55  ;;  %3598 = vmatmul.msk.f32.gmra.mxu1 %vm889_vm1, %v850_v53 }
  0xbe   : > { %3623 = vmatmul.msk.f32.gmra.mxu2 %vm889_vm1, %v850_v53 }
  0xc3   : > { %3575 = vmatmul.msk.f32.gmra.mxu0 %vm889_vm1, %v852_v58  ;;  %3599 = vmatmul.msk.f32.gmra.mxu1 %vm889_vm1, %v851_v55 }
  0xc6   : > { %3624 = vmatmul.msk.f32.gmra.mxu2 %vm889_vm1, %v851_v55  ;;  %v864_v55 = vld [vmem:[%s4706_s20 + $0x98] sm:$0xff] }
  0xcb   : > { %3576 = vmatmul.msk.f32.gmra.mxu0 %vm889_vm1, %v853_v61  ;;  %3600 = vmatmul.msk.f32.gmra.mxu1 %vm889_vm1, %v852_v58 }
  0xce   : > { %3625 = vmatmul.msk.f32.gmra.mxu2 %vm889_vm1, %v852_v58 }
  0xd3   : > { %3577 = vmatmul.msk.f32.gmra.mxu0 %vm889_vm1, %v854_v1  ;;  %3601 = vmatmul.msk.f32.gmra.mxu1 %vm889_vm1, %v853_v61 }
  0xd6   : > { %3626 = vmatmul.msk.f32.gmra.mxu2 %vm889_vm1, %v853_v61 }
  0xdb   : > { %3578 = vmatmul.msk.f32.gmra.mxu0 %vm889_vm1, %v855_v7  ;;  %3602 = vmatmul.msk.f32.gmra.mxu1 %vm889_vm1, %v854_v1 }
  0xde   : > { %3627 = vmatmul.msk.f32.gmra.mxu2 %vm889_vm1, %v854_v1 }
  0xe3   : > { %3579 = vmatmul.msk.f32.gmra.mxu0 %vm889_vm1, %v856_v14  ;;  %3603 = vmatmul.msk.f32.gmra.mxu1 %vm889_vm1, %v855_v7 }
  0xe6   : > { %3628 = vmatmul.msk.f32.gmra.mxu2 %vm889_vm1, %v855_v7 }
  0xeb   : > { %3580 = vmatmul.msk.f32.gmra.mxu0 %vm889_vm1, %v857_v19  ;;  %3604 = vmatmul.msk.f32.gmra.mxu1 %vm889_vm1, %v856_v14 }
  0xee   : > { %3629 = vmatmul.msk.f32.gmra.mxu2 %vm889_vm1, %v856_v14 }
  0xf3   : > { %3581 = vmatmul.msk.f32.gmra.mxu0 %vm889_vm1, %v858_v24  ;;  %3605 = vmatmul.msk.f32.gmra.mxu1 %vm889_vm1, %v857_v19 }
  0xf6   : > { %3630 = vmatmul.msk.f32.gmra.mxu2 %vm889_vm1, %v857_v19 }
  0xfb   : > { %3582 = vmatmul.msk.f32.gmra.mxu0 %vm889_vm1, %v859_v26  ;;  %3606 = vmatmul.msk.f32.gmra.mxu1 %vm889_vm1, %v858_v24 }
  0xfe   : > { %3631 = vmatmul.msk.f32.gmra.mxu2 %vm889_vm1, %v858_v24 }
 0x103   : > { %3583 = vmatmul.msk.f32.gmra.mxu0 %vm889_vm1, %v860_v28  ;;  %3607 = vmatmul.msk.f32.gmra.mxu1 %vm889_vm1, %v859_v26 }
 0x106   : > { %3632 = vmatmul.msk.f32.gmra.mxu2 %vm889_vm1, %v859_v26 }
 0x108   : > { %v989_v34 = vpop.f32.mrf.mxu0  ;;  %v4809_v35 = vpop.f32.mrf.mxu1 }
 0x109   : > { %v990_v37 = vadd.f32 %v989_v34, %v4807_v33 }
 0x10b   : > { %3584 = vmatmul.msk.f32.gmra.mxu0 %vm889_vm1, %v861_v36  ;;  %3608 = vmatmul.msk.f32.gmra.mxu1 %vm889_vm1, %v860_v28  ;;  %v1239_v38 = vmax.f32 %v990_v37, 0.0 }
 0x10d   : > { %1379 = vmatmul.f32.vlgmr.msra.gmra.mxu3 %v1239_v38 }
 0x10e   : > { %3633 = vmatmul.msk.f32.gmra.mxu2 %vm889_vm1, %v860_v28 }
 0x110   : > { %v992_v41 = vpop.f32.mrf.mxu0  ;;  %v4816_v42 = vpop.f32.mrf.mxu1 }
 0x111   : > { %v993_v44 = vadd.f32 %v992_v41, %v4807_v33  ;;  %v1079_v14 = vadd.f32 %v4816_v42, %v4855_v11 }
 0x113   : > { %3585 = vmatmul.msk.f32.gmra.mxu0 %vm889_vm1, %v862_v43  ;;  %3609 = vmatmul.msk.f32.gmra.mxu1 %vm889_vm1, %v861_v36  ;;  %v1242_v45 = vmax.f32 %v993_v44, 0.0  ;;  %v1240_v18 = vmax.f32 %v1079_v14, 0.0 }
 0x115   : > { %1382 = vmatmul.f32.gmra.mxu3 %v1242_v45 }
 0x116   : > { %3634 = vmatmul.msk.f32.gmra.mxu2 %vm889_vm1, %v861_v36 }
 0x118   : > { %v995_v46 = vpop.f32.mrf.mxu0  ;;  %v4823_v47 = vpop.f32.mrf.mxu1 }
 0x119   : > { %v996_v49 = vadd.f32 %v995_v46, %v4807_v33  ;;  %v1167_v1 = vpop.f32.mrf.mxu2  ;;  %v1082_v21 = vadd.f32 %v4823_v47, %v4855_v11 }
 0x11a   : > { %v1168_v31 = vadd.f32 %v1167_v1, %v4871_v22 }
 0x11b   : > { %3586 = vmatmul.msk.f32.gmra.mxu0 %vm889_vm1, %v863_v48  ;;  %3610 = vmatmul.msk.f32.gmra.mxu1 %vm889_vm1, %v862_v43  ;;  %v1245_v50 = vmax.f32 %v996_v49, 0.0  ;;  %v1243_v26 = vmax.f32 %v1082_v21, 0.0 }
 0x11c   : > { %v1241_v32 = vmax.f32 %v1168_v31, 0.0 }
 0x11d   : > { %1385 = vmatmul.f32.gmra.mxu3 %v1245_v50 }
 0x11e   : > { %3635 = vmatmul.msk.f32.gmra.mxu2 %vm889_vm1, %v862_v43 }
 0x120   : > { %v998_v53 = vpop.f32.mrf.mxu0  ;;  %v4830_v54 = vpop.f32.mrf.mxu1 }
 0x121   : > { %v999_v56 = vadd.f32 %v998_v53, %v4807_v33  ;;  %v1170_v7 = vpop.f32.mrf.mxu2  ;;  %v1085_v30 = vadd.f32 %v4830_v54, %v4855_v11 }
 0x122   : > { %v1171_v41 = vadd.f32 %v1170_v7, %v4871_v22 }
 0x123   : > { %3587 = vmatmul.msk.f32.gmra.mxu0 %vm889_vm1, %v864_v55  ;;  %3611 = vmatmul.msk.f32.gmra.mxu1 %vm889_vm1, %v863_v48  ;;  %v1248_v58 = vmax.f32 %v999_v56, 0.0  ;;  %v1246_v38 = vmax.f32 %v1085_v30, 0.0 }
 0x124   : > { %v1244_v43 = vmax.f32 %v1171_v41, 0.0 }
 0x125   : > { %1388 = vmatmul.f32.gmra.mxu3 %v1248_v58 }
 0x126   : > { %3636 = vmatmul.msk.f32.gmra.mxu2 %vm889_vm1, %v863_v48 }
 0x128   : > { %v1001_v60 = vpop.f32.mrf.mxu0  ;;  %v4837_v61 = vpop.f32.mrf.mxu1 }
 0x129   : > { %v1002_v63 = vadd.f32 %v1001_v60, %v4807_v33  ;;  %v1173_v15 = vpop.f32.mrf.mxu2  ;;  %v1088_v42 = vadd.f32 %v4837_v61, %v4855_v11 }
 0x12a   : > { %v1174_v50 = vadd.f32 %v1173_v15, %v4871_v22 }
 0x12b   : > { %3588 = vmatmul.msk.f32.gmra.mxu0 %vm889_vm1, %v865_v62  ;;  %3612 = vmatmul.msk.f32.gmra.mxu1 %vm889_vm1, %v864_v55  ;;  %v1251_v0 = vmax.f32 %v1002_v63, 0.0  ;;  %v1249_v47 = vmax.f32 %v1088_v42, 0.0 }
 0x12c   : > { %v1247_v52 = vmax.f32 %v1174_v50, 0.0 }
 0x12d   : > { %1391 = vmatmul.f32.gmra.mxu3 %v1251_v0 }
 0x12e   : > { %3637 = vmatmul.msk.f32.gmra.mxu2 %vm889_vm1, %v864_v55 }
 0x130   : > { %v1004_v2 = vpop.f32.mrf.mxu0  ;;  %v4844_v3 = vpop.f32.mrf.mxu1 }
 0x131   : > { %v1005_v5 = vadd.f32 %v1004_v2, %v4807_v33  ;;  %v1176_v23 = vpop.f32.mrf.mxu2  ;;  %v1091_v51 = vadd.f32 %v4844_v3, %v4855_v11 }
 0x132   : > { %v1177_v59 = vadd.f32 %v1176_v23, %v4871_v22 }
 0x133   : > { %3589 = vmatmul.msk.f32.gmra.mxu0 %vm889_vm1, %v866_v4  ;;  %3613 = vmatmul.msk.f32.gmra.mxu1 %vm889_vm1, %v865_v62  ;;  %v1254_v6 = vmax.f32 %v1005_v5, 0.0  ;;  %v1252_v56 = vmax.f32 %v1091_v51, 0.0 }
 0x134   : > { %v1250_v61 = vmax.f32 %v1177_v59, 0.0 }
 0x135   : > { %1394 = vmatmul.f32.gmra.mxu3 %v1254_v6 }
 0x136   : > { %3638 = vmatmul.msk.f32.gmra.mxu2 %vm889_vm1, %v865_v62 }
 0x138   : > { %v1007_v8 = vpop.f32.mrf.mxu0  ;;  %v4851_v9 = vpop.f32.mrf.mxu1 }
 0x139   : > { %v1008_v12 = vadd.f32 %v1007_v8, %v4807_v33  ;;  %v1179_v34 = vpop.f32.mrf.mxu2  ;;  %v1094_v60 = vadd.f32 %v4851_v9, %v4855_v11 }
 0x13b   : > { %3590 = vmatmul.msk.f32.gmra.mxu0 %vm889_vm1, %v867_v10  ;;  %3614 = vmatmul.msk.f32.gmra.mxu1 %vm889_vm1, %v866_v4  ;;  %v1257_v13 = vmax.f32 %v1008_v12, 0.0  ;;  %v1255_v1 = vmax.f32 %v1094_v60, 0.0 }
 0x13d   : > { %1397 = vmatmul.f32.gmra.mxu3 %v1257_v13 }
 0x13e   : > { %3639 = vmatmul.msk.f32.gmra.mxu2 %vm889_vm1, %v866_v4  ;;  %v1180_v4 = vadd.f32 %v1179_v34, %v4871_v22 }
 0x140   : > { %v1010_v16 = vpop.f32.mrf.mxu0  ;;  %v4863_v17 = vpop.f32.mrf.mxu1  ;;  %v1253_v5 = vmax.f32 %v1180_v4, 0.0 }
 0x141   : > { %v1011_v19 = vadd.f32 %v1010_v16, %v4807_v33  ;;  %v1182_v44 = vpop.f32.mrf.mxu2 }
 0x142   : > { %v1183_v13 = vadd.f32 %v1182_v44, %v4871_v22 }
 0x143   : > { %3615 = vmatmul.msk.f32.gmra.mxu1 %vm889_vm1, %v867_v10  ;;  %1468 = vmatmul.f32.vlgmr.msrb.gmra.mxu0 %v1240_v18  ;;  %v1260_v20 = vmax.f32 %v1011_v19, 0.0 }
 0x144   : > { %v1256_v15 = vmax.f32 %v1183_v13, 0.0 }
 0x145   : > { %1400 = vmatmul.f32.gmra.mxu3 %v1260_v20 }
 0x146   : > { %3640 = vmatmul.msk.f32.gmra.mxu2 %vm889_vm1, %v867_v10 }
 0x148   : > { %v1013_v24 = vpop.f32.mrf.mxu0  ;;  %v4873_v25 = vpop.f32.mrf.mxu1 }
 0x149   : > { %v1014_v27 = vadd.f32 %v1013_v24, %v4807_v33  ;;  %v1185_v53 = vpop.f32.mrf.mxu2  ;;  %v1100_v14 = vadd.f32 %v4873_v25, %v4855_v11 }
 0x14a   : > { %v1186_v23 = vadd.f32 %v1185_v53, %v4871_v22 }
 0x14b   : > { %3616 = vmatmul.msk.f32.gmra.mxu1 %vm889_vm1, %v4740_v29  ;;  %1471 = vmatmul.f32.gmra.mxu0 %v1243_v26  ;;  %v1263_v28 = vmax.f32 %v1014_v27, 0.0  ;;  %v1261_v19 = vmax.f32 %v1100_v14, 0.0 }
 0x14c   : > { %v1259_v26 = vmax.f32 %v1186_v23, 0.0 }
 0x14d   : > { %1403 = vmatmul.f32.gmra.mxu3 %v1263_v28 }
 0x14e   : > { %3641 = vmatmul.msk.f32.gmra.mxu2 %vm889_vm1, %v4740_v29  ;;  %v1097_v29 = vadd.f32 %v4863_v17, %v4855_v11 }
 0x150   : > { %v1016_v36 = vpop.f32.mrf.mxu0  ;;  %v4882_v37 = vpop.f32.mrf.mxu1  ;;  %v1258_v9 = vmax.f32 %v1097_v29, 0.0 }
 0x151   : > { %v1017_v39 = vadd.f32 %v1016_v36, %v4807_v33  ;;  %v1188_v62 = vpop.f32.mrf.mxu2  ;;  %v1103_v24 = vadd.f32 %v4882_v37, %v4855_v11 }
 0x152   : > { %v1189_v34 = vadd.f32 %v1188_v62, %v4871_v22 }
 0x153   : > { %1474 = vmatmul.f32.gmra.mxu0 %v1246_v38  ;;  %1557 = vmatmul.f32.vlgmr.msra.gmra.mxu1 %v1241_v32  ;;  %v1266_v40 = vmax.f32 %v1017_v39, 0.0  ;;  %v1264_v31 = vmax.f32 %v1103_v24, 0.0 }
 0x154   : > { %v1262_v38 = vmax.f32 %v1189_v34, 0.0 }
 0x155   : > { %1406 = vmatmul.f32.gmra.mxu3 %v1266_v40 }
 0x158   : > { %v1019_v45 = vpop.f32.mrf.mxu0  ;;  %v4889_v46 = vpop.f32.mrf.mxu1 }
 0x159   : > { %v1020_v48 = vadd.f32 %v1019_v45, %v4807_v33  ;;  %v1191_v6 = vpop.f32.mrf.mxu2  ;;  %v1106_v36 = vadd.f32 %v4889_v46, %v4855_v11 }
 0x15a   : > { %v1192_v44 = vadd.f32 %v1191_v6, %v4871_v22 }
 0x15b   : > { %1477 = vmatmul.f32.gmra.mxu0 %v1249_v47  ;;  %1560 = vmatmul.f32.gmra.mxu1 %v1244_v43  ;;  %v1269_v49 = vmax.f32 %v1020_v48, 0.0  ;;  %v1267_v41 = vmax.f32 %v1106_v36, 0.0 }
 0x15c   : > { %v1265_v47 = vmax.f32 %v1192_v44, 0.0 }
 0x15d   : > { %1409 = vmatmul.f32.gmra.mxu3 %v1269_v49 }
 0x160   : > { %v1022_v54 = vpop.f32.mrf.mxu0  ;;  %v4896_v55 = vpop.f32.mrf.mxu1 }
 0x161   : > { %v1023_v57 = vadd.f32 %v1022_v54, %v4807_v33  ;;  %v1194_v16 = vpop.f32.mrf.mxu2  ;;  %v1109_v45 = vadd.f32 %v4896_v55, %v4855_v11 }
 0x162   : > { %v1195_v53 = vadd.f32 %v1194_v16, %v4871_v22 }
 0x163   : > { %1480 = vmatmul.f32.gmra.mxu0 %v1252_v56  ;;  %1563 = vmatmul.f32.gmra.mxu1 %v1247_v52  ;;  %v1272_v58 = vmax.f32 %v1023_v57, 0.0  ;;  %v1270_v49 = vmax.f32 %v1109_v45, 0.0 }
 0x164   : > { %v1268_v56 = vmax.f32 %v1195_v53, 0.0 }
 0x165   : > { %1412 = vmatmul.f32.gmra.mxu3 %v1272_v58 }
 0x168   : > { %v1025_v63 = vpop.f32.mrf.mxu0  ;;  %v4904_v0 = vpop.f32.mrf.mxu1 }
 0x169   : > { %v1026_v2 = vadd.f32 %v1025_v63, %v4807_v33  ;;  %v1197_v25 = vpop.f32.mrf.mxu2  ;;  %v1112_v54 = vadd.f32 %v4904_v0, %v4855_v11 }
 0x16a   : > { %v1198_v62 = vadd.f32 %v1197_v25, %v4871_v22 }
 0x16b   : > { %1483 = vmatmul.f32.gmra.mxu0 %v1255_v1  ;;  %1566 = vmatmul.f32.gmra.mxu1 %v1250_v61  ;;  %v1275_v3 = vmax.f32 %v1026_v2, 0.0  ;;  %v1273_v58 = vmax.f32 %v1112_v54, 0.0 }
 0x16c   : > { %v1271_v0 = vmax.f32 %v1198_v62, 0.0 }
 0x16d   : > { %1415 = vmatmul.f32.gmra.mxu3 %v1275_v3 }
 0x170   : > { %v1028_v7 = vpop.f32.mrf.mxu0  ;;  %v4910_v8 = vpop.f32.mrf.mxu1 }
 0x171   : > { %v1029_v10 = vadd.f32 %v1028_v7, %v4807_v33  ;;  %v1200_v37 = vpop.f32.mrf.mxu2  ;;  %v1115_v1 = vadd.f32 %v4910_v8, %v4855_v11  ;;  %v1875_v7 = vld [vmem:[#allocation14 + $0x168] sm:$0xff] }
 0x172   : > { %v1201_v6 = vadd.f32 %v1200_v37, %v4871_v22  ;;  %1893 = vmatpush.msrb.mxu2 %v1875_v7 }
 0x173   : > { %1486 = vmatmul.f32.gmra.mxu0 %v1258_v9  ;;  %1569 = vmatmul.f32.gmra.mxu1 %v1253_v5  ;;  %v1278_v12 = vmax.f32 %v1029_v10, 0.0  ;;  %v1276_v4 = vmax.f32 %v1115_v1, 0.0 }
 0x175   : > { %1418 = vmatmul.f32.gmra.mxu3 %v1278_v12  ;;  %v1274_v12 = vmax.f32 %v1201_v6, 0.0 }
 0x178   : > { %v1031_v17 = vpop.f32.mrf.mxu0  ;;  %v4916_v18 = vpop.f32.mrf.mxu1 }
 0x179   : > { %v1032_v20 = vadd.f32 %v1031_v17, %v4807_v33  ;;  %v1203_v51 = vpop.f32.mrf.mxu2  ;;  %v1118_v9 = vadd.f32 %v4916_v18, %v4855_v11 }
 0x17b   : > { %1489 = vmatmul.f32.gmra.mxu0 %v1261_v19  ;;  %1572 = vmatmul.f32.gmra.mxu1 %v1256_v15  ;;  %v1281_v21 = vmax.f32 %v1032_v20, 0.0  ;;  %v1279_v15 = vmax.f32 %v1118_v9, 0.0  ;;  %v1204_v19 = vadd.f32 %v1203_v51, %v4871_v22  ;;  %v1877_v20 = vld [vmem:[#allocation14 + $0x178] sm:$0xff] }
 0x17c   : > { %1939 = vmatpush.msrb.mxu3 %v1877_v20 }
 0x17d   : > { %1421 = vmatmul.f32.gmra.mxu3 %v1281_v21  ;;  %v1277_v23 = vmax.f32 %v1204_v19, 0.0 }
 0x180   : > { %v1034_v27 = vpop.f32.mrf.mxu0  ;;  %v4922_v28 = vpop.f32.mrf.mxu1 }
 0x181   : > { %v1035_v30 = vadd.f32 %v1034_v27, %v4807_v33  ;;  %v1206_v63 = vpop.f32.mrf.mxu2  ;;  %v1121_v18 = vadd.f32 %v4922_v28, %v4855_v11 }
 0x183   : > { %1492 = vmatmul.f32.gmra.mxu0 %v1264_v31  ;;  %1575 = vmatmul.f32.gmra.mxu1 %v1259_v26  ;;  %v1284_v32 = vmax.f32 %v1035_v30, 0.0  ;;  %v1282_v27 = vmax.f32 %v1121_v18, 0.0 }
 0x185   : > { %1424 = vmatmul.f32.gmra.mxu3 %v1284_v32  ;;  %v1207_v32 = vadd.f32 %v1206_v63, %v4871_v22 }
 0x187   : > { %v1280_v28 = vmax.f32 %v1207_v32, 0.0 }
 0x188   : > { %v1037_v39 = vpop.f32.mrf.mxu0  ;;  %v4928_v40 = vpop.f32.mrf.mxu1 }
 0x189   : > { %v1038_v42 = vadd.f32 %v1037_v39, %v4807_v33  ;;  %v1209_v8 = vpop.f32.mrf.mxu2  ;;  %v1124_v34 = vadd.f32 %v4928_v40, %v4855_v11 }
 0x18a   : > { %v1210_v45 = vadd.f32 %v1209_v8, %v4871_v22 }
 0x18b   : > { %1495 = vmatmul.f32.gmra.mxu0 %v1267_v41  ;;  %1578 = vmatmul.f32.gmra.mxu1 %v1262_v38  ;;  %v1287_v43 = vmax.f32 %v1038_v42, 0.0  ;;  %v1285_v37 = vmax.f32 %v1124_v34, 0.0 }
 0x18d   : > { %1427 = vmatmul.f32.gmra.mxu3 %v1287_v43  ;;  %v1872_v43 = vld [vmem:[#allocation14 + $0x150] sm:$0xff] }
 0x18e   : > { %1894 = vmatpush.msrb.mxu2 %v1872_v43  ;;  %v1866_v43 = vld [vmem:[#allocation14 + $0x120] sm:$0xff] }
 0x190   : > { %v1040_v46 = vpop.f32.mrf.mxu0  ;;  %v4934_v48 = vpop.f32.mrf.mxu1 }
 0x191   : > { %v1041_v50 = vadd.f32 %v1040_v46, %v4807_v33  ;;  %v4943_v60 = vpop.f32.mrf.mxu3  ;;  %v1212_v24 = vpop.f32.mrf.mxu2  ;;  %v1127_v40 = vadd.f32 %v4934_v48, %v4855_v11  ;;  %v1283_v46 = vmax.f32 %v1210_v45, 0.0 }
 0x192   : > { %v1213_v54 = vadd.f32 %v1212_v24, %v4871_v22 }
 0x193   : > { %1498 = vmatmul.f32.gmra.mxu0 %v1270_v49  ;;  %1581 = vmatmul.f32.gmra.mxu1 %v1265_v47  ;;  %v1290_v52 = vmax.f32 %v1041_v50, 0.0  ;;  %v1059_v47 = vadd.f32 %v4809_v35, %v4807_v33  ;;  %v1288_v51 = vmax.f32 %v1127_v40, 0.0 }
 0x195   : > { %1430 = vmatmul.f32.gmra.mxu3 %v1290_v52  ;;  %v1308_v53 = vmax.f32 %v1059_v47, 0.0 }
 0x198   : > { %v1043_v55 = vpop.f32.mrf.mxu0  ;;  %v4940_v57 = vpop.f32.mrf.mxu1 }
 0x199   : > { %v1044_v59 = vadd.f32 %v1043_v55, %v4807_v33  ;;  %v4954_v10 = vpop.f32.mrf.mxu3  ;;  %v1215_v42 = vpop.f32.mrf.mxu2  ;;  %v1874_v55 = vld [vmem:[#allocation14 + $0x160] sm:$0xff]  ;;  %v1130_v48 = vadd.f32 %v4940_v57, %v4855_v11 }
 0x19a   : > { %1940 = vmatpush.msrb.mxu3 %v1874_v55 }
 0x19b   : > { %1501 = vmatmul.f32.gmra.mxu0 %v1273_v58  ;;  %1584 = vmatmul.f32.gmra.mxu1 %v1268_v56  ;;  %v1293_v61 = vmax.f32 %v1044_v59, 0.0  ;;  %v1291_v59 = vmax.f32 %v1130_v48, 0.0 }
 0x19d   : > { %1433 = vmatmul.f32.gmra.mxu3 %v1293_v61  ;;  %v1216_v61 = vadd.f32 %v1215_v42, %v4871_v22 }
 0x1a0   : > { %v1046_v2 = vpop.f32.mrf.mxu0  ;;  %v4948_v3 = vpop.f32.mrf.mxu1 }
 0x1a1   : > { %v1047_v29 = vadd.f32 %v1046_v2, %v4807_v33  ;;  %v4962_v21 = vpop.f32.mrf.mxu3  ;;  %v1218_v56 = vpop.f32.mrf.mxu2  ;;  %v1133_v62 = vadd.f32 %v4948_v3, %v4855_v11 }
 0x1a3   : > { %1504 = vmatmul.f32.gmra.mxu0 %v1276_v4  ;;  %1587 = vmatmul.f32.gmra.mxu1 %v1271_v0  ;;  %v1296_v5 = vmax.f32 %v1047_v29, 0.0  ;;  %v1289_v0 = vmax.f32 %v1216_v61, 0.0  ;;  %v1294_v4 = vmax.f32 %v1133_v62, 0.0  ;;  %v1869_v29 = vld [vmem:[#allocation14 + $0x138] sm:$0xff] }
 0x1a4   : > { %1895 = vmatpush.msrb.mxu2 %v1869_v29 }
 0x1a5   : > { %1436 = vmatmul.f32.gmra.mxu3 %v1296_v5  ;;  %v1219_v5 = vadd.f32 %v1218_v56, %v4871_v22 }
 0x1a6   : > { %1896 = vmatpush.msrb.mxu2 %v1866_v43 }
 0x1a7   : > { %v1292_v3 = vmax.f32 %v1219_v5, 0.0 }
 0x1a8   : > { %v1049_v13 = vpop.f32.mrf.mxu0  ;;  %v4956_v14 = vpop.f32.mrf.mxu1 }
 0x1a9   : > { %v1050_v16 = vadd.f32 %v1049_v13, %v4807_v33  ;;  %v4972_v39 = vpop.f32.mrf.mxu3  ;;  %v1221_v1 = vpop.f32.mrf.mxu2  ;;  %v1136_v6 = vadd.f32 %v4956_v14, %v4855_v11 }
 0x1ab   : > { %1507 = vmatmul.f32.gmra.mxu0 %v1279_v15  ;;  %1590 = vmatmul.f32.gmra.mxu1 %v1274_v12  ;;  %v1299_v17 = vmax.f32 %v1050_v16, 0.0  ;;  %v1297_v13 = vmax.f32 %v1136_v6, 0.0  ;;  %v5007_v15 = vld [vmem:[#allocation9] ss:$0 sm:$0xff]  ;;  %v1222_v16 = vadd.f32 %v1221_v1, %v4871_v22  ;;  %v1863_v6 = vld [vmem:[#allocation14 + $0x108] sm:$0xff] }
 0x1ac   : > { %v1387_v19 = vadd.f32 %v5007_v15, %v4962_v21  ;;  %v1390_v21 = vadd.f32 %v5007_v15, %v4972_v39  ;;  %1897 = vmatpush.msrb.mxu2 %v1863_v6  ;;  %v1856_v6 = vld [vmem:[#allocation14 + $0xd0] sm:$0xff] }
 0x1ad   : > { %1439 = vmatmul.f32.gmra.mxu3 %v1299_v17  ;;  %v1871_v17 = vld [vmem:[#allocation14 + $0x148] sm:$0xff]  ;;  %v1295_v18 = vmax.f32 %v1222_v16, 0.0 }
 0x1ae   : > { %1941 = vmatpush.msrb.mxu3 %v1871_v17 }
 0x1b0   : > { %v1052_v26 = vpop.f32.mrf.mxu0  ;;  %v4964_v25 = vpop.f32.mrf.mxu1 }
 0x1b1   : > { %v1053_v31 = vadd.f32 %v1052_v26, %v4807_v33  ;;  %v4984_v52 = vpop.f32.mrf.mxu3  ;;  %v1224_v9 = vpop.f32.mrf.mxu2  ;;  %v1139_v14 = vadd.f32 %v4964_v25, %v4855_v11 }
 0x1b2   : > { %v1225_v32 = vadd.f32 %v1224_v9, %v4871_v22 }
 0x1b3   : > { %1510 = vmatmul.f32.gmra.mxu0 %v1282_v27  ;;  %1593 = vmatmul.f32.gmra.mxu1 %v1277_v23  ;;  %v1302_v30 = vmax.f32 %v1053_v31, 0.0  ;;  %v1300_v26 = vmax.f32 %v1139_v14, 0.0  ;;  %v1865_v14 = vld [vmem:[#allocation14 + $0x118] sm:$0xff] }
 0x1b5   : > { %1442 = vmatmul.f32.gmra.mxu3 %v1302_v30 }
 0x1b8   : > { %v1055_v36 = vpop.f32.mrf.mxu0  ;;  %v4970_v38 = vpop.f32.mrf.mxu1 }
 0x1b9   : > { %v1056_v41 = vadd.f32 %v1055_v36, %v4807_v33  ;;  %v1286_v33 = vmax.f32 %v1213_v54, 0.0  ;;  %v4996_v63 = vpop.f32.mrf.mxu3  ;;  %v1227_v30 = vpop.f32.mrf.mxu2  ;;  %v1142_v25 = vadd.f32 %v4970_v38, %v4855_v11 }
 0x1ba   : > { %v1228_v45 = vadd.f32 %v1227_v30, %v4871_v22 }
 0x1bb   : > { %1513 = vmatmul.f32.gmra.mxu0 %v1285_v37  ;;  %1596 = vmatmul.f32.gmra.mxu1 %v1280_v28  ;;  %v1305_v44 = vmax.f32 %v1056_v41, 0.0  ;;  %v1298_v28 = vmax.f32 %v1225_v32, 0.0  ;;  %v1303_v41 = vmax.f32 %v1142_v25, 0.0 }
 0x1bc   : > { %v1301_v39 = vmax.f32 %v1228_v45, 0.0 }
 0x1bd   : > { %1445 = vmatmul.f32.gmra.mxu3 %v1305_v44 }
 0x1c0   : > { %v4980_v49 = vpop.f32.mrf.mxu1  ;;  %v4982_v50 = vpop.f32.mrf.mxu0 }
 0x1c1   : > { %v5003_v7 = vpop.f32.mrf.mxu3  ;;  %v1230_v40 = vpop.f32.mrf.mxu2  ;;  %v1145_v38 = vadd.f32 %v4980_v49, %v4855_v11 }
 0x1c2   : > { %v1231_v54 = vadd.f32 %v1230_v40, %v4871_v22  ;;  %v1399_v1 = vadd.f32 %v5007_v15, %v5003_v7 }
 0x1c3   : > { %1516 = vmatmul.f32.gmra.mxu0 %v1288_v51  ;;  %1599 = vmatmul.f32.gmra.mxu1 %v1283_v46  ;;  %v1306_v51 = vmax.f32 %v1145_v38, 0.0 }
 0x1c5   : > { %1448 = vmatmul.f32.gmra.mxu3 %v1308_v53  ;;  %v1868_v53 = vld [vmem:[#allocation14 + $0x130] sm:$0xff] }
 0x1c6   : > { %1942 = vmatpush.msrb.mxu3 %v1868_v53 }
 0x1c8   : > { %v4989_v35 = vpop.f32.mrf.mxu1  ;;  %v4991_v58 = vpop.f32.mrf.mxu0  ;;  %1943 = vmatpush.msrb.mxu3 %v1865_v14  ;;  %v1870_v14 = vld [vmem:[#allocation14 + $0x140] sm:$0xff] }
 0x1c9   : > { %v1401_v27 = vpop.f32.mrf.mxu3  ;;  %v1148_v56 = vadd.f32 %v4989_v35, %v4855_v11  ;;  %v1233_v48 = vpop.f32.mrf.mxu2 }
 0x1ca   : > { %v1234_v62 = vadd.f32 %v1233_v48, %v4871_v22  ;;  %v1402_v9 = vadd.f32 %v5007_v15, %v1401_v27  ;;  %v1860_v27 = vld [vmem:[#allocation14 + $0xf0] sm:$0xff]  ;;  %v1857_v48 = vld [vmem:[#allocation14 + $0xd8] sm:$0xff] }
 0x1cb   : > { %1519 = vmatmul.f32.gmra.mxu0 %v1291_v59  ;;  %1602 = vmatmul.f32.gmra.mxu1 %v1286_v33  ;;  %v1304_v33 = vmax.f32 %v1231_v54, 0.0  ;;  %v1309_v61 = vmax.f32 %v1148_v56, 0.0 }
 0x1cc   : > { %1898 = vmatpush.msrb.mxu2 %v1860_v27 }
 0x1ce   : > { %1899 = vmatpush.msrb.mxu2 %v1857_v48  ;;  %v1994_v48 = vld [vmem:[#allocation14 + $0x2c0] sm:$0xff] }
 0x1d0   : > { %v1475_v57 = vpop.f32.mrf.mxu0  ;;  %v4998_v2 = vpop.f32.mrf.mxu1 }
 0x1d1   : > { %v1476_v20 = vadd.f32 %v1475_v57, %v1387_v19  ;;  %v5029_v44 = vpop.f32.mrf.mxu3  ;;  %v1236_v29 = vpop.f32.mrf.mxu2 }
 0x1d3   : > { %1522 = vmatmul.f32.gmra.mxu0 %v1294_v4  ;;  %1605 = vmatmul.f32.gmra.mxu1 %v1289_v0  ;;  %v1307_v4 = vmax.f32 %v1234_v62, 0.0 }
 0x1d8   : > { %v1478_v8 = vpop.f32.mrf.mxu0  ;;  %v5005_v12 = vpop.f32.mrf.mxu1 }
 0x1d9   : > { %v1479_v34 = vadd.f32 %v1478_v8, %v1390_v21  ;;  %v5041_v55 = vpop.f32.mrf.mxu3 }
 0x1db   : > { %1525 = vmatmul.f32.gmra.mxu0 %v1297_v13  ;;  %1608 = vmatmul.f32.gmra.mxu1 %v1292_v3  ;;  %v1237_v3 = vadd.f32 %v1236_v29, %v4871_v22 }
 0x1dd   : > { %v1310_v8 = vmax.f32 %v1237_v3, 0.0 }
 0x1e0   : > { %v5014_v23 = vpop.f32.mrf.mxu0  ;;  %v1564_v24 = vpop.f32.mrf.mxu1 }
 0x1e1   : > { %v5016_v31 = vadd.f32 %v1564_v24, %v1476_v20  ;;  %v1410_v0 = vpop.f32.mrf.mxu3 }
 0x1e2   : > { %v1411_v30 = vadd.f32 %v5007_v15, %v1410_v0 }
 0x1e3   : > { %1528 = vmatmul.f32.gmra.mxu0 %v1300_v26  ;;  %1611 = vmatmul.f32.gmra.mxu1 %v1295_v18 }
 0x1e4   : > { %1658 = vrot.lane.b32.xlu0 %v5016_v31, %s4418_s19 }
 0x1e8   : > { %v5025_v36 = vpop.f32.mrf.mxu0  ;;  %v1567_v37 = vpop.f32.mrf.mxu1 }
 0x1e9   : > { %v5027_v42 = vadd.f32 %v1567_v37, %v1479_v34  ;;  %v1413_v17 = vpop.f32.mrf.mxu3  ;;  %v1862_v37 = vld [vmem:[#allocation14 + $0x100] sm:$0xff] }
 0x1ea   : > { %1944 = vmatpush.msrb.mxu3 %v1862_v37  ;;  %v1858_v37 = vld [vmem:[#allocation14 + $0xe0] sm:$0xff] }
 0x1eb   : > { %1531 = vmatmul.f32.gmra.mxu0 %v1303_v41  ;;  %1614 = vmatmul.f32.gmra.mxu1 %v1298_v28  ;;  %v1414_v41 = vadd.f32 %v5007_v15, %v1413_v17  ;;  %v1873_v17 = vld [vmem:[#allocation14 + $0x158] sm:$0xff] }
 0x1ec   : > { %1660 = vrot.lane.b32.xlu0 %v5027_v42, %s4418_s19 }
 0x1f0   : > { %v1487_v47 = vpop.f32.mrf.mxu0  ;;  %v5036_v46 = vpop.f32.mrf.mxu1 }
 0x1f1   : > { %v1488_v57 = vadd.f32 %v1487_v47, %v1399_v1  ;;  %v1416_v22 = vpop.f32.mrf.mxu3 }
 0x1f2   : > { %v1417_v47 = vadd.f32 %v5007_v15, %v1416_v22  ;;  %v1867_v22 = vld [vmem:[#allocation14 + $0x128] sm:$0xff] }
 0x1f3   : > { %1534 = vmatmul.f32.gmra.mxu0 %v1306_v51  ;;  %1617 = vmatmul.f32.gmra.mxu1 %v1301_v39 }
 0x1f8   : > { %v1490_v59 = vpop.f32.mrf.mxu0  ;;  %v5043_v49 = vpop.f32.mrf.mxu1 }
 0x1f9   : > { %v1491_v7 = vadd.f32 %v1490_v59, %v1402_v9  ;;  %v1419_v32 = vpop.f32.mrf.mxu3  ;;  %v1876_v9 = vld [vmem:[#allocation14 + $0x170] sm:$0xff] }
 0x1fa   : > { %v1420_v59 = vadd.f32 %v5007_v15, %v1419_v32 }
 0x1fb   : > { %1537 = vmatmul.f32.gmra.mxu0 %v1309_v61  ;;  %1620 = vmatmul.f32.gmra.mxu1 %v1304_v33 }
 0x200   : > { %v5048_v11 = vpop.f32.mrf.mxu0  ;;  %v1576_v35 = vpop.f32.mrf.mxu1 }
 0x201   : > { %v5050_v5 = vadd.f32 %v1576_v35, %v1488_v57  ;;  %v1422_v43 = vpop.f32.mrf.mxu3  ;;  %v1859_v57 = vld [vmem:[#allocation14 + $0xe8] sm:$0xff]  ;;  %v1854_v35 = vld [vmem:[#allocation14 + $0xc0] sm:$0xff] }
 0x202   : > { %1945 = vmatpush.msrb.mxu3 %v1859_v57  ;;  %v1423_v29 = vadd.f32 %v5007_v15, %v1422_v43  ;;  %1900 = vmatpush.msrb.mxu2 %v1854_v35  ;;  %v1988_v57 = vld [vmem:[#allocation14 + $0x290] sm:$0xff]  ;;  %v1985_v35 = vld [vmem:[#allocation14 + $0x278] sm:$0xff] }
 0x203   : > { %1623 = vmatmul.f32.gmra.mxu1 %v1307_v4  ;;  %1666 = vrot.lane.b32.xlu1 %v5050_v5, %s4418_s19 }
 0x204   : > { %1946 = vmatpush.msrb.mxu3 %v1856_v6  ;;  %1916 = vmatpush.msra.mxu2 %v1876_v9  ;;  %v1982_v9 = vld [vmem:[#allocation14 + $0x260] sm:$0xff] }
 0x206   : > { %1917 = vmatpush.msra.mxu2 %v1873_v17  ;;  %v1979_v17 = vld [vmem:[#allocation14 + $0x248] sm:$0xff] }
 0x208   : > { %v5056_v13 = vpop.f32.mrf.mxu0  ;;  %v1579_v16 = vpop.f32.mrf.mxu1  ;;  %1918 = vmatpush.msra.mxu2 %v1870_v14 }
 0x209   : > { %v5058_v19 = vadd.f32 %v1579_v16, %v1491_v7  ;;  %v1425_v33 = vpop.f32.mrf.mxu3 }
 0x20a   : > { %1919 = vmatpush.msra.mxu2 %v1867_v22 }
 0x20b   : > { %1626 = vmatmul.f32.gmra.mxu1 %v1310_v8  ;;  %1668 = vrot.lane.b32.xlu1 %v5058_v19, %s4418_s19 }
 0x210   : > { %v1499_v20 = vpop.f32.mrf.mxu0  ;;  %v5062_v18 = vpop.f32.mrf.mxu1 }
 0x211   : > { %v1500_v21 = vadd.f32 %v1499_v20, %v1411_v30  ;;  %v1428_v4 = vpop.f32.mrf.mxu3  ;;  %v1426_v20 = vadd.f32 %v5007_v15, %v1425_v33  ;;  %v1864_v30 = vld [vmem:[#allocation14 + $0x110] sm:$0xff]  ;;  %v1991_v33 = vld [vmem:[#allocation14 + $0x2a8] sm:$0xff] }
 0x212   : > { %1920 = vmatpush.msra.mxu2 %v1864_v30  ;;  %v1429_v43 = vadd.f32 %v5007_v15, %v1428_v4 }
 0x218   : > { %v1502_v24 = vpop.f32.mrf.mxu0  ;;  %v5064_v26 = vpop.f32.mrf.mxu1 }
 0x219   : > { %v1503_v45 = vadd.f32 %v1502_v24, %v1414_v41  ;;  %v5088_v24 = vpop.f32.mrf.mxu3  ;;  %v1855_v41 = vld [vmem:[#allocation14 + $0xc8] sm:$0xff] }
 0x220   : > { %v1505_v25 = vpop.f32.mrf.mxu0  ;;  %v1588_v34 = vpop.f32.mrf.mxu1 }
 0x221   : > { %v5067_v28 = vadd.f32 %v1588_v34, %v1500_v21  ;;  %v1506_v51 = vadd.f32 %v1505_v25, %v1417_v47  ;;  %v1861_v34 = vld [vmem:[#allocation14 + $0xf8] sm:$0xff] }
 0x222   : > { %1921 = vmatpush.msra.mxu2 %v1861_v34  ;;  %v2122_v34 = vld [vmem:[#allocation14 + $0x468] sm:$0xff] }
 0x223   : > { %1674 = vrot.lane.b32.xlu2 %v5067_v28, %s4418_s19 }
 0x224   : > { %1922 = vmatpush.msra.mxu2 %v1858_v37 }
 0x226   : > { %1923 = vmatpush.msra.mxu2 %v1855_v41 }
 0x228   : > { %v1508_v40 = vpop.f32.mrf.mxu0  ;;  %v1591_v38 = vpop.f32.mrf.mxu1 }
 0x229   : > { %v5072_v39 = vadd.f32 %v1591_v38, %v1503_v45  ;;  %v1509_v61 = vadd.f32 %v1508_v40, %v1420_v59  ;;  %v2000_v40 = vld [vmem:[#allocation14 + $0x2f0] sm:$0xff]  ;;  %v1434_v38 = vpop.f32.mrf.mxu3  ;;  %v5099_v59 = vld [vmem:[#allocation11] ss:$0 sm:$0xff] }
 0x22a   : > { %2039 = vmatpush.msra.mxu3 %v2000_v40  ;;  %v1435_v14 = vadd.f32 %v5007_v15, %v1434_v38  ;;  %v2119_v40 = vld [vmem:[#allocation14 + $0x450] sm:$0xff] }
 0x22b   : > { %1676 = vrot.lane.b32.xlu2 %v5072_v39, %s4418_s19 }
 0x230   : > { %v1511_v53 = vpop.f32.mrf.mxu0  ;;  %v1594_v54 = vpop.f32.mrf.mxu1 }
 0x231   : > { %v5077_v56 = vadd.f32 %v1594_v54, %v1506_v51  ;;  %v1512_v3 = vadd.f32 %v1511_v53, %v1423_v29  ;;  %v1997_v53 = vld [vmem:[#allocation14 + $0x2d8] sm:$0xff]  ;;  %v1437_v6 = vpop.f32.mrf.mxu3 }
 0x232   : > { %2040 = vmatpush.msra.mxu3 %v1997_v53 }
 0x234   : > { %2041 = vmatpush.msra.mxu3 %v1994_v48 }
 0x236   : > { %2042 = vmatpush.msra.mxu3 %v1991_v33  ;;  %v1987_v33 = vld [vmem:[#allocation14 + $0x288] sm:$0xff] }
 0x238   : > { %v1514_v62 = vpop.f32.mrf.mxu0  ;;  %v1597_v1 = vpop.f32.mrf.mxu1  ;;  %2043 = vmatpush.msra.mxu3 %v1988_v57 }
 0x239   : > { %v5080_v0 = vadd.f32 %v1597_v1, %v1509_v61  ;;  %v1515_v27 = vadd.f32 %v1514_v62, %v1426_v20  ;;  %v5101_v62 = vld [vmem:[#allocation12] ss:$0 sm:$0xff]  ;;  %v1999_v20 = vld [vmem:[#allocation14 + $0x2e8] sm:$0xff]  ;;  %v5118_v53 = vpop.f32.mrf.mxu3 }
 0x23a   : > { %2044 = vmatpush.msra.mxu3 %v1985_v35  ;;  %v2110_v35 = vld [vmem:[#allocation14 + $0x408] sm:$0xff] }
 0x23c   : > { %2045 = vmatpush.msra.mxu3 %v1982_v9 }
 0x23e   : > { %2046 = vmatpush.msra.mxu3 %v1979_v17  ;;  %v1978_v17 = vld [vmem:[#allocation14 + $0x240] sm:$0xff] }
 0x240   : > { %v1517_v7 = vpop.f32.mrf.mxu0  ;;  %v1600_v8 = vpop.f32.mrf.mxu1 }
 0x241   : > { %v5083_v16 = vadd.f32 %v1600_v8, %v1512_v3  ;;  %v1518_v45 = vadd.f32 %v1517_v7, %v1429_v43  ;;  %v1977_v8 = vld [vmem:[#allocation14 + $0x238] sm:$0xff] }
 0x242   : > { %2704 = vmatpush.msra.mxu0 %v1977_v8  ;;  %v2107_v8 = vld [vmem:[#allocation14 + $0x3f0] sm:$0xff] }
 0x243   : > { %1682 = vrot.lane.b32.xlu0 %v5083_v16, %s4418_s19 }
 0x248   : > { %v5090_v32 = vpop.f32.mrf.mxu0  ;;  %v1603_v21 = vpop.f32.mrf.mxu1 }
 0x249   : > { %v5092_v25 = vadd.f32 %v1603_v21, %v1515_v27  ;;  %v1996_v21 = vld [vmem:[#allocation14 + $0x2d0] sm:$0xff] }
 0x24b   : > { %1684 = vrot.lane.b32.xlu1 %v5092_v25, %s4418_s19 }
 0x250   : > { %v1606_v47 = vpop.f32.mrf.mxu1  ;;  %v1523_v54 = vpop.f32.mrf.mxu0 }
 0x251   : > { %v5097_v51 = vadd.f32 %v1606_v47, %v1518_v45  ;;  %v1524_v27 = vadd.f32 %v1523_v54, %v1435_v14  ;;  %v1993_v45 = vld [vmem:[#allocation14 + $0x2b8] sm:$0xff]  ;;  %v1438_v54 = vadd.f32 %v5007_v15, %v1437_v6  ;;  %v2098_v14 = vld [vmem:[#allocation14 + $0x3a8] sm:$0xff] }
 0x252   : > { %v2116_v47 = vld [vmem:[#allocation14 + $0x438] sm:$0xff]  ;;  %2733 = vmatpush.msrb.mxu1 %v2098_v14  ;;  %v2121_v14 = vld [vmem:[#allocation14 + $0x460] sm:$0xff] }
 0x253   : > { %v1981_v6 = vld [vmem:[#allocation14 + $0x258] sm:$0xff] }
 0x256   : > { %v1659_v61 = vpop.permute.xlu0 %1658 }
 0x257   : > { %v1728_v1 = vmax.f32 %v5016_v31, %v1659_v61  ;;  %v2113_v61 = vld [vmem:[#allocation14 + $0x420] sm:$0xff] }
 0x258   : > { %v5104_v4 = vpop.f32.mrf.mxu1  ;;  %v1526_v7 = vpop.f32.mrf.mxu0 }
 0x259   : > { %v1756_v29 = vmul.f32 %v5099_v59, %v1728_v1  ;;  %v1527_v57 = vadd.f32 %v1526_v7, %v1438_v54  ;;  %v2104_v7 = vld [vmem:[#allocation14 + $0x3d8] sm:$0xff] }
 0x25b   : > { %v1784_v3 = vadd.f32 %v5101_v62, %v1756_v29  ;;  %v1984_v29 = vld [vmem:[#allocation14 + $0x270] sm:$0xff] }
 0x25d   : > { %v1808_v31 = vmax.f32 %v1784_v3, 0.0 }
 0x25e   : > { %v1661_v22 = vpop.permute.xlu0 %1660 }
 0x25f   : > { %v1729_v30 = vmax.f32 %v5027_v42, %v1661_v22  ;;  %3642 = vmatmul.msk.f32.vlgmr.msrb.gmra.mxu2 %vm1878_vm2, %v1808_v31  ;;  %3646 = vmatmul.msk.f32.vlgmr.msrb.gmra.mxu3 %vm1878_vm2, %v1808_v31  ;;  %v1990_v42 = vld [vmem:[#allocation14 + $0x2a0] sm:$0xff]  ;;  %v1381_v22 = vadd.f32 %v5007_v15, %v4943_v60 }
 0x260   : > { %v1612_v37 = vpop.f32.mrf.mxu1  ;;  %2016 = vmatpush.msrb.mxu2 %v1999_v20  ;;  %2139 = vmatpush.msrb.mxu3 %v2122_v34  ;;  %v5121_v1 = vpop.f32.mrf.mxu0  ;;  %v2101_v20 = vld [vmem:[#allocation14 + $0x3c0] sm:$0xff] }
 0x261   : > { %v1757_v41 = vmul.f32 %v5099_v59, %v1729_v30  ;;  %v5113_v43 = vadd.f32 %v1612_v37, %v1524_v27  ;;  %v2001_v27 = vld [vmem:[#allocation14 + $0x2f8] sm:$0xff]  ;;  %v5131_v30 = vpop.f32.mrf.mxu3  ;;  %v1998_v34 = vld [vmem:[#allocation14 + $0x2e0] sm:$0xff] }
 0x262   : > { %2017 = vmatpush.msrb.mxu2 %v1996_v21  ;;  %2140 = vmatpush.msrb.mxu3 %v2119_v40  ;;  %v1470_v21 = vadd.f32 %v4982_v50, %v1381_v22  ;;  %v1974_v37 = vld [vmem:[#allocation14 + $0x220] sm:$0xff]  ;;  %v1995_v40 = vld [vmem:[#allocation14 + $0x2c8] sm:$0xff]  ;;  %v1396_v50 = vadd.f32 %v5007_v15, %v4996_v63  ;;  %v2120_v22 = vld [vmem:[#allocation14 + $0x458] sm:$0xff] }
 0x263   : > { %v1785_v38 = vadd.f32 %v5101_v62, %v1757_v41  ;;  %1690 = vrot.lane.b32.xlu2 %v5113_v43, %s4418_s19  ;;  %2705 = vmatpush.msra.mxu0 %v1974_v37  ;;  %v1983_v63 = vld [vmem:[#allocation14 + $0x268] sm:$0xff] }
 0x264   : > { %2018 = vmatpush.msrb.mxu2 %v1993_v45  ;;  %2141 = vmatpush.msrb.mxu3 %v2116_v47  ;;  %v5140_v60 = vadd.f32 %v4998_v2, %v1470_v21  ;;  %v1485_v54 = vadd.f32 %v5025_v36, %v1396_v50  ;;  %v1986_v2 = vld [vmem:[#allocation14 + $0x280] sm:$0xff]  ;;  %v1980_v36 = vld [vmem:[#allocation14 + $0x250] sm:$0xff] }
 0x265   : > { %v1809_v48 = vmax.f32 %v1785_v38, 0.0  ;;  %v1992_v38 = vld [vmem:[#allocation14 + $0x2b0] sm:$0xff] }
 0x266   : > { %2019 = vmatpush.msrb.mxu2 %v1990_v42  ;;  %2142 = vmatpush.msrb.mxu3 %v2113_v61  ;;  %v1989_v42 = vld [vmem:[#allocation14 + $0x298] sm:$0xff] }
 0x267   : > { %3643 = vmatmul.msk.f32.gmra.mxu2 %vm1878_vm2, %v1809_v48  ;;  %3647 = vmatmul.msk.f32.gmra.mxu3 %vm1878_vm2, %v1809_v48 }
 0x268   : > { %v1615_v3 = vpop.f32.mrf.mxu1  ;;  %2020 = vmatpush.msrb.mxu2 %v1987_v33  ;;  %2143 = vmatpush.msrb.mxu3 %v2110_v35  ;;  %v5135_v41 = vpop.f32.mrf.mxu0 }
 0x269   : > { %v5125_v9 = vadd.f32 %v1615_v3, %v1527_v57  ;;  %v1446_v33 = vpop.f32.mrf.mxu3 }
 0x26a   : > { %2021 = vmatpush.msrb.mxu2 %v1984_v29  ;;  %2144 = vmatpush.msrb.mxu3 %v2107_v8  ;;  %v5153_v29 = vadd.f32 %v5043_v49, %v1485_v54 }
 0x26b   : > { %1692 = vrot.lane.b32.xlu0 %v5125_v9, %s4418_s19 }
 0x26c   : > { %2022 = vmatpush.msrb.mxu2 %v1981_v6  ;;  %2145 = vmatpush.msrb.mxu3 %v2104_v7  ;;  %v1447_v6 = vadd.f32 %v5007_v15, %v1446_v33  ;;  %v2123_v7 = vld [vmem:[#allocation14 + $0x470] sm:$0xff]  ;;  %v1384_v33 = vadd.f32 %v5007_v15, %v4954_v10  ;;  %v2108_v10 = vld [vmem:[#allocation14 + $0x3f8] sm:$0xff] }
 0x26e   : > { %2023 = vmatpush.msrb.mxu2 %v1978_v17  ;;  %2146 = vmatpush.msrb.mxu3 %v2101_v20 }
 0x26f   : > { %3644 = vmatmul.msk.f32.vlgmr.msra.gmra.mxu2 %vm1878_vm2, %v1808_v31 }
 0x270   : > { %v5137_v45 = vpop.f32.mrf.mxu1  ;;  %2062 = vmatpush.msra.mxu2 %v2001_v27  ;;  %v1535_v35 = vpop.f32.mrf.mxu0  ;;  %v2095_v27 = vld [vmem:[#allocation14 + $0x390] sm:$0xff] }
 0x271   : > { %v1536_v20 = vadd.f32 %v1535_v35, %v1447_v6  ;;  %2734 = vmatpush.msrb.mxu1 %v2095_v27  ;;  %v1449_v50 = vpop.f32.mrf.mxu3  ;;  %v2111_v35 = vld [vmem:[#allocation14 + $0x410] sm:$0xff]  ;;  %v2105_v27 = vld [vmem:[#allocation14 + $0x3e0] sm:$0xff] }
 0x272   : > { %2063 = vmatpush.msra.mxu2 %v1998_v34 }
 0x273   : > { %1654 = vrot.lane.b32.xlu0 %v5140_v60, %s4418_s19 }
 0x274   : > { %2064 = vmatpush.msra.mxu2 %v1995_v40  ;;  %v2117_v40 = vld [vmem:[#allocation14 + $0x440] sm:$0xff] }
 0x275   : > { %v1667_v31 = vpop.permute.xlu1 %1666 }
 0x276   : > { %v1732_v47 = vmax.f32 %v5050_v5, %v1667_v31  ;;  %2065 = vmatpush.msra.mxu2 %v1992_v38  ;;  %v2118_v38 = vld [vmem:[#allocation14 + $0x448] sm:$0xff] }
 0x277   : > { %3645 = vmatmul.msk.f32.gmra.mxu2 %vm1878_vm2, %v1809_v48  ;;  %v2124_v48 = vld [vmem:[#allocation14 + $0x478] sm:$0xff] }
 0x278   : > { %v1760_v61 = vmul.f32 %v5099_v59, %v1732_v47  ;;  %v5150_v57 = vpop.f32.mrf.mxu1  ;;  %2066 = vmatpush.msra.mxu2 %v1989_v42  ;;  %v1538_v42 = vpop.f32.mrf.mxu0 }
 0x27a   : > { %v1788_v3 = vadd.f32 %v5101_v62, %v1760_v61  ;;  %2067 = vmatpush.msra.mxu2 %v1986_v2  ;;  %v2115_v2 = vld [vmem:[#allocation14 + $0x430] sm:$0xff]  ;;  %v1450_v61 = vadd.f32 %v5007_v15, %v1449_v50 }
 0x27b   : > { %1664 = vrot.lane.b32.xlu0 %v5153_v29, %s4418_s19 }
 0x27c   : > { %v5158_v5 = vmax.f32 %v1788_v3, 0.0  ;;  %2068 = vmatpush.msra.mxu2 %v1983_v63  ;;  %v1432_v3 = vadd.f32 %v5007_v15, %v5088_v24  ;;  %v1539_v6 = vadd.f32 %v1538_v42, %v1450_v61  ;;  %v2242_v42 = vld [vmem:[#allocation14 + $0x5d0] sm:$0xff]  ;;  %v2233_v61 = vld [vmem:[#allocation14 + $0x588] sm:$0xff] }
 0x27d   : > { %v1675_v8 = vpop.permute.xlu2 %1674  ;;  %v1669_v17 = vpop.permute.xlu1 %1668 }
 0x27e   : > { %v1733_v49 = vmax.f32 %v5058_v19, %v1669_v17  ;;  %3650 = vmatmul.msk.f32.vlgmr.msra.gmra.mxu3 %vm1878_vm2, %v5158_v5  ;;  %2069 = vmatpush.msra.mxu2 %v1980_v36  ;;  %v1736_v21 = vmax.f32 %v5067_v28, %v1675_v8  ;;  %v2114_v28 = vld [vmem:[#allocation14 + $0x428] sm:$0xff]  ;;  %v2112_v36 = vld [vmem:[#allocation14 + $0x418] sm:$0xff]  ;;  %v1521_v17 = vadd.f32 %v5090_v32, %v1432_v3  ;;  %v2230_v3 = vld [vmem:[#allocation14 + $0x570] sm:$0xff] }
 0x27f   : > { %3648 = vmatmul.msk.f32.vlgmr.msrb.gmra.mxu2 %vm1878_vm2, %v5158_v5  ;;  %2185 = vmatpush.msra.mxu3 %v2124_v48  ;;  %v1473_v48 = vadd.f32 %v4991_v58, %v1384_v33  ;;  %v1971_v8 = vld [vmem:[#allocation14 + $0x208] sm:$0xff] }
 0x280   : > { %v1761_v34 = vmul.f32 %v5099_v59, %v1733_v49  ;;  %v1624_v37 = vpop.f32.mrf.mxu1  ;;  %2162 = vmatpush.msrb.mxu2 %v2123_v7  ;;  %v1764_v47 = vmul.f32 %v5099_v59, %v1736_v21  ;;  %2706 = vmatpush.msra.mxu0 %v1971_v8  ;;  %v1405_v21 = vadd.f32 %v5007_v15, %v5029_v44 }
 0x281   : > { %v5168_v19 = vadd.f32 %v1624_v37, %v1536_v20  ;;  %2186 = vmatpush.msra.mxu3 %v2121_v14  ;;  %v5192_v14 = vadd.f32 %v5005_v12, %v1473_v48  ;;  %v2109_v20 = vld [vmem:[#allocation14 + $0x400] sm:$0xff]  ;;  %v2106_v12 = vld [vmem:[#allocation14 + $0x3e8] sm:$0xff]  ;;  %v2103_v37 = vld [vmem:[#allocation14 + $0x3d0] sm:$0xff] }
 0x282   : > { %v1789_v31 = vadd.f32 %v5101_v62, %v1761_v34  ;;  %2163 = vmatpush.msrb.mxu2 %v2120_v22  ;;  %v1792_v7 = vadd.f32 %v5101_v62, %v1764_v47  ;;  %v5197_v22 = vadd.f32 %v5104_v4, %v1521_v17  ;;  %v1393_v4 = vadd.f32 %v5007_v15, %v4984_v52  ;;  %v2102_v34 = vld [vmem:[#allocation14 + $0x3c8] sm:$0xff]  ;;  %v2236_v47 = vld [vmem:[#allocation14 + $0x5a0] sm:$0xff] }
 0x283   : > { %1698 = vrot.lane.b32.xlu1 %v5168_v19, %s4418_s19  ;;  %1678 = vrot.lane.b32.xlu0 %v5077_v56, %s4418_s19  ;;  %v1494_v50 = vadd.f32 %v5048_v11, %v1405_v21  ;;  %v2239_v11 = vld [vmem:[#allocation14 + $0x5b8] sm:$0xff]  ;;  %v2228_v48 = vld [vmem:[#allocation14 + $0x560] sm:$0xff]  ;;  %v2225_v17 = vld [vmem:[#allocation14 + $0x548] sm:$0xff] }
 0x284   : > { %v5176_v54 = vmax.f32 %v1789_v31, 0.0  ;;  %2164 = vmatpush.msrb.mxu2 %v2117_v40  ;;  %2187 = vmatpush.msra.mxu3 %v2118_v38  ;;  %v2245_v40 = vld [vmem:[#allocation14 + $0x5e8] sm:$0xff]  ;;  %v1482_v38 = vadd.f32 %v5014_v23, %v1393_v4  ;;  %v2246_v31 = vld [vmem:[#allocation14 + $0x5f0] sm:$0xff]  ;;  %v2243_v23 = vld [vmem:[#allocation14 + $0x5d8] sm:$0xff] }
 0x285   : > { %v1677_v63 = vpop.permute.xlu2 %1676  ;;  %v2229_v21 = vld [vmem:[#allocation14 + $0x568] sm:$0xff] }
 0x286   : > { %3651 = vmatmul.msk.f32.gmra.mxu3 %vm1878_vm2, %v5176_v54  ;;  %2165 = vmatpush.msrb.mxu2 %v2114_v28  ;;  %v1737_v24 = vmax.f32 %v5072_v39, %v1677_v63  ;;  %v1816_v39 = vmax.f32 %v1792_v7, 0.0  ;;  %v5217_v44 = vadd.f32 %v5036_v46, %v1482_v38  ;;  %v5220_v28 = vadd.f32 %v5062_v18, %v1494_v50  ;;  %v2240_v46 = vld [vmem:[#allocation14 + $0x5c0] sm:$0xff]  ;;  %v2368_v7 = vld [vmem:[#allocation14 + $0x768] sm:$0xff] }
 0x287   : > { %3649 = vmatmul.msk.f32.gmra.mxu2 %vm1878_vm2, %v5176_v54  ;;  %2188 = vmatpush.msra.mxu3 %v2115_v2  ;;  %v1408_v18 = vadd.f32 %v5007_v15, %v5041_v55  ;;  %v2237_v2 = vld [vmem:[#allocation14 + $0x5a8] sm:$0xff]  ;;  %v2227_v55 = vld [vmem:[#allocation14 + $0x558] sm:$0xff] }
 0x288   : > { %v1627_v49 = vpop.f32.mrf.mxu1  ;;  %2166 = vmatpush.msrb.mxu2 %v2111_v35  ;;  %v1765_v32 = vmul.f32 %v5099_v59, %v1737_v24  ;;  %v2234_v35 = vld [vmem:[#allocation14 + $0x590] sm:$0xff] }
 0x289   : > { %v5194_v58 = vadd.f32 %v1627_v49, %v1539_v6  ;;  %2189 = vmatpush.msra.mxu3 %v2112_v36  ;;  %v1497_v33 = vadd.f32 %v5056_v13, %v1408_v18  ;;  %v2092_v13 = vld [vmem:[#allocation14 + $0x378] sm:$0xff]  ;;  %v1441_v36 = vadd.f32 %v5007_v15, %v5118_v53  ;;  %v2244_v53 = vld [vmem:[#allocation14 + $0x5e0] sm:$0xff]  ;;  %v1968_v24 = vld [vmem:[#allocation14 + $0x1f0] sm:$0xff] }
 0x28a   : > { %2167 = vmatpush.msrb.mxu2 %v2108_v10  ;;  %v1793_v52 = vadd.f32 %v5101_v62, %v1765_v32  ;;  %2735 = vmatpush.msrb.mxu1 %v2092_v13  ;;  %v2247_v10 = vld [vmem:[#allocation14 + $0x5f8] sm:$0xff]  ;;  %v2365_v49 = vld [vmem:[#allocation14 + $0x750] sm:$0xff] }
 0x28b   : > { %1700 = vrot.lane.b32.xlu2 %v5194_v58, %s4418_s19  ;;  %1656 = vrot.lane.b32.xlu1 %v5192_v14, %s4418_s19  ;;  %v5233_v63 = vadd.f32 %v5064_v26, %v1497_v33  ;;  %v2224_v26 = vld [vmem:[#allocation14 + $0x540] sm:$0xff]  ;;  %v1530_v6 = vadd.f32 %v5121_v1, %v1441_v36  ;;  %v2241_v1 = vld [vmem:[#allocation14 + $0x5c8] sm:$0xff]  ;;  %v2235_v32 = vld [vmem:[#allocation14 + $0x598] sm:$0xff] }
 0x28c   : > { %1688 = vrot.lane.b32.xlu0 %v5197_v22, %s4418_s19  ;;  %2190 = vmatpush.msra.mxu3 %v2109_v20  ;;  %v2238_v20 = vld [vmem:[#allocation14 + $0x5b0] sm:$0xff] }
 0x28d   : > { %2168 = vmatpush.msrb.mxu2 %v2105_v27  ;;  %v5245_v8 = vadd.f32 %v5137_v45, %v1530_v6  ;;  %v1444_v45 = vadd.f32 %v5007_v15, %v5131_v30  ;;  %2707 = vmatpush.msra.mxu0 %v1968_v24  ;;  %v2362_v27 = vld [vmem:[#allocation14 + $0x738] sm:$0xff]  ;;  %v2232_v15 = vld [vmem:[#allocation14 + $0x580] sm:$0xff]  ;;  %v2356_v30 = vld [vmem:[#allocation14 + $0x708] sm:$0xff] }
 0x28e   : > { %3654 = vmatmul.msk.f32.vlgmr.msrb.gmra.mxu3 %vm1878_vm2, %v1816_v39  ;;  %v2357_v36 = vld [vmem:[#allocation14 + $0x710] sm:$0xff]  ;;  %v2352_v24 = vld [vmem:[#allocation14 + $0x6e8] sm:$0xff] }
 0x28f   : > { %3652 = vmatmul.msk.f32.vlgmr.msra.gmra.mxu2 %vm1878_vm2, %v5158_v5  ;;  %2191 = vmatpush.msra.mxu3 %v2106_v12  ;;  %v1817_v5 = vmax.f32 %v1793_v52, 0.0  ;;  %v2359_v12 = vld [vmem:[#allocation14 + $0x720] sm:$0xff] }
 0x290   : > { %2169 = vmatpush.msrb.mxu2 %v2102_v34  ;;  %v2226_v34 = vld [vmem:[#allocation14 + $0x550] sm:$0xff] }
 0x291   : > { %2192 = vmatpush.msra.mxu3 %v2103_v37  ;;  %v2350_v37 = vld [vmem:[#allocation14 + $0x6d8] sm:$0xff] }
 0x292   : > { %2262 = vmatpush.msra.mxu2 %v2245_v40  ;;  %v2089_v40 = vld [vmem:[#allocation14 + $0x360] sm:$0xff] }
 0x293   : > { %2285 = vmatpush.msrb.mxu3 %v2246_v31  ;;  %1662 = vrot.lane.b32.xlu2 %v5217_v44, %s4418_s19  ;;  %v1965_v31 = vld [vmem:[#allocation14 + $0x1d8] sm:$0xff] }
 0x294   : > { %1670 = vrot.lane.b32.xlu1 %v5220_v28, %s4418_s19  ;;  %2263 = vmatpush.msra.mxu2 %v2242_v42 }
 0x295   : > { %2286 = vmatpush.msrb.mxu3 %v2243_v23  ;;  %2736 = vmatpush.msrb.mxu1 %v2089_v40  ;;  %v2479_v40 = vld [vmem:[#allocation14 + $0x888] sm:$0xff] }
 0x296   : > { %3655 = vmatmul.msk.f32.gmra.mxu3 %vm1878_vm2, %v1817_v5  ;;  %2264 = vmatpush.msra.mxu2 %v2239_v11  ;;  %v2369_v11 = vld [vmem:[#allocation14 + $0x770] sm:$0xff] }
 0x297   : > { %3653 = vmatmul.msk.f32.gmra.mxu2 %vm1878_vm2, %v5176_v54  ;;  %2287 = vmatpush.msrb.mxu3 %v2240_v46  ;;  %v2231_v54 = vld [vmem:[#allocation14 + $0x578] sm:$0xff] }
 0x298   : > { %2265 = vmatpush.msra.mxu2 %v2236_v47  ;;  %2708 = vmatpush.msra.mxu0 %v1965_v31  ;;  %v2366_v47 = vld [vmem:[#allocation14 + $0x758] sm:$0xff]  ;;  %v2218_v31 = vld [vmem:[#allocation14 + $0x510] sm:$0xff] }
 0x299   : > { %2288 = vmatpush.msrb.mxu3 %v2237_v2  ;;  %v2370_v2 = vld [vmem:[#allocation14 + $0x778] sm:$0xff] }
 0x29a   : > { %2266 = vmatpush.msra.mxu2 %v2233_v61  ;;  %v2363_v61 = vld [vmem:[#allocation14 + $0x740] sm:$0xff] }
 0x29b   : > { %1672 = vrot.lane.b32.xlu2 %v5233_v63, %s4418_s19  ;;  %2289 = vmatpush.msrb.mxu3 %v2234_v35  ;;  %v2367_v35 = vld [vmem:[#allocation14 + $0x760] sm:$0xff] }
 0x29c   : > { %1680 = vrot.lane.b32.xlu1 %v5080_v0, %s4418_s19  ;;  %2267 = vmatpush.msra.mxu2 %v2230_v3 }
 0x29d   : > { %2290 = vmatpush.msrb.mxu3 %v2231_v54 }
 0x29e   : > { %3658 = vmatmul.msk.f32.vlgmr.msra.gmra.mxu3 %vm1878_vm2, %v1816_v39  ;;  %2268 = vmatpush.msra.mxu2 %v2227_v55  ;;  %v2360_v55 = vld [vmem:[#allocation14 + $0x728] sm:$0xff] }
 0x29f   : > { %3656 = vmatmul.msk.f32.vlgmr.msrb.gmra.mxu2 %vm1878_vm2, %v1816_v39  ;;  %2291 = vmatpush.msrb.mxu3 %v2228_v48  ;;  %v1533_v39 = vadd.f32 %v5135_v41, %v1444_v45  ;;  %v2353_v41 = vld [vmem:[#allocation14 + $0x6f0] sm:$0xff]  ;;  %v2358_v48 = vld [vmem:[#allocation14 + $0x718] sm:$0xff] }
 0x2a0   : > { %2269 = vmatpush.msra.mxu2 %v2224_v26  ;;  %v2361_v26 = vld [vmem:[#allocation14 + $0x730] sm:$0xff] }
 0x2a1   : > { %2292 = vmatpush.msrb.mxu3 %v2225_v17  ;;  %v5257_v4 = vadd.f32 %v5150_v57, %v1533_v39  ;;  %v2347_v57 = vld [vmem:[#allocation14 + $0x6c0] sm:$0xff]  ;;  %v2492_v45 = vld [vmem:[#allocation14 + $0x8f0] sm:$0xff]  ;;  %v2489_v39 = vld [vmem:[#allocation14 + $0x8d8] sm:$0xff] }
 0x2a2   : > { %2308 = vmatpush.msrb.mxu2 %v2247_v10  ;;  %v2351_v10 = vld [vmem:[#allocation14 + $0x6e0] sm:$0xff] }
 0x2a3   : > { %1686 = vrot.lane.b32.xlu2 %v5097_v51, %s4418_s19  ;;  %2385 = vmatpush.msra.mxu3 %v2368_v7  ;;  %v2355_v17 = vld [vmem:[#allocation14 + $0x700] sm:$0xff] }
 0x2a4   : > { %1694 = vrot.lane.b32.xlu1 %v5245_v8, %s4418_s19  ;;  %2309 = vmatpush.msrb.mxu2 %v2244_v53  ;;  %v2348_v53 = vld [vmem:[#allocation14 + $0x6c8] sm:$0xff] }
 0x2a5   : > { %2386 = vmatpush.msra.mxu3 %v2365_v49  ;;  %v2349_v49 = vld [vmem:[#allocation14 + $0x6d0] sm:$0xff] }
 0x2a6   : > { %3659 = vmatmul.msk.f32.gmra.mxu3 %vm1878_vm2, %v1817_v5  ;;  %2310 = vmatpush.msrb.mxu2 %v2241_v1  ;;  %v2086_v1 = vld [vmem:[#allocation14 + $0x348] sm:$0xff] }
 0x2a7   : > { %3657 = vmatmul.msk.f32.gmra.mxu2 %vm1878_vm2, %v1817_v5  ;;  %2387 = vmatpush.msra.mxu3 %v2362_v27  ;;  %v1962_v27 = vld [vmem:[#allocation14 + $0x1c0] sm:$0xff] }
 0x2a8   : > { %2311 = vmatpush.msrb.mxu2 %v2238_v20  ;;  %2737 = vmatpush.msrb.mxu1 %v2086_v1  ;;  %v2491_v20 = vld [vmem:[#allocation14 + $0x8e8] sm:$0xff] }
 0x2a9   : > { %2388 = vmatpush.msra.mxu3 %v2359_v12  ;;  %2709 = vmatpush.msra.mxu0 %v1962_v27  ;;  %v2486_v12 = vld [vmem:[#allocation14 + $0x8c0] sm:$0xff]  ;;  %v1851_v1 = vld [vmem:[#allocation14 + $0xa8] sm:$0xff] }
 0x2aa   : > { %2312 = vmatpush.msrb.mxu2 %v2235_v32  ;;  %v2488_v32 = vld [vmem:[#allocation14 + $0x8d0] sm:$0xff] }
 0x2ab   : > { %1696 = vrot.lane.b32.xlu2 %v5257_v4, %s4418_s19  ;;  %2389 = vmatpush.msra.mxu3 %v2356_v30  ;;  %v1959_v30 = vld [vmem:[#allocation14 + $0x1a8] sm:$0xff] }
 0x2ac   : > { %2313 = vmatpush.msrb.mxu2 %v2232_v15  ;;  %v2485_v15 = vld [vmem:[#allocation14 + $0x8b8] sm:$0xff]  ;;  %2710 = vmatpush.msra.mxu0 %v1959_v30 }
 0x2ad   : > { %2390 = vmatpush.msra.mxu3 %v2353_v41  ;;  %v2483_v41 = vld [vmem:[#allocation14 + $0x8a8] sm:$0xff]  ;;  %v1845_v30 = vld [vmem:[#allocation14 + $0x78] sm:$0xff] }
 0x2ae   : > { %2314 = vmatpush.msrb.mxu2 %v2229_v21  ;;  %v1956_v21 = vld [vmem:[#allocation14 + $0x190] sm:$0xff] }
 0x2af   : > { %2391 = vmatpush.msra.mxu3 %v2350_v37  ;;  %2711 = vmatpush.msra.mxu0 %v1956_v21  ;;  %v2480_v37 = vld [vmem:[#allocation14 + $0x890] sm:$0xff] }
 0x2b0   : > { %2315 = vmatpush.msrb.mxu2 %v2226_v34  ;;  %v2482_v34 = vld [vmem:[#allocation14 + $0x8a0] sm:$0xff] }
 0x2b1   : > { %2392 = vmatpush.msra.mxu3 %v2347_v57  ;;  %v2221_v57 = vld [vmem:[#allocation14 + $0x528] sm:$0xff] }
 0x2b2   : > { %2808 = vmatpush.msrb.mxu0 %v2221_v57  ;;  %v2345_v57 = vld [vmem:[#allocation14 + $0x6b0] sm:$0xff] }
 0x2b4   : > { %2809 = vmatpush.msrb.mxu0 %v2218_v31  ;;  %v2213_v31 = vld [vmem:[#allocation14 + $0x4e8] sm:$0xff] }
 0x2b5   : > { %v1683_v38 = vpop.permute.xlu0 %1682 }
 0x2b6   : > { %v1740_v50 = vmax.f32 %v5083_v16, %v1683_v38  ;;  %v2477_v38 = vld [vmem:[#allocation14 + $0x878] sm:$0xff] }
 0x2b8   : > { %v1768_v52 = vmul.f32 %v5099_v59, %v1740_v50  ;;  %v2476_v50 = vld [vmem:[#allocation14 + $0x870] sm:$0xff] }
 0x2ba   : > { %v1796_v42 = vadd.f32 %v5101_v62, %v1768_v52  ;;  %v2474_v52 = vld [vmem:[#allocation14 + $0x860] sm:$0xff] }
 0x2bc   : > { %v1820_v23 = vmax.f32 %v1796_v42, 0.0  ;;  %v2473_v42 = vld [vmem:[#allocation14 + $0x858] sm:$0xff] }
 0x2bd   : > { %v1691_v5 = vpop.permute.xlu2 %1690  ;;  %v1685_v46 = vpop.permute.xlu1 %1684 }
 0x2be   : > { %v1741_v18 = vmax.f32 %v5092_v25, %v1685_v46  ;;  %3660 = vmatmul.msk.f32.vlgmr.msra.gmra.mxu2 %vm1878_vm2, %v1820_v23  ;;  %3662 = vmatmul.msk.f32.vlgmr.msrb.gmra.mxu3 %vm1878_vm2, %v1820_v23  ;;  %v1744_v16 = vmax.f32 %v5113_v43, %v1691_v5  ;;  %v2364_v25 = vld [vmem:[#allocation14 + $0x748] sm:$0xff]  ;;  %v2354_v43 = vld [vmem:[#allocation14 + $0x6f8] sm:$0xff]  ;;  %v2212_v46 = vld [vmem:[#allocation14 + $0x4e0] sm:$0xff] }
 0x2bf   : > { %2408 = vmatpush.msra.mxu2 %v2369_v11  ;;  %2431 = vmatpush.msrb.mxu3 %v2370_v2  ;;  %v2471_v5 = vld [vmem:[#allocation14 + $0x848] sm:$0xff]  ;;  %v2493_v2 = vld [vmem:[#allocation14 + $0x8f8] sm:$0xff] }
 0x2c0   : > { %v1769_v33 = vmul.f32 %v5099_v59, %v1741_v18  ;;  %v1772_v13 = vmul.f32 %v5099_v59, %v1744_v16  ;;  %v2470_v18 = vld [vmem:[#allocation14 + $0x840] sm:$0xff]  ;;  %v2209_v16 = vld [vmem:[#allocation14 + $0x4c8] sm:$0xff] }
 0x2c1   : > { %2409 = vmatpush.msra.mxu2 %v2366_v47  ;;  %2432 = vmatpush.msrb.mxu3 %v2367_v35  ;;  %v2206_v35 = vld [vmem:[#allocation14 + $0x4b0] sm:$0xff] }
 0x2c2   : > { %v1797_v3 = vadd.f32 %v5101_v62, %v1769_v33  ;;  %v1800_v6 = vadd.f32 %v5101_v62, %v1772_v13 }
 0x2c3   : > { %2410 = vmatpush.msra.mxu2 %v2363_v61  ;;  %2433 = vmatpush.msrb.mxu3 %v2364_v25  ;;  %v2490_v61 = vld [vmem:[#allocation14 + $0x8e0] sm:$0xff] }
 0x2c4   : > { %v1821_v54 = vmax.f32 %v1797_v3, 0.0  ;;  %v5274_v7 = vmax.f32 %v1800_v6, 0.0  ;;  %v2481_v6 = vld [vmem:[#allocation14 + $0x898] sm:$0xff] }
 0x2c5   : > { %2411 = vmatpush.msra.mxu2 %v2360_v55  ;;  %2434 = vmatpush.msrb.mxu3 %v2361_v26  ;;  %v2203_v55 = vld [vmem:[#allocation14 + $0x498] sm:$0xff]  ;;  %v2083_v26 = vld [vmem:[#allocation14 + $0x330] sm:$0xff] }
 0x2c6   : > { %3661 = vmatmul.msk.f32.gmra.mxu2 %vm1878_vm2, %v1821_v54  ;;  %3663 = vmatmul.msk.f32.gmra.mxu3 %vm1878_vm2, %v1821_v54 }
 0x2c7   : > { %2412 = vmatpush.msra.mxu2 %v2357_v36  ;;  %2435 = vmatpush.msrb.mxu3 %v2358_v48  ;;  %v2484_v48 = vld [vmem:[#allocation14 + $0x8b0] sm:$0xff] }
 0x2c8   : > { %2738 = vmatpush.msrb.mxu1 %v2083_v26  ;;  %v1852_v26 = vld [vmem:[#allocation14 + $0xb0] sm:$0xff] }
 0x2c9   : > { %2413 = vmatpush.msra.mxu2 %v2354_v43  ;;  %2436 = vmatpush.msrb.mxu3 %v2355_v17  ;;  %v2200_v43 = vld [vmem:[#allocation14 + $0x480] sm:$0xff]  ;;  %v2475_v17 = vld [vmem:[#allocation14 + $0x868] sm:$0xff] }
 0x2cb   : > { %2414 = vmatpush.msra.mxu2 %v2351_v10  ;;  %2437 = vmatpush.msrb.mxu3 %v2352_v24  ;;  %v2478_v10 = vld [vmem:[#allocation14 + $0x880] sm:$0xff] }
 0x2cc   : > { %v2077_v24 = vld [vmem:[#allocation14 + $0x300] sm:$0xff] }
 0x2cd   : > { %2415 = vmatpush.msra.mxu2 %v2348_v53  ;;  %2438 = vmatpush.msrb.mxu3 %v2349_v49  ;;  %v2080_v53 = vld [vmem:[#allocation14 + $0x318] sm:$0xff] }
 0x2ce   : > { %3664 = vmatmul.msk.f32.vlgmr.msrb.gmra.mxu2 %vm1878_vm2, %v1820_v23  ;;  %3666 = vmatmul.msk.f32.vlgmr.msra.gmra.mxu3 %vm1878_vm2, %v5274_v7  ;;  %v2215_v23 = vld [vmem:[#allocation14 + $0x4f8] sm:$0xff] }
 0x2cf   : > { %2508 = vmatpush.msrb.mxu2 %v2491_v20  ;;  %2531 = vmatpush.msra.mxu3 %v2492_v45  ;;  %v2472_v20 = vld [vmem:[#allocation14 + $0x850] sm:$0xff] }
 0x2d0   : > { %2810 = vmatpush.msrb.mxu0 %v2215_v23  ;;  %2739 = vmatpush.msrb.mxu1 %v2080_v53  ;;  %v2342_v23 = vld [vmem:[#allocation14 + $0x698] sm:$0xff] }
 0x2d1   : > { %2509 = vmatpush.msrb.mxu2 %v2488_v32  ;;  %2532 = vmatpush.msra.mxu3 %v2489_v39  ;;  %v1848_v39 = vld [vmem:[#allocation14 + $0x90] sm:$0xff] }
 0x2d2   : > { %2811 = vmatpush.msrb.mxu0 %v2212_v46  ;;  %2740 = vmatpush.msrb.mxu1 %v2077_v24  ;;  %v2201_v24 = vld [vmem:[#allocation14 + $0x488] sm:$0xff] }
 0x2d3   : > { %2510 = vmatpush.msrb.mxu2 %v2485_v15  ;;  %2533 = vmatpush.msra.mxu3 %v2486_v12  ;;  %v2222_v12 = vld [vmem:[#allocation14 + $0x530] sm:$0xff] }
 0x2d4   : > { %2812 = vmatpush.msrb.mxu0 %v2209_v16  ;;  %2831 = vmatpush.msra.mxu1 %v2222_v12  ;;  %v1844_v12 = vld [vmem:[#allocation14 + $0x70] sm:$0xff] }
 0x2d5   : > { %2511 = vmatpush.msrb.mxu2 %v2482_v34  ;;  %2534 = vmatpush.msra.mxu3 %v2483_v41  ;;  %v2219_v41 = vld [vmem:[#allocation14 + $0x518] sm:$0xff]  ;;  %v1842_v34 = vld [vmem:[#allocation14 + $0x60] sm:$0xff] }
 0x2d6   : > { %3665 = vmatmul.msk.f32.gmra.mxu2 %vm1878_vm2, %v1821_v54  ;;  %2813 = vmatpush.msrb.mxu0 %v2206_v35  ;;  %v1830_v35 = vld [vmem:[#allocation14] sm:$0xff] }
 0x2d7   : > { %2512 = vmatpush.msrb.mxu2 %v2479_v40  ;;  %2535 = vmatpush.msra.mxu3 %v2480_v37  ;;  %v1839_v40 = vld [vmem:[#allocation14 + $0x48] sm:$0xff] }
 0x2d8   : > { %2814 = vmatpush.msrb.mxu0 %v2203_v55  ;;  %2832 = vmatpush.msra.mxu1 %v2219_v41  ;;  %v1853_v55 = vld [vmem:[#allocation14 + $0xb8] sm:$0xff] }
 0x2d9   : > { %2513 = vmatpush.msrb.mxu2 %v2476_v50  ;;  %2536 = vmatpush.msra.mxu3 %v2477_v38 }
 0x2da   : > { %2815 = vmatpush.msrb.mxu0 %v2200_v43  ;;  %v2333_v43 = vld [vmem:[#allocation14 + $0x650] sm:$0xff] }
 0x2db   : > { %2514 = vmatpush.msrb.mxu2 %v2473_v42  ;;  %2537 = vmatpush.msra.mxu3 %v2474_v52  ;;  %v1836_v42 = vld [vmem:[#allocation14 + $0x30] sm:$0xff] }
 0x2dd   : > { %v1693_v11 = vpop.permute.xlu0 %1692  ;;  %2515 = vmatpush.msrb.mxu2 %v2470_v18  ;;  %2538 = vmatpush.msra.mxu3 %v2471_v5  ;;  %v1833_v18 = vld [vmem:[#allocation14 + $0x18] sm:$0xff] }
 0x2de   : > { %v1745_v47 = vmax.f32 %v5125_v9, %v1693_v11  ;;  %3668 = vmatmul.msk.f32.vlgmr.msra.gmra.mxu2 %vm1878_vm2, %v5274_v7  ;;  %v2487_v9 = vld [vmem:[#allocation14 + $0x8c8] sm:$0xff]  ;;  %v2210_v11 = vld [vmem:[#allocation14 + $0x4d0] sm:$0xff] }
 0x2df   : > { %2554 = vmatpush.msra.mxu2 %v2493_v2 }
 0x2e0   : > { %v1773_v33 = vmul.f32 %v5099_v59, %v1745_v47  ;;  %v2339_v47 = vld [vmem:[#allocation14 + $0x680] sm:$0xff] }
 0x2e1   : > { %2555 = vmatpush.msra.mxu2 %v2490_v61 }
 0x2e2   : > { %v1801_v3 = vadd.f32 %v5101_v62, %v1773_v33  ;;  %v5285_v13 = vpop.f32.mrf.mxu2  ;;  %v2207_v33 = vld [vmem:[#allocation14 + $0x4b8] sm:$0xff] }
 0x2e3   : > { %2556 = vmatpush.msra.mxu2 %v2487_v9 }
 0x2e4   : > { %v1825_v25 = vmax.f32 %v1801_v3, 0.0  ;;  %v2336_v3 = vld [vmem:[#allocation14 + $0x668] sm:$0xff] }
 0x2e5   : > { %v5287_v54 = vpop.permute.xlu2 %1700  ;;  %v5289_v36 = vpop.permute.xlu0 %1654  ;;  %2557 = vmatpush.msra.mxu2 %v2484_v48  ;;  %v1850_v48 = vld [vmem:[#allocation14 + $0xa0] sm:$0xff] }
 0x2e6   : > { %3667 = vmatmul.msk.f32.gmra.mxu3 %vm1878_vm2, %v1825_v25  ;;  %3669 = vmatmul.msk.f32.gmra.mxu2 %vm1878_vm2, %v1825_v25  ;;  %v1749_v5 = vmax.f32 %v5194_v58, %v5287_v54  ;;  %v1726_v53 = vmax.f32 %v5140_v60, %v5289_v36  ;;  %v5342_v36 = vld [vmem:[#allocation11] ss:$0 sm:$0xff] }
 0x2e7   : > { %2558 = vmatpush.msra.mxu2 %v2481_v6  ;;  %v2204_v6 = vld [vmem:[#allocation14 + $0x4a0] sm:$0xff] }
 0x2e8   : > { %v1777_v58 = vmul.f32 %v5099_v59, %v1749_v5 }
 0x2e9   : > { %2559 = vmatpush.msra.mxu2 %v2478_v10  ;;  %v1849_v10 = vld [vmem:[#allocation14 + $0x98] sm:$0xff] }
 0x2ea   : > { %v5296_v32 = vpop.f32.mrf.mxu2 }
 0x2eb   : > { %2560 = vmatpush.msra.mxu2 %v2475_v17  ;;  %v1805_v17 = vadd.f32 %v5101_v62, %v1777_v58  ;;  %v1976_v58 = vld [vmem:[#allocation14 + $0x230] sm:$0xff] }
 0x2ed   : > { %v1663_v49 = vpop.permute.xlu2 %1662  ;;  %v1665_v45 = vpop.permute.xlu0 %1664  ;;  %2561 = vmatpush.msra.mxu2 %v2472_v20  ;;  %v5340_v60 = vmax.f32 %v1805_v17, 0.0 }
 0x2ee   : > { %v1730_v27 = vmax.f32 %v5217_v44, %v1663_v49  ;;  %3670 = vmatmul.msk.f32.vlgmr.msrb.gmra.mxu3 %vm1878_vm2, %v5274_v7  ;;  %v1731_v21 = vmax.f32 %v5153_v29, %v1665_v45  ;;  %v2216_v7 = vld [vmem:[#allocation14 + $0x500] sm:$0xff]  ;;  %v5333_v49 = vpop.f32.mrf.mxu3  ;;  %v5335_v45 = vld [vmem:[#allocation12] ss:$0 sm:$0xff] }
 0x2ef   : > { %2583 = vmatpush.msrb.mxu3 %v1851_v1  ;;  %2833 = vmatpush.msra.mxu1 %v2216_v7  ;;  %v1847_v1 = vld [vmem:[#allocation14 + $0x88] sm:$0xff] }
 0x2f0   : > { %v1758_v15 = vmul.f32 %v5099_v59, %v1730_v27  ;;  %v1759_v38 = vmul.f32 %v5099_v59, %v1731_v21  ;;  %v1846_v27 = vld [vmem:[#allocation14 + $0x80] sm:$0xff]  ;;  %v1843_v21 = vld [vmem:[#allocation14 + $0x68] sm:$0xff] }
 0x2f1   : > { %2584 = vmatpush.msrb.mxu3 %v1848_v39  ;;  %2834 = vmatpush.msra.mxu1 %v2213_v31  ;;  %v2327_v39 = vld [vmem:[#allocation14 + $0x620] sm:$0xff]  ;;  %v2324_v7 = vld [vmem:[#allocation14 + $0x608] sm:$0xff] }
 0x2f2   : > { %v1786_v44 = vadd.f32 %v5101_v62, %v1758_v15  ;;  %v5312_v2 = vpop.f32.mrf.mxu2  ;;  %v1754_v15 = vmul.f32 %v5342_v36, %v1726_v53  ;;  %v1970_v53 = vld [vmem:[#allocation14 + $0x200] sm:$0xff] }
 0x2f3   : > { %2585 = vmatpush.msrb.mxu3 %v1845_v30  ;;  %2835 = vmatpush.msra.mxu1 %v2210_v11  ;;  %v1835_v11 = vld [vmem:[#allocation14 + $0x28] sm:$0xff] }
 0x2f4   : > { %v5301_v37 = vmax.f32 %v1786_v44, 0.0  ;;  %v1782_v31 = vadd.f32 %v5335_v45, %v1754_v15 }
 0x2f5   : > { %v1699_v50 = vpop.permute.xlu1 %1698  ;;  %2586 = vmatpush.msrb.mxu3 %v1842_v34  ;;  %v1679_v52 = vpop.permute.xlu0 %1678  ;;  %2836 = vmatpush.msra.mxu1 %v2207_v33  ;;  %v1841_v34 = vld [vmem:[#allocation14 + $0x58] sm:$0xff] }
 0x2f6   : > { %v1748_v29 = vmax.f32 %v5168_v19, %v1699_v50  ;;  %3671 = vmatmul.msk.f32.gmra.mxu3 %vm1878_vm2, %v1825_v25  ;;  %3688 = vmatmul.msk.f32.vlgmr.msra.gmra.mxu0 %vm1878_vm2, %v5301_v37  ;;  %v1787_v19 = vadd.f32 %v5101_v62, %v1759_v38  ;;  %v1738_v16 = vmax.f32 %v5077_v56, %v1679_v52  ;;  %v1673_v30 = vpop.permute.xlu2 %1672  ;;  %v2469_v38 = vld [vmem:[#allocation14 + $0x838] sm:$0xff]  ;;  %v1838_v50 = vld [vmem:[#allocation14 + $0x40] sm:$0xff] }
 0x2f7   : > { %2587 = vmatpush.msrb.mxu3 %v1839_v40  ;;  %2906 = vmatpush.msra.mxu0 %v2345_v57  ;;  %v1840_v57 = vld [vmem:[#allocation14 + $0x50] sm:$0xff]  ;;  %v1837_v52 = vld [vmem:[#allocation14 + $0x38] sm:$0xff] }
 0x2f8   : > { %v1776_v46 = vmul.f32 %v5099_v59, %v1748_v29  ;;  %v5319_v25 = vmax.f32 %v1787_v19, 0.0  ;;  %v1766_v56 = vmul.f32 %v5099_v59, %v1738_v16  ;;  %v2330_v59 = vld [vmem:[#allocation14 + $0x638] sm:$0xff]  ;;  %2837 = vmatpush.msra.mxu1 %v2204_v6 }
 0x2f9   : > { %2588 = vmatpush.msrb.mxu3 %v1836_v42  ;;  %2907 = vmatpush.msra.mxu0 %v2342_v23  ;;  %v2466_v42 = vld [vmem:[#allocation14 + $0x820] sm:$0xff]  ;;  %v1735_v23 = vmax.f32 %v5233_v63, %v1673_v30  ;;  %v1832_v63 = vld [vmem:[#allocation14 + $0x10] sm:$0xff] }
 0x2fa   : > { %v1804_v61 = vadd.f32 %v5101_v62, %v1776_v46  ;;  %v1794_v20 = vadd.f32 %v5335_v45, %v1766_v56  ;;  %v5338_v62 = vpop.f32.mrf.mxu2  ;;  %2838 = vmatpush.msra.mxu1 %v2201_v24  ;;  %v1834_v46 = vld [vmem:[#allocation14 + $0x20] sm:$0xff] }
 0x2fb   : > { %2589 = vmatpush.msrb.mxu3 %v1833_v18  ;;  %2908 = vmatpush.msra.mxu0 %v2339_v47  ;;  %v2463_v18 = vld [vmem:[#allocation14 + $0x808] sm:$0xff]  ;;  %v5360_v47 = vpop.f32.mrf.mxu3  ;;  %v1763_v33 = vmul.f32 %v5342_v36, %v1735_v23  ;;  %v2331_v23 = vld [vmem:[#allocation14 + $0x640] sm:$0xff] }
 0x2fc   : > { %v5317_v9 = vmax.f32 %v1804_v61, 0.0  ;;  %v5345_v41 = vmax.f32 %v1794_v20, 0.0  ;;  %v1969_v20 = vld [vmem:[#allocation14 + $0x1f8] sm:$0xff] }
 0x2fd   : > { %v5322_v54 = vpop.permute.xlu1 %1656  ;;  %2590 = vmatpush.msrb.mxu3 %v1830_v35  ;;  %2909 = vmatpush.msra.mxu0 %v2336_v3  ;;  %v1831_v3 = vld [vmem:[#allocation14 + $0x8] sm:$0xff] }
 0x2fe   : > { %3672 = vmatmul.msk.f32.vlgmr.msrb.gmra.mxu2 %vm1878_vm2, %v5317_v9  ;;  %3674 = vmatmul.msk.f32.vlgmr.msra.gmra.mxu3 %vm1878_vm2, %v5317_v9  ;;  %v1727_v29 = vmax.f32 %v5192_v14, %v5322_v54  ;;  %v5362_v14 = vmax.f32 %v1782_v31, 0.0  ;;  %v1975_v54 = vld [vmem:[#allocation14 + $0x228] sm:$0xff]  ;;  %v2334_v31 = vld [vmem:[#allocation14 + $0x658] sm:$0xff] }
 0x2ff   : > { %3689 = vmatmul.msk.f32.gmra.mxu0 %vm1878_vm2, %v5319_v25  ;;  %2629 = vmatpush.msra.mxu3 %v1853_v55  ;;  %v1687_v55 = vpop.permute.xlu2 %1686 }
 0x300   : > { %2606 = vmatpush.msrb.mxu2 %v1852_v26  ;;  %2910 = vmatpush.msra.mxu0 %v2333_v43  ;;  %v1755_v19 = vmul.f32 %v5342_v36, %v1727_v29  ;;  %v2346_v26 = vld [vmem:[#allocation14 + $0x6b8] sm:$0xff]  ;;  %v1742_v17 = vmax.f32 %v5097_v51, %v1687_v55  ;;  %v2451_v29 = vld [vmem:[#allocation14 + $0x7a8] sm:$0xff] }
 0x301   : > { %2630 = vmatpush.msra.mxu3 %v1850_v48  ;;  %v1973_v43 = vld [vmem:[#allocation14 + $0x218] sm:$0xff]  ;;  %v2460_v48 = vld [vmem:[#allocation14 + $0x7f0] sm:$0xff] }
 0x302   : > { %2607 = vmatpush.msrb.mxu2 %v1849_v10  ;;  %2911 = vmatpush.msra.mxu0 %v2330_v59  ;;  %v5368_v61 = vpop.f32.mrf.mxu2  ;;  %v1783_v6 = vadd.f32 %v5335_v45, %v1755_v19  ;;  %v2343_v59 = vld [vmem:[#allocation14 + $0x6a0] sm:$0xff]  ;;  %v1770_v30 = vmul.f32 %v5342_v36, %v1742_v17  ;;  %v1957_v19 = vld [vmem:[#allocation14 + $0x198] sm:$0xff]  ;;  %v2091_v17 = vld [vmem:[#allocation14 + $0x370] sm:$0xff] }
 0x303   : > { %2631 = vmatpush.msra.mxu3 %v1847_v1  ;;  %v2457_v1 = vld [vmem:[#allocation14 + $0x7d8] sm:$0xff] }
 0x304   : > { %2608 = vmatpush.msrb.mxu2 %v1846_v27  ;;  %2912 = vmatpush.msra.mxu0 %v2327_v39  ;;  %v2340_v27 = vld [vmem:[#allocation14 + $0x688] sm:$0xff]  ;;  %v5382_v39 = vpop.f32.mrf.mxu3  ;;  %v2100_v55 = vld [vmem:[#allocation14 + $0x3b8] sm:$0xff] }
 0x305   : > { %2632 = vmatpush.msra.mxu3 %v1844_v12  ;;  %v5384_v12 = vmax.f32 %v1783_v6, 0.0 }
 0x306   : > { %v1671_v44 = vpop.permute.xlu1 %1670  ;;  %3673 = vmatmul.msk.f32.gmra.mxu2 %vm1878_vm2, %v5340_v60  ;;  %3675 = vmatmul.msk.f32.gmra.mxu3 %vm1878_vm2, %v5340_v60 }
 0x307   : > { %v1734_v40 = vmax.f32 %v5220_v28, %v1671_v44  ;;  %3696 = vmatmul.msk.f32.vlgmr.msrb.gmra.mxu0 %vm1878_vm2, %v5345_v41  ;;  %2609 = vmatpush.msrb.mxu2 %v1843_v21  ;;  %v1967_v21 = vld [vmem:[#allocation14 + $0x1e8] sm:$0xff]  ;;  %v1966_v44 = vld [vmem:[#allocation14 + $0x1e0] sm:$0xff] }
 0x308   : > { %2633 = vmatpush.msra.mxu3 %v1841_v34  ;;  %2913 = vmatpush.msra.mxu0 %v2324_v7  ;;  %v1689_v34 = vpop.permute.xlu0 %1688  ;;  %v2337_v7 = vld [vmem:[#allocation14 + $0x670] sm:$0xff] }
 0x309   : > { %v1762_v28 = vmul.f32 %v5342_v36, %v1734_v40  ;;  %2610 = vmatpush.msrb.mxu2 %v1840_v57  ;;  %v2454_v40 = vld [vmem:[#allocation14 + $0x7c0] sm:$0xff] }
 0x30a   : > { %3004 = vmatpush.msrb.mxu0 %v2469_v38  ;;  %2634 = vmatpush.msra.mxu3 %v1838_v50  ;;  %v5395_v57 = vpop.f32.mrf.mxu2  ;;  %v1964_v38 = vld [vmem:[#allocation14 + $0x1d0] sm:$0xff]  ;;  %v1963_v50 = vld [vmem:[#allocation14 + $0x1c8] sm:$0xff] }
 0x30b   : > { %v1790_v5 = vadd.f32 %v5335_v45, %v1762_v28  ;;  %2611 = vmatpush.msrb.mxu2 %v1837_v52  ;;  %v1743_v28 = vmax.f32 %v5197_v22, %v1689_v34  ;;  %v1961_v52 = vld [vmem:[#allocation14 + $0x1b8] sm:$0xff]  ;;  %v1958_v22 = vld [vmem:[#allocation14 + $0x1a0] sm:$0xff]  ;;  %v2082_v34 = vld [vmem:[#allocation14 + $0x328] sm:$0xff] }
 0x30c   : > { %3005 = vmatpush.msrb.mxu0 %v2466_v42  ;;  %2635 = vmatpush.msra.mxu3 %v1835_v11  ;;  %v1960_v42 = vld [vmem:[#allocation14 + $0x1b0] sm:$0xff] }
 0x30d   : > { %v5365_v16 = vmax.f32 %v1790_v5, 0.0  ;;  %2612 = vmatpush.msrb.mxu2 %v1834_v46  ;;  %v2448_v11 = vld [vmem:[#allocation14 + $0x790] sm:$0xff]  ;;  %v1771_v46 = vmul.f32 %v5342_v36, %v1743_v28  ;;  %v2338_v28 = vld [vmem:[#allocation14 + $0x678] sm:$0xff] }
 0x30e   : > { %v1681_v35 = vpop.permute.xlu1 %1680  ;;  %3006 = vmatpush.msrb.mxu0 %v2463_v18  ;;  %3676 = vmatmul.msk.f32.vlgmr.msra.gmra.mxu2 %vm1878_vm2, %v5317_v9  ;;  %v1791_v9 = vadd.f32 %v5335_v45, %v1763_v33  ;;  %v5406_v18 = vpop.f32.mrf.mxu3  ;;  %v2328_v33 = vld [vmem:[#allocation14 + $0x628] sm:$0xff] }
 0x30f   : > { %v1739_v56 = vmax.f32 %v5080_v0, %v1681_v35  ;;  %3678 = vmatmul.msk.f32.vlgmr.msrb.gmra.mxu3 %vm1878_vm2, %v5362_v14  ;;  %3690 = vmatmul.msk.f32.vlgmr.msrb.gmra.mxu1 %vm1878_vm2, %v5365_v16  ;;  %v1972_v0 = vld [vmem:[#allocation14 + $0x210] sm:$0xff]  ;;  %v1955_v35 = vld [vmem:[#allocation14 + $0x188] sm:$0xff] }
 0x310   : > { %2636 = vmatpush.msra.mxu3 %v1832_v63  ;;  %2613 = vmatpush.msrb.mxu2 %v1831_v3  ;;  %v5388_v51 = vmax.f32 %v1791_v9, 0.0  ;;  %v1954_v3 = vld [vmem:[#allocation14 + $0x180] sm:$0xff] }
 0x311   : > { %v1767_v10 = vmul.f32 %v5342_v36, %v1739_v56  ;;  %2929 = vmatpush.msrb.mxu1 %v2346_v26  ;;  %3007 = vmatpush.msrb.mxu0 %v2460_v48  ;;  %v1799_v56 = vadd.f32 %v5335_v45, %v1771_v46  ;;  %v2093_v9 = vld [vmem:[#allocation14 + $0x380] sm:$0xff]  ;;  %v2332_v46 = vld [vmem:[#allocation14 + $0x648] sm:$0xff] }
 0x312   : > { %2681 = vmatpush.msrb.mxu3 %v1976_v58  ;;  %2658 = vmatpush.msra.mxu2 %v1975_v54  ;;  %v2325_v58 = vld [vmem:[#allocation14 + $0x610] sm:$0xff]  ;;  %v5417_v54 = vpop.f32.mrf.mxu2 }
 0x313   : > { %v1795_v24 = vadd.f32 %v5335_v45, %v1767_v10  ;;  %2930 = vmatpush.msrb.mxu1 %v2343_v59  ;;  %3008 = vmatpush.msrb.mxu0 %v2457_v1  ;;  %v5420_v48 = vmax.f32 %v1799_v56, 0.0  ;;  %v2096_v10 = vld [vmem:[#allocation14 + $0x398] sm:$0xff]  ;;  %v1697_v59 = vpop.permute.xlu2 %1696  ;;  %v2468_v56 = vld [vmem:[#allocation14 + $0x830] sm:$0xff] }
 0x314   : > { %2682 = vmatpush.msrb.mxu3 %v1973_v43  ;;  %2659 = vmatpush.msra.mxu2 %v1972_v0  ;;  %v2097_v43 = vld [vmem:[#allocation14 + $0x3a0] sm:$0xff]  ;;  %v2094_v0 = vld [vmem:[#allocation14 + $0x388] sm:$0xff] }
 0x315   : > { %v5386_v15 = vmax.f32 %v1795_v24, 0.0  ;;  %2931 = vmatpush.msrb.mxu1 %v2340_v27  ;;  %3009 = vmatpush.msrb.mxu0 %v2454_v40  ;;  %v2090_v24 = vld [vmem:[#allocation14 + $0x368] sm:$0xff]  ;;  %v2081_v40 = vld [vmem:[#allocation14 + $0x320] sm:$0xff] }
 0x316   : > { %2683 = vmatpush.msrb.mxu3 %v1970_v53  ;;  %2660 = vmatpush.msra.mxu2 %v1969_v20  ;;  %v1695_v63 = vpop.permute.xlu1 %1694  ;;  %v1747_v53 = vmax.f32 %v5257_v4, %v1697_v59  ;;  %v2088_v20 = vld [vmem:[#allocation14 + $0x358] sm:$0xff]  ;;  %v2459_v59 = vld [vmem:[#allocation14 + $0x7e8] sm:$0xff] }
 0x317   : > { %3677 = vmatmul.msk.f32.gmra.mxu2 %vm1878_vm2, %v5340_v60  ;;  %3679 = vmatmul.msk.f32.gmra.mxu3 %vm1878_vm2, %v5384_v12  ;;  %v1798_v60 = vadd.f32 %v5335_v45, %v1770_v30  ;;  %v1746_v26 = vmax.f32 %v5245_v8, %v1695_v63  ;;  %v5427_v8 = vpop.f32.mrf.mxu3  ;;  %v2084_v4 = vld [vmem:[#allocation14 + $0x338] sm:$0xff] }
 0x318   : > { %3691 = vmatmul.msk.f32.gmra.mxu1 %vm1878_vm2, %v5388_v51  ;;  %3697 = vmatmul.msk.f32.gmra.mxu0 %vm1878_vm2, %v5386_v15 }
 0x319   : > { %2684 = vmatpush.msrb.mxu3 %v1967_v21  ;;  %2661 = vmatpush.msra.mxu2 %v1966_v44  ;;  %v5403_v5 = vmax.f32 %v1798_v60, 0.0  ;;  %v1774_v6 = vmul.f32 %v5342_v36, %v1746_v26  ;;  %v2087_v21 = vld [vmem:[#allocation14 + $0x350] sm:$0xff]  ;;  %v2085_v44 = vld [vmem:[#allocation14 + $0x340] sm:$0xff] }
 0x31a   : > { %2932 = vmatpush.msrb.mxu1 %v2337_v7  ;;  %3010 = vmatpush.msrb.mxu0 %v2451_v29  ;;  %v5435_v27 = vpop.f32.mrf.mxu2  ;;  %v2078_v29 = vld [vmem:[#allocation14 + $0x308] sm:$0xff]  ;;  %v2341_v60 = vld [vmem:[#allocation14 + $0x690] sm:$0xff] }
 0x31b   : > { %2685 = vmatpush.msrb.mxu3 %v1964_v38  ;;  %2662 = vmatpush.msra.mxu2 %v1963_v50  ;;  %v1802_v1 = vadd.f32 %v5335_v45, %v1774_v6  ;;  %v2079_v38 = vld [vmem:[#allocation14 + $0x310] sm:$0xff]  ;;  %v2344_v50 = vld [vmem:[#allocation14 + $0x6a8] sm:$0xff] }
 0x31c   : > { %2933 = vmatpush.msrb.mxu1 %v2334_v31  ;;  %3011 = vmatpush.msrb.mxu0 %v2448_v11  ;;  %v2464_v6 = vld [vmem:[#allocation14 + $0x810] sm:$0xff] }
 0x31d   : > { %2686 = vmatpush.msrb.mxu3 %v1961_v52  ;;  %2663 = vmatpush.msra.mxu2 %v1960_v42  ;;  %v5438_v30 = vmax.f32 %v1802_v1, 0.0  ;;  %v2220_v52 = vld [vmem:[#allocation14 + $0x520] sm:$0xff]  ;;  %v2453_v1 = vld [vmem:[#allocation14 + $0x7b8] sm:$0xff] }
 0x31e   : > { %2934 = vmatpush.msrb.mxu1 %v2331_v23  ;;  %v2335_v42 = vld [vmem:[#allocation14 + $0x660] sm:$0xff]  ;;  %v2217_v23 = vld [vmem:[#allocation14 + $0x508] sm:$0xff] }
 0x31f   : > { %3680 = vmatmul.msk.f32.vlgmr.msrb.gmra.mxu2 %vm1878_vm2, %v5362_v14  ;;  %3682 = vmatmul.msk.f32.vlgmr.msra.gmra.mxu3 %vm1878_vm2, %v5362_v14  ;;  %v2099_v14 = vld [vmem:[#allocation14 + $0x3b0] sm:$0xff]  ;;  %v5449_v7 = vpop.f32.mrf.mxu3 }
 0x320   : > { %3698 = vmatmul.msk.f32.vlgmr.msra.gmra.mxu1 %vm1878_vm2, %v5345_v41  ;;  %3704 = vmatmul.msk.f32.vlgmr.msra.gmra.mxu0 %vm1878_vm2, %v5403_v5 }
 0x321   : > { %2687 = vmatpush.msrb.mxu3 %v1958_v22  ;;  %2664 = vmatpush.msra.mxu2 %v1957_v19  ;;  %v2211_v22 = vld [vmem:[#allocation14 + $0x4d8] sm:$0xff]  ;;  %v2329_v19 = vld [vmem:[#allocation14 + $0x630] sm:$0xff] }
 0x322   : > { %2935 = vmatpush.msrb.mxu1 %v2328_v33  ;;  %v5453_v31 = vpop.f32.mrf.mxu2  ;;  %v2208_v33 = vld [vmem:[#allocation14 + $0x4c0] sm:$0xff] }
 0x323   : > { %2688 = vmatpush.msrb.mxu3 %v1955_v35  ;;  %2665 = vmatpush.msra.mxu2 %v1954_v3  ;;  %v2326_v35 = vld [vmem:[#allocation14 + $0x618] sm:$0xff]  ;;  %v2205_v3 = vld [vmem:[#allocation14 + $0x4a8] sm:$0xff] }
 0x324   : > { %2936 = vmatpush.msrb.mxu1 %v2325_v58  ;;  %v2323_v58 = vld [vmem:[#allocation14 + $0x600] sm:$0xff] }
 0x325   : > { %2779 = vmatpush.msra.mxu3 %v2100_v55  ;;  %2756 = vmatpush.msrb.mxu2 %v2099_v14  ;;  %v2202_v55 = vld [vmem:[#allocation14 + $0x490] sm:$0xff]  ;;  %v2465_v14 = vld [vmem:[#allocation14 + $0x818] sm:$0xff] }
 0x327   : > { %2780 = vmatpush.msra.mxu3 %v2097_v43  ;;  %3681 = vmatmul.msk.f32.gmra.mxu2 %vm1878_vm2, %v5384_v12  ;;  %v5463_v11 = vpop.f32.mrf.mxu3 }
 0x328   : > { %3683 = vmatmul.msk.f32.gmra.mxu3 %vm1878_vm2, %v5384_v12  ;;  %3699 = vmatmul.msk.f32.gmra.mxu1 %vm1878_vm2, %v5386_v15  ;;  %v1775_v12 = vmul.f32 %v5342_v36, %v1747_v53 }
 0x329   : > { %3705 = vmatmul.msk.f32.gmra.mxu0 %vm1878_vm2, %v5420_v48  ;;  %2757 = vmatpush.msrb.mxu2 %v2096_v10  ;;  %v2462_v10 = vld [vmem:[#allocation14 + $0x800] sm:$0xff] }
 0x32a   : > { %2781 = vmatpush.msra.mxu3 %v2094_v0  ;;  %v1803_v36 = vadd.f32 %v5335_v45, %v1775_v12  ;;  %v2223_v45 = vld [vmem:[#allocation14 + $0x538] sm:$0xff]  ;;  %v5469_v63 = vpop.f32.mrf.mxu2 }
 0x32b   : > { %2758 = vmatpush.msrb.mxu2 %v2093_v9  ;;  %v2461_v0 = vld [vmem:[#allocation14 + $0x7f8] sm:$0xff]  ;;  %v2458_v9 = vld [vmem:[#allocation14 + $0x7e0] sm:$0xff] }
 0x32c   : > { %2782 = vmatpush.msra.mxu3 %v2091_v17  ;;  %v2456_v17 = vld [vmem:[#allocation14 + $0x7d0] sm:$0xff] }
 0x32d   : > { %2759 = vmatpush.msrb.mxu2 %v2090_v24  ;;  %v2452_v24 = vld [vmem:[#allocation14 + $0x7b0] sm:$0xff] }
 0x32e   : > { %2783 = vmatpush.msra.mxu3 %v2088_v20  ;;  %v2450_v20 = vld [vmem:[#allocation14 + $0x7a0] sm:$0xff] }
 0x32f   : > { %3684 = vmatmul.msk.f32.vlgmr.msra.gmra.mxu2 %vm1878_vm2, %v5301_v37  ;;  %v5471_v26 = vpop.f32.mrf.mxu3 }
 0x330   : > { %3686 = vmatmul.msk.f32.vlgmr.msrb.gmra.mxu3 %vm1878_vm2, %v5301_v37  ;;  %3706 = vmatmul.msk.f32.vlgmr.msrb.gmra.mxu1 %vm1878_vm2, %v5403_v5  ;;  %v5451_v37 = vmax.f32 %v1803_v36, 0.0 }
 0x331   : > { %3712 = vmatmul.msk.f32.vlgmr.msrb.gmra.mxu0 %vm1878_vm2, %v5438_v30  ;;  %2760 = vmatpush.msrb.mxu2 %v2087_v21  ;;  %v2449_v21 = vld [vmem:[#allocation14 + $0x798] sm:$0xff] }
 0x332   : > { %2784 = vmatpush.msra.mxu3 %v2085_v44  ;;  %v2447_v44 = vld [vmem:[#allocation14 + $0x788] sm:$0xff] }
 0x333   : > { %2761 = vmatpush.msrb.mxu2 %v2084_v4  ;;  %v2446_v4 = vld [vmem:[#allocation14 + $0x780] sm:$0xff] }
 0x334   : > { %2785 = vmatpush.msra.mxu3 %v2082_v34 }
 0x335   : > { %2762 = vmatpush.msrb.mxu2 %v2081_v40 }
 0x336   : > { %2786 = vmatpush.msra.mxu3 %v2079_v38 }
 0x337   : > { %3685 = vmatmul.msk.f32.gmra.mxu2 %vm1878_vm2, %v5319_v25 }
 0x338   : > { %2883 = vmatpush.msrb.mxu3 %v2344_v50  ;;  %3707 = vmatmul.msk.f32.gmra.mxu1 %vm1878_vm2, %v5420_v48 }
 0x339   : > { %3687 = vmatmul.msk.f32.gmra.mxu3 %vm1878_vm2, %v5319_v25  ;;  %3713 = vmatmul.msk.f32.gmra.mxu0 %vm1878_vm2, %v5451_v37  ;;  %v2214_v25 = vld [vmem:[#allocation14 + $0x4f0] sm:$0xff] }
 0x33a   : > { %2763 = vmatpush.msrb.mxu2 %v2078_v29  ;;  %2884 = vmatpush.msrb.mxu3 %v2341_v60 }
 0x33c   : > { %2854 = vmatpush.msra.mxu2 %v2223_v45  ;;  %2885 = vmatpush.msrb.mxu3 %v2338_v28 }
 0x33e   : > { %2855 = vmatpush.msra.mxu2 %v2220_v52  ;;  %2886 = vmatpush.msrb.mxu3 %v2335_v42 }
 0x33f   : > { %3692 = vmatmul.msk.f32.vlgmr.msrb.gmra.mxu2 %vm1878_vm2, %v5365_v16 }
 0x340   : > { %2856 = vmatpush.msra.mxu2 %v2217_v23  ;;  %2887 = vmatpush.msrb.mxu3 %v2332_v46 }
 0x341   : > { %3694 = vmatmul.msk.f32.vlgmr.msra.gmra.mxu3 %vm1878_vm2, %v5365_v16  ;;  %v2467_v16 = vld [vmem:[#allocation14 + $0x828] sm:$0xff]  ;;  %v5477_v43 = vpop.f32.mrf.mxu2  ;;  %v5479_v53 = vpop.f32.mrf.mxu3 }
 0x342   : > { %2857 = vmatpush.msra.mxu2 %v2214_v25  ;;  %2888 = vmatpush.msrb.mxu3 %v2329_v19 }
 0x344   : > { %2858 = vmatpush.msra.mxu2 %v2211_v22  ;;  %2889 = vmatpush.msrb.mxu3 %v2326_v35 }
 0x346   : > { %2859 = vmatpush.msra.mxu2 %v2208_v33  ;;  %2890 = vmatpush.msrb.mxu3 %v2323_v58  ;;  %v3122_v58 = vld [vmem:[%s5858_s9 + $0x178] sm:$0xff] }
 0x347   : > { %3693 = vmatmul.msk.f32.gmra.mxu2 %vm1878_vm2, %v5388_v51 }
 0x348   : > { %2860 = vmatpush.msra.mxu2 %v2205_v3  ;;  %2981 = vmatpush.msra.mxu3 %v2468_v56 }
 0x349   : > { %3695 = vmatmul.msk.f32.gmra.mxu3 %vm1878_vm2, %v5388_v51  ;;  %v2455_v51 = vld [vmem:[#allocation14 + $0x7c8] sm:$0xff]  ;;  %v5485_v12 = vpop.f32.mrf.mxu2 }
 0x34a   : > { %2861 = vmatpush.msra.mxu2 %v2202_v55  ;;  %2982 = vmatpush.msra.mxu3 %v2465_v14  ;;  %v3120_v14 = vld [vmem:[%s5858_s9 + $0x168] sm:$0xff] }
 0x34c   : > { %2958 = vmatpush.msrb.mxu2 %v2467_v16  ;;  %2983 = vmatpush.msra.mxu3 %v2462_v10  ;;  %v3121_v16 = vld [vmem:[%s5858_s9 + $0x170] sm:$0xff] }
 0x34e   : > { %2959 = vmatpush.msrb.mxu2 %v2464_v6  ;;  %2984 = vmatpush.msra.mxu3 %v2459_v59  ;;  %v3118_v59 = vld [vmem:[%s5858_s9 + $0x158] sm:$0xff] }
 0x34f   : > { %3700 = vmatmul.msk.f32.vlgmr.msra.gmra.mxu2 %vm1878_vm2, %v5345_v41  ;;  %v5491_v41 = vpop.f32.mrf.mxu3 }
 0x350   : > { %2960 = vmatpush.msrb.mxu2 %v2461_v0  ;;  %2985 = vmatpush.msra.mxu3 %v2456_v17  ;;  %v3119_v0 = vld [vmem:[%s5858_s9 + $0x160] sm:$0xff] }
 0x351   : > { %3702 = vmatmul.msk.f32.vlgmr.msrb.gmra.mxu3 %vm1878_vm2, %v5403_v5  ;;  %v5493_v5 = vpop.f32.mrf.mxu2 }
 0x352   : > { %2961 = vmatpush.msrb.mxu2 %v2458_v9  ;;  %2986 = vmatpush.msra.mxu3 %v2453_v1  ;;  %v3116_v1 = vld [vmem:[%s5858_s9 + $0x148] sm:$0xff] }
 0x354   : > { %2962 = vmatpush.msrb.mxu2 %v2455_v51  ;;  %2987 = vmatpush.msra.mxu3 %v2450_v20  ;;  %v3117_v51 = vld [vmem:[%s5858_s9 + $0x150] sm:$0xff] }
 0x356   : > { %2963 = vmatpush.msrb.mxu2 %v2452_v24  ;;  %2988 = vmatpush.msra.mxu3 %v2447_v44 }
 0x357   : > { %3701 = vmatmul.msk.f32.gmra.mxu2 %vm1878_vm2, %v5386_v15  ;;  %v5499_v34 = vpop.f32.mrf.mxu3 }
 0x358   : > { %2964 = vmatpush.msrb.mxu2 %v2449_v21  ;;  %3173 = vmatpush.msrb.mxu3 %v3122_v58  ;;  %v3106_v58 = vld [vmem:[%s5858_s9 + $0xf8] sm:$0xff] }
 0x359   : > { %3703 = vmatmul.msk.f32.gmra.mxu3 %vm1878_vm2, %v5420_v48  ;;  %v5501_v36 = vpop.f32.mrf.mxu2 }
 0x35a   : > { %2965 = vmatpush.msrb.mxu2 %v2446_v4  ;;  %3174 = vmatpush.msrb.mxu3 %v3121_v16  ;;  %v3090_v4 = vld [vmem:[%s5858_s9 + $0x78] sm:$0xff]  ;;  %v3115_v16 = vld [vmem:[%s5858_s9 + $0x140] sm:$0xff] }
 0x35b   : > { %3127 = vmatpush.msra.mxu1 %v3090_v4  ;;  %v3087_v4 = vld [vmem:[%s5858_s9 + $0x60] sm:$0xff] }
 0x35c   : > { %3175 = vmatpush.msrb.mxu3 %v3120_v14  ;;  %3150 = vmatpush.msra.mxu2 %v3106_v58  ;;  %v3089_v14 = vld [vmem:[%s5858_s9 + $0x70] sm:$0xff]  ;;  %v3103_v58 = vld [vmem:[%s5858_s9 + $0xe0] sm:$0xff] }
 0x35d   : > { %3128 = vmatpush.msra.mxu1 %v3089_v14 }
 0x35e   : > { %3176 = vmatpush.msrb.mxu3 %v3119_v0 }
 0x35f   : > { %3708 = vmatmul.msk.f32.vlgmr.msrb.gmra.mxu2 %vm1878_vm2, %v5438_v30 }
 0x360   : > { %3177 = vmatpush.msrb.mxu3 %v3118_v59 }
 0x361   : > { %3710 = vmatmul.msk.f32.vlgmr.msra.gmra.mxu3 %vm1878_vm2, %v5438_v30  ;;  %v5509_v48 = vpop.f32.mrf.mxu2 }
 0x362   : > { %3178 = vmatpush.msrb.mxu3 %v3117_v51 }
 0x364   : > { %3179 = vmatpush.msrb.mxu3 %v3116_v1 }
 0x366   : > { %3180 = vmatpush.msrb.mxu3 %v3115_v16  ;;  %v3112_v16 = vld [vmem:[%s5858_s9 + $0x128] sm:$0xff] }
 0x367   : > { %3709 = vmatmul.msk.f32.gmra.mxu2 %vm1878_vm2, %v5451_v37 }
 0x369   : > { %3711 = vmatmul.msk.f32.gmra.mxu3 %vm1878_vm2, %v5451_v37  ;;  %v5507_v15 = vpop.f32.mrf.mxu3  ;;  %v5513_v50 = vpop.f32.mrf.mxu2 }
 0x371   : > { %v2440_v40 = vpop.f32.mrf.mxu3 }
 0x373   : > { %v5511_v38 = vpop.f32.mrf.mxu0 }
 0x379   : > { %v5515_v30 = vpop.f32.mrf.mxu3 }
 0x37c   : > { %v5521_v45 = vpop.f32.mrf.mxu0 }
 0x381   : > { %v5517_v29 = vpop.f32.mrf.mxu2  ;;  %v5519_v60 = vpop.f32.mrf.mxu3 }
 0x384   : > { %v2817_v52 = vpop.f32.mrf.mxu0 }
 0x389   : > { %v5523_v28 = vpop.f32.mrf.mxu2  ;;  %v5525_v37 = vpop.f32.mrf.mxu3 }
 0x38c   : > { %v2742_v42 = vpop.f32.mrf.mxu1 }
 0x38d   : > { %v2743_v59 = vadd.f32 %v2742_v42, %v5427_v8  ;;  %v2818_v8 = vadd.f32 %v2817_v52, %v5477_v43 }
 0x38f   : > { %v3025_v43 = vadd.f32 %v2818_v8, %v2743_v59  ;;  %v3111_v59 = vld [vmem:[%s5858_s9 + $0x120] sm:$0xff] }
 0x391   : > { %v2563_v23 = vpop.f32.mrf.mxu2 }
 0x392   : > { %v2592_v25 = vpop.f32.mrf.mxu3 }
 0x393   : > { %v2593_v42 = vadd.f32 %v2592_v25, %v5285_v13 }
 0x395   : > { %v5527_v46 = vpop.f32.mrf.mxu1  ;;  %v5529_v22 = vpop.f32.mrf.mxu0 }
 0x39a   : > { %v5531_v19 = vpop.f32.mrf.mxu2  ;;  %v5533_v33 = vpop.f32.mrf.mxu3 }
 0x39d   : > { %v5535_v35 = vpop.f32.mrf.mxu1  ;;  %v5537_v3 = vpop.f32.mrf.mxu0 }
 0x3a2   : > { %v5542_v55 = vpop.f32.mrf.mxu2  ;;  %v5544_v56 = vpop.f32.mrf.mxu3 }
 0x3a5   : > { %v5552_v6 = vpop.f32.mrf.mxu1 }
 0x3a6   : > { %v5554_v10 = vpop.f32.mrf.mxu0 }
 0x3aa   : > { %v5562_v9 = vpop.f32.mrf.mxu2 }
 0x3ab   : > { %v5564_v17 = vpop.f32.mrf.mxu3 }
 0x3ad   : > { %v2938_v24 = vpop.f32.mrf.mxu1 }
 0x3ae   : > { %v3013_v20 = vpop.f32.mrf.mxu0  ;;  %v2939_v21 = vadd.f32 %v2938_v24, %v2440_v40  ;;  %v3105_v40 = vld [vmem:[%s5858_s9 + $0xf0] sm:$0xff]  ;;  %v3088_v24 = vld [vmem:[%s5858_s9 + $0x68] sm:$0xff] }
 0x3af   : > { %v3014_v44 = vadd.f32 %v3013_v20, %v2563_v23  ;;  %v3114_v23 = vld [vmem:[%s5858_s9 + $0x138] sm:$0xff]  ;;  %3151 = vmatpush.msra.mxu2 %v3105_v40  ;;  %v3104_v20 = vld [vmem:[%s5858_s9 + $0xe8] sm:$0xff]  ;;  %3129 = vmatpush.msra.mxu1 %v3088_v24  ;;  %v3101_v24 = vld [vmem:[%s5858_s9 + $0xd0] sm:$0xff] }
 0x3b0   : > { %3181 = vmatpush.msrb.mxu3 %v3114_v23  ;;  %v3086_v40 = vld [vmem:[%s5858_s9 + $0x58] sm:$0xff] }
 0x3b1   : > { %v5590_v0 = vadd.f32 %v3014_v44, %v2939_v21  ;;  %v3113_v21 = vld [vmem:[%s5858_s9 + $0x130] sm:$0xff]  ;;  %3152 = vmatpush.msra.mxu2 %v3104_v20  ;;  %3130 = vmatpush.msra.mxu1 %v3087_v4  ;;  %v3102_v23 = vld [vmem:[%s5858_s9 + $0xd8] sm:$0xff] }
 0x3b2   : > { %v2667_v51 = vpop.f32.mrf.mxu2  ;;  %3182 = vmatpush.msrb.mxu3 %v3113_v21  ;;  %v3110_v20 = vld [vmem:[%s5858_s9 + $0x118] sm:$0xff]  ;;  %v3109_v4 = vld [vmem:[%s5858_s9 + $0x110] sm:$0xff] }
 0x3b3   : > { %v5593_v1 = vpop.f32.mrf.mxu3  ;;  %v2668_v44 = vadd.f32 %v2667_v51, %v5368_v61  ;;  %3153 = vmatpush.msra.mxu2 %v3103_v58  ;;  %3131 = vmatpush.msra.mxu1 %v3086_v40  ;;  %v3083_v58 = vld [vmem:[%s5858_s9 + $0x40] sm:$0xff] }
 0x3b4   : > { %3183 = vmatpush.msrb.mxu3 %v3112_v16  ;;  %v3099_v16 = vld [vmem:[%s5858_s9 + $0xc0] sm:$0xff] }
 0x3b5   : > { %v3019_v52 = vadd.f32 %v2668_v44, %v2593_v42  ;;  %v2941_v13 = vpop.f32.mrf.mxu1  ;;  %3154 = vmatpush.msra.mxu2 %v3102_v23  ;;  %v3084_v42 = vld [vmem:[%s5858_s9 + $0x48] sm:$0xff] }
 0x3b6   : > { %v3016_v25 = vpop.f32.mrf.mxu0  ;;  %v2942_v61 = vadd.f32 %v2941_v13, %v5515_v30  ;;  %3184 = vmatpush.msrb.mxu3 %v3111_v59  ;;  %v3100_v44 = vld [vmem:[%s5858_s9 + $0xc8] sm:$0xff]  ;;  %v3098_v13 = vld [vmem:[%s5858_s9 + $0xb8] sm:$0xff] }
 0x3b7   : > { %v3017_v14 = vadd.f32 %v3016_v25, %v5531_v19  ;;  %v5627_v51 = vadd.f32 %v3025_v43, %v3019_v52  ;;  %v3085_v19 = vld [vmem:[%s5858_s9 + $0x50] sm:$0xff]  ;;  %3155 = vmatpush.msra.mxu2 %v3101_v24  ;;  %v3108_v43 = vld [vmem:[%s5858_s9 + $0x108] sm:$0xff]  ;;  %v3082_v52 = vld [vmem:[%s5858_s9 + $0x38] sm:$0xff] }
 0x3b8   : > { %3132 = vmatpush.msra.mxu1 %v3085_v19  ;;  %3185 = vmatpush.msrb.mxu3 %v3110_v20  ;;  %v3107_v25 = vld [vmem:[%s5858_s9 + $0x100] sm:$0xff]  ;;  %v3080_v59 = vld [vmem:[%s5858_s9 + $0x28] sm:$0xff] }
 0x3b9   : > { %v5629_v30 = vadd.f32 %v3017_v14, %v2942_v61  ;;  %3156 = vmatpush.msra.mxu2 %v3100_v44  ;;  %v3081_v61 = vld [vmem:[%s5858_s9 + $0x30] sm:$0xff]  ;;  %v3096_v19 = vld [vmem:[%s5858_s9 + $0xa8] sm:$0xff]  ;;  %v3079_v24 = vld [vmem:[%s5858_s9 + $0x20] sm:$0xff] }
 0x3ba   : > { %v5640_v21 = vpop.f32.mrf.mxu2  ;;  %3133 = vmatpush.msra.mxu1 %v3084_v42  ;;  %3186 = vmatpush.msrb.mxu3 %v3109_v4  ;;  %v3097_v14 = vld [vmem:[%s5858_s9 + $0xb0] sm:$0xff]  ;;  %v3095_v20 = vld [vmem:[%s5858_s9 + $0xa0] sm:$0xff]  ;;  %v3078_v42 = vld [vmem:[%s5858_s9 + $0x18] sm:$0xff] }
 0x3bb   : > { %3157 = vmatpush.msra.mxu2 %v3099_v16  ;;  %v3094_v44 = vld [vmem:[%s5858_s9 + $0x98] sm:$0xff]  ;;  %v3077_v4 = vld [vmem:[%s5858_s9 + $0x10] sm:$0xff] }
 0x3bc   : > { %v5642_v8 = vpop.f32.mrf.mxu3  ;;  %3134 = vmatpush.msra.mxu1 %v3083_v58  ;;  %3187 = vmatpush.msrb.mxu3 %v3108_v43  ;;  %v3093_v58 = vld [vmem:[%s5858_s9 + $0x90] sm:$0xff] }
 0x3bd   : > { %3158 = vmatpush.msra.mxu2 %v3098_v13  ;;  %v3092_v13 = vld [vmem:[%s5858_s9 + $0x88] sm:$0xff] }
 0x3be   : > { %3135 = vmatpush.msra.mxu1 %v3082_v52  ;;  %3188 = vmatpush.msrb.mxu3 %v3107_v25  ;;  %v3076_v52 = vld [vmem:[%s5858_s9 + $0x8] sm:$0xff]  ;;  %v3075_v25 = vld [vmem:[%s5858_s9] sm:$0xff] }
 0x3bf   : > { %3159 = vmatpush.msra.mxu2 %v3097_v14  ;;  %v2639_v14 = vadd.f32 %v5544_v56, %v5333_v49  ;;  %v2642_v49 = vadd.f32 %v5564_v17, %v5360_v47  ;;  %v2841_v47 = vadd.f32 %v5535_v35, %v5479_v53  ;;  %v2691_v17 = vadd.f32 %v5593_v1, %v5382_v39 }
 0x3c0   : > { %3136 = vmatpush.msra.mxu1 %v3081_v61  ;;  %v3091_v61 = vld [vmem:[%s5858_s9 + $0x80] sm:$0xff] }
 0x3c1   : > { %3160 = vmatpush.msra.mxu2 %v3096_v19 }
 0x3c2   : > { %v2765_v40 = vpop.f32.mrf.mxu2  ;;  %3137 = vmatpush.msra.mxu1 %v3080_v59 }
 0x3c3   : > { %3161 = vmatpush.msra.mxu2 %v3095_v20 }
 0x3c4   : > { %v2788_v23 = vpop.f32.mrf.mxu3  ;;  %3138 = vmatpush.msra.mxu1 %v3079_v24  ;;  %v2714_v24 = vadd.f32 %v5511_v38, %v5417_v54  ;;  %v2717_v54 = vadd.f32 %v5521_v45, %v5435_v27  ;;  %v2916_v45 = vadd.f32 %v5537_v3, %v5509_v48 }
 0x3c5   : > { %3162 = vmatpush.msra.mxu2 %v3094_v44  ;;  %v2789_v20 = vadd.f32 %v2788_v23, %v5463_v11  ;;  %v5719_v44 = vld [vmem:[#allocation15] sm:$0x7]  ;;  %v2766_v23 = vadd.f32 %v2765_v40, %v5453_v31 }
 0x3c6   : > { %3139 = vmatpush.msra.mxu1 %v3078_v42 }
 0x3c7   : > { %3163 = vmatpush.msra.mxu2 %v3093_v58 }
 0x3c8   : > { %3140 = vmatpush.msra.mxu1 %v3077_v4  ;;  %v3021_v4 = vadd.f32 %v2714_v24, %v2639_v14  ;;  %v3024_v14 = vadd.f32 %v2717_v54, %v2642_v49  ;;  %v3203_v54 = vld [vmem:[%s5902_s17 + $0x28] sm:$0xff] }
 0x3c9   : > { %3164 = vmatpush.msra.mxu2 %v3092_v13  ;;  %v3053_v13 = vperm.slane %v5719_v44, 2 }
 0x3ca   : > { %v2768_v16 = vpop.f32.mrf.mxu2  ;;  %3141 = vmatpush.msra.mxu1 %v3076_v52 }
 0x3cb   : > { %3165 = vmatpush.msra.mxu2 %v3091_v61  ;;  %v2769_v48 = vadd.f32 %v2768_v16, %v5469_v63 }
 0x3cc   : > { %v2791_v43 = vpop.f32.mrf.mxu3  ;;  %3142 = vmatpush.msra.mxu1 %v3075_v25 }
 0x3cd   : > { %v2792_v11 = vadd.f32 %v2791_v43, %v5471_v26  ;;  %v2616_v26 = vadd.f32 %v5542_v55, %v5312_v2  ;;  %v2671_v2 = vadd.f32 %v5640_v21, %v5395_v57  ;;  %v2694_v57 = vadd.f32 %v5642_v8, %v5406_v18 }
 0x3ce   : > { %v2844_v21 = vadd.f32 %v5552_v6, %v5491_v41  ;;  %v2919_v18 = vadd.f32 %v5554_v10, %v5513_v50 }
 0x3d2   : > { %v2863_v59 = vpop.f32.mrf.mxu2 }
 0x3d3   : > { %v2864_v42 = vadd.f32 %v2863_v59, %v5493_v5 }
 0x3d4   : > { %v2892_v19 = vpop.f32.mrf.mxu3 }
 0x3d5   : > { %v3027_v58 = vadd.f32 %v2864_v42, %v2789_v20  ;;  %v2893_v39 = vadd.f32 %v2892_v19, %v5499_v34  ;;  %v3052_v20 = vperm.slane %v5719_v44, 1  ;;  %v2746_v34 = vadd.f32 %v5527_v46, %v5449_v7 }
 0x3d6   : > { %v2619_v7 = vadd.f32 %v5562_v9, %v5338_v62 }
 0x3d7   : > { %v3039_v52 = vadd.f32 %v3027_v58, %v3021_v4 }
 0x3d9   : > { %v3045_v56 = vadd.f32 %v3039_v52, %v5590_v0  ;;  %v3020_v0 = vadd.f32 %v2691_v17, %v2616_v26  ;;  %v3913_v17 = vld [vmem:[#allocation17] ss:$0 sm:$0xff] }
 0x3da   : > { %v2866_v25 = vpop.f32.mrf.mxu2 }
 0x3db   : > { %v3059_v5 = vadd.f32 %v3053_v13, %v3045_v56  ;;  %v2867_v38 = vadd.f32 %v2866_v25, %v5501_v36  ;;  %v3026_v36 = vadd.f32 %v2841_v47, %v2766_v23  ;;  %v3199_v23 = vld [vmem:[%s5902_s17 + $0x8] sm:$0xff] }
 0x3dc   : > { %v2895_v61 = vpop.f32.mrf.mxu3 }
 0x3dd   : > { %v3065_v59 = vmax.f32 %v3059_v5, 0.0  ;;  %v3030_v24 = vadd.f32 %v2867_v38, %v2792_v11  ;;  %v3038_v55 = vadd.f32 %v3026_v36, %v3020_v0  ;;  %v2896_v41 = vadd.f32 %v2895_v61, %v5507_v15  ;;  %v3202_v11 = vld [vmem:[%s5902_s17 + $0x20] sm:$0xff]  ;;  %v3201_v5 = vld [vmem:[%s5902_s17 + $0x18] sm:$0xff]  ;;  %v3200_v38 = vld [vmem:[%s5902_s17 + $0x10] sm:$0xff] }
 0x3df   : > { %3071 = vst [vmem:[%s5735_s11 + $0x10] sm:$0xff] %v3065_v59  ;;  %v3042_v27 = vadd.f32 %v3030_v24, %v3024_v14  ;;  %3189 = vmatmul.f32.vlgmr.msrb.gmra.mxu3 %v3065_v59  ;;  %v3198_v14 = vld [vmem:[%s5902_s17] sm:$0xff]  ;;  %v3241_v24 = vld [vmem:[#allocation20] sm:$0xff] }
 0x3e0   : > { %v3242_v59 = vld [vmem:[#allocation20 + $0x8] sm:$0xff] }
 0x3e1   : > { %v3048_v31 = vadd.f32 %v3042_v27, %v5629_v30  ;;  %v3051_v30 = vperm.slane %v5719_v44, 0 }
 0x3e2   : > { %v2967_v53 = vpop.f32.mrf.mxu2 }
 0x3e3   : > { %v2968_v1 = vadd.f32 %v2967_v53, %v5517_v29  ;;  %v3062_v43 = vadd.f32 %v3053_v13, %v3048_v31  ;;  %v2821_v29 = vadd.f32 %v5529_v22, %v5485_v12  ;;  %v3029_v12 = vadd.f32 %v2844_v21, %v2769_v48 }
 0x3e4   : > { %v2990_v35 = vpop.f32.mrf.mxu3 }
 0x3e5   : > { %v2991_v40 = vadd.f32 %v2990_v35, %v5519_v60  ;;  %v3031_v3 = vadd.f32 %v2968_v1, %v2893_v39  ;;  %v3068_v4 = vmax.f32 %v3062_v43, 0.0  ;;  %v2596_v60 = vadd.f32 %v5533_v33, %v5296_v32 }
 0x3e6   : > { %v3028_v32 = vadd.f32 %v2821_v29, %v2746_v34  ;;  %v3023_v33 = vadd.f32 %v2694_v57, %v2619_v7 }
 0x3e7   : > { %v3032_v42 = vadd.f32 %v2991_v40, %v2916_v45  ;;  %v3043_v63 = vadd.f32 %v5627_v51, %v3031_v3  ;;  %3074 = vst [vmem:[%s5735_s11 + $0x28] sm:$0xff] %v3068_v4  ;;  %3192 = vmatmul.f32.gmra.mxu3 %v3068_v4  ;;  %v3022_v46 = vadd.f32 %v2671_v2, %v2596_v60 }
 0x3e8   : > { %v3041_v52 = vadd.f32 %v3029_v12, %v3023_v33 }
 0x3e9   : > { %v3044_v16 = vadd.f32 %v3038_v55, %v3032_v42  ;;  %v3057_v22 = vadd.f32 %v3051_v30, %v3043_v63  ;;  %v3040_v9 = vadd.f32 %v3028_v32, %v3022_v46  ;;  %v3914_v55 = vld [vmem:[#allocation18] ss:$0 sm:$0xff] }
 0x3ea   : > { %v2970_v6 = vpop.f32.mrf.mxu2 }
 0x3eb   : > { %v3058_v19 = vadd.f32 %v3052_v20, %v3044_v16  ;;  %v3063_v8 = vmax.f32 %v3057_v22, 0.0  ;;  %v2971_v58 = vadd.f32 %v2970_v6, %v5523_v28  ;;  %v3205_v28 = vld [vmem:[%s5902_s17 + $0x38] sm:$0xff] }
 0x3ec   : > { %v2993_v51 = vpop.f32.mrf.mxu3  ;;  %3224 = vmatpush.msra.mxu0 %v3205_v28 }
 0x3ed   : > { %v3064_v44 = vmax.f32 %v3058_v19, 0.0  ;;  %v2994_v62 = vadd.f32 %v2993_v51, %v5525_v37  ;;  %3069 = vst [vmem:[%s5735_s11] sm:$0xff] %v3063_v8  ;;  %v3034_v13 = vadd.f32 %v2971_v58, %v2896_v41  ;;  %3143 = vmatmul.f32.vlgmr.msra.gmra.mxu1 %v3063_v8  ;;  %v3204_v37 = vld [vmem:[%s5902_s17 + $0x30] sm:$0xff] }
 0x3ee   : > { %3225 = vmatpush.msra.mxu0 %v3204_v37 }
 0x3ef   : > { %v3035_v49 = vadd.f32 %v2994_v62, %v2919_v18  ;;  %3166 = vmatmul.f32.vlgmr.msra.gmra.mxu2 %v3064_v44  ;;  %3070 = vst [vmem:[%s5735_s11 + $0x8] sm:$0xff] %v3064_v44  ;;  %v3046_v50 = vadd.f32 %v3040_v9, %v3034_v13 }
 0x3f0   : > { %3226 = vmatpush.msra.mxu0 %v3203_v54 }
 0x3f1   : > { %v3047_v15 = vadd.f32 %v3041_v52, %v3035_v49  ;;  %v3060_v10 = vadd.f32 %v3051_v30, %v3046_v50 }
 0x3f2   : > { %3227 = vmatpush.msra.mxu0 %v3202_v11 }
 0x3f3   : > { %v3061_v56 = vadd.f32 %v3052_v20, %v3047_v15  ;;  %v3066_v25 = vmax.f32 %v3060_v10, 0.0 }
 0x3f4   : > { %3228 = vmatpush.msra.mxu0 %v3201_v5 }
 0x3f5   : > { %v3067_v61 = vmax.f32 %v3061_v56, 0.0  ;;  %3072 = vst [vmem:[%s5735_s11 + $0x18] sm:$0xff] %v3066_v25  ;;  %3146 = vmatmul.f32.gmra.mxu1 %v3066_v25 }
 0x3f6   : > { %3229 = vmatpush.msra.mxu0 %v3200_v38 }
 0x3f7   : > { %3169 = vmatmul.f32.gmra.mxu2 %v3067_v61  ;;  %3073 = vst [vmem:[%s5735_s11 + $0x20] sm:$0xff] %v3067_v61 }
 0x3f8   : > { %3230 = vmatpush.msra.mxu0 %v3199_v23 }
 0x3fa   : > { %3231 = vmatpush.msra.mxu0 %v3198_v14 }
 0x3fc   : > { %3268 = vmatpush.msrb.mxu0 %v3242_v59 }
 0x3fe   : > { %3269 = vmatpush.msrb.mxu0 %v3241_v24 }
 0x462   : > { %v3190_v26 = vpop.f32.mrf.mxu3 }
 0x46a   : > { %v3144_v47 = vpop.f32.mrf.mxu1  ;;  %v3193_v40 = vpop.f32.mrf.mxu3 }
 0x46b   : > { %v3145_v27 = vadd.f32 %v3913_v17, %v3144_v47 }
 0x472   : > { %v3167_v36 = vpop.f32.mrf.mxu2  ;;  %v3147_v0 = vpop.f32.mrf.mxu1 }
 0x473   : > { %v3168_v31 = vadd.f32 %v3167_v36, %v3145_v27  ;;  %v3148_v35 = vadd.f32 %v3913_v17, %v3147_v0 }
 0x475   : > { %v3191_v45 = vadd.f32 %v3190_v26, %v3168_v31 }
 0x477   : > { %v3196_v53 = vmax.f32 %v3191_v45, 0.0 }
 0x479   : > { %3714 = vmatmul.msk.f32.vlgmr.msra.gmra.mxu0 %vm1878_vm2, %v3196_v53 }
 0x47a   : > { %v3170_v39 = vpop.f32.mrf.mxu2 }
 0x47b   : > { %v3171_v1 = vadd.f32 %v3170_v39, %v3148_v35 }
 0x47d   : > { %v3194_v43 = vadd.f32 %v3193_v40, %v3171_v1 }
 0x47f   : > { %v3197_v2 = vmax.f32 %v3194_v43, 0.0 }
 0x481   : > { %3715 = vmatmul.msk.f32.gmra.mxu0 %vm1878_vm2, %v3197_v2 }
 0x4f6   : > { %v3233_v30 = vpop.f32.mrf.mxu0 }
 0x4f7   : > { %v3234_v20 = vadd.f32 %v3914_v55, %v3233_v30 }
 0x4f9   : > { %v3239_v48 = vmax.f32 %v3234_v20, 0.0 }
 0x4fb   : > { %3716 = vmatmul.msk.f32.vlgmr.msrb.gmra.mxu0 %vm3247_vm3, %v3239_v48 }
 0x4fe   : > { %v3236_v3 = vpop.f32.mrf.mxu0 }
 0x4ff   : > { %v3237_v42 = vadd.f32 %v3914_v55, %v3236_v3 }
 0x501   : > { %v3240_v4 = vmax.f32 %v3237_v42, 0.0 }
 0x503   : > { %3717 = vmatmul.msk.f32.gmra.mxu0 %vm3247_vm3, %v3240_v4 }
 0x504   : > { %4305 = shalt.err (!%p4302_p9)
}
 0x505   : > { %s4419_s11 = smov 384   ;;  %s4420_s4 = smov 24   ;;  %v3915_v34 = vld [vmem:[#allocation21] ss:$0 sm:$0xff] }
 0x506   : > { %3785 = dma.vmem_to_hbm [thread:$0]  (%p4551_p6), %s3316_s27, 768, %s3318_s28, %s3285_s16, %s4419_s11, %s4419_s11, %s4420_s4  }
 0x507   : > { %s3566_s29 = sshll.u32 %s4703_s0, 4  ;;  %s3727_s3 = sshll.u32 %s4529_s25, 4 }
 0x508   : > { %s5905_s18 = sld [smem:[#allocation48_spill]]  ;;  %s834_s21 = scalar_lea.vmem [#allocation23], %s3566_s29 }
 0x509   : > { %s3297_s15 = sshll.u32 %s834_s21, 4  ;;  %s3280_s27 = scalar_lea.sflag [#allocation5], %s4703_s0  ;;  %s3298_s15 = int_to_ptr.vmem [resolvable:$true] %s3297_s15 }
 0x50e   : > { %s3296_s26 = scalar_lea.hbm %s5905_s18, %s3727_s3  ;;  %s4326_s19 = scalar_lea.hbm %s5905_s18, 48 }
 0x50f   : > { %s3299_s2 = sshll.u32 %s3296_s26, 4  ;;  %s3300_s2 = int_to_ptr.hbm [resolvable:$true] %s3299_s2 }
 0x510   : > { %s4320_s28 = sshra.s32 %s3300_s2, 4  ;;  %s4321_s28 = int_to_ptr.hbm [resolvable:$true] %s4320_s28 }
 0x511   : > { %s4322_s25 = scalar_lea.hbm %s4321_s28, 16  ;;  %p4327_p0 = scmp.lt.s32.totalorder %s4321_s28, %s5905_s18 }
 0x512   : > { %p4323_p11 = scmp.ne.s32.totalorder %s4321_s28, %s4322_s25  ;;  %p4328_p1 = scmp.lt.s32.totalorder %s4326_s19, %s4322_s25 }
 0x514   : > { %p4324_p12 = pnand %p4323_p11, %p4551_p6  ;;  %p4329_p2 = por %p4328_p1, %p4327_p0 }
 0x516   : > { %p4325_p13 = pneg %p4324_p12 }
 0x518   : > { %p4330_p3 = pnand %p4329_p2, %p4325_p13 }
 0x578   : > { %v3271_v29 = vpop.f32.mrf.mxu0 }
 0x579   : > { %v3272_v60 = vadd.f32 %v3915_v34, %v3271_v29 }
 0x57b   : > { %3277 = vst [vmem:[%s834_s21] sm:$0xff] %v3272_v60 }
 0x580   : > { %v3274_v57 = vpop.f32.mrf.mxu0 }
 0x581   : > { %v3275_v21 = vadd.f32 %v3915_v34, %v3274_v57 }
 0x583   : > { %3278 = vst [vmem:[%s834_s21 + $0x8] sm:$0xff] %v3275_v21 }
 0x584   : > { %4333 = shalt.err (!%p4330_p3)
}
 0x585   : > { %s4421_s0 = smov 128   ;;  %s4422_s29 = smov 8  }
 0x586   : > { %3784 = dma.vmem_to_hbm [thread:$0]  (%p4551_p6), %s3298_s15, 256, %s3300_s2, %s3280_s27, %s4421_s0, %s4421_s0, %s4422_s29  }
 0x587 PF: > { %s5906_s3 = sld [smem:[#allocation35_spill]]  ;;  %p3856_p4 = scmp.ge.s32.totalorder %s4400_s24, 2 }
 0x589   : > { %p3826_p5 = pnand %p3856_p4, %p4557_p10 }
 0x58b   : > { %p3827_p7 = pneg %p3826_p5 }
 0x58d   : > { %s3332_s1 = sand.u32 1, %s5906_s3  }
 0x58e   : > { %s3333_s26 = scalar_lea.sflag [#allocation5], %s3332_s1 }
 0x58f   : > { %4379 = dma.done.wait (%p3827_p7), %s3333_s26, 256  }
 0x590   : > { %4381 = vsyncadd (%p3827_p7), %s3333_s26, 4294967040  ;;  %s3343_s21 = scalar_lea.sflag [#allocation25], %s3332_s1 }
 0x591   : > { %4383 = dma.done.wait (%p3827_p7), %s3343_s21, 768  }
 0x592   : > { %4385 = vsyncadd (%p3827_p7), %s3343_s21, 4294966528  ;;  %s5908_s24 = sld [smem:[#allocation36_spill]]  ;;  %s5910_s21 = smov %s4392_s22 }
 0x593   : > { %s5909_s30 = sld [smem:[#allocation37_spill]]  ;;  %s5911_s22 = smov %s4396_s23 }
 0x598   : > { %p37_p6 = scmp.ge.s32.totalorder %s5908_s24, 5  }
 0x599   : > { %s5912_s23 = smov %s5909_s30 }
 0x59a   :  { %39 = sbr.rel (!%p37_p6) target bundleno = 23 (0x17), region = 224 }
 0x59f   :  { %3349 = vsyncpa [#allocation4], 1 }
 0x5a0   :  { %3351 = vsyncpa [#allocation4 + $0x1], 1 }
 0x5a1   :  { %3352 = vsyncpa [#allocation7], 1 }
 0x5a2   :  { %3353 = vsyncpa [#allocation10], 1 }
 0x5a3   :  { %3354 = vsyncpa [#allocation13], 1 }
 0x5a4   :  { %3355 = vsyncpa [#allocation16], 1 }
 0x5a5   :  { %3356 = vsyncpa [#allocation19], 1 }
 0x5a6   :  { %3357 = vsyncpa [#allocation22], 1 }
 0x5a7   :  { %3358 = vsyncpa [#allocation5], 1 }
 0x5a8   :  { %3360 = vsyncpa [#allocation5 + $0x1], 1 }
 0x5a9   :  { %3361 = vsyncpa [#allocation25], 1 }
 0x5aa   :  { %3363 = vsyncpa [#allocation25 + $0x1], 1 }

// kernel: tpu_custom_call.1
= control target key start
LH: loop header
LB: loop body
LE: loop exit
PB: predicated region body
PF: predicated region fallthrough
CT: control target
= control target key end

     0   :  { %s5849_s0 = inlined_call_operand.vmem [shape: f32[12,48,30], index: 0, kind: input, shape index: {}]   ;;  %s5850_s1 = inlined_call_operand.hbm [shape: f32[30,384], index: 1, kind: input, shape index: {}]   ;;  %s5851_s2 = inlined_call_operand.hbm [shape: f32[1,384], index: 2, kind: input, shape index: {}]   ;;  %s5852_s3 = inlined_call_operand.hbm [shape: f32[384,128], index: 3, kind: input, shape index: {}]   ;;  %s5853_s4 = inlined_call_operand.hbm [shape: f32[1,128], index: 4, kind: input, shape index: {}]   ;;  %s5854_s5 = inlined_call_operand.hbm [shape: f32[1,64], index: 5, kind: input, shape index: {}]   ;;  %s5855_s6 = inlined_call_operand.hbm [shape: f32[1,64], index: 6, kind: input, shape index: {}]   ;;  %s5856_s7 = inlined_call_operand.hbm [shape: f32[768,384], index: 7, kind: input, shape index: {}]   ;;  %s5857_s8 = inlined_call_operand.hbm [shape: f32[1,384], index: 8, kind: input, shape index: {}]   ;;  %s5858_s9 = inlined_call_operand.vmem [shape: f32[384,64], index: 9, kind: input, shape index: {}]   ;;  %s5859_s10 = inlined_call_operand.hbm [shape: f32[1,64], index: 10, kind: input, shape index: {}]   ;;  %s5860_s11 = inlined_call_operand.vmem [shape: f32[64,16], index: 11, kind: input, shape index: {}]   ;;  %s5861_s12 = inlined_call_operand.hbm [shape: f32[1,16], index: 12, kind: input, shape index: {}]   ;;  %s5862_s13 = inlined_call_operand.hbm [shape: f32[16,128], index: 13, kind: input, shape index: {}]   ;;  %s5863_s14 = inlined_call_operand.hbm [shape: f32[1,128], index: 14, kind: input, shape index: {}]   ;;  %s5864_s15 = inlined_call_operand.hbm [shape: f32[48,128], index: 15, kind: output, shape index: {0}]   ;;  %s5865_s16 = inlined_call_operand.hbm [shape: f32[48,384], index: 16, kind: output, shape index: {1}]  }
   0x1   :  { %5875 = sst [smem:[#allocation40_spill]] %s5849_s0 }
   0x2   :  { %5876 = sst [smem:[#allocation41_spill]] %s5850_s1 }
   0x3   :  { %5877 = sst [smem:[#allocation42_spill]] %s5851_s2 }
   0x4   :  { %5878 = sst [smem:[#allocation43_spill]] %s5852_s3 }
   0x5   :  { %5879 = sst [smem:[#allocation44_spill]] %s5853_s4 }
   0x6   :  { %5880 = sst [smem:[#allocation45_spill]] %s5854_s5 }
   0x7   :  { %5881 = sst [smem:[#allocation46_spill]] %s5855_s6 }
   0x8   :  { %5882 = sst [smem:[#allocation47_spill]] %s5860_s11 }
   0x9   :  { %5883 = sst [smem:[#allocation48_spill]] %s5864_s15 }
   0xa   :  { %5884 = sst [smem:[#allocation49_spill]] %s5865_s16 }
   0xb   :  { %22 = vsyncpa [#allocation4], 0 }
   0xc   :  { %23 = vsyncpa [#allocation7], 0 }
   0xd   :  { %24 = vsyncpa [#allocation10], 0 }
   0xe   :  { %25 = vsyncpa [#allocation13], 0 }
   0xf   :  { %26 = vsyncpa [#allocation16], 0 }
  0x10   :  { %27 = vsyncpa [#allocation19], 0 }
  0x11   :  { %28 = vsyncpa [#allocation22], 0 }
  0x12   :  { %29 = vsyncpa [#allocation5], 0 }
  0x13   :  { %31 = vsyncpa [#allocation5 + $0x1], 0 }
  0x14   :  { %32 = vsyncpa [#allocation25], 0 }
  0x15   :  { %34 = vsyncpa [#allocation25 + $0x1], 0  ;;  %s4508_s21 = smov 0   ;;  %s4510_s22 = smov 0  }
  0x16   :  { %s4512_s23 = smov 0   ;;  %s4514_s24 = smov 0  }
  0x17 LB: > { %5885 = sst [smem:[#allocation35_spill]] %s4388_s21  ;;  %s4529_s25 = sadd.s32 4294967295, %s4400_s24   ;;  %s4400_s24 = sphi %s4514_s24, %s5908_s24   ;;  %s4396_s23 = sphi %s4512_s23, %s5912_s23   ;;  %s4392_s22 = sphi %s4510_s22, %s5911_s22   ;;  %s4388_s21 = sphi %s4508_s21, %s5910_s21  }
  0x18   : > { %s3536_s26 = sadd.s32 4294967294, %s4400_s24   ;;  %s4533_s27 = sadd.s32 1, %s4400_s24  }
  0x19   : > { %5886 = sst [smem:[#allocation36_spill]] %s4533_s27  ;;  %s47_s28 = sadd.s32 1, %s4396_s23 }
  0x1a   : > { %s44_s29 = ssub.s32 %s4400_s24, %s4533_s27  ;;  %p54_p0 = scmp.ne.s32.totalorder %s4396_s23, %s4392_s22 }
  0x1b   : > { %p45_p1 = scmp.eq.s32.totalorder %s44_s29, 0  ;;  %p55_p2 = scmp.eq.s32.totalorder %s4400_s24, 0 }
  0x1c   : > { %p378_p3 = scmp.eq.s32.totalorder %s4529_s25, 2  ;;  %p383_p4 = scmp.ne.s32.totalorder %s4392_s22, %s4388_s21 }
  0x1d   : > { %s4545_s30 = scalar_select %p45_p1, %s4396_s23, %s47_s28  }
  0x1e   : > { %p4547_p5 = por %p55_p2, %p54_p0  ;;  %p4551_p6 = por %p378_p3, %p54_p0 }
  0x1f   : > { %5887 = sst [smem:[#allocation37_spill]] %s4545_s30  ;;  %p384_p7 = scmp.eq.s32.totalorder %s3536_s26, 2 }
  0x20   : > { %s5889_s17 = scalar_select %p4551_p6, 1, 0 }
  0x21   : > { %p3537_p8 = scmp.ge.s32.totalorder %s4400_s24, 1  ;;  %p417_p9 = scmp.lt.s32.totalorder %s4400_s24, 4 }
  0x22   : > { %5890 = sst [smem:[#allocation38_spill]] %s5889_s17  ;;  %p4557_p10 = por %p384_p7, %p383_p4 }
  0x23   : > { %p3832_p11 = scmp.eq.s32.totalorder %s4529_s25, 0  ;;  %p4562_p12 = pnand %p3537_p8, %p417_p9 }
  0x24   : > { %s5891_s18 = scalar_select %p4557_p10, 1, 0 }
  0x25   : > { %s5894_s2 = sld [smem:[#allocation42_spill]]  ;;  %p3788_p13 = pneg %p4562_p12 }
  0x26   : > { %5892 = sst [smem:[#allocation39_spill]] %s5891_s18  ;;  %s4402_s26 = smov [#allocation6]  }
  0x27   : > { %s445_s30 = sshll.u32 %s4402_s26, 4  ;;  %s5895_s4 = sld [smem:[#allocation44_spill]]  ;;  %s446_s30 = int_to_ptr.vmem [resolvable:$true] %s445_s30 }
  0x28   : > { %p4576_p0 = pnand %p3832_p11, %p3788_p13  ;;  %s5897_s6 = sld [smem:[#allocation46_spill]] }
  0x29   : > { %s4403_s16 = smov [#allocation9]   ;;  %s4404_s17 = smov [#allocation12]  }
  0x2a   : > { %s471_s26 = sshll.u32 %s4403_s16, 4  ;;  %s495_s11 = sshll.u32 %s4404_s17, 4  ;;  %s472_s26 = int_to_ptr.vmem [resolvable:$true] %s471_s26  ;;  %s496_s11 = int_to_ptr.vmem [resolvable:$true] %s495_s11 }
  0x2b   : > { %s443_s29 = sshll.u32 %s5894_s2, 4  ;;  %s4405_s20 = smov [#allocation15]   ;;  %s444_s29 = int_to_ptr.hbm [resolvable:$true] %s443_s29 }
  0x2c   : > { %3794 = dma.hbm_to_vmem [thread:$0]  (!%p4576_p0), %s444_s29, 48, %s446_s30, [#allocation7]  }
  0x2d   : > { %s469_s18 = sshll.u32 %s5895_s4, 4  ;;  %s519_s4 = sshll.u32 %s5857_s8, 4  ;;  %s470_s18 = int_to_ptr.hbm [resolvable:$true] %s469_s18  ;;  %s520_s4 = int_to_ptr.hbm [resolvable:$true] %s519_s4 }
  0x2e   : > { %s493_s2 = sshll.u32 %s5897_s6, 4  ;;  %s521_s16 = sshll.u32 %s4405_s20, 4  ;;  %s494_s2 = int_to_ptr.hbm [resolvable:$true] %s493_s2  ;;  %s522_s16 = int_to_ptr.vmem [resolvable:$true] %s521_s16 }
  0x2f   : > { %3800 = dma.hbm_to_vmem [thread:$0]  (!%p4576_p0), %s470_s18, 16, %s472_s26, [#allocation10]  }
  0x30   : > { %3806 = dma.hbm_to_vmem [thread:$0]  (!%p4576_p0), %s494_s2, 16, %s496_s11, [#allocation13]  }
  0x31   : > { %s549_s30 = sshll.u32 %s5861_s12, 4  ;;  %s5898_s1 = sld [smem:[#allocation41_spill]]  ;;  %s550_s30 = int_to_ptr.hbm [resolvable:$true] %s549_s30 }
  0x32   : > { %3812 = dma.hbm_to_vmem [thread:$0]  (!%p4576_p0), %s520_s4, 48, %s522_s16, [#allocation16]  }
  0x33   : > { %s4406_s17 = smov [#allocation18]   ;;  %s4407_s2 = smov [#allocation3]  }
  0x34   : > { %s551_s21 = sshll.u32 %s4406_s17, 4  ;;  %s430_s11 = sshll.u32 %s4407_s2, 4  ;;  %s552_s21 = int_to_ptr.vmem [resolvable:$true] %s551_s21  ;;  %s431_s11 = int_to_ptr.vmem [resolvable:$true] %s430_s11 }
  0x35   : > { %3818 = dma.hbm_to_vmem [thread:$0]  (!%p4576_p0), %s550_s30, 16, %s552_s21, [#allocation19]  }
  0x36   : > { %s4408_s6 = smov 384   ;;  %s4409_s27 = smov 24  }
  0x37   : > { %s428_s26 = sshll.u32 %s5898_s1, 4  ;;  %s5899_s3 = sld [smem:[#allocation43_spill]]  ;;  %s429_s26 = int_to_ptr.hbm [resolvable:$true] %s428_s26 }
  0x38   : > { %3791 = dma.hbm_to_vmem [thread:$0]  (!%p4576_p0), %s429_s26, 1536, %s431_s11, [#allocation4], %s4408_s6, %s4408_s6, %s4409_s27  }
  0x39   : > { %s4410_s28 = smov [#allocation8]   ;;  %s5900_s5 = sld [smem:[#allocation45_spill]] }
  0x3a   : > { %s456_s18 = sshll.u32 %s4410_s28, 4  ;;  %s4411_s21 = smov 128   ;;  %s457_s18 = int_to_ptr.vmem [resolvable:$true] %s456_s18 }
  0x3b   : > { %s4412_s2 = smov 8   ;;  %s4413_s26 = smov [#allocation11]  }
  0x3c   : > { %s483_s11 = sshll.u32 %s4413_s26, 4  ;;  %s504_s28 = sshll.u32 %s5856_s7, 4  ;;  %s484_s11 = int_to_ptr.vmem [resolvable:$true] %s483_s11  ;;  %s505_s28 = int_to_ptr.hbm [resolvable:$true] %s504_s28 }
  0x3d   : > { %s454_s16 = sshll.u32 %s5899_s3, 4  ;;  %s534_s1 = sshll.u32 %s5859_s10, 4  ;;  %s455_s16 = int_to_ptr.hbm [resolvable:$true] %s454_s16  ;;  %s535_s1 = int_to_ptr.hbm [resolvable:$true] %s534_s1 }
  0x3e   : > { %3797 = dma.hbm_to_vmem [thread:$0]  (!%p4576_p0), %s455_s16, 6144, %s457_s18, [#allocation7], %s4411_s21, %s4411_s21, %s4412_s2  }
  0x3f   : > { %s481_s30 = sshll.u32 %s5900_s5, 4  ;;  %s4414_s3 = smov [#allocation14]   ;;  %s482_s30 = int_to_ptr.hbm [resolvable:$true] %s481_s30 }
  0x40   : > { %3803 = dma.hbm_to_vmem [thread:$0]  (!%p4576_p0), %s482_s30, 16, %s484_s11, [#allocation10]  }
  0x41   : > { %s506_s5 = sshll.u32 %s4414_s3, 4  ;;  %s4415_s16 = smov [#allocation17]   ;;  %s507_s5 = int_to_ptr.vmem [resolvable:$true] %s506_s5 }
  0x42   : > { %3809 = dma.hbm_to_vmem [thread:$0]  (!%p4576_p0), %s505_s28, 36864, %s507_s5, [#allocation13], %s4408_s6, %s4408_s6, %s4409_s27  }
  0x43   : > { %s536_s18 = sshll.u32 %s4415_s16, 4  ;;  %s560_s4 = sshll.u32 %s5862_s13, 4  ;;  %s537_s18 = int_to_ptr.vmem [resolvable:$true] %s536_s18  ;;  %s561_s4 = int_to_ptr.hbm [resolvable:$true] %s560_s4 }
  0x44   : > { %3815 = dma.hbm_to_vmem [thread:$0]  (!%p4576_p0), %s535_s1, 16, %s537_s18, [#allocation16]  }
  0x45   : > { %s575_s29 = sshll.u32 %s5863_s14, 4  ;;  %s4416_s3 = smov [#allocation20]   ;;  %s576_s29 = int_to_ptr.hbm [resolvable:$true] %s575_s29 }
  0x46   : > { %s562_s17 = sshll.u32 %s4416_s3, 4  ;;  %s4417_s5 = smov [#allocation21]   ;;  %s563_s17 = int_to_ptr.vmem [resolvable:$true] %s562_s17 }
  0x47   : > { %3821 = dma.hbm_to_vmem [thread:$0]  (!%p4576_p0), %s561_s4, 256, %s563_s17, [#allocation19], %s4411_s21, %s4411_s21, %s4412_s2  }
  0x48   : > { %s577_s6 = sshll.u32 %s4417_s5, 4  ;;  %p3550_p1 = scmp.ge.s32.totalorder %s4400_s24, 3  ;;  %s578_s6 = int_to_ptr.vmem [resolvable:$true] %s577_s6 }
  0x49   : > { %3824 = dma.hbm_to_vmem [thread:$0]  (!%p4576_p0), %s576_s29, 16, %s578_s6, [#allocation22]  }
  0x4a   : > { %584 = sbr.rel (%p3550_p1) target bundleno = 113 (0x71), region = 72 }
  0x4f   : > { %587 = sbr.rel (!%p4547_p5) target bundleno = 113 (0x71), region = 76  ;;  %s589_s1 = sand.u32 (%p4547_p5), 1, %s4396_s23  }
  0x50   : > { %s3726_s27 = sshll.u32 (%p4547_p5), %s4400_s24, 4  ;;  %s3732_s28 = smul.u32 (%p4547_p5), 192, %s589_s1 }
  0x51   : > { %s5901_s26 = sld [smem:[#allocation40_spill]] (%p4547_p5) }
  0x52   : > { %s4653_s15 = scalar_lea.vmem (%p4547_p5), [#allocation2], %s3732_s28 }
  0x57   : > { %s4648_s21 = scalar_lea.vmem %s5901_s26, %s3726_s27 }
  0x58   : > { %v669_v0 = vld [vmem:[%s4648_s21] sm:$0xff]  ;;  %v671_v1 = vld [vmem:[%s4648_s21 + $0x8] sm:$0xff]  ;;  %v673_v2 = vld [vmem:[%s4648_s21 + $0x30] sm:$0xff] }
  0x59   : > { %670 = vst [vmem:[%s4653_s15] sm:$0xff] %v669_v0  ;;  %v675_v3 = vld [vmem:[%s4648_s21 + $0x38] sm:$0xff]  ;;  %v677_v4 = vld [vmem:[%s4648_s21 + $0x60] sm:$0xff]  ;;  %v679_v5 = vld [vmem:[%s4648_s21 + $0x68] sm:$0xff] }
  0x5a   : > { %672 = vst [vmem:[%s4653_s15 + $0x8] sm:$0xff] %v671_v1  ;;  %v681_v6 = vld [vmem:[%s4648_s21 + $0x90] sm:$0xff]  ;;  %v683_v7 = vld [vmem:[%s4648_s21 + $0x98] sm:$0xff]  ;;  %v685_v8 = vld [vmem:[%s4648_s21 + $0xc0] sm:$0xff] }
  0x5b   : > { %674 = vst [vmem:[%s4653_s15 + $0x10] sm:$0xff] %v673_v2  ;;  %v687_v9 = vld [vmem:[%s4648_s21 + $0xc8] sm:$0xff]  ;;  %v689_v10 = vld [vmem:[%s4648_s21 + $0xf0] sm:$0xff]  ;;  %v691_v11 = vld [vmem:[%s4648_s21 + $0xf8] sm:$0xff] }
  0x5c   : > { %676 = vst [vmem:[%s4653_s15 + $0x18] sm:$0xff] %v675_v3  ;;  %v693_v12 = vld [vmem:[%s4648_s21 + $0x120] sm:$0xff]  ;;  %v695_v13 = vld [vmem:[%s4648_s21 + $0x128] sm:$0xff]  ;;  %v697_v14 = vld [vmem:[%s4648_s21 + $0x150] sm:$0xff] }
  0x5d   : > { %678 = vst [vmem:[%s4653_s15 + $0x20] sm:$0xff] %v677_v4  ;;  %v699_v15 = vld [vmem:[%s4648_s21 + $0x158] sm:$0xff]  ;;  %v701_v16 = vld [vmem:[%s4648_s21 + $0x180] sm:$0xff]  ;;  %v703_v17 = vld [vmem:[%s4648_s21 + $0x188] sm:$0xff] }
  0x5e   : > { %680 = vst [vmem:[%s4653_s15 + $0x28] sm:$0xff] %v679_v5  ;;  %v705_v18 = vld [vmem:[%s4648_s21 + $0x1b0] sm:$0xff]  ;;  %v707_v19 = vld [vmem:[%s4648_s21 + $0x1b8] sm:$0xff]  ;;  %v709_v20 = vld [vmem:[%s4648_s21 + $0x1e0] sm:$0xff] }
  0x5f   : > { %682 = vst [vmem:[%s4653_s15 + $0x30] sm:$0xff] %v681_v6  ;;  %v711_v21 = vld [vmem:[%s4648_s21 + $0x1e8] sm:$0xff]  ;;  %v713_v22 = vld [vmem:[%s4648_s21 + $0x210] sm:$0xff]  ;;  %v715_v23 = vld [vmem:[%s4648_s21 + $0x218] sm:$0xff] }
  0x60   : > { %684 = vst [vmem:[%s4653_s15 + $0x38] sm:$0xff] %v683_v7 }
  0x61   : > { %686 = vst [vmem:[%s4653_s15 + $0x40] sm:$0xff] %v685_v8 }
  0x62   : > { %688 = vst [vmem:[%s4653_s15 + $0x48] sm:$0xff] %v687_v9 }
  0x63   : > { %690 = vst [vmem:[%s4653_s15 + $0x50] sm:$0xff] %v689_v10 }
  0x64   : > { %692 = vst [vmem:[%s4653_s15 + $0x58] sm:$0xff] %v691_v11 }
  0x65   : > { %694 = vst [vmem:[%s4653_s15 + $0x60] sm:$0xff] %v693_v12 }
  0x66   : > { %696 = vst [vmem:[%s4653_s15 + $0x68] sm:$0xff] %v695_v13 }
  0x67   : > { %698 = vst [vmem:[%s4653_s15 + $0x70] sm:$0xff] %v697_v14 }
  0x68   : > { %700 = vst [vmem:[%s4653_s15 + $0x78] sm:$0xff] %v699_v15 }
  0x69   : > { %702 = vst [vmem:[%s4653_s15 + $0x80] sm:$0xff] %v701_v16 }
  0x6a   : > { %704 = vst [vmem:[%s4653_s15 + $0x88] sm:$0xff] %v703_v17 }
  0x6b   : > { %706 = vst [vmem:[%s4653_s15 + $0x90] sm:$0xff] %v705_v18 }
  0x6c   : > { %708 = vst [vmem:[%s4653_s15 + $0x98] sm:$0xff] %v707_v19 }
  0x6d   : > { %710 = vst [vmem:[%s4653_s15 + $0xa0] sm:$0xff] %v709_v20 }
  0x6e   : > { %712 = vst [vmem:[%s4653_s15 + $0xa8] sm:$0xff] %v711_v21 }
  0x6f   : > { %714 = vst [vmem:[%s4653_s15 + $0xb0] sm:$0xff] %v713_v22 }
  0x70   : > { %716 = vst [vmem:[%s4653_s15 + $0xb8] sm:$0xff] %v715_v23 }
  0x71 PF: > { %725 = sbr.rel (%p4562_p12) target bundleno = 1415 (0x587), region = 114  ;;  %s4703_s0 = sand.u32 (!%p4562_p12), 1, %s4392_s22  }
  0x72   : > { %s3733_s2 = smul.u32 (!%p4562_p12), 192, %s4703_s0 }
  0x74   : > { %s4706_s20 = scalar_lea.vmem (!%p4562_p12), [#allocation2], %s3733_s2 }
  0x76   : > { %4351 = dma.done.wait (%p3832_p11), [#allocation4], 1536  }
  0x77   : > { %4353 = vsyncadd (%p3832_p11), [#allocation4], 4294965760 }
  0x78   : > { %4355 = dma.done.wait (%p3832_p11), [#allocation7], 6192  }
  0x79   : > { %4357 = vsyncadd (%p3832_p11), [#allocation7], 4294961104 }
  0x7a   : > { %4359 = dma.done.wait (%p3832_p11), [#allocation10], 32  }
  0x7b   : > { %4361 = vsyncadd (%p3832_p11), [#allocation10], 4294967264 }
  0x7c   : > { %4363 = dma.done.wait (%p3832_p11), [#allocation13], 36880  }
  0x7d   : > { %4365 = vsyncadd (%p3832_p11), [#allocation13], 4294930416 }
  0x7e   : > { %4367 = dma.done.wait (%p3832_p11), [#allocation16], 64  }
  0x7f   : > { %4369 = vsyncadd (%p3832_p11), [#allocation16], 4294967232 }
  0x80   : > { %4371 = dma.done.wait (%p3832_p11), [#allocation19], 272  }
  0x81   : > { %4373 = vsyncadd (%p3832_p11), [#allocation19], 4294967024 }
  0x82   : > { %4375 = dma.done.wait (%p3832_p11), [#allocation22], 16  }
  0x83   : > { %4377 = vsyncadd (%p3832_p11), [#allocation22], 4294967280  ;;  %vm962_vm0 = vcmask 1045504   ;;  %v878_v24 = vld [vmem:[#allocation3 + $0x48] sm:$0x3f]  ;;  %v875_v25 = vld [vmem:[#allocation3 + $0x30] sm:$0xff] }
  0x84   : > { %3567 = vmatpush.msk.msra.mxu0 %vm962_vm0, %v878_v24  ;;  %3728 = vmatpush.msk.msra.mxu1 %vm962_vm0, %v878_v24  ;;  %v872_v26 = vld [vmem:[#allocation3 + $0x18] sm:$0xff]  ;;  %v869_v27 = vld [vmem:[#allocation3] sm:$0xff]  ;;  %vm889_vm1 = vcmask 244736   ;;  %v879_v30 = vld [vmem:[#allocation3 + $0x50] sm:$0x3f]  ;;  %s4418_s19 = smov 64  }
  0x85   : > { %v845_v28 = vld [vmem:[%s4706_s20] sm:$0xff]  ;;  %v4740_v29 = vld [vmem:[%s4706_s20 + $0xb8] sm:$0xff]  ;;  %v1340_v35 = vld [vmem:[#allocation8 + $0xe8] sm:$0xff]  ;;  %vm1878_vm2 = vcmask 523264   ;;  %s3734_s30 = smul.u32 48, %s4703_s0  ;;  %s5902_s17 = sld [smem:[#allocation47_spill]] }
  0x86   : > { %985 = vmatpush.msra.mxu0 %v875_v25  ;;  %3729 = vmatpush.msra.mxu1 %v875_v25  ;;  %v1342_v31 = vld [vmem:[#allocation8 + $0xf8] sm:$0xff]  ;;  %v1341_v33 = vld [vmem:[#allocation8 + $0xf0] sm:$0xff]  ;;  %v870_v36 = vld [vmem:[#allocation3 + $0x8] sm:$0xff]  ;;  %vm3247_vm3 = vcmask 130048   ;;  %s3735_s29 = smul.u32 48, %s4529_s25  ;;  %s5904_s6 = sld [smem:[#allocation49_spill]] }
  0x87   : > { %v876_v32 = vld [vmem:[#allocation3 + $0x38] sm:$0xff]  ;;  %v873_v34 = vld [vmem:[#allocation3 + $0x20] sm:$0xff]  ;;  %v846_v37 = vld [vmem:[%s4706_s20 + $0x8] sm:$0xff]  ;;  %s5735_s11 = scalar_lea.vmem [#allocation24], %s3734_s30  ;;  %s3285_s16 = scalar_lea.sflag [#allocation25], %s4703_s0 }
  0x88   : > { %986 = vmatpush.msra.mxu0 %v872_v26  ;;  %3730 = vmatpush.msra.mxu1 %v872_v26  ;;  %v1358_v38 = vld [vmem:[#allocation8 + $0x178] sm:$0xff]  ;;  %v1357_v39 = vld [vmem:[#allocation8 + $0x170] sm:$0xff]  ;;  %v1356_v40 = vld [vmem:[#allocation8 + $0x168] sm:$0xff]  ;;  %s3315_s27 = sshll.u32 %s5735_s11, 4  ;;  %s3316_s27 = int_to_ptr.vmem [resolvable:$true] %s3315_s27 }
  0x89   : > { %v1355_v41 = vld [vmem:[#allocation8 + $0x160] sm:$0xff]  ;;  %v847_v42 = vld [vmem:[%s4706_s20 + $0x10] sm:$0xff]  ;;  %v848_v44 = vld [vmem:[%s4706_s20 + $0x18] sm:$0xff] }
  0x8a   : > { %987 = vmatpush.msra.mxu0 %v869_v27  ;;  %3731 = vmatpush.msra.mxu1 %v869_v27  ;;  %v1339_v43 = vld [vmem:[#allocation8 + $0xe0] sm:$0xff]  ;;  %v1354_v45 = vld [vmem:[#allocation8 + $0x158] sm:$0xff]  ;;  %v871_v50 = vld [vmem:[#allocation3 + $0x10] sm:$0xff] }
  0x8b   : > { %3568 = vmatmul.msk.f32.vlgmr.msra.gmra.mxu0 %vm889_vm1, %v845_v28  ;;  %3591 = vmatmul.msk.f32.vlgmr.msra.gmra.mxu1 %vm889_vm1, %v4740_v29  ;;  %v880_v46 = vld [vmem:[#allocation3 + $0x58] sm:$0x3f]  ;;  %v877_v47 = vld [vmem:[#allocation3 + $0x40] sm:$0xff]  ;;  %v874_v49 = vld [vmem:[#allocation3 + $0x28] sm:$0xff] }
  0x8c   : > { %3592 = vmatpush.msk.msrb.mxu1 %vm962_vm0, %v879_v30  ;;  %1452 = vmatpush.msrb.mxu0 %v1342_v31  ;;  %v1338_v48 = vld [vmem:[#allocation8 + $0xd8] sm:$0xff]  ;;  %v1353_v52 = vld [vmem:[#allocation8 + $0x150] sm:$0xff]  ;;  %v850_v53 = vld [vmem:[%s4706_s20 + $0x28] sm:$0xff]  ;;  %s3314_s1 = scalar_lea.hbm %s5904_s6, %s3735_s29  ;;  %s4298_s2 = scalar_lea.hbm %s5904_s6, 144 }
  0x8d   : > { %3617 = vmatpush.msk.msra.mxu2 %vm962_vm0, %v880_v46  ;;  %v849_v51 = vld [vmem:[%s4706_s20 + $0x20] sm:$0xff]  ;;  %v1337_v54 = vld [vmem:[#allocation8 + $0xd0] sm:$0xff]  ;;  %v1352_v56 = vld [vmem:[#allocation8 + $0x148] sm:$0xff]  ;;  %s3317_s28 = sshll.u32 %s3314_s1, 4  ;;  %s3318_s28 = int_to_ptr.hbm [resolvable:$true] %s3317_s28 }
  0x8e   : > { %1074 = vmatpush.msrb.mxu1 %v876_v32  ;;  %1453 = vmatpush.msrb.mxu0 %v1341_v33  ;;  %v851_v55 = vld [vmem:[%s4706_s20 + $0x30] sm:$0xff]  ;;  %v852_v58 = vld [vmem:[%s4706_s20 + $0x38] sm:$0xff]  ;;  %v1351_v59 = vld [vmem:[#allocation8 + $0x140] sm:$0xff]  ;;  %s4292_s18 = sshra.s32 %s3318_s28, 4  ;;  %s4293_s18 = int_to_ptr.hbm [resolvable:$true] %s4292_s18 }
  0x8f   : > { %1163 = vmatpush.msra.mxu2 %v877_v47  ;;  %v1336_v57 = vld [vmem:[#allocation8 + $0xc8] sm:$0xff]  ;;  %v1335_v60 = vld [vmem:[#allocation8 + $0xc0] sm:$0xff]  ;;  %v1326_v62 = vld [vmem:[#allocation8 + $0x78] sm:$0xff]  ;;  %s4294_s26 = scalar_lea.hbm %s4293_s18, 48  ;;  %p4299_p5 = scmp.lt.s32.totalorder %s4293_s18, %s5904_s6 }
  0x90   : > { %1075 = vmatpush.msrb.mxu1 %v873_v34  ;;  %1454 = vmatpush.msrb.mxu0 %v1340_v35  ;;  %v853_v61 = vld [vmem:[%s4706_s20 + $0x40] sm:$0xff]  ;;  %v1325_v63 = vld [vmem:[#allocation8 + $0x70] sm:$0xff]  ;;  %v1324_v0 = vld [vmem:[#allocation8 + $0x68] sm:$0xff]  ;;  %p4295_p2 = scmp.ne.s32.totalorder %s4293_s18, %s4294_s26  ;;  %p4300_p7 = scmp.lt.s32.totalorder %s4298_s2, %s4294_s26 }
  0x91   : > { %1164 = vmatpush.msra.mxu2 %v874_v49  ;;  %1363 = vmatpush.msra.mxu3 %v1326_v62  ;;  %v854_v1 = vld [vmem:[%s4706_s20 + $0x48] sm:$0xff]  ;;  %v1350_v2 = vld [vmem:[#allocation8 + $0x138] sm:$0xff]  ;;  %v1321_v6 = vld [vmem:[#allocation8 + $0x50] sm:$0xff] }
  0x92   : > { %1076 = vmatpush.msrb.mxu1 %v870_v36  ;;  %1455 = vmatpush.msrb.mxu0 %v1339_v43  ;;  %v1323_v3 = vld [vmem:[#allocation8 + $0x60] sm:$0xff]  ;;  %v1334_v4 = vld [vmem:[#allocation8 + $0xb8] sm:$0xff]  ;;  %v855_v7 = vld [vmem:[%s4706_s20 + $0x50] sm:$0xff]  ;;  %p4296_p3 = pnand %p4295_p2, %p4551_p6  ;;  %p4301_p8 = por %p4300_p7, %p4299_p5 }
  0x93   : > { %3569 = vmatmul.msk.f32.gmra.mxu0 %vm889_vm1, %v846_v37  ;;  %3593 = vmatmul.msk.f32.vlgmr.msrb.gmra.mxu1 %vm889_vm1, %v845_v28  ;;  %v1322_v5 = vld [vmem:[#allocation8 + $0x58] sm:$0xff]  ;;  %v1320_v8 = vld [vmem:[#allocation8 + $0x48] sm:$0xff]  ;;  %v1319_v9 = vld [vmem:[#allocation8 + $0x40] sm:$0xff] }
  0x94   : > { %1541 = vmatpush.msra.mxu1 %v1358_v38  ;;  %1456 = vmatpush.msrb.mxu0 %v1338_v48  ;;  %v1349_v10 = vld [vmem:[#allocation8 + $0x130] sm:$0xff]  ;;  %v1318_v12 = vld [vmem:[#allocation8 + $0x38] sm:$0xff]  ;;  %v1316_v15 = vld [vmem:[#allocation8 + $0x28] sm:$0xff]  ;;  %p4297_p4 = pneg %p4296_p3 }
  0x95   : > { %1165 = vmatpush.msra.mxu2 %v871_v50  ;;  %1364 = vmatpush.msra.mxu3 %v1325_v63  ;;  %v1333_v11 = vld [vmem:[#allocation8 + $0xb0] sm:$0xff]  ;;  %v1315_v16 = vld [vmem:[#allocation8 + $0x20] sm:$0xff]  ;;  %v1314_v17 = vld [vmem:[#allocation8 + $0x18] sm:$0xff] }
  0x96   : > { %1542 = vmatpush.msra.mxu1 %v1357_v39  ;;  %3618 = vmatmul.msk.f32.vlgmr.msra.gmra.mxu2 %vm889_vm1, %v845_v28  ;;  %v1317_v13 = vld [vmem:[#allocation8 + $0x30] sm:$0xff]  ;;  %v857_v19 = vld [vmem:[%s4706_s20 + $0x60] sm:$0xff]  ;;  %v1312_v20 = vld [vmem:[#allocation8 + $0x8] sm:$0xff]  ;;  %p4302_p9 = pnand %p4301_p8, %p4297_p4 }
  0x97   : > { %1457 = vmatpush.msrb.mxu0 %v1337_v54  ;;  %1365 = vmatpush.msra.mxu3 %v1324_v0  ;;  %v856_v14 = vld [vmem:[%s4706_s20 + $0x58] sm:$0xff]  ;;  %v1348_v21 = vld [vmem:[#allocation8 + $0x128] sm:$0xff]  ;;  %v1311_v22 = vld [vmem:[#allocation8] sm:$0xff] }
  0x98   : > { %1543 = vmatpush.msra.mxu1 %v1356_v40  ;;  %v1313_v18 = vld [vmem:[#allocation8 + $0x10] sm:$0xff]  ;;  %v1332_v23 = vld [vmem:[#allocation8 + $0xa8] sm:$0xff]  ;;  %v1347_v25 = vld [vmem:[#allocation8 + $0x120] sm:$0xff] }
  0x99   : > { %1458 = vmatpush.msrb.mxu0 %v1336_v57  ;;  %1366 = vmatpush.msra.mxu3 %v1323_v3  ;;  %v858_v24 = vld [vmem:[%s4706_s20 + $0x68] sm:$0xff]  ;;  %v859_v26 = vld [vmem:[%s4706_s20 + $0x70] sm:$0xff]  ;;  %v860_v28 = vld [vmem:[%s4706_s20 + $0x78] sm:$0xff] }
  0x9a   : > { %1544 = vmatpush.msra.mxu1 %v1355_v41  ;;  %v1331_v27 = vld [vmem:[#allocation8 + $0xa0] sm:$0xff]  ;;  %v4801_v30 = vld [vmem:[#allocation6] sm:$0x7]  ;;  %v1329_v39 = vld [vmem:[#allocation8 + $0x90] sm:$0xff] }
  0x9b   : > { %3570 = vmatmul.msk.f32.gmra.mxu0 %vm889_vm1, %v847_v42  ;;  %3594 = vmatmul.msk.f32.gmra.mxu1 %vm889_vm1, %v846_v37  ;;  %v1330_v31 = vld [vmem:[#allocation8 + $0x98] sm:$0xff]  ;;  %v4807_v33 = vperm.slane %v4801_v30, 0  ;;  %v1345_v40 = vld [vmem:[#allocation8 + $0x110] sm:$0xff]  ;;  %v862_v43 = vld [vmem:[%s4706_s20 + $0x88] sm:$0xff] }
  0x9c   : > { %1545 = vmatpush.msra.mxu1 %v1354_v45  ;;  %1459 = vmatpush.msrb.mxu0 %v1335_v60  ;;  %v1346_v32 = vld [vmem:[#allocation8 + $0x118] sm:$0xff]  ;;  %v863_v48 = vld [vmem:[%s4706_s20 + $0x90] sm:$0xff]  ;;  %v1327_v57 = vld [vmem:[#allocation8 + $0x80] sm:$0xff] }
  0x9d   : > { %1367 = vmatpush.msra.mxu3 %v1322_v5  ;;  %v861_v36 = vld [vmem:[%s4706_s20 + $0x80] sm:$0xff] }
  0x9e   : > { %1546 = vmatpush.msra.mxu1 %v1353_v52  ;;  %3619 = vmatmul.msk.f32.gmra.mxu2 %vm889_vm1, %v846_v37  ;;  %v1344_v52 = vld [vmem:[#allocation8 + $0x108] sm:$0xff]  ;;  %v865_v62 = vld [vmem:[%s4706_s20 + $0xa0] sm:$0xff] }
  0x9f   : > { %1460 = vmatpush.msrb.mxu0 %v1334_v4  ;;  %1368 = vmatpush.msra.mxu3 %v1321_v6  ;;  %v866_v4 = vld [vmem:[%s4706_s20 + $0xa8] sm:$0xff] }
  0xa0   : > { %1547 = vmatpush.msra.mxu1 %v1352_v56 }
  0xa1   : > { %1369 = vmatpush.msra.mxu3 %v1320_v8  ;;  %1461 = vmatpush.msrb.mxu0 %v1333_v11  ;;  %v4855_v11 = vperm.slane %v4801_v30, 1 }
  0xa2   : > { %1548 = vmatpush.msra.mxu1 %v1351_v59  ;;  %v1343_v59 = vld [vmem:[#allocation8 + $0x100] sm:$0xff] }
  0xa3   : > { %3571 = vmatmul.msk.f32.gmra.mxu0 %vm889_vm1, %v848_v44  ;;  %3595 = vmatmul.msk.f32.gmra.mxu1 %vm889_vm1, %v847_v42 }
  0xa4   : > { %1549 = vmatpush.msra.mxu1 %v1350_v2  ;;  %1370 = vmatpush.msra.mxu3 %v1319_v9 }
  0xa5   : > { %1462 = vmatpush.msrb.mxu0 %v1332_v23 }
  0xa6   : > { %3620 = vmatmul.msk.f32.gmra.mxu2 %vm889_vm1, %v847_v42  ;;  %1550 = vmatpush.msra.mxu1 %v1349_v10  ;;  %v867_v10 = vld [vmem:[%s4706_s20 + $0xb0] sm:$0xff] }
  0xa7   : > { %1371 = vmatpush.msra.mxu3 %v1318_v12  ;;  %1463 = vmatpush.msrb.mxu0 %v1331_v27 }
  0xa8   : > { %1551 = vmatpush.msra.mxu1 %v1348_v21 }
  0xa9   : > { %1372 = vmatpush.msra.mxu3 %v1317_v13  ;;  %1464 = vmatpush.msrb.mxu0 %v1330_v31 }
  0xaa   : > { %1552 = vmatpush.msra.mxu1 %v1347_v25 }
  0xab   : > { %3572 = vmatmul.msk.f32.gmra.mxu0 %vm889_vm1, %v849_v51  ;;  %3596 = vmatmul.msk.f32.gmra.mxu1 %vm889_vm1, %v848_v44 }
  0xac   : > { %1373 = vmatpush.msra.mxu3 %v1316_v15  ;;  %1553 = vmatpush.msra.mxu1 %v1346_v32 }
  0xad   : > { %1465 = vmatpush.msrb.mxu0 %v1329_v39 }
  0xae   : > { %3621 = vmatmul.msk.f32.gmra.mxu2 %vm889_vm1, %v848_v44  ;;  %1374 = vmatpush.msra.mxu3 %v1315_v16 }
  0xaf   : > { %1554 = vmatpush.msra.mxu1 %v1345_v40 }
  0xb0   : > { %1375 = vmatpush.msra.mxu3 %v1314_v17 }
  0xb1   : > { %1555 = vmatpush.msra.mxu1 %v1344_v52 }
  0xb2   : > { %1376 = vmatpush.msra.mxu3 %v1313_v18 }
  0xb3   : > { %3573 = vmatmul.msk.f32.gmra.mxu0 %vm889_vm1, %v850_v53  ;;  %3597 = vmatmul.msk.f32.gmra.mxu1 %vm889_vm1, %v849_v51 }
  0xb4   : > { %1377 = vmatpush.msra.mxu3 %v1312_v20  ;;  %1556 = vmatpush.msra.mxu1 %v1343_v59 }
  0xb6   : > { %3622 = vmatmul.msk.f32.gmra.mxu2 %vm889_vm1, %v849_v51  ;;  %1378 = vmatpush.msra.mxu3 %v1311_v22  ;;  %v1328_v51 = vld [vmem:[#allocation8 + $0x88] sm:$0xff]  ;;  %v4871_v22 = vperm.slane %v4801_v30, 2 }
  0xb7   : > { %1466 = vmatpush.msrb.mxu0 %v1328_v51 }
  0xb9   : > { %1467 = vmatpush.msrb.mxu0 %v1327_v57 }
  0xbb   : > { %3574 = vmatmul.msk.f32.gmra.mxu0 %vm889_vm1, %v851_v55  ;;  %3598 = vmatmul.msk.f32.gmra.mxu1 %vm889_vm1, %v850_v53 }
  0xbe   : > { %3623 = vmatmul.msk.f32.gmra.mxu2 %vm889_vm1, %v850_v53 }
  0xc3   : > { %3575 = vmatmul.msk.f32.gmra.mxu0 %vm889_vm1, %v852_v58  ;;  %3599 = vmatmul.msk.f32.gmra.mxu1 %vm889_vm1, %v851_v55 }
  0xc6   : > { %3624 = vmatmul.msk.f32.gmra.mxu2 %vm889_vm1, %v851_v55  ;;  %v864_v55 = vld [vmem:[%s4706_s20 + $0x98] sm:$0xff] }
  0xcb   : > { %3576 = vmatmul.msk.f32.gmra.mxu0 %vm889_vm1, %v853_v61  ;;  %3600 = vmatmul.msk.f32.gmra.mxu1 %vm889_vm1, %v852_v58 }
  0xce   : > { %3625 = vmatmul.msk.f32.gmra.mxu2 %vm889_vm1, %v852_v58 }
  0xd3   : > { %3577 = vmatmul.msk.f32.gmra.mxu0 %vm889_vm1, %v854_v1  ;;  %3601 = vmatmul.msk.f32.gmra.mxu1 %vm889_vm1, %v853_v61 }
  0xd6   : > { %3626 = vmatmul.msk.f32.gmra.mxu2 %vm889_vm1, %v853_v61 }
  0xdb   : > { %3578 = vmatmul.msk.f32.gmra.mxu0 %vm889_vm1, %v855_v7  ;;  %3602 = vmatmul.msk.f32.gmra.mxu1 %vm889_vm1, %v854_v1 }
  0xde   : > { %3627 = vmatmul.msk.f32.gmra.mxu2 %vm889_vm1, %v854_v1 }
  0xe3   : > { %3579 = vmatmul.msk.f32.gmra.mxu0 %vm889_vm1, %v856_v14  ;;  %3603 = vmatmul.msk.f32.gmra.mxu1 %vm889_vm1, %v855_v7 }
  0xe6   : > { %3628 = vmatmul.msk.f32.gmra.mxu2 %vm889_vm1, %v855_v7 }
  0xeb   : > { %3580 = vmatmul.msk.f32.gmra.mxu0 %vm889_vm1, %v857_v19  ;;  %3604 = vmatmul.msk.f32.gmra.mxu1 %vm889_vm1, %v856_v14 }
  0xee   : > { %3629 = vmatmul.msk.f32.gmra.mxu2 %vm889_vm1, %v856_v14 }
  0xf3   : > { %3581 = vmatmul.msk.f32.gmra.mxu0 %vm889_vm1, %v858_v24  ;;  %3605 = vmatmul.msk.f32.gmra.mxu1 %vm889_vm1, %v857_v19 }
  0xf6   : > { %3630 = vmatmul.msk.f32.gmra.mxu2 %vm889_vm1, %v857_v19 }
  0xfb   : > { %3582 = vmatmul.msk.f32.gmra.mxu0 %vm889_vm1, %v859_v26  ;;  %3606 = vmatmul.msk.f32.gmra.mxu1 %vm889_vm1, %v858_v24 }
  0xfe   : > { %3631 = vmatmul.msk.f32.gmra.mxu2 %vm889_vm1, %v858_v24 }
 0x103   : > { %3583 = vmatmul.msk.f32.gmra.mxu0 %vm889_vm1, %v860_v28  ;;  %3607 = vmatmul.msk.f32.gmra.mxu1 %vm889_vm1, %v859_v26 }
 0x106   : > { %3632 = vmatmul.msk.f32.gmra.mxu2 %vm889_vm1, %v859_v26 }
 0x108   : > { %v989_v34 = vpop.f32.mrf.mxu0  ;;  %v4809_v35 = vpop.f32.mrf.mxu1 }
 0x109   : > { %v990_v37 = vadd.f32 %v989_v34, %v4807_v33 }
 0x10b   : > { %3584 = vmatmul.msk.f32.gmra.mxu0 %vm889_vm1, %v861_v36  ;;  %3608 = vmatmul.msk.f32.gmra.mxu1 %vm889_vm1, %v860_v28  ;;  %v1239_v38 = vmax.f32 %v990_v37, 0.0 }
 0x10d   : > { %1379 = vmatmul.f32.vlgmr.msra.gmra.mxu3 %v1239_v38 }
 0x10e   : > { %3633 = vmatmul.msk.f32.gmra.mxu2 %vm889_vm1, %v860_v28 }
 0x110   : > { %v992_v41 = vpop.f32.mrf.mxu0  ;;  %v4816_v42 = vpop.f32.mrf.mxu1 }
 0x111   : > { %v993_v44 = vadd.f32 %v992_v41, %v4807_v33  ;;  %v1079_v14 = vadd.f32 %v4816_v42, %v4855_v11 }
 0x113   : > { %3585 = vmatmul.msk.f32.gmra.mxu0 %vm889_vm1, %v862_v43  ;;  %3609 = vmatmul.msk.f32.gmra.mxu1 %vm889_vm1, %v861_v36  ;;  %v1242_v45 = vmax.f32 %v993_v44, 0.0  ;;  %v1240_v18 = vmax.f32 %v1079_v14, 0.0 }
 0x115   : > { %1382 = vmatmul.f32.gmra.mxu3 %v1242_v45 }
 0x116   : > { %3634 = vmatmul.msk.f32.gmra.mxu2 %vm889_vm1, %v861_v36 }
 0x118   : > { %v995_v46 = vpop.f32.mrf.mxu0  ;;  %v4823_v47 = vpop.f32.mrf.mxu1 }
 0x119   : > { %v996_v49 = vadd.f32 %v995_v46, %v4807_v33  ;;  %v1167_v1 = vpop.f32.mrf.mxu2  ;;  %v1082_v21 = vadd.f32 %v4823_v47, %v4855_v11 }
 0x11a   : > { %v1168_v31 = vadd.f32 %v1167_v1, %v4871_v22 }
 0x11b   : > { %3586 = vmatmul.msk.f32.gmra.mxu0 %vm889_vm1, %v863_v48  ;;  %3610 = vmatmul.msk.f32.gmra.mxu1 %vm889_vm1, %v862_v43  ;;  %v1245_v50 = vmax.f32 %v996_v49, 0.0  ;;  %v1243_v26 = vmax.f32 %v1082_v21, 0.0 }
 0x11c   : > { %v1241_v32 = vmax.f32 %v1168_v31, 0.0 }
 0x11d   : > { %1385 = vmatmul.f32.gmra.mxu3 %v1245_v50 }
 0x11e   : > { %3635 = vmatmul.msk.f32.gmra.mxu2 %vm889_vm1, %v862_v43 }
 0x120   : > { %v998_v53 = vpop.f32.mrf.mxu0  ;;  %v4830_v54 = vpop.f32.mrf.mxu1 }
 0x121   : > { %v999_v56 = vadd.f32 %v998_v53, %v4807_v33  ;;  %v1170_v7 = vpop.f32.mrf.mxu2  ;;  %v1085_v30 = vadd.f32 %v4830_v54, %v4855_v11 }
 0x122   : > { %v1171_v41 = vadd.f32 %v1170_v7, %v4871_v22 }
 0x123   : > { %3587 = vmatmul.msk.f32.gmra.mxu0 %vm889_vm1, %v864_v55  ;;  %3611 = vmatmul.msk.f32.gmra.mxu1 %vm889_vm1, %v863_v48  ;;  %v1248_v58 = vmax.f32 %v999_v56, 0.0  ;;  %v1246_v38 = vmax.f32 %v1085_v30, 0.0 }
 0x124   : > { %v1244_v43 = vmax.f32 %v1171_v41, 0.0 }
 0x125   : > { %1388 = vmatmul.f32.gmra.mxu3 %v1248_v58 }
 0x126   : > { %3636 = vmatmul.msk.f32.gmra.mxu2 %vm889_vm1, %v863_v48 }
 0x128   : > { %v1001_v60 = vpop.f32.mrf.mxu0  ;;  %v4837_v61 = vpop.f32.mrf.mxu1 }
 0x129   : > { %v1002_v63 = vadd.f32 %v1001_v60, %v4807_v33  ;;  %v1173_v15 = vpop.f32.mrf.mxu2  ;;  %v1088_v42 = vadd.f32 %v4837_v61, %v4855_v11 }
 0x12a   : > { %v1174_v50 = vadd.f32 %v1173_v15, %v4871_v22 }
 0x12b   : > { %3588 = vmatmul.msk.f32.gmra.mxu0 %vm889_vm1, %v865_v62  ;;  %3612 = vmatmul.msk.f32.gmra.mxu1 %vm889_vm1, %v864_v55  ;;  %v1251_v0 = vmax.f32 %v1002_v63, 0.0  ;;  %v1249_v47 = vmax.f32 %v1088_v42, 0.0 }
 0x12c   : > { %v1247_v52 = vmax.f32 %v1174_v50, 0.0 }
 0x12d   : > { %1391 = vmatmul.f32.gmra.mxu3 %v1251_v0 }
 0x12e   : > { %3637 = vmatmul.msk.f32.gmra.mxu2 %vm889_vm1, %v864_v55 }
 0x130   : > { %v1004_v2 = vpop.f32.mrf.mxu0  ;;  %v4844_v3 = vpop.f32.mrf.mxu1 }
 0x131   : > { %v1005_v5 = vadd.f32 %v1004_v2, %v4807_v33  ;;  %v1176_v23 = vpop.f32.mrf.mxu2  ;;  %v1091_v51 = vadd.f32 %v4844_v3, %v4855_v11 }
 0x132   : > { %v1177_v59 = vadd.f32 %v1176_v23, %v4871_v22 }
 0x133   : > { %3589 = vmatmul.msk.f32.gmra.mxu0 %vm889_vm1, %v866_v4  ;;  %3613 = vmatmul.msk.f32.gmra.mxu1 %vm889_vm1, %v865_v62  ;;  %v1254_v6 = vmax.f32 %v1005_v5, 0.0  ;;  %v1252_v56 = vmax.f32 %v1091_v51, 0.0 }
 0x134   : > { %v1250_v61 = vmax.f32 %v1177_v59, 0.0 }
 0x135   : > { %1394 = vmatmul.f32.gmra.mxu3 %v1254_v6 }
 0x136   : > { %3638 = vmatmul.msk.f32.gmra.mxu2 %vm889_vm1, %v865_v62 }
 0x138   : > { %v1007_v8 = vpop.f32.mrf.mxu0  ;;  %v4851_v9 = vpop.f32.mrf.mxu1 }
 0x139   : > { %v1008_v12 = vadd.f32 %v1007_v8, %v4807_v33  ;;  %v1179_v34 = vpop.f32.mrf.mxu2  ;;  %v1094_v60 = vadd.f32 %v4851_v9, %v4855_v11 }
 0x13b   : > { %3590 = vmatmul.msk.f32.gmra.mxu0 %vm889_vm1, %v867_v10  ;;  %3614 = vmatmul.msk.f32.gmra.mxu1 %vm889_vm1, %v866_v4  ;;  %v1257_v13 = vmax.f32 %v1008_v12, 0.0  ;;  %v1255_v1 = vmax.f32 %v1094_v60, 0.0 }
 0x13d   : > { %1397 = vmatmul.f32.gmra.mxu3 %v1257_v13 }
 0x13e   : > { %3639 = vmatmul.msk.f32.gmra.mxu2 %vm889_vm1, %v866_v4  ;;  %v1180_v4 = vadd.f32 %v1179_v34, %v4871_v22 }
 0x140   : > { %v1010_v16 = vpop.f32.mrf.mxu0  ;;  %v4863_v17 = vpop.f32.mrf.mxu1  ;;  %v1253_v5 = vmax.f32 %v1180_v4, 0.0 }
 0x141   : > { %v1011_v19 = vadd.f32 %v1010_v16, %v4807_v33  ;;  %v1182_v44 = vpop.f32.mrf.mxu2 }
 0x142   : > { %v1183_v13 = vadd.f32 %v1182_v44, %v4871_v22 }
 0x143   : > { %3615 = vmatmul.msk.f32.gmra.mxu1 %vm889_vm1, %v867_v10  ;;  %1468 = vmatmul.f32.vlgmr.msrb.gmra.mxu0 %v1240_v18  ;;  %v1260_v20 = vmax.f32 %v1011_v19, 0.0 }
 0x144   : > { %v1256_v15 = vmax.f32 %v1183_v13, 0.0 }
 0x145   : > { %1400 = vmatmul.f32.gmra.mxu3 %v1260_v20 }
 0x146   : > { %3640 = vmatmul.msk.f32.gmra.mxu2 %vm889_vm1, %v867_v10 }
 0x148   : > { %v1013_v24 = vpop.f32.mrf.mxu0  ;;  %v4873_v25 = vpop.f32.mrf.mxu1 }
 0x149   : > { %v1014_v27 = vadd.f32 %v1013_v24, %v4807_v33  ;;  %v1185_v53 = vpop.f32.mrf.mxu2  ;;  %v1100_v14 = vadd.f32 %v4873_v25, %v4855_v11 }
 0x14a   : > { %v1186_v23 = vadd.f32 %v1185_v53, %v4871_v22 }
 0x14b   : > { %3616 = vmatmul.msk.f32.gmra.mxu1 %vm889_vm1, %v4740_v29  ;;  %1471 = vmatmul.f32.gmra.mxu0 %v1243_v26  ;;  %v1263_v28 = vmax.f32 %v1014_v27, 0.0  ;;  %v1261_v19 = vmax.f32 %v1100_v14, 0.0 }
 0x14c   : > { %v1259_v26 = vmax.f32 %v1186_v23, 0.0 }
 0x14d   : > { %1403 = vmatmul.f32.gmra.mxu3 %v1263_v28 }
 0x14e   : > { %3641 = vmatmul.msk.f32.gmra.mxu2 %vm889_vm1, %v4740_v29  ;;  %v1097_v29 = vadd.f32 %v4863_v17, %v4855_v11 }
 0x150   : > { %v1016_v36 = vpop.f32.mrf.mxu0  ;;  %v4882_v37 = vpop.f32.mrf.mxu1  ;;  %v1258_v9 = vmax.f32 %v1097_v29, 0.0 }
 0x151   : > { %v1017_v39 = vadd.f32 %v1016_v36, %v4807_v33  ;;  %v1188_v62 = vpop.f32.mrf.mxu2  ;;  %v1103_v24 = vadd.f32 %v4882_v37, %v4855_v11 }
 0x152   : > { %v1189_v34 = vadd.f32 %v1188_v62, %v4871_v22 }
 0x153   : > { %1474 = vmatmul.f32.gmra.mxu0 %v1246_v38  ;;  %1557 = vmatmul.f32.vlgmr.msra.gmra.mxu1 %v1241_v32  ;;  %v1266_v40 = vmax.f32 %v1017_v39, 0.0  ;;  %v1264_v31 = vmax.f32 %v1103_v24, 0.0 }
 0x154   : > { %v1262_v38 = vmax.f32 %v1189_v34, 0.0 }
 0x155   : > { %1406 = vmatmul.f32.gmra.mxu3 %v1266_v40 }
 0x158   : > { %v1019_v45 = vpop.f32.mrf.mxu0  ;;  %v4889_v46 = vpop.f32.mrf.mxu1 }
 0x159   : > { %v1020_v48 = vadd.f32 %v1019_v45, %v4807_v33  ;;  %v1191_v6 = vpop.f32.mrf.mxu2  ;;  %v1106_v36 = vadd.f32 %v4889_v46, %v4855_v11 }
 0x15a   : > { %v1192_v44 = vadd.f32 %v1191_v6, %v4871_v22 }
 0x15b   : > { %1477 = vmatmul.f32.gmra.mxu0 %v1249_v47  ;;  %1560 = vmatmul.f32.gmra.mxu1 %v1244_v43  ;;  %v1269_v49 = vmax.f32 %v1020_v48, 0.0  ;;  %v1267_v41 = vmax.f32 %v1106_v36, 0.0 }
 0x15c   : > { %v1265_v47 = vmax.f32 %v1192_v44, 0.0 }
 0x15d   : > { %1409 = vmatmul.f32.gmra.mxu3 %v1269_v49 }
 0x160   : > { %v1022_v54 = vpop.f32.mrf.mxu0  ;;  %v4896_v55 = vpop.f32.mrf.mxu1 }
 0x161   : > { %v1023_v57 = vadd.f32 %v1022_v54, %v4807_v33  ;;  %v1194_v16 = vpop.f32.mrf.mxu2  ;;  %v1109_v45 = vadd.f32 %v4896_v55, %v4855_v11 }
 0x162   : > { %v1195_v53 = vadd.f32 %v1194_v16, %v4871_v22 }
 0x163   : > { %1480 = vmatmul.f32.gmra.mxu0 %v1252_v56  ;;  %1563 = vmatmul.f32.gmra.mxu1 %v1247_v52  ;;  %v1272_v58 = vmax.f32 %v1023_v57, 0.0  ;;  %v1270_v49 = vmax.f32 %v1109_v45, 0.0 }
 0x164   : > { %v1268_v56 = vmax.f32 %v1195_v53, 0.0 }
 0x165   : > { %1412 = vmatmul.f32.gmra.mxu3 %v1272_v58 }
 0x168   : > { %v1025_v63 = vpop.f32.mrf.mxu0  ;;  %v4904_v0 = vpop.f32.mrf.mxu1 }
 0x169   : > { %v1026_v2 = vadd.f32 %v1025_v63, %v4807_v33  ;;  %v1197_v25 = vpop.f32.mrf.mxu2  ;;  %v1112_v54 = vadd.f32 %v4904_v0, %v4855_v11 }
 0x16a   : > { %v1198_v62 = vadd.f32 %v1197_v25, %v4871_v22 }
 0x16b   : > { %1483 = vmatmul.f32.gmra.mxu0 %v1255_v1  ;;  %1566 = vmatmul.f32.gmra.mxu1 %v1250_v61  ;;  %v1275_v3 = vmax.f32 %v1026_v2, 0.0  ;;  %v1273_v58 = vmax.f32 %v1112_v54, 0.0 }
 0x16c   : > { %v1271_v0 = vmax.f32 %v1198_v62, 0.0 }
 0x16d   : > { %1415 = vmatmul.f32.gmra.mxu3 %v1275_v3 }
 0x170   : > { %v1028_v7 = vpop.f32.mrf.mxu0  ;;  %v4910_v8 = vpop.f32.mrf.mxu1 }
 0x171   : > { %v1029_v10 = vadd.f32 %v1028_v7, %v4807_v33  ;;  %v1200_v37 = vpop.f32.mrf.mxu2  ;;  %v1115_v1 = vadd.f32 %v4910_v8, %v4855_v11  ;;  %v1875_v7 = vld [vmem:[#allocation14 + $0x168] sm:$0xff] }
 0x172   : > { %v1201_v6 = vadd.f32 %v1200_v37, %v4871_v22  ;;  %1893 = vmatpush.msrb.mxu2 %v1875_v7 }
 0x173   : > { %1486 = vmatmul.f32.gmra.mxu0 %v1258_v9  ;;  %1569 = vmatmul.f32.gmra.mxu1 %v1253_v5  ;;  %v1278_v12 = vmax.f32 %v1029_v10, 0.0  ;;  %v1276_v4 = vmax.f32 %v1115_v1, 0.0 }
 0x175   : > { %1418 = vmatmul.f32.gmra.mxu3 %v1278_v12  ;;  %v1274_v12 = vmax.f32 %v1201_v6, 0.0 }
 0x178   : > { %v1031_v17 = vpop.f32.mrf.mxu0  ;;  %v4916_v18 = vpop.f32.mrf.mxu1 }
 0x179   : > { %v1032_v20 = vadd.f32 %v1031_v17, %v4807_v33  ;;  %v1203_v51 = vpop.f32.mrf.mxu2  ;;  %v1118_v9 = vadd.f32 %v4916_v18, %v4855_v11 }
 0x17b   : > { %1489 = vmatmul.f32.gmra.mxu0 %v1261_v19  ;;  %1572 = vmatmul.f32.gmra.mxu1 %v1256_v15  ;;  %v1281_v21 = vmax.f32 %v1032_v20, 0.0  ;;  %v1279_v15 = vmax.f32 %v1118_v9, 0.0  ;;  %v1204_v19 = vadd.f32 %v1203_v51, %v4871_v22  ;;  %v1877_v20 = vld [vmem:[#allocation14 + $0x178] sm:$0xff] }
 0x17c   : > { %1939 = vmatpush.msrb.mxu3 %v1877_v20 }
 0x17d   : > { %1421 = vmatmul.f32.gmra.mxu3 %v1281_v21  ;;  %v1277_v23 = vmax.f32 %v1204_v19, 0.0 }
 0x180   : > { %v1034_v27 = vpop.f32.mrf.mxu0  ;;  %v4922_v28 = vpop.f32.mrf.mxu1 }
 0x181   : > { %v1035_v30 = vadd.f32 %v1034_v27, %v4807_v33  ;;  %v1206_v63 = vpop.f32.mrf.mxu2  ;;  %v1121_v18 = vadd.f32 %v4922_v28, %v4855_v11 }
 0x183   : > { %1492 = vmatmul.f32.gmra.mxu0 %v1264_v31  ;;  %1575 = vmatmul.f32.gmra.mxu1 %v1259_v26  ;;  %v1284_v32 = vmax.f32 %v1035_v30, 0.0  ;;  %v1282_v27 = vmax.f32 %v1121_v18, 0.0 }
 0x185   : > { %1424 = vmatmul.f32.gmra.mxu3 %v1284_v32  ;;  %v1207_v32 = vadd.f32 %v1206_v63, %v4871_v22 }
 0x187   : > { %v1280_v28 = vmax.f32 %v1207_v32, 0.0 }
 0x188   : > { %v1037_v39 = vpop.f32.mrf.mxu0  ;;  %v4928_v40 = vpop.f32.mrf.mxu1 }
 0x189   : > { %v1038_v42 = vadd.f32 %v1037_v39, %v4807_v33  ;;  %v1209_v8 = vpop.f32.mrf.mxu2  ;;  %v1124_v34 = vadd.f32 %v4928_v40, %v4855_v11 }
 0x18a   : > { %v1210_v45 = vadd.f32 %v1209_v8, %v4871_v22 }
 0x18b   : > { %1495 = vmatmul.f32.gmra.mxu0 %v1267_v41  ;;  %1578 = vmatmul.f32.gmra.mxu1 %v1262_v38  ;;  %v1287_v43 = vmax.f32 %v1038_v42, 0.0  ;;  %v1285_v37 = vmax.f32 %v1124_v34, 0.0 }
 0x18d   : > { %1427 = vmatmul.f32.gmra.mxu3 %v1287_v43  ;;  %v1872_v43 = vld [vmem:[#allocation14 + $0x150] sm:$0xff] }
 0x18e   : > { %1894 = vmatpush.msrb.mxu2 %v1872_v43  ;;  %v1866_v43 = vld [vmem:[#allocation14 + $0x120] sm:$0xff] }
 0x190   : > { %v1040_v46 = vpop.f32.mrf.mxu0  ;;  %v4934_v48 = vpop.f32.mrf.mxu1 }
 0x191   : > { %v1041_v50 = vadd.f32 %v1040_v46, %v4807_v33  ;;  %v4943_v60 = vpop.f32.mrf.mxu3  ;;  %v1212_v24 = vpop.f32.mrf.mxu2  ;;  %v1127_v40 = vadd.f32 %v4934_v48, %v4855_v11  ;;  %v1283_v46 = vmax.f32 %v1210_v45, 0.0 }
 0x192   : > { %v1213_v54 = vadd.f32 %v1212_v24, %v4871_v22 }
 0x193   : > { %1498 = vmatmul.f32.gmra.mxu0 %v1270_v49  ;;  %1581 = vmatmul.f32.gmra.mxu1 %v1265_v47  ;;  %v1290_v52 = vmax.f32 %v1041_v50, 0.0  ;;  %v1059_v47 = vadd.f32 %v4809_v35, %v4807_v33  ;;  %v1288_v51 = vmax.f32 %v1127_v40, 0.0 }
 0x195   : > { %1430 = vmatmul.f32.gmra.mxu3 %v1290_v52  ;;  %v1308_v53 = vmax.f32 %v1059_v47, 0.0 }
 0x198   : > { %v1043_v55 = vpop.f32.mrf.mxu0  ;;  %v4940_v57 = vpop.f32.mrf.mxu1 }
 0x199   : > { %v1044_v59 = vadd.f32 %v1043_v55, %v4807_v33  ;;  %v4954_v10 = vpop.f32.mrf.mxu3  ;;  %v1215_v42 = vpop.f32.mrf.mxu2  ;;  %v1874_v55 = vld [vmem:[#allocation14 + $0x160] sm:$0xff]  ;;  %v1130_v48 = vadd.f32 %v4940_v57, %v4855_v11 }
 0x19a   : > { %1940 = vmatpush.msrb.mxu3 %v1874_v55 }
 0x19b   : > { %1501 = vmatmul.f32.gmra.mxu0 %v1273_v58  ;;  %1584 = vmatmul.f32.gmra.mxu1 %v1268_v56  ;;  %v1293_v61 = vmax.f32 %v1044_v59, 0.0  ;;  %v1291_v59 = vmax.f32 %v1130_v48, 0.0 }
 0x19d   : > { %1433 = vmatmul.f32.gmra.mxu3 %v1293_v61  ;;  %v1216_v61 = vadd.f32 %v1215_v42, %v4871_v22 }
 0x1a0   : > { %v1046_v2 = vpop.f32.mrf.mxu0  ;;  %v4948_v3 = vpop.f32.mrf.mxu1 }
 0x1a1   : > { %v1047_v29 = vadd.f32 %v1046_v2, %v4807_v33  ;;  %v4962_v21 = vpop.f32.mrf.mxu3  ;;  %v1218_v56 = vpop.f32.mrf.mxu2  ;;  %v1133_v62 = vadd.f32 %v4948_v3, %v4855_v11 }
 0x1a3   : > { %1504 = vmatmul.f32.gmra.mxu0 %v1276_v4  ;;  %1587 = vmatmul.f32.gmra.mxu1 %v1271_v0  ;;  %v1296_v5 = vmax.f32 %v1047_v29, 0.0  ;;  %v1289_v0 = vmax.f32 %v1216_v61, 0.0  ;;  %v1294_v4 = vmax.f32 %v1133_v62, 0.0  ;;  %v1869_v29 = vld [vmem:[#allocation14 + $0x138] sm:$0xff] }
 0x1a4   : > { %1895 = vmatpush.msrb.mxu2 %v1869_v29 }
 0x1a5   : > { %1436 = vmatmul.f32.gmra.mxu3 %v1296_v5  ;;  %v1219_v5 = vadd.f32 %v1218_v56, %v4871_v22 }
 0x1a6   : > { %1896 = vmatpush.msrb.mxu2 %v1866_v43 }
 0x1a7   : > { %v1292_v3 = vmax.f32 %v1219_v5, 0.0 }
 0x1a8   : > { %v1049_v13 = vpop.f32.mrf.mxu0  ;;  %v4956_v14 = vpop.f32.mrf.mxu1 }
 0x1a9   : > { %v1050_v16 = vadd.f32 %v1049_v13, %v4807_v33  ;;  %v4972_v39 = vpop.f32.mrf.mxu3  ;;  %v1221_v1 = vpop.f32.mrf.mxu2  ;;  %v1136_v6 = vadd.f32 %v4956_v14, %v4855_v11 }
 0x1ab   : > { %1507 = vmatmul.f32.gmra.mxu0 %v1279_v15  ;;  %1590 = vmatmul.f32.gmra.mxu1 %v1274_v12  ;;  %v1299_v17 = vmax.f32 %v1050_v16, 0.0  ;;  %v1297_v13 = vmax.f32 %v1136_v6, 0.0  ;;  %v5007_v15 = vld [vmem:[#allocation9] ss:$0 sm:$0xff]  ;;  %v1222_v16 = vadd.f32 %v1221_v1, %v4871_v22  ;;  %v1863_v6 = vld [vmem:[#allocation14 + $0x108] sm:$0xff] }
 0x1ac   : > { %v1387_v19 = vadd.f32 %v5007_v15, %v4962_v21  ;;  %v1390_v21 = vadd.f32 %v5007_v15, %v4972_v39  ;;  %1897 = vmatpush.msrb.mxu2 %v1863_v6  ;;  %v1856_v6 = vld [vmem:[#allocation14 + $0xd0] sm:$0xff] }
 0x1ad   : > { %1439 = vmatmul.f32.gmra.mxu3 %v1299_v17  ;;  %v1871_v17 = vld [vmem:[#allocation14 + $0x148] sm:$0xff]  ;;  %v1295_v18 = vmax.f32 %v1222_v16, 0.0 }
 0x1ae   : > { %1941 = vmatpush.msrb.mxu3 %v1871_v17 }
 0x1b0   : > { %v1052_v26 = vpop.f32.mrf.mxu0  ;;  %v4964_v25 = vpop.f32.mrf.mxu1 }
 0x1b1   : > { %v1053_v31 = vadd.f32 %v1052_v26, %v4807_v33  ;;  %v4984_v52 = vpop.f32.mrf.mxu3  ;;  %v1224_v9 = vpop.f32.mrf.mxu2  ;;  %v1139_v14 = vadd.f32 %v4964_v25, %v4855_v11 }
 0x1b2   : > { %v1225_v32 = vadd.f32 %v1224_v9, %v4871_v22 }
 0x1b3   : > { %1510 = vmatmul.f32.gmra.mxu0 %v1282_v27  ;;  %1593 = vmatmul.f32.gmra.mxu1 %v1277_v23  ;;  %v1302_v30 = vmax.f32 %v1053_v31, 0.0  ;;  %v1300_v26 = vmax.f32 %v1139_v14, 0.0  ;;  %v1865_v14 = vld [vmem:[#allocation14 + $0x118] sm:$0xff] }
 0x1b5   : > { %1442 = vmatmul.f32.gmra.mxu3 %v1302_v30 }
 0x1b8   : > { %v1055_v36 = vpop.f32.mrf.mxu0  ;;  %v4970_v38 = vpop.f32.mrf.mxu1 }
 0x1b9   : > { %v1056_v41 = vadd.f32 %v1055_v36, %v4807_v33  ;;  %v1286_v33 = vmax.f32 %v1213_v54, 0.0  ;;  %v4996_v63 = vpop.f32.mrf.mxu3  ;;  %v1227_v30 = vpop.f32.mrf.mxu2  ;;  %v1142_v25 = vadd.f32 %v4970_v38, %v4855_v11 }
 0x1ba   : > { %v1228_v45 = vadd.f32 %v1227_v30, %v4871_v22 }
 0x1bb   : > { %1513 = vmatmul.f32.gmra.mxu0 %v1285_v37  ;;  %1596 = vmatmul.f32.gmra.mxu1 %v1280_v28  ;;  %v1305_v44 = vmax.f32 %v1056_v41, 0.0  ;;  %v1298_v28 = vmax.f32 %v1225_v32, 0.0  ;;  %v1303_v41 = vmax.f32 %v1142_v25, 0.0 }
 0x1bc   : > { %v1301_v39 = vmax.f32 %v1228_v45, 0.0 }
 0x1bd   : > { %1445 = vmatmul.f32.gmra.mxu3 %v1305_v44 }
 0x1c0   : > { %v4980_v49 = vpop.f32.mrf.mxu1  ;;  %v4982_v50 = vpop.f32.mrf.mxu0 }
 0x1c1   : > { %v5003_v7 = vpop.f32.mrf.mxu3  ;;  %v1230_v40 = vpop.f32.mrf.mxu2  ;;  %v1145_v38 = vadd.f32 %v4980_v49, %v4855_v11 }
 0x1c2   : > { %v1231_v54 = vadd.f32 %v1230_v40, %v4871_v22  ;;  %v1399_v1 = vadd.f32 %v5007_v15, %v5003_v7 }
 0x1c3   : > { %1516 = vmatmul.f32.gmra.mxu0 %v1288_v51  ;;  %1599 = vmatmul.f32.gmra.mxu1 %v1283_v46  ;;  %v1306_v51 = vmax.f32 %v1145_v38, 0.0 }
 0x1c5   : > { %1448 = vmatmul.f32.gmra.mxu3 %v1308_v53  ;;  %v1868_v53 = vld [vmem:[#allocation14 + $0x130] sm:$0xff] }
 0x1c6   : > { %1942 = vmatpush.msrb.mxu3 %v1868_v53 }
 0x1c8   : > { %v4989_v35 = vpop.f32.mrf.mxu1  ;;  %v4991_v58 = vpop.f32.mrf.mxu0  ;;  %1943 = vmatpush.msrb.mxu3 %v1865_v14  ;;  %v1870_v14 = vld [vmem:[#allocation14 + $0x140] sm:$0xff] }
 0x1c9   : > { %v1401_v27 = vpop.f32.mrf.mxu3  ;;  %v1148_v56 = vadd.f32 %v4989_v35, %v4855_v11  ;;  %v1233_v48 = vpop.f32.mrf.mxu2 }
 0x1ca   : > { %v1234_v62 = vadd.f32 %v1233_v48, %v4871_v22  ;;  %v1402_v9 = vadd.f32 %v5007_v15, %v1401_v27  ;;  %v1860_v27 = vld [vmem:[#allocation14 + $0xf0] sm:$0xff]  ;;  %v1857_v48 = vld [vmem:[#allocation14 + $0xd8] sm:$0xff] }
 0x1cb   : > { %1519 = vmatmul.f32.gmra.mxu0 %v1291_v59  ;;  %1602 = vmatmul.f32.gmra.mxu1 %v1286_v33  ;;  %v1304_v33 = vmax.f32 %v1231_v54, 0.0  ;;  %v1309_v61 = vmax.f32 %v1148_v56, 0.0 }
 0x1cc   : > { %1898 = vmatpush.msrb.mxu2 %v1860_v27 }
 0x1ce   : > { %1899 = vmatpush.msrb.mxu2 %v1857_v48  ;;  %v1994_v48 = vld [vmem:[#allocation14 + $0x2c0] sm:$0xff] }
 0x1d0   : > { %v1475_v57 = vpop.f32.mrf.mxu0  ;;  %v4998_v2 = vpop.f32.mrf.mxu1 }
 0x1d1   : > { %v1476_v20 = vadd.f32 %v1475_v57, %v1387_v19  ;;  %v5029_v44 = vpop.f32.mrf.mxu3  ;;  %v1236_v29 = vpop.f32.mrf.mxu2 }
 0x1d3   : > { %1522 = vmatmul.f32.gmra.mxu0 %v1294_v4  ;;  %1605 = vmatmul.f32.gmra.mxu1 %v1289_v0  ;;  %v1307_v4 = vmax.f32 %v1234_v62, 0.0 }
 0x1d8   : > { %v1478_v8 = vpop.f32.mrf.mxu0  ;;  %v5005_v12 = vpop.f32.mrf.mxu1 }
 0x1d9   : > { %v1479_v34 = vadd.f32 %v1478_v8, %v1390_v21  ;;  %v5041_v55 = vpop.f32.mrf.mxu3 }
 0x1db   : > { %1525 = vmatmul.f32.gmra.mxu0 %v1297_v13  ;;  %1608 = vmatmul.f32.gmra.mxu1 %v1292_v3  ;;  %v1237_v3 = vadd.f32 %v1236_v29, %v4871_v22 }
 0x1dd   : > { %v1310_v8 = vmax.f32 %v1237_v3, 0.0 }
 0x1e0   : > { %v5014_v23 = vpop.f32.mrf.mxu0  ;;  %v1564_v24 = vpop.f32.mrf.mxu1 }
 0x1e1   : > { %v5016_v31 = vadd.f32 %v1564_v24, %v1476_v20  ;;  %v1410_v0 = vpop.f32.mrf.mxu3 }
 0x1e2   : > { %v1411_v30 = vadd.f32 %v5007_v15, %v1410_v0 }
 0x1e3   : > { %1528 = vmatmul.f32.gmra.mxu0 %v1300_v26  ;;  %1611 = vmatmul.f32.gmra.mxu1 %v1295_v18 }
 0x1e4   : > { %1658 = vrot.lane.b32.xlu0 %v5016_v31, %s4418_s19 }
 0x1e8   : > { %v5025_v36 = vpop.f32.mrf.mxu0  ;;  %v1567_v37 = vpop.f32.mrf.mxu1 }
 0x1e9   : > { %v5027_v42 = vadd.f32 %v1567_v37, %v1479_v34  ;;  %v1413_v17 = vpop.f32.mrf.mxu3  ;;  %v1862_v37 = vld [vmem:[#allocation14 + $0x100] sm:$0xff] }
 0x1ea   : > { %1944 = vmatpush.msrb.mxu3 %v1862_v37  ;;  %v1858_v37 = vld [vmem:[#allocation14 + $0xe0] sm:$0xff] }
 0x1eb   : > { %1531 = vmatmul.f32.gmra.mxu0 %v1303_v41  ;;  %1614 = vmatmul.f32.gmra.mxu1 %v1298_v28  ;;  %v1414_v41 = vadd.f32 %v5007_v15, %v1413_v17  ;;  %v1873_v17 = vld [vmem:[#allocation14 + $0x158] sm:$0xff] }
 0x1ec   : > { %1660 = vrot.lane.b32.xlu0 %v5027_v42, %s4418_s19 }
 0x1f0   : > { %v1487_v47 = vpop.f32.mrf.mxu0  ;;  %v5036_v46 = vpop.f32.mrf.mxu1 }
 0x1f1   : > { %v1488_v57 = vadd.f32 %v1487_v47, %v1399_v1  ;;  %v1416_v22 = vpop.f32.mrf.mxu3 }
 0x1f2   : > { %v1417_v47 = vadd.f32 %v5007_v15, %v1416_v22  ;;  %v1867_v22 = vld [vmem:[#allocation14 + $0x128] sm:$0xff] }
 0x1f3   : > { %1534 = vmatmul.f32.gmra.mxu0 %v1306_v51  ;;  %1617 = vmatmul.f32.gmra.mxu1 %v1301_v39 }
 0x1f8   : > { %v1490_v59 = vpop.f32.mrf.mxu0  ;;  %v5043_v49 = vpop.f32.mrf.mxu1 }
 0x1f9   : > { %v1491_v7 = vadd.f32 %v1490_v59, %v1402_v9  ;;  %v1419_v32 = vpop.f32.mrf.mxu3  ;;  %v1876_v9 = vld [vmem:[#allocation14 + $0x170] sm:$0xff] }
 0x1fa   : > { %v1420_v59 = vadd.f32 %v5007_v15, %v1419_v32 }
 0x1fb   : > { %1537 = vmatmul.f32.gmra.mxu0 %v1309_v61  ;;  %1620 = vmatmul.f32.gmra.mxu1 %v1304_v33 }
 0x200   : > { %v5048_v11 = vpop.f32.mrf.mxu0  ;;  %v1576_v35 = vpop.f32.mrf.mxu1 }
 0x201   : > { %v5050_v5 = vadd.f32 %v1576_v35, %v1488_v57  ;;  %v1422_v43 = vpop.f32.mrf.mxu3  ;;  %v1859_v57 = vld [vmem:[#allocation14 + $0xe8] sm:$0xff]  ;;  %v1854_v35 = vld [vmem:[#allocation14 + $0xc0] sm:$0xff] }
 0x202   : > { %1945 = vmatpush.msrb.mxu3 %v1859_v57  ;;  %v1423_v29 = vadd.f32 %v5007_v15, %v1422_v43  ;;  %1900 = vmatpush.msrb.mxu2 %v1854_v35  ;;  %v1988_v57 = vld [vmem:[#allocation14 + $0x290] sm:$0xff]  ;;  %v1985_v35 = vld [vmem:[#allocation14 + $0x278] sm:$0xff] }
 0x203   : > { %1623 = vmatmul.f32.gmra.mxu1 %v1307_v4  ;;  %1666 = vrot.lane.b32.xlu1 %v5050_v5, %s4418_s19 }
 0x204   : > { %1946 = vmatpush.msrb.mxu3 %v1856_v6  ;;  %1916 = vmatpush.msra.mxu2 %v1876_v9  ;;  %v1982_v9 = vld [vmem:[#allocation14 + $0x260] sm:$0xff] }
 0x206   : > { %1917 = vmatpush.msra.mxu2 %v1873_v17  ;;  %v1979_v17 = vld [vmem:[#allocation14 + $0x248] sm:$0xff] }
 0x208   : > { %v5056_v13 = vpop.f32.mrf.mxu0  ;;  %v1579_v16 = vpop.f32.mrf.mxu1  ;;  %1918 = vmatpush.msra.mxu2 %v1870_v14 }
 0x209   : > { %v5058_v19 = vadd.f32 %v1579_v16, %v1491_v7  ;;  %v1425_v33 = vpop.f32.mrf.mxu3 }
 0x20a   : > { %1919 = vmatpush.msra.mxu2 %v1867_v22 }
 0x20b   : > { %1626 = vmatmul.f32.gmra.mxu1 %v1310_v8  ;;  %1668 = vrot.lane.b32.xlu1 %v5058_v19, %s4418_s19 }
 0x210   : > { %v1499_v20 = vpop.f32.mrf.mxu0  ;;  %v5062_v18 = vpop.f32.mrf.mxu1 }
 0x211   : > { %v1500_v21 = vadd.f32 %v1499_v20, %v1411_v30  ;;  %v1428_v4 = vpop.f32.mrf.mxu3  ;;  %v1426_v20 = vadd.f32 %v5007_v15, %v1425_v33  ;;  %v1864_v30 = vld [vmem:[#allocation14 + $0x110] sm:$0xff]  ;;  %v1991_v33 = vld [vmem:[#allocation14 + $0x2a8] sm:$0xff] }
 0x212   : > { %1920 = vmatpush.msra.mxu2 %v1864_v30  ;;  %v1429_v43 = vadd.f32 %v5007_v15, %v1428_v4 }
 0x218   : > { %v1502_v24 = vpop.f32.mrf.mxu0  ;;  %v5064_v26 = vpop.f32.mrf.mxu1 }
 0x219   : > { %v1503_v45 = vadd.f32 %v1502_v24, %v1414_v41  ;;  %v5088_v24 = vpop.f32.mrf.mxu3  ;;  %v1855_v41 = vld [vmem:[#allocation14 + $0xc8] sm:$0xff] }
 0x220   : > { %v1505_v25 = vpop.f32.mrf.mxu0  ;;  %v1588_v34 = vpop.f32.mrf.mxu1 }
 0x221   : > { %v5067_v28 = vadd.f32 %v1588_v34, %v1500_v21  ;;  %v1506_v51 = vadd.f32 %v1505_v25, %v1417_v47  ;;  %v1861_v34 = vld [vmem:[#allocation14 + $0xf8] sm:$0xff] }
 0x222   : > { %1921 = vmatpush.msra.mxu2 %v1861_v34  ;;  %v2122_v34 = vld [vmem:[#allocation14 + $0x468] sm:$0xff] }
 0x223   : > { %1674 = vrot.lane.b32.xlu2 %v5067_v28, %s4418_s19 }
 0x224   : > { %1922 = vmatpush.msra.mxu2 %v1858_v37 }
 0x226   : > { %1923 = vmatpush.msra.mxu2 %v1855_v41 }
 0x228   : > { %v1508_v40 = vpop.f32.mrf.mxu0  ;;  %v1591_v38 = vpop.f32.mrf.mxu1 }
 0x229   : > { %v5072_v39 = vadd.f32 %v1591_v38, %v1503_v45  ;;  %v1509_v61 = vadd.f32 %v1508_v40, %v1420_v59  ;;  %v2000_v40 = vld [vmem:[#allocation14 + $0x2f0] sm:$0xff]  ;;  %v1434_v38 = vpop.f32.mrf.mxu3  ;;  %v5099_v59 = vld [vmem:[#allocation11] ss:$0 sm:$0xff] }
 0x22a   : > { %2039 = vmatpush.msra.mxu3 %v2000_v40  ;;  %v1435_v14 = vadd.f32 %v5007_v15, %v1434_v38  ;;  %v2119_v40 = vld [vmem:[#allocation14 + $0x450] sm:$0xff] }
 0x22b   : > { %1676 = vrot.lane.b32.xlu2 %v5072_v39, %s4418_s19 }
 0x230   : > { %v1511_v53 = vpop.f32.mrf.mxu0  ;;  %v1594_v54 = vpop.f32.mrf.mxu1 }
 0x231   : > { %v5077_v56 = vadd.f32 %v1594_v54, %v1506_v51  ;;  %v1512_v3 = vadd.f32 %v1511_v53, %v1423_v29  ;;  %v1997_v53 = vld [vmem:[#allocation14 + $0x2d8] sm:$0xff]  ;;  %v1437_v6 = vpop.f32.mrf.mxu3 }
 0x232   : > { %2040 = vmatpush.msra.mxu3 %v1997_v53 }
 0x234   : > { %2041 = vmatpush.msra.mxu3 %v1994_v48 }
 0x236   : > { %2042 = vmatpush.msra.mxu3 %v1991_v33  ;;  %v1987_v33 = vld [vmem:[#allocation14 + $0x288] sm:$0xff] }
 0x238   : > { %v1514_v62 = vpop.f32.mrf.mxu0  ;;  %v1597_v1 = vpop.f32.mrf.mxu1  ;;  %2043 = vmatpush.msra.mxu3 %v1988_v57 }
 0x239   : > { %v5080_v0 = vadd.f32 %v1597_v1, %v1509_v61  ;;  %v1515_v27 = vadd.f32 %v1514_v62, %v1426_v20  ;;  %v5101_v62 = vld [vmem:[#allocation12] ss:$0 sm:$0xff]  ;;  %v1999_v20 = vld [vmem:[#allocation14 + $0x2e8] sm:$0xff]  ;;  %v5118_v53 = vpop.f32.mrf.mxu3 }
 0x23a   : > { %2044 = vmatpush.msra.mxu3 %v1985_v35  ;;  %v2110_v35 = vld [vmem:[#allocation14 + $0x408] sm:$0xff] }
 0x23c   : > { %2045 = vmatpush.msra.mxu3 %v1982_v9 }
 0x23e   : > { %2046 = vmatpush.msra.mxu3 %v1979_v17  ;;  %v1978_v17 = vld [vmem:[#allocation14 + $0x240] sm:$0xff] }
 0x240   : > { %v1517_v7 = vpop.f32.mrf.mxu0  ;;  %v1600_v8 = vpop.f32.mrf.mxu1 }
 0x241   : > { %v5083_v16 = vadd.f32 %v1600_v8, %v1512_v3  ;;  %v1518_v45 = vadd.f32 %v1517_v7, %v1429_v43  ;;  %v1977_v8 = vld [vmem:[#allocation14 + $0x238] sm:$0xff] }
 0x242   : > { %2704 = vmatpush.msra.mxu0 %v1977_v8  ;;  %v2107_v8 = vld [vmem:[#allocation14 + $0x3f0] sm:$0xff] }
 0x243   : > { %1682 = vrot.lane.b32.xlu0 %v5083_v16, %s4418_s19 }
 0x248   : > { %v5090_v32 = vpop.f32.mrf.mxu0  ;;  %v1603_v21 = vpop.f32.mrf.mxu1 }
 0x249   : > { %v5092_v25 = vadd.f32 %v1603_v21, %v1515_v27  ;;  %v1996_v21 = vld [vmem:[#allocation14 + $0x2d0] sm:$0xff] }
 0x24b   : > { %1684 = vrot.lane.b32.xlu1 %v5092_v25, %s4418_s19 }
 0x250   : > { %v1606_v47 = vpop.f32.mrf.mxu1  ;;  %v1523_v54 = vpop.f32.mrf.mxu0 }
 0x251   : > { %v5097_v51 = vadd.f32 %v1606_v47, %v1518_v45  ;;  %v1524_v27 = vadd.f32 %v1523_v54, %v1435_v14  ;;  %v1993_v45 = vld [vmem:[#allocation14 + $0x2b8] sm:$0xff]  ;;  %v1438_v54 = vadd.f32 %v5007_v15, %v1437_v6  ;;  %v2098_v14 = vld [vmem:[#allocation14 + $0x3a8] sm:$0xff] }
 0x252   : > { %v2116_v47 = vld [vmem:[#allocation14 + $0x438] sm:$0xff]  ;;  %2733 = vmatpush.msrb.mxu1 %v2098_v14  ;;  %v2121_v14 = vld [vmem:[#allocation14 + $0x460] sm:$0xff] }
 0x253   : > { %v1981_v6 = vld [vmem:[#allocation14 + $0x258] sm:$0xff] }
 0x256   : > { %v1659_v61 = vpop.permute.xlu0 %1658 }
 0x257   : > { %v1728_v1 = vmax.f32 %v5016_v31, %v1659_v61  ;;  %v2113_v61 = vld [vmem:[#allocation14 + $0x420] sm:$0xff] }
 0x258   : > { %v5104_v4 = vpop.f32.mrf.mxu1  ;;  %v1526_v7 = vpop.f32.mrf.mxu0 }
 0x259   : > { %v1756_v29 = vmul.f32 %v5099_v59, %v1728_v1  ;;  %v1527_v57 = vadd.f32 %v1526_v7, %v1438_v54  ;;  %v2104_v7 = vld [vmem:[#allocation14 + $0x3d8] sm:$0xff] }
 0x25b   : > { %v1784_v3 = vadd.f32 %v5101_v62, %v1756_v29  ;;  %v1984_v29 = vld [vmem:[#allocation14 + $0x270] sm:$0xff] }
 0x25d   : > { %v1808_v31 = vmax.f32 %v1784_v3, 0.0 }
 0x25e   : > { %v1661_v22 = vpop.permute.xlu0 %1660 }
 0x25f   : > { %v1729_v30 = vmax.f32 %v5027_v42, %v1661_v22  ;;  %3642 = vmatmul.msk.f32.vlgmr.msrb.gmra.mxu2 %vm1878_vm2, %v1808_v31  ;;  %3646 = vmatmul.msk.f32.vlgmr.msrb.gmra.mxu3 %vm1878_vm2, %v1808_v31  ;;  %v1990_v42 = vld [vmem:[#allocation14 + $0x2a0] sm:$0xff]  ;;  %v1381_v22 = vadd.f32 %v5007_v15, %v4943_v60 }
 0x260   : > { %v1612_v37 = vpop.f32.mrf.mxu1  ;;  %2016 = vmatpush.msrb.mxu2 %v1999_v20  ;;  %2139 = vmatpush.msrb.mxu3 %v2122_v34  ;;  %v5121_v1 = vpop.f32.mrf.mxu0  ;;  %v2101_v20 = vld [vmem:[#allocation14 + $0x3c0] sm:$0xff] }
 0x261   : > { %v1757_v41 = vmul.f32 %v5099_v59, %v1729_v30  ;;  %v5113_v43 = vadd.f32 %v1612_v37, %v1524_v27  ;;  %v2001_v27 = vld [vmem:[#allocation14 + $0x2f8] sm:$0xff]  ;;  %v5131_v30 = vpop.f32.mrf.mxu3  ;;  %v1998_v34 = vld [vmem:[#allocation14 + $0x2e0] sm:$0xff] }
 0x262   : > { %2017 = vmatpush.msrb.mxu2 %v1996_v21  ;;  %2140 = vmatpush.msrb.mxu3 %v2119_v40  ;;  %v1470_v21 = vadd.f32 %v4982_v50, %v1381_v22  ;;  %v1974_v37 = vld [vmem:[#allocation14 + $0x220] sm:$0xff]  ;;  %v1995_v40 = vld [vmem:[#allocation14 + $0x2c8] sm:$0xff]  ;;  %v1396_v50 = vadd.f32 %v5007_v15, %v4996_v63  ;;  %v2120_v22 = vld [vmem:[#allocation14 + $0x458] sm:$0xff] }
 0x263   : > { %v1785_v38 = vadd.f32 %v5101_v62, %v1757_v41  ;;  %1690 = vrot.lane.b32.xlu2 %v5113_v43, %s4418_s19  ;;  %2705 = vmatpush.msra.mxu0 %v1974_v37  ;;  %v1983_v63 = vld [vmem:[#allocation14 + $0x268] sm:$0xff] }
 0x264   : > { %2018 = vmatpush.msrb.mxu2 %v1993_v45  ;;  %2141 = vmatpush.msrb.mxu3 %v2116_v47  ;;  %v5140_v60 = vadd.f32 %v4998_v2, %v1470_v21  ;;  %v1485_v54 = vadd.f32 %v5025_v36, %v1396_v50  ;;  %v1986_v2 = vld [vmem:[#allocation14 + $0x280] sm:$0xff]  ;;  %v1980_v36 = vld [vmem:[#allocation14 + $0x250] sm:$0xff] }
 0x265   : > { %v1809_v48 = vmax.f32 %v1785_v38, 0.0  ;;  %v1992_v38 = vld [vmem:[#allocation14 + $0x2b0] sm:$0xff] }
 0x266   : > { %2019 = vmatpush.msrb.mxu2 %v1990_v42  ;;  %2142 = vmatpush.msrb.mxu3 %v2113_v61  ;;  %v1989_v42 = vld [vmem:[#allocation14 + $0x298] sm:$0xff] }
 0x267   : > { %3643 = vmatmul.msk.f32.gmra.mxu2 %vm1878_vm2, %v1809_v48  ;;  %3647 = vmatmul.msk.f32.gmra.mxu3 %vm1878_vm2, %v1809_v48 }
 0x268   : > { %v1615_v3 = vpop.f32.mrf.mxu1  ;;  %2020 = vmatpush.msrb.mxu2 %v1987_v33  ;;  %2143 = vmatpush.msrb.mxu3 %v2110_v35  ;;  %v5135_v41 = vpop.f32.mrf.mxu0 }
 0x269   : > { %v5125_v9 = vadd.f32 %v1615_v3, %v1527_v57  ;;  %v1446_v33 = vpop.f32.mrf.mxu3 }
 0x26a   : > { %2021 = vmatpush.msrb.mxu2 %v1984_v29  ;;  %2144 = vmatpush.msrb.mxu3 %v2107_v8  ;;  %v5153_v29 = vadd.f32 %v5043_v49, %v1485_v54 }
 0x26b   : > { %1692 = vrot.lane.b32.xlu0 %v5125_v9, %s4418_s19 }
 0x26c   : > { %2022 = vmatpush.msrb.mxu2 %v1981_v6  ;;  %2145 = vmatpush.msrb.mxu3 %v2104_v7  ;;  %v1447_v6 = vadd.f32 %v5007_v15, %v1446_v33  ;;  %v2123_v7 = vld [vmem:[#allocation14 + $0x470] sm:$0xff]  ;;  %v1384_v33 = vadd.f32 %v5007_v15, %v4954_v10  ;;  %v2108_v10 = vld [vmem:[#allocation14 + $0x3f8] sm:$0xff] }
 0x26e   : > { %2023 = vmatpush.msrb.mxu2 %v1978_v17  ;;  %2146 = vmatpush.msrb.mxu3 %v2101_v20 }
 0x26f   : > { %3644 = vmatmul.msk.f32.vlgmr.msra.gmra.mxu2 %vm1878_vm2, %v1808_v31 }
 0x270   : > { %v5137_v45 = vpop.f32.mrf.mxu1  ;;  %2062 = vmatpush.msra.mxu2 %v2001_v27  ;;  %v1535_v35 = vpop.f32.mrf.mxu0  ;;  %v2095_v27 = vld [vmem:[#allocation14 + $0x390] sm:$0xff] }
 0x271   : > { %v1536_v20 = vadd.f32 %v1535_v35, %v1447_v6  ;;  %2734 = vmatpush.msrb.mxu1 %v2095_v27  ;;  %v1449_v50 = vpop.f32.mrf.mxu3  ;;  %v2111_v35 = vld [vmem:[#allocation14 + $0x410] sm:$0xff]  ;;  %v2105_v27 = vld [vmem:[#allocation14 + $0x3e0] sm:$0xff] }
 0x272   : > { %2063 = vmatpush.msra.mxu2 %v1998_v34 }
 0x273   : > { %1654 = vrot.lane.b32.xlu0 %v5140_v60, %s4418_s19 }
 0x274   : > { %2064 = vmatpush.msra.mxu2 %v1995_v40  ;;  %v2117_v40 = vld [vmem:[#allocation14 + $0x440] sm:$0xff] }
 0x275   : > { %v1667_v31 = vpop.permute.xlu1 %1666 }
 0x276   : > { %v1732_v47 = vmax.f32 %v5050_v5, %v1667_v31  ;;  %2065 = vmatpush.msra.mxu2 %v1992_v38  ;;  %v2118_v38 = vld [vmem:[#allocation14 + $0x448] sm:$0xff] }
 0x277   : > { %3645 = vmatmul.msk.f32.gmra.mxu2 %vm1878_vm2, %v1809_v48  ;;  %v2124_v48 = vld [vmem:[#allocation14 + $0x478] sm:$0xff] }
 0x278   : > { %v1760_v61 = vmul.f32 %v5099_v59, %v1732_v47  ;;  %v5150_v57 = vpop.f32.mrf.mxu1  ;;  %2066 = vmatpush.msra.mxu2 %v1989_v42  ;;  %v1538_v42 = vpop.f32.mrf.mxu0 }
 0x27a   : > { %v1788_v3 = vadd.f32 %v5101_v62, %v1760_v61  ;;  %2067 = vmatpush.msra.mxu2 %v1986_v2  ;;  %v2115_v2 = vld [vmem:[#allocation14 + $0x430] sm:$0xff]  ;;  %v1450_v61 = vadd.f32 %v5007_v15, %v1449_v50 }
 0x27b   : > { %1664 = vrot.lane.b32.xlu0 %v5153_v29, %s4418_s19 }
 0x27c   : > { %v5158_v5 = vmax.f32 %v1788_v3, 0.0  ;;  %2068 = vmatpush.msra.mxu2 %v1983_v63  ;;  %v1432_v3 = vadd.f32 %v5007_v15, %v5088_v24  ;;  %v1539_v6 = vadd.f32 %v1538_v42, %v1450_v61  ;;  %v2242_v42 = vld [vmem:[#allocation14 + $0x5d0] sm:$0xff]  ;;  %v2233_v61 = vld [vmem:[#allocation14 + $0x588] sm:$0xff] }
 0x27d   : > { %v1675_v8 = vpop.permute.xlu2 %1674  ;;  %v1669_v17 = vpop.permute.xlu1 %1668 }
 0x27e   : > { %v1733_v49 = vmax.f32 %v5058_v19, %v1669_v17  ;;  %3650 = vmatmul.msk.f32.vlgmr.msra.gmra.mxu3 %vm1878_vm2, %v5158_v5  ;;  %2069 = vmatpush.msra.mxu2 %v1980_v36  ;;  %v1736_v21 = vmax.f32 %v5067_v28, %v1675_v8  ;;  %v2114_v28 = vld [vmem:[#allocation14 + $0x428] sm:$0xff]  ;;  %v2112_v36 = vld [vmem:[#allocation14 + $0x418] sm:$0xff]  ;;  %v1521_v17 = vadd.f32 %v5090_v32, %v1432_v3  ;;  %v2230_v3 = vld [vmem:[#allocation14 + $0x570] sm:$0xff] }
 0x27f   : > { %3648 = vmatmul.msk.f32.vlgmr.msrb.gmra.mxu2 %vm1878_vm2, %v5158_v5  ;;  %2185 = vmatpush.msra.mxu3 %v2124_v48  ;;  %v1473_v48 = vadd.f32 %v4991_v58, %v1384_v33  ;;  %v1971_v8 = vld [vmem:[#allocation14 + $0x208] sm:$0xff] }
 0x280   : > { %v1761_v34 = vmul.f32 %v5099_v59, %v1733_v49  ;;  %v1624_v37 = vpop.f32.mrf.mxu1  ;;  %2162 = vmatpush.msrb.mxu2 %v2123_v7  ;;  %v1764_v47 = vmul.f32 %v5099_v59, %v1736_v21  ;;  %2706 = vmatpush.msra.mxu0 %v1971_v8  ;;  %v1405_v21 = vadd.f32 %v5007_v15, %v5029_v44 }
 0x281   : > { %v5168_v19 = vadd.f32 %v1624_v37, %v1536_v20  ;;  %2186 = vmatpush.msra.mxu3 %v2121_v14  ;;  %v5192_v14 = vadd.f32 %v5005_v12, %v1473_v48  ;;  %v2109_v20 = vld [vmem:[#allocation14 + $0x400] sm:$0xff]  ;;  %v2106_v12 = vld [vmem:[#allocation14 + $0x3e8] sm:$0xff]  ;;  %v2103_v37 = vld [vmem:[#allocation14 + $0x3d0] sm:$0xff] }
 0x282   : > { %v1789_v31 = vadd.f32 %v5101_v62, %v1761_v34  ;;  %2163 = vmatpush.msrb.mxu2 %v2120_v22  ;;  %v1792_v7 = vadd.f32 %v5101_v62, %v1764_v47  ;;  %v5197_v22 = vadd.f32 %v5104_v4, %v1521_v17  ;;  %v1393_v4 = vadd.f32 %v5007_v15, %v4984_v52  ;;  %v2102_v34 = vld [vmem:[#allocation14 + $0x3c8] sm:$0xff]  ;;  %v2236_v47 = vld [vmem:[#allocation14 + $0x5a0] sm:$0xff] }
 0x283   : > { %1698 = vrot.lane.b32.xlu1 %v5168_v19, %s4418_s19  ;;  %1678 = vrot.lane.b32.xlu0 %v5077_v56, %s4418_s19  ;;  %v1494_v50 = vadd.f32 %v5048_v11, %v1405_v21  ;;  %v2239_v11 = vld [vmem:[#allocation14 + $0x5b8] sm:$0xff]  ;;  %v2228_v48 = vld [vmem:[#allocation14 + $0x560] sm:$0xff]  ;;  %v2225_v17 = vld [vmem:[#allocation14 + $0x548] sm:$0xff] }
 0x284   : > { %v5176_v54 = vmax.f32 %v1789_v31, 0.0  ;;  %2164 = vmatpush.msrb.mxu2 %v2117_v40  ;;  %2187 = vmatpush.msra.mxu3 %v2118_v38  ;;  %v2245_v40 = vld [vmem:[#allocation14 + $0x5e8] sm:$0xff]  ;;  %v1482_v38 = vadd.f32 %v5014_v23, %v1393_v4  ;;  %v2246_v31 = vld [vmem:[#allocation14 + $0x5f0] sm:$0xff]  ;;  %v2243_v23 = vld [vmem:[#allocation14 + $0x5d8] sm:$0xff] }
 0x285   : > { %v1677_v63 = vpop.permute.xlu2 %1676  ;;  %v2229_v21 = vld [vmem:[#allocation14 + $0x568] sm:$0xff] }
 0x286   : > { %3651 = vmatmul.msk.f32.gmra.mxu3 %vm1878_vm2, %v5176_v54  ;;  %2165 = vmatpush.msrb.mxu2 %v2114_v28  ;;  %v1737_v24 = vmax.f32 %v5072_v39, %v1677_v63  ;;  %v1816_v39 = vmax.f32 %v1792_v7, 0.0  ;;  %v5217_v44 = vadd.f32 %v5036_v46, %v1482_v38  ;;  %v5220_v28 = vadd.f32 %v5062_v18, %v1494_v50  ;;  %v2240_v46 = vld [vmem:[#allocation14 + $0x5c0] sm:$0xff]  ;;  %v2368_v7 = vld [vmem:[#allocation14 + $0x768] sm:$0xff] }
 0x287   : > { %3649 = vmatmul.msk.f32.gmra.mxu2 %vm1878_vm2, %v5176_v54  ;;  %2188 = vmatpush.msra.mxu3 %v2115_v2  ;;  %v1408_v18 = vadd.f32 %v5007_v15, %v5041_v55  ;;  %v2237_v2 = vld [vmem:[#allocation14 + $0x5a8] sm:$0xff]  ;;  %v2227_v55 = vld [vmem:[#allocation14 + $0x558] sm:$0xff] }
 0x288   : > { %v1627_v49 = vpop.f32.mrf.mxu1  ;;  %2166 = vmatpush.msrb.mxu2 %v2111_v35  ;;  %v1765_v32 = vmul.f32 %v5099_v59, %v1737_v24  ;;  %v2234_v35 = vld [vmem:[#allocation14 + $0x590] sm:$0xff] }
 0x289   : > { %v5194_v58 = vadd.f32 %v1627_v49, %v1539_v6  ;;  %2189 = vmatpush.msra.mxu3 %v2112_v36  ;;  %v1497_v33 = vadd.f32 %v5056_v13, %v1408_v18  ;;  %v2092_v13 = vld [vmem:[#allocation14 + $0x378] sm:$0xff]  ;;  %v1441_v36 = vadd.f32 %v5007_v15, %v5118_v53  ;;  %v2244_v53 = vld [vmem:[#allocation14 + $0x5e0] sm:$0xff]  ;;  %v1968_v24 = vld [vmem:[#allocation14 + $0x1f0] sm:$0xff] }
 0x28a   : > { %2167 = vmatpush.msrb.mxu2 %v2108_v10  ;;  %v1793_v52 = vadd.f32 %v5101_v62, %v1765_v32  ;;  %2735 = vmatpush.msrb.mxu1 %v2092_v13  ;;  %v2247_v10 = vld [vmem:[#allocation14 + $0x5f8] sm:$0xff]  ;;  %v2365_v49 = vld [vmem:[#allocation14 + $0x750] sm:$0xff] }
 0x28b   : > { %1700 = vrot.lane.b32.xlu2 %v5194_v58, %s4418_s19  ;;  %1656 = vrot.lane.b32.xlu1 %v5192_v14, %s4418_s19  ;;  %v5233_v63 = vadd.f32 %v5064_v26, %v1497_v33  ;;  %v2224_v26 = vld [vmem:[#allocation14 + $0x540] sm:$0xff]  ;;  %v1530_v6 = vadd.f32 %v5121_v1, %v1441_v36  ;;  %v2241_v1 = vld [vmem:[#allocation14 + $0x5c8] sm:$0xff]  ;;  %v2235_v32 = vld [vmem:[#allocation14 + $0x598] sm:$0xff] }
 0x28c   : > { %1688 = vrot.lane.b32.xlu0 %v5197_v22, %s4418_s19  ;;  %2190 = vmatpush.msra.mxu3 %v2109_v20  ;;  %v2238_v20 = vld [vmem:[#allocation14 + $0x5b0] sm:$0xff] }
 0x28d   : > { %2168 = vmatpush.msrb.mxu2 %v2105_v27  ;;  %v5245_v8 = vadd.f32 %v5137_v45, %v1530_v6  ;;  %v1444_v45 = vadd.f32 %v5007_v15, %v5131_v30  ;;  %2707 = vmatpush.msra.mxu0 %v1968_v24  ;;  %v2362_v27 = vld [vmem:[#allocation14 + $0x738] sm:$0xff]  ;;  %v2232_v15 = vld [vmem:[#allocation14 + $0x580] sm:$0xff]  ;;  %v2356_v30 = vld [vmem:[#allocation14 + $0x708] sm:$0xff] }
 0x28e   : > { %3654 = vmatmul.msk.f32.vlgmr.msrb.gmra.mxu3 %vm1878_vm2, %v1816_v39  ;;  %v2357_v36 = vld [vmem:[#allocation14 + $0x710] sm:$0xff]  ;;  %v2352_v24 = vld [vmem:[#allocation14 + $0x6e8] sm:$0xff] }
 0x28f   : > { %3652 = vmatmul.msk.f32.vlgmr.msra.gmra.mxu2 %vm1878_vm2, %v5158_v5  ;;  %2191 = vmatpush.msra.mxu3 %v2106_v12  ;;  %v1817_v5 = vmax.f32 %v1793_v52, 0.0  ;;  %v2359_v12 = vld [vmem:[#allocation14 + $0x720] sm:$0xff] }
 0x290   : > { %2169 = vmatpush.msrb.mxu2 %v2102_v34  ;;  %v2226_v34 = vld [vmem:[#allocation14 + $0x550] sm:$0xff] }
 0x291   : > { %2192 = vmatpush.msra.mxu3 %v2103_v37  ;;  %v2350_v37 = vld [vmem:[#allocation14 + $0x6d8] sm:$0xff] }
 0x292   : > { %2262 = vmatpush.msra.mxu2 %v2245_v40  ;;  %v2089_v40 = vld [vmem:[#allocation14 + $0x360] sm:$0xff] }
 0x293   : > { %2285 = vmatpush.msrb.mxu3 %v2246_v31  ;;  %1662 = vrot.lane.b32.xlu2 %v5217_v44, %s4418_s19  ;;  %v1965_v31 = vld [vmem:[#allocation14 + $0x1d8] sm:$0xff] }
 0x294   : > { %1670 = vrot.lane.b32.xlu1 %v5220_v28, %s4418_s19  ;;  %2263 = vmatpush.msra.mxu2 %v2242_v42 }
 0x295   : > { %2286 = vmatpush.msrb.mxu3 %v2243_v23  ;;  %2736 = vmatpush.msrb.mxu1 %v2089_v40  ;;  %v2479_v40 = vld [vmem:[#allocation14 + $0x888] sm:$0xff] }
 0x296   : > { %3655 = vmatmul.msk.f32.gmra.mxu3 %vm1878_vm2, %v1817_v5  ;;  %2264 = vmatpush.msra.mxu2 %v2239_v11  ;;  %v2369_v11 = vld [vmem:[#allocation14 + $0x770] sm:$0xff] }
 0x297   : > { %3653 = vmatmul.msk.f32.gmra.mxu2 %vm1878_vm2, %v5176_v54  ;;  %2287 = vmatpush.msrb.mxu3 %v2240_v46  ;;  %v2231_v54 = vld [vmem:[#allocation14 + $0x578] sm:$0xff] }
 0x298   : > { %2265 = vmatpush.msra.mxu2 %v2236_v47  ;;  %2708 = vmatpush.msra.mxu0 %v1965_v31  ;;  %v2366_v47 = vld [vmem:[#allocation14 + $0x758] sm:$0xff]  ;;  %v2218_v31 = vld [vmem:[#allocation14 + $0x510] sm:$0xff] }
 0x299   : > { %2288 = vmatpush.msrb.mxu3 %v2237_v2  ;;  %v2370_v2 = vld [vmem:[#allocation14 + $0x778] sm:$0xff] }
 0x29a   : > { %2266 = vmatpush.msra.mxu2 %v2233_v61  ;;  %v2363_v61 = vld [vmem:[#allocation14 + $0x740] sm:$0xff] }
 0x29b   : > { %1672 = vrot.lane.b32.xlu2 %v5233_v63, %s4418_s19  ;;  %2289 = vmatpush.msrb.mxu3 %v2234_v35  ;;  %v2367_v35 = vld [vmem:[#allocation14 + $0x760] sm:$0xff] }
 0x29c   : > { %1680 = vrot.lane.b32.xlu1 %v5080_v0, %s4418_s19  ;;  %2267 = vmatpush.msra.mxu2 %v2230_v3 }
 0x29d   : > { %2290 = vmatpush.msrb.mxu3 %v2231_v54 }
 0x29e   : > { %3658 = vmatmul.msk.f32.vlgmr.msra.gmra.mxu3 %vm1878_vm2, %v1816_v39  ;;  %2268 = vmatpush.msra.mxu2 %v2227_v55  ;;  %v2360_v55 = vld [vmem:[#allocation14 + $0x728] sm:$0xff] }
 0x29f   : > { %3656 = vmatmul.msk.f32.vlgmr.msrb.gmra.mxu2 %vm1878_vm2, %v1816_v39  ;;  %2291 = vmatpush.msrb.mxu3 %v2228_v48  ;;  %v1533_v39 = vadd.f32 %v5135_v41, %v1444_v45  ;;  %v2353_v41 = vld [vmem:[#allocation14 + $0x6f0] sm:$0xff]  ;;  %v2358_v48 = vld [vmem:[#allocation14 + $0x718] sm:$0xff] }
 0x2a0   : > { %2269 = vmatpush.msra.mxu2 %v2224_v26  ;;  %v2361_v26 = vld [vmem:[#allocation14 + $0x730] sm:$0xff] }
 0x2a1   : > { %2292 = vmatpush.msrb.mxu3 %v2225_v17  ;;  %v5257_v4 = vadd.f32 %v5150_v57, %v1533_v39  ;;  %v2347_v57 = vld [vmem:[#allocation14 + $0x6c0] sm:$0xff]  ;;  %v2492_v45 = vld [vmem:[#allocation14 + $0x8f0] sm:$0xff]  ;;  %v2489_v39 = vld [vmem:[#allocation14 + $0x8d8] sm:$0xff] }
 0x2a2   : > { %2308 = vmatpush.msrb.mxu2 %v2247_v10  ;;  %v2351_v10 = vld [vmem:[#allocation14 + $0x6e0] sm:$0xff] }
 0x2a3   : > { %1686 = vrot.lane.b32.xlu2 %v5097_v51, %s4418_s19  ;;  %2385 = vmatpush.msra.mxu3 %v2368_v7  ;;  %v2355_v17 = vld [vmem:[#allocation14 + $0x700] sm:$0xff] }
 0x2a4   : > { %1694 = vrot.lane.b32.xlu1 %v5245_v8, %s4418_s19  ;;  %2309 = vmatpush.msrb.mxu2 %v2244_v53  ;;  %v2348_v53 = vld [vmem:[#allocation14 + $0x6c8] sm:$0xff] }
 0x2a5   : > { %2386 = vmatpush.msra.mxu3 %v2365_v49  ;;  %v2349_v49 = vld [vmem:[#allocation14 + $0x6d0] sm:$0xff] }
 0x2a6   : > { %3659 = vmatmul.msk.f32.gmra.mxu3 %vm1878_vm2, %v1817_v5  ;;  %2310 = vmatpush.msrb.mxu2 %v2241_v1  ;;  %v2086_v1 = vld [vmem:[#allocation14 + $0x348] sm:$0xff] }
 0x2a7   : > { %3657 = vmatmul.msk.f32.gmra.mxu2 %vm1878_vm2, %v1817_v5  ;;  %2387 = vmatpush.msra.mxu3 %v2362_v27  ;;  %v1962_v27 = vld [vmem:[#allocation14 + $0x1c0] sm:$0xff] }
 0x2a8   : > { %2311 = vmatpush.msrb.mxu2 %v2238_v20  ;;  %2737 = vmatpush.msrb.mxu1 %v2086_v1  ;;  %v2491_v20 = vld [vmem:[#allocation14 + $0x8e8] sm:$0xff] }
 0x2a9   : > { %2388 = vmatpush.msra.mxu3 %v2359_v12  ;;  %2709 = vmatpush.msra.mxu0 %v1962_v27  ;;  %v2486_v12 = vld [vmem:[#allocation14 + $0x8c0] sm:$0xff]  ;;  %v1851_v1 = vld [vmem:[#allocation14 + $0xa8] sm:$0xff] }
 0x2aa   : > { %2312 = vmatpush.msrb.mxu2 %v2235_v32  ;;  %v2488_v32 = vld [vmem:[#allocation14 + $0x8d0] sm:$0xff] }
 0x2ab   : > { %1696 = vrot.lane.b32.xlu2 %v5257_v4, %s4418_s19  ;;  %2389 = vmatpush.msra.mxu3 %v2356_v30  ;;  %v1959_v30 = vld [vmem:[#allocation14 + $0x1a8] sm:$0xff] }
 0x2ac   : > { %2313 = vmatpush.msrb.mxu2 %v2232_v15  ;;  %v2485_v15 = vld [vmem:[#allocation14 + $0x8b8] sm:$0xff]  ;;  %2710 = vmatpush.msra.mxu0 %v1959_v30 }
 0x2ad   : > { %2390 = vmatpush.msra.mxu3 %v2353_v41  ;;  %v2483_v41 = vld [vmem:[#allocation14 + $0x8a8] sm:$0xff]  ;;  %v1845_v30 = vld [vmem:[#allocation14 + $0x78] sm:$0xff] }
 0x2ae   : > { %2314 = vmatpush.msrb.mxu2 %v2229_v21  ;;  %v1956_v21 = vld [vmem:[#allocation14 + $0x190] sm:$0xff] }
 0x2af   : > { %2391 = vmatpush.msra.mxu3 %v2350_v37  ;;  %2711 = vmatpush.msra.mxu0 %v1956_v21  ;;  %v2480_v37 = vld [vmem:[#allocation14 + $0x890] sm:$0xff] }
 0x2b0   : > { %2315 = vmatpush.msrb.mxu2 %v2226_v34  ;;  %v2482_v34 = vld [vmem:[#allocation14 + $0x8a0] sm:$0xff] }
 0x2b1   : > { %2392 = vmatpush.msra.mxu3 %v2347_v57  ;;  %v2221_v57 = vld [vmem:[#allocation14 + $0x528] sm:$0xff] }
 0x2b2   : > { %2808 = vmatpush.msrb.mxu0 %v2221_v57  ;;  %v2345_v57 = vld [vmem:[#allocation14 + $0x6b0] sm:$0xff] }
 0x2b4   : > { %2809 = vmatpush.msrb.mxu0 %v2218_v31  ;;  %v2213_v31 = vld [vmem:[#allocation14 + $0x4e8] sm:$0xff] }
 0x2b5   : > { %v1683_v38 = vpop.permute.xlu0 %1682 }
 0x2b6   : > { %v1740_v50 = vmax.f32 %v5083_v16, %v1683_v38  ;;  %v2477_v38 = vld [vmem:[#allocation14 + $0x878] sm:$0xff] }
 0x2b8   : > { %v1768_v52 = vmul.f32 %v5099_v59, %v1740_v50  ;;  %v2476_v50 = vld [vmem:[#allocation14 + $0x870] sm:$0xff] }
 0x2ba   : > { %v1796_v42 = vadd.f32 %v5101_v62, %v1768_v52  ;;  %v2474_v52 = vld [vmem:[#allocation14 + $0x860] sm:$0xff] }
 0x2bc   : > { %v1820_v23 = vmax.f32 %v1796_v42, 0.0  ;;  %v2473_v42 = vld [vmem:[#allocation14 + $0x858] sm:$0xff] }
 0x2bd   : > { %v1691_v5 = vpop.permute.xlu2 %1690  ;;  %v1685_v46 = vpop.permute.xlu1 %1684 }
 0x2be   : > { %v1741_v18 = vmax.f32 %v5092_v25, %v1685_v46  ;;  %3660 = vmatmul.msk.f32.vlgmr.msra.gmra.mxu2 %vm1878_vm2, %v1820_v23  ;;  %3662 = vmatmul.msk.f32.vlgmr.msrb.gmra.mxu3 %vm1878_vm2, %v1820_v23  ;;  %v1744_v16 = vmax.f32 %v5113_v43, %v1691_v5  ;;  %v2364_v25 = vld [vmem:[#allocation14 + $0x748] sm:$0xff]  ;;  %v2354_v43 = vld [vmem:[#allocation14 + $0x6f8] sm:$0xff]  ;;  %v2212_v46 = vld [vmem:[#allocation14 + $0x4e0] sm:$0xff] }
 0x2bf   : > { %2408 = vmatpush.msra.mxu2 %v2369_v11  ;;  %2431 = vmatpush.msrb.mxu3 %v2370_v2  ;;  %v2471_v5 = vld [vmem:[#allocation14 + $0x848] sm:$0xff]  ;;  %v2493_v2 = vld [vmem:[#allocation14 + $0x8f8] sm:$0xff] }
 0x2c0   : > { %v1769_v33 = vmul.f32 %v5099_v59, %v1741_v18  ;;  %v1772_v13 = vmul.f32 %v5099_v59, %v1744_v16  ;;  %v2470_v18 = vld [vmem:[#allocation14 + $0x840] sm:$0xff]  ;;  %v2209_v16 = vld [vmem:[#allocation14 + $0x4c8] sm:$0xff] }
 0x2c1   : > { %2409 = vmatpush.msra.mxu2 %v2366_v47  ;;  %2432 = vmatpush.msrb.mxu3 %v2367_v35  ;;  %v2206_v35 = vld [vmem:[#allocation14 + $0x4b0] sm:$0xff] }
 0x2c2   : > { %v1797_v3 = vadd.f32 %v5101_v62, %v1769_v33  ;;  %v1800_v6 = vadd.f32 %v5101_v62, %v1772_v13 }
 0x2c3   : > { %2410 = vmatpush.msra.mxu2 %v2363_v61  ;;  %2433 = vmatpush.msrb.mxu3 %v2364_v25  ;;  %v2490_v61 = vld [vmem:[#allocation14 + $0x8e0] sm:$0xff] }
 0x2c4   : > { %v1821_v54 = vmax.f32 %v1797_v3, 0.0  ;;  %v5274_v7 = vmax.f32 %v1800_v6, 0.0  ;;  %v2481_v6 = vld [vmem:[#allocation14 + $0x898] sm:$0xff] }
 0x2c5   : > { %2411 = vmatpush.msra.mxu2 %v2360_v55  ;;  %2434 = vmatpush.msrb.mxu3 %v2361_v26  ;;  %v2203_v55 = vld [vmem:[#allocation14 + $0x498] sm:$0xff]  ;;  %v2083_v26 = vld [vmem:[#allocation14 + $0x330] sm:$0xff] }
 0x2c6   : > { %3661 = vmatmul.msk.f32.gmra.mxu2 %vm1878_vm2, %v1821_v54  ;;  %3663 = vmatmul.msk.f32.gmra.mxu3 %vm1878_vm2, %v1821_v54 }
 0x2c7   : > { %2412 = vmatpush.msra.mxu2 %v2357_v36  ;;  %2435 = vmatpush.msrb.mxu3 %v2358_v48  ;;  %v2484_v48 = vld [vmem:[#allocation14 + $0x8b0] sm:$0xff] }
 0x2c8   : > { %2738 = vmatpush.msrb.mxu1 %v2083_v26  ;;  %v1852_v26 = vld [vmem:[#allocation14 + $0xb0] sm:$0xff] }
 0x2c9   : > { %2413 = vmatpush.msra.mxu2 %v2354_v43  ;;  %2436 = vmatpush.msrb.mxu3 %v2355_v17  ;;  %v2200_v43 = vld [vmem:[#allocation14 + $0x480] sm:$0xff]  ;;  %v2475_v17 = vld [vmem:[#allocation14 + $0x868] sm:$0xff] }
 0x2cb   : > { %2414 = vmatpush.msra.mxu2 %v2351_v10  ;;  %2437 = vmatpush.msrb.mxu3 %v2352_v24  ;;  %v2478_v10 = vld [vmem:[#allocation14 + $0x880] sm:$0xff] }
 0x2cc   : > { %v2077_v24 = vld [vmem:[#allocation14 + $0x300] sm:$0xff] }
 0x2cd   : > { %2415 = vmatpush.msra.mxu2 %v2348_v53  ;;  %2438 = vmatpush.msrb.mxu3 %v2349_v49  ;;  %v2080_v53 = vld [vmem:[#allocation14 + $0x318] sm:$0xff] }
 0x2ce   : > { %3664 = vmatmul.msk.f32.vlgmr.msrb.gmra.mxu2 %vm1878_vm2, %v1820_v23  ;;  %3666 = vmatmul.msk.f32.vlgmr.msra.gmra.mxu3 %vm1878_vm2, %v5274_v7  ;;  %v2215_v23 = vld [vmem:[#allocation14 + $0x4f8] sm:$0xff] }
 0x2cf   : > { %2508 = vmatpush.msrb.mxu2 %v2491_v20  ;;  %2531 = vmatpush.msra.mxu3 %v2492_v45  ;;  %v2472_v20 = vld [vmem:[#allocation14 + $0x850] sm:$0xff] }
 0x2d0   : > { %2810 = vmatpush.msrb.mxu0 %v2215_v23  ;;  %2739 = vmatpush.msrb.mxu1 %v2080_v53  ;;  %v2342_v23 = vld [vmem:[#allocation14 + $0x698] sm:$0xff] }
 0x2d1   : > { %2509 = vmatpush.msrb.mxu2 %v2488_v32  ;;  %2532 = vmatpush.msra.mxu3 %v2489_v39  ;;  %v1848_v39 = vld [vmem:[#allocation14 + $0x90] sm:$0xff] }
 0x2d2   : > { %2811 = vmatpush.msrb.mxu0 %v2212_v46  ;;  %2740 = vmatpush.msrb.mxu1 %v2077_v24  ;;  %v2201_v24 = vld [vmem:[#allocation14 + $0x488] sm:$0xff] }
 0x2d3   : > { %2510 = vmatpush.msrb.mxu2 %v2485_v15  ;;  %2533 = vmatpush.msra.mxu3 %v2486_v12  ;;  %v2222_v12 = vld [vmem:[#allocation14 + $0x530] sm:$0xff] }
 0x2d4   : > { %2812 = vmatpush.msrb.mxu0 %v2209_v16  ;;  %2831 = vmatpush.msra.mxu1 %v2222_v12  ;;  %v1844_v12 = vld [vmem:[#allocation14 + $0x70] sm:$0xff] }
 0x2d5   : > { %2511 = vmatpush.msrb.mxu2 %v2482_v34  ;;  %2534 = vmatpush.msra.mxu3 %v2483_v41  ;;  %v2219_v41 = vld [vmem:[#allocation14 + $0x518] sm:$0xff]  ;;  %v1842_v34 = vld [vmem:[#allocation14 + $0x60] sm:$0xff] }
 0x2d6   : > { %3665 = vmatmul.msk.f32.gmra.mxu2 %vm1878_vm2, %v1821_v54  ;;  %2813 = vmatpush.msrb.mxu0 %v2206_v35  ;;  %v1830_v35 = vld [vmem:[#allocation14] sm:$0xff] }
 0x2d7   : > { %2512 = vmatpush.msrb.mxu2 %v2479_v40  ;;  %2535 = vmatpush.msra.mxu3 %v2480_v37  ;;  %v1839_v40 = vld [vmem:[#allocation14 + $0x48] sm:$0xff] }
 0x2d8   : > { %2814 = vmatpush.msrb.mxu0 %v2203_v55  ;;  %2832 = vmatpush.msra.mxu1 %v2219_v41  ;;  %v1853_v55 = vld [vmem:[#allocation14 + $0xb8] sm:$0xff] }
 0x2d9   : > { %2513 = vmatpush.msrb.mxu2 %v2476_v50  ;;  %2536 = vmatpush.msra.mxu3 %v2477_v38 }
 0x2da   : > { %2815 = vmatpush.msrb.mxu0 %v2200_v43  ;;  %v2333_v43 = vld [vmem:[#allocation14 + $0x650] sm:$0xff] }
 0x2db   : > { %2514 = vmatpush.msrb.mxu2 %v2473_v42  ;;  %2537 = vmatpush.msra.mxu3 %v2474_v52  ;;  %v1836_v42 = vld [vmem:[#allocation14 + $0x30] sm:$0xff] }
 0x2dd   : > { %v1693_v11 = vpop.permute.xlu0 %1692  ;;  %2515 = vmatpush.msrb.mxu2 %v2470_v18  ;;  %2538 = vmatpush.msra.mxu3 %v2471_v5  ;;  %v1833_v18 = vld [vmem:[#allocation14 + $0x18] sm:$0xff] }
 0x2de   : > { %v1745_v47 = vmax.f32 %v5125_v9, %v1693_v11  ;;  %3668 = vmatmul.msk.f32.vlgmr.msra.gmra.mxu2 %vm1878_vm2, %v5274_v7  ;;  %v2487_v9 = vld [vmem:[#allocation14 + $0x8c8] sm:$0xff]  ;;  %v2210_v11 = vld [vmem:[#allocation14 + $0x4d0] sm:$0xff] }
 0x2df   : > { %2554 = vmatpush.msra.mxu2 %v2493_v2 }
 0x2e0   : > { %v1773_v33 = vmul.f32 %v5099_v59, %v1745_v47  ;;  %v2339_v47 = vld [vmem:[#allocation14 + $0x680] sm:$0xff] }
 0x2e1   : > { %2555 = vmatpush.msra.mxu2 %v2490_v61 }
 0x2e2   : > { %v1801_v3 = vadd.f32 %v5101_v62, %v1773_v33  ;;  %v5285_v13 = vpop.f32.mrf.mxu2  ;;  %v2207_v33 = vld [vmem:[#allocation14 + $0x4b8] sm:$0xff] }
 0x2e3   : > { %2556 = vmatpush.msra.mxu2 %v2487_v9 }
 0x2e4   : > { %v1825_v25 = vmax.f32 %v1801_v3, 0.0  ;;  %v2336_v3 = vld [vmem:[#allocation14 + $0x668] sm:$0xff] }
 0x2e5   : > { %v5287_v54 = vpop.permute.xlu2 %1700  ;;  %v5289_v36 = vpop.permute.xlu0 %1654  ;;  %2557 = vmatpush.msra.mxu2 %v2484_v48  ;;  %v1850_v48 = vld [vmem:[#allocation14 + $0xa0] sm:$0xff] }
 0x2e6   : > { %3667 = vmatmul.msk.f32.gmra.mxu3 %vm1878_vm2, %v1825_v25  ;;  %3669 = vmatmul.msk.f32.gmra.mxu2 %vm1878_vm2, %v1825_v25  ;;  %v1749_v5 = vmax.f32 %v5194_v58, %v5287_v54  ;;  %v1726_v53 = vmax.f32 %v5140_v60, %v5289_v36  ;;  %v5342_v36 = vld [vmem:[#allocation11] ss:$0 sm:$0xff] }
 0x2e7   : > { %2558 = vmatpush.msra.mxu2 %v2481_v6  ;;  %v2204_v6 = vld [vmem:[#allocation14 + $0x4a0] sm:$0xff] }
 0x2e8   : > { %v1777_v58 = vmul.f32 %v5099_v59, %v1749_v5 }
 0x2e9   : > { %2559 = vmatpush.msra.mxu2 %v2478_v10  ;;  %v1849_v10 = vld [vmem:[#allocation14 + $0x98] sm:$0xff] }
 0x2ea   : > { %v5296_v32 = vpop.f32.mrf.mxu2 }
 0x2eb   : > { %2560 = vmatpush.msra.mxu2 %v2475_v17  ;;  %v1805_v17 = vadd.f32 %v5101_v62, %v1777_v58  ;;  %v1976_v58 = vld [vmem:[#allocation14 + $0x230] sm:$0xff] }
 0x2ed   : > { %v1663_v49 = vpop.permute.xlu2 %1662  ;;  %v1665_v45 = vpop.permute.xlu0 %1664  ;;  %2561 = vmatpush.msra.mxu2 %v2472_v20  ;;  %v5340_v60 = vmax.f32 %v1805_v17, 0.0 }
 0x2ee   : > { %v1730_v27 = vmax.f32 %v5217_v44, %v1663_v49  ;;  %3670 = vmatmul.msk.f32.vlgmr.msrb.gmra.mxu3 %vm1878_vm2, %v5274_v7  ;;  %v1731_v21 = vmax.f32 %v5153_v29, %v1665_v45  ;;  %v2216_v7 = vld [vmem:[#allocation14 + $0x500] sm:$0xff]  ;;  %v5333_v49 = vpop.f32.mrf.mxu3  ;;  %v5335_v45 = vld [vmem:[#allocation12] ss:$0 sm:$0xff] }
 0x2ef   : > { %2583 = vmatpush.msrb.mxu3 %v1851_v1  ;;  %2833 = vmatpush.msra.mxu1 %v2216_v7  ;;  %v1847_v1 = vld [vmem:[#allocation14 + $0x88] sm:$0xff] }
 0x2f0   : > { %v1758_v15 = vmul.f32 %v5099_v59, %v1730_v27  ;;  %v1759_v38 = vmul.f32 %v5099_v59, %v1731_v21  ;;  %v1846_v27 = vld [vmem:[#allocation14 + $0x80] sm:$0xff]  ;;  %v1843_v21 = vld [vmem:[#allocation14 + $0x68] sm:$0xff] }
 0x2f1   : > { %2584 = vmatpush.msrb.mxu3 %v1848_v39  ;;  %2834 = vmatpush.msra.mxu1 %v2213_v31  ;;  %v2327_v39 = vld [vmem:[#allocation14 + $0x620] sm:$0xff]  ;;  %v2324_v7 = vld [vmem:[#allocation14 + $0x608] sm:$0xff] }
 0x2f2   : > { %v1786_v44 = vadd.f32 %v5101_v62, %v1758_v15  ;;  %v5312_v2 = vpop.f32.mrf.mxu2  ;;  %v1754_v15 = vmul.f32 %v5342_v36, %v1726_v53  ;;  %v1970_v53 = vld [vmem:[#allocation14 + $0x200] sm:$0xff] }
 0x2f3   : > { %2585 = vmatpush.msrb.mxu3 %v1845_v30  ;;  %2835 = vmatpush.msra.mxu1 %v2210_v11  ;;  %v1835_v11 = vld [vmem:[#allocation14 + $0x28] sm:$0xff] }
 0x2f4   : > { %v5301_v37 = vmax.f32 %v1786_v44, 0.0  ;;  %v1782_v31 = vadd.f32 %v5335_v45, %v1754_v15 }
 0x2f5   : > { %v1699_v50 = vpop.permute.xlu1 %1698  ;;  %2586 = vmatpush.msrb.mxu3 %v1842_v34  ;;  %v1679_v52 = vpop.permute.xlu0 %1678  ;;  %2836 = vmatpush.msra.mxu1 %v2207_v33  ;;  %v1841_v34 = vld [vmem:[#allocation14 + $0x58] sm:$0xff] }
 0x2f6   : > { %v1748_v29 = vmax.f32 %v5168_v19, %v1699_v50  ;;  %3671 = vmatmul.msk.f32.gmra.mxu3 %vm1878_vm2, %v1825_v25  ;;  %3688 = vmatmul.msk.f32.vlgmr.msra.gmra.mxu0 %vm1878_vm2, %v5301_v37  ;;  %v1787_v19 = vadd.f32 %v5101_v62, %v1759_v38  ;;  %v1738_v16 = vmax.f32 %v5077_v56, %v1679_v52  ;;  %v1673_v30 = vpop.permute.xlu2 %1672  ;;  %v2469_v38 = vld [vmem:[#allocation14 + $0x838] sm:$0xff]  ;;  %v1838_v50 = vld [vmem:[#allocation14 + $0x40] sm:$0xff] }
 0x2f7   : > { %2587 = vmatpush.msrb.mxu3 %v1839_v40  ;;  %2906 = vmatpush.msra.mxu0 %v2345_v57  ;;  %v1840_v57 = vld [vmem:[#allocation14 + $0x50] sm:$0xff]  ;;  %v1837_v52 = vld [vmem:[#allocation14 + $0x38] sm:$0xff] }
 0x2f8   : > { %v1776_v46 = vmul.f32 %v5099_v59, %v1748_v29  ;;  %v5319_v25 = vmax.f32 %v1787_v19, 0.0  ;;  %v1766_v56 = vmul.f32 %v5099_v59, %v1738_v16  ;;  %v2330_v59 = vld [vmem:[#allocation14 + $0x638] sm:$0xff]  ;;  %2837 = vmatpush.msra.mxu1 %v2204_v6 }
 0x2f9   : > { %2588 = vmatpush.msrb.mxu3 %v1836_v42  ;;  %2907 = vmatpush.msra.mxu0 %v2342_v23  ;;  %v2466_v42 = vld [vmem:[#allocation14 + $0x820] sm:$0xff]  ;;  %v1735_v23 = vmax.f32 %v5233_v63, %v1673_v30  ;;  %v1832_v63 = vld [vmem:[#allocation14 + $0x10] sm:$0xff] }
 0x2fa   : > { %v1804_v61 = vadd.f32 %v5101_v62, %v1776_v46  ;;  %v1794_v20 = vadd.f32 %v5335_v45, %v1766_v56  ;;  %v5338_v62 = vpop.f32.mrf.mxu2  ;;  %2838 = vmatpush.msra.mxu1 %v2201_v24  ;;  %v1834_v46 = vld [vmem:[#allocation14 + $0x20] sm:$0xff] }
 0x2fb   : > { %2589 = vmatpush.msrb.mxu3 %v1833_v18  ;;  %2908 = vmatpush.msra.mxu0 %v2339_v47  ;;  %v2463_v18 = vld [vmem:[#allocation14 + $0x808] sm:$0xff]  ;;  %v5360_v47 = vpop.f32.mrf.mxu3  ;;  %v1763_v33 = vmul.f32 %v5342_v36, %v1735_v23  ;;  %v2331_v23 = vld [vmem:[#allocation14 + $0x640] sm:$0xff] }
 0x2fc   : > { %v5317_v9 = vmax.f32 %v1804_v61, 0.0  ;;  %v5345_v41 = vmax.f32 %v1794_v20, 0.0  ;;  %v1969_v20 = vld [vmem:[#allocation14 + $0x1f8] sm:$0xff] }
 0x2fd   : > { %v5322_v54 = vpop.permute.xlu1 %1656  ;;  %2590 = vmatpush.msrb.mxu3 %v1830_v35  ;;  %2909 = vmatpush.msra.mxu0 %v2336_v3  ;;  %v1831_v3 = vld [vmem:[#allocation14 + $0x8] sm:$0xff] }
 0x2fe   : > { %3672 = vmatmul.msk.f32.vlgmr.msrb.gmra.mxu2 %vm1878_vm2, %v5317_v9  ;;  %3674 = vmatmul.msk.f32.vlgmr.msra.gmra.mxu3 %vm1878_vm2, %v5317_v9  ;;  %v1727_v29 = vmax.f32 %v5192_v14, %v5322_v54  ;;  %v5362_v14 = vmax.f32 %v1782_v31, 0.0  ;;  %v1975_v54 = vld [vmem:[#allocation14 + $0x228] sm:$0xff]  ;;  %v2334_v31 = vld [vmem:[#allocation14 + $0x658] sm:$0xff] }
 0x2ff   : > { %3689 = vmatmul.msk.f32.gmra.mxu0 %vm1878_vm2, %v5319_v25  ;;  %2629 = vmatpush.msra.mxu3 %v1853_v55  ;;  %v1687_v55 = vpop.permute.xlu2 %1686 }
 0x300   : > { %2606 = vmatpush.msrb.mxu2 %v1852_v26  ;;  %2910 = vmatpush.msra.mxu0 %v2333_v43  ;;  %v1755_v19 = vmul.f32 %v5342_v36, %v1727_v29  ;;  %v2346_v26 = vld [vmem:[#allocation14 + $0x6b8] sm:$0xff]  ;;  %v1742_v17 = vmax.f32 %v5097_v51, %v1687_v55  ;;  %v2451_v29 = vld [vmem:[#allocation14 + $0x7a8] sm:$0xff] }
 0x301   : > { %2630 = vmatpush.msra.mxu3 %v1850_v48  ;;  %v1973_v43 = vld [vmem:[#allocation14 + $0x218] sm:$0xff]  ;;  %v2460_v48 = vld [vmem:[#allocation14 + $0x7f0] sm:$0xff] }
 0x302   : > { %2607 = vmatpush.msrb.mxu2 %v1849_v10  ;;  %2911 = vmatpush.msra.mxu0 %v2330_v59  ;;  %v5368_v61 = vpop.f32.mrf.mxu2  ;;  %v1783_v6 = vadd.f32 %v5335_v45, %v1755_v19  ;;  %v2343_v59 = vld [vmem:[#allocation14 + $0x6a0] sm:$0xff]  ;;  %v1770_v30 = vmul.f32 %v5342_v36, %v1742_v17  ;;  %v1957_v19 = vld [vmem:[#allocation14 + $0x198] sm:$0xff]  ;;  %v2091_v17 = vld [vmem:[#allocation14 + $0x370] sm:$0xff] }
 0x303   : > { %2631 = vmatpush.msra.mxu3 %v1847_v1  ;;  %v2457_v1 = vld [vmem:[#allocation14 + $0x7d8] sm:$0xff] }
 0x304   : > { %2608 = vmatpush.msrb.mxu2 %v1846_v27  ;;  %2912 = vmatpush.msra.mxu0 %v2327_v39  ;;  %v2340_v27 = vld [vmem:[#allocation14 + $0x688] sm:$0xff]  ;;  %v5382_v39 = vpop.f32.mrf.mxu3  ;;  %v2100_v55 = vld [vmem:[#allocation14 + $0x3b8] sm:$0xff] }
 0x305   : > { %2632 = vmatpush.msra.mxu3 %v1844_v12  ;;  %v5384_v12 = vmax.f32 %v1783_v6, 0.0 }
 0x306   : > { %v1671_v44 = vpop.permute.xlu1 %1670  ;;  %3673 = vmatmul.msk.f32.gmra.mxu2 %vm1878_vm2, %v5340_v60  ;;  %3675 = vmatmul.msk.f32.gmra.mxu3 %vm1878_vm2, %v5340_v60 }
 0x307   : > { %v1734_v40 = vmax.f32 %v5220_v28, %v1671_v44  ;;  %3696 = vmatmul.msk.f32.vlgmr.msrb.gmra.mxu0 %vm1878_vm2, %v5345_v41  ;;  %2609 = vmatpush.msrb.mxu2 %v1843_v21  ;;  %v1967_v21 = vld [vmem:[#allocation14 + $0x1e8] sm:$0xff]  ;;  %v1966_v44 = vld [vmem:[#allocation14 + $0x1e0] sm:$0xff] }
 0x308   : > { %2633 = vmatpush.msra.mxu3 %v1841_v34  ;;  %2913 = vmatpush.msra.mxu0 %v2324_v7  ;;  %v1689_v34 = vpop.permute.xlu0 %1688  ;;  %v2337_v7 = vld [vmem:[#allocation14 + $0x670] sm:$0xff] }
 0x309   : > { %v1762_v28 = vmul.f32 %v5342_v36, %v1734_v40  ;;  %2610 = vmatpush.msrb.mxu2 %v1840_v57  ;;  %v2454_v40 = vld [vmem:[#allocation14 + $0x7c0] sm:$0xff] }
 0x30a   : > { %3004 = vmatpush.msrb.mxu0 %v2469_v38  ;;  %2634 = vmatpush.msra.mxu3 %v1838_v50  ;;  %v5395_v57 = vpop.f32.mrf.mxu2  ;;  %v1964_v38 = vld [vmem:[#allocation14 + $0x1d0] sm:$0xff]  ;;  %v1963_v50 = vld [vmem:[#allocation14 + $0x1c8] sm:$0xff] }
 0x30b   : > { %v1790_v5 = vadd.f32 %v5335_v45, %v1762_v28  ;;  %2611 = vmatpush.msrb.mxu2 %v1837_v52  ;;  %v1743_v28 = vmax.f32 %v5197_v22, %v1689_v34  ;;  %v1961_v52 = vld [vmem:[#allocation14 + $0x1b8] sm:$0xff]  ;;  %v1958_v22 = vld [vmem:[#allocation14 + $0x1a0] sm:$0xff]  ;;  %v2082_v34 = vld [vmem:[#allocation14 + $0x328] sm:$0xff] }
 0x30c   : > { %3005 = vmatpush.msrb.mxu0 %v2466_v42  ;;  %2635 = vmatpush.msra.mxu3 %v1835_v11  ;;  %v1960_v42 = vld [vmem:[#allocation14 + $0x1b0] sm:$0xff] }
 0x30d   : > { %v5365_v16 = vmax.f32 %v1790_v5, 0.0  ;;  %2612 = vmatpush.msrb.mxu2 %v1834_v46  ;;  %v2448_v11 = vld [vmem:[#allocation14 + $0x790] sm:$0xff]  ;;  %v1771_v46 = vmul.f32 %v5342_v36, %v1743_v28  ;;  %v2338_v28 = vld [vmem:[#allocation14 + $0x678] sm:$0xff] }
 0x30e   : > { %v1681_v35 = vpop.permute.xlu1 %1680  ;;  %3006 = vmatpush.msrb.mxu0 %v2463_v18  ;;  %3676 = vmatmul.msk.f32.vlgmr.msra.gmra.mxu2 %vm1878_vm2, %v5317_v9  ;;  %v1791_v9 = vadd.f32 %v5335_v45, %v1763_v33  ;;  %v5406_v18 = vpop.f32.mrf.mxu3  ;;  %v2328_v33 = vld [vmem:[#allocation14 + $0x628] sm:$0xff] }
 0x30f   : > { %v1739_v56 = vmax.f32 %v5080_v0, %v1681_v35  ;;  %3678 = vmatmul.msk.f32.vlgmr.msrb.gmra.mxu3 %vm1878_vm2, %v5362_v14  ;;  %3690 = vmatmul.msk.f32.vlgmr.msrb.gmra.mxu1 %vm1878_vm2, %v5365_v16  ;;  %v1972_v0 = vld [vmem:[#allocation14 + $0x210] sm:$0xff]  ;;  %v1955_v35 = vld [vmem:[#allocation14 + $0x188] sm:$0xff] }
 0x310   : > { %2636 = vmatpush.msra.mxu3 %v1832_v63  ;;  %2613 = vmatpush.msrb.mxu2 %v1831_v3  ;;  %v5388_v51 = vmax.f32 %v1791_v9, 0.0  ;;  %v1954_v3 = vld [vmem:[#allocation14 + $0x180] sm:$0xff] }
 0x311   : > { %v1767_v10 = vmul.f32 %v5342_v36, %v1739_v56  ;;  %2929 = vmatpush.msrb.mxu1 %v2346_v26  ;;  %3007 = vmatpush.msrb.mxu0 %v2460_v48  ;;  %v1799_v56 = vadd.f32 %v5335_v45, %v1771_v46  ;;  %v2093_v9 = vld [vmem:[#allocation14 + $0x380] sm:$0xff]  ;;  %v2332_v46 = vld [vmem:[#allocation14 + $0x648] sm:$0xff] }
 0x312   : > { %2681 = vmatpush.msrb.mxu3 %v1976_v58  ;;  %2658 = vmatpush.msra.mxu2 %v1975_v54  ;;  %v2325_v58 = vld [vmem:[#allocation14 + $0x610] sm:$0xff]  ;;  %v5417_v54 = vpop.f32.mrf.mxu2 }
 0x313   : > { %v1795_v24 = vadd.f32 %v5335_v45, %v1767_v10  ;;  %2930 = vmatpush.msrb.mxu1 %v2343_v59  ;;  %3008 = vmatpush.msrb.mxu0 %v2457_v1  ;;  %v5420_v48 = vmax.f32 %v1799_v56, 0.0  ;;  %v2096_v10 = vld [vmem:[#allocation14 + $0x398] sm:$0xff]  ;;  %v1697_v59 = vpop.permute.xlu2 %1696  ;;  %v2468_v56 = vld [vmem:[#allocation14 + $0x830] sm:$0xff] }
 0x314   : > { %2682 = vmatpush.msrb.mxu3 %v1973_v43  ;;  %2659 = vmatpush.msra.mxu2 %v1972_v0  ;;  %v2097_v43 = vld [vmem:[#allocation14 + $0x3a0] sm:$0xff]  ;;  %v2094_v0 = vld [vmem:[#allocation14 + $0x388] sm:$0xff] }
 0x315   : > { %v5386_v15 = vmax.f32 %v1795_v24, 0.0  ;;  %2931 = vmatpush.msrb.mxu1 %v2340_v27  ;;  %3009 = vmatpush.msrb.mxu0 %v2454_v40  ;;  %v2090_v24 = vld [vmem:[#allocation14 + $0x368] sm:$0xff]  ;;  %v2081_v40 = vld [vmem:[#allocation14 + $0x320] sm:$0xff] }
 0x316   : > { %2683 = vmatpush.msrb.mxu3 %v1970_v53  ;;  %2660 = vmatpush.msra.mxu2 %v1969_v20  ;;  %v1695_v63 = vpop.permute.xlu1 %1694  ;;  %v1747_v53 = vmax.f32 %v5257_v4, %v1697_v59  ;;  %v2088_v20 = vld [vmem:[#allocation14 + $0x358] sm:$0xff]  ;;  %v2459_v59 = vld [vmem:[#allocation14 + $0x7e8] sm:$0xff] }
 0x317   : > { %3677 = vmatmul.msk.f32.gmra.mxu2 %vm1878_vm2, %v5340_v60  ;;  %3679 = vmatmul.msk.f32.gmra.mxu3 %vm1878_vm2, %v5384_v12  ;;  %v1798_v60 = vadd.f32 %v5335_v45, %v1770_v30  ;;  %v1746_v26 = vmax.f32 %v5245_v8, %v1695_v63  ;;  %v5427_v8 = vpop.f32.mrf.mxu3  ;;  %v2084_v4 = vld [vmem:[#allocation14 + $0x338] sm:$0xff] }
 0x318   : > { %3691 = vmatmul.msk.f32.gmra.mxu1 %vm1878_vm2, %v5388_v51  ;;  %3697 = vmatmul.msk.f32.gmra.mxu0 %vm1878_vm2, %v5386_v15 }
 0x319   : > { %2684 = vmatpush.msrb.mxu3 %v1967_v21  ;;  %2661 = vmatpush.msra.mxu2 %v1966_v44  ;;  %v5403_v5 = vmax.f32 %v1798_v60, 0.0  ;;  %v1774_v6 = vmul.f32 %v5342_v36, %v1746_v26  ;;  %v2087_v21 = vld [vmem:[#allocation14 + $0x350] sm:$0xff]  ;;  %v2085_v44 = vld [vmem:[#allocation14 + $0x340] sm:$0xff] }
 0x31a   : > { %2932 = vmatpush.msrb.mxu1 %v2337_v7  ;;  %3010 = vmatpush.msrb.mxu0 %v2451_v29  ;;  %v5435_v27 = vpop.f32.mrf.mxu2  ;;  %v2078_v29 = vld [vmem:[#allocation14 + $0x308] sm:$0xff]  ;;  %v2341_v60 = vld [vmem:[#allocation14 + $0x690] sm:$0xff] }
 0x31b   : > { %2685 = vmatpush.msrb.mxu3 %v1964_v38  ;;  %2662 = vmatpush.msra.mxu2 %v1963_v50  ;;  %v1802_v1 = vadd.f32 %v5335_v45, %v1774_v6  ;;  %v2079_v38 = vld [vmem:[#allocation14 + $0x310] sm:$0xff]  ;;  %v2344_v50 = vld [vmem:[#allocation14 + $0x6a8] sm:$0xff] }
 0x31c   : > { %2933 = vmatpush.msrb.mxu1 %v2334_v31  ;;  %3011 = vmatpush.msrb.mxu0 %v2448_v11  ;;  %v2464_v6 = vld [vmem:[#allocation14 + $0x810] sm:$0xff] }
 0x31d   : > { %2686 = vmatpush.msrb.mxu3 %v1961_v52  ;;  %2663 = vmatpush.msra.mxu2 %v1960_v42  ;;  %v5438_v30 = vmax.f32 %v1802_v1, 0.0  ;;  %v2220_v52 = vld [vmem:[#allocation14 + $0x520] sm:$0xff]  ;;  %v2453_v1 = vld [vmem:[#allocation14 + $0x7b8] sm:$0xff] }
 0x31e   : > { %2934 = vmatpush.msrb.mxu1 %v2331_v23  ;;  %v2335_v42 = vld [vmem:[#allocation14 + $0x660] sm:$0xff]  ;;  %v2217_v23 = vld [vmem:[#allocation14 + $0x508] sm:$0xff] }
 0x31f   : > { %3680 = vmatmul.msk.f32.vlgmr.msrb.gmra.mxu2 %vm1878_vm2, %v5362_v14  ;;  %3682 = vmatmul.msk.f32.vlgmr.msra.gmra.mxu3 %vm1878_vm2, %v5362_v14  ;;  %v2099_v14 = vld [vmem:[#allocation14 + $0x3b0] sm:$0xff]  ;;  %v5449_v7 = vpop.f32.mrf.mxu3 }
 0x320   : > { %3698 = vmatmul.msk.f32.vlgmr.msra.gmra.mxu1 %vm1878_vm2, %v5345_v41  ;;  %3704 = vmatmul.msk.f32.vlgmr.msra.gmra.mxu0 %vm1878_vm2, %v5403_v5 }
 0x321   : > { %2687 = vmatpush.msrb.mxu3 %v1958_v22  ;;  %2664 = vmatpush.msra.mxu2 %v1957_v19  ;;  %v2211_v22 = vld [vmem:[#allocation14 + $0x4d8] sm:$0xff]  ;;  %v2329_v19 = vld [vmem:[#allocation14 + $0x630] sm:$0xff] }
 0x322   : > { %2935 = vmatpush.msrb.mxu1 %v2328_v33  ;;  %v5453_v31 = vpop.f32.mrf.mxu2  ;;  %v2208_v33 = vld [vmem:[#allocation14 + $0x4c0] sm:$0xff] }
 0x323   : > { %2688 = vmatpush.msrb.mxu3 %v1955_v35  ;;  %2665 = vmatpush.msra.mxu2 %v1954_v3  ;;  %v2326_v35 = vld [vmem:[#allocation14 + $0x618] sm:$0xff]  ;;  %v2205_v3 = vld [vmem:[#allocation14 + $0x4a8] sm:$0xff] }
 0x324   : > { %2936 = vmatpush.msrb.mxu1 %v2325_v58  ;;  %v2323_v58 = vld [vmem:[#allocation14 + $0x600] sm:$0xff] }
 0x325   : > { %2779 = vmatpush.msra.mxu3 %v2100_v55  ;;  %2756 = vmatpush.msrb.mxu2 %v2099_v14  ;;  %v2202_v55 = vld [vmem:[#allocation14 + $0x490] sm:$0xff]  ;;  %v2465_v14 = vld [vmem:[#allocation14 + $0x818] sm:$0xff] }
 0x327   : > { %2780 = vmatpush.msra.mxu3 %v2097_v43  ;;  %3681 = vmatmul.msk.f32.gmra.mxu2 %vm1878_vm2, %v5384_v12  ;;  %v5463_v11 = vpop.f32.mrf.mxu3 }
 0x328   : > { %3683 = vmatmul.msk.f32.gmra.mxu3 %vm1878_vm2, %v5384_v12  ;;  %3699 = vmatmul.msk.f32.gmra.mxu1 %vm1878_vm2, %v5386_v15  ;;  %v1775_v12 = vmul.f32 %v5342_v36, %v1747_v53 }
 0x329   : > { %3705 = vmatmul.msk.f32.gmra.mxu0 %vm1878_vm2, %v5420_v48  ;;  %2757 = vmatpush.msrb.mxu2 %v2096_v10  ;;  %v2462_v10 = vld [vmem:[#allocation14 + $0x800] sm:$0xff] }
 0x32a   : > { %2781 = vmatpush.msra.mxu3 %v2094_v0  ;;  %v1803_v36 = vadd.f32 %v5335_v45, %v1775_v12  ;;  %v2223_v45 = vld [vmem:[#allocation14 + $0x538] sm:$0xff]  ;;  %v5469_v63 = vpop.f32.mrf.mxu2 }
 0x32b   : > { %2758 = vmatpush.msrb.mxu2 %v2093_v9  ;;  %v2461_v0 = vld [vmem:[#allocation14 + $0x7f8] sm:$0xff]  ;;  %v2458_v9 = vld [vmem:[#allocation14 + $0x7e0] sm:$0xff] }
 0x32c   : > { %2782 = vmatpush.msra.mxu3 %v2091_v17  ;;  %v2456_v17 = vld [vmem:[#allocation14 + $0x7d0] sm:$0xff] }
 0x32d   : > { %2759 = vmatpush.msrb.mxu2 %v2090_v24  ;;  %v2452_v24 = vld [vmem:[#allocation14 + $0x7b0] sm:$0xff] }
 0x32e   : > { %2783 = vmatpush.msra.mxu3 %v2088_v20  ;;  %v2450_v20 = vld [vmem:[#allocation14 + $0x7a0] sm:$0xff] }
 0x32f   : > { %3684 = vmatmul.msk.f32.vlgmr.msra.gmra.mxu2 %vm1878_vm2, %v5301_v37  ;;  %v5471_v26 = vpop.f32.mrf.mxu3 }
 0x330   : > { %3686 = vmatmul.msk.f32.vlgmr.msrb.gmra.mxu3 %vm1878_vm2, %v5301_v37  ;;  %3706 = vmatmul.msk.f32.vlgmr.msrb.gmra.mxu1 %vm1878_vm2, %v5403_v5  ;;  %v5451_v37 = vmax.f32 %v1803_v36, 0.0 }
 0x331   : > { %3712 = vmatmul.msk.f32.vlgmr.msrb.gmra.mxu0 %vm1878_vm2, %v5438_v30  ;;  %2760 = vmatpush.msrb.mxu2 %v2087_v21  ;;  %v2449_v21 = vld [vmem:[#allocation14 + $0x798] sm:$0xff] }
 0x332   : > { %2784 = vmatpush.msra.mxu3 %v2085_v44  ;;  %v2447_v44 = vld [vmem:[#allocation14 + $0x788] sm:$0xff] }
 0x333   : > { %2761 = vmatpush.msrb.mxu2 %v2084_v4  ;;  %v2446_v4 = vld [vmem:[#allocation14 + $0x780] sm:$0xff] }
 0x334   : > { %2785 = vmatpush.msra.mxu3 %v2082_v34 }
 0x335   : > { %2762 = vmatpush.msrb.mxu2 %v2081_v40 }
 0x336   : > { %2786 = vmatpush.msra.mxu3 %v2079_v38 }
 0x337   : > { %3685 = vmatmul.msk.f32.gmra.mxu2 %vm1878_vm2, %v5319_v25 }
 0x338   : > { %2883 = vmatpush.msrb.mxu3 %v2344_v50  ;;  %3707 = vmatmul.msk.f32.gmra.mxu1 %vm1878_vm2, %v5420_v48 }
 0x339   : > { %3687 = vmatmul.msk.f32.gmra.mxu3 %vm1878_vm2, %v5319_v25  ;;  %3713 = vmatmul.msk.f32.gmra.mxu0 %vm1878_vm2, %v5451_v37  ;;  %v2214_v25 = vld [vmem:[#allocation14 + $0x4f0] sm:$0xff] }
 0x33a   : > { %2763 = vmatpush.msrb.mxu2 %v2078_v29  ;;  %2884 = vmatpush.msrb.mxu3 %v2341_v60 }
 0x33c   : > { %2854 = vmatpush.msra.mxu2 %v2223_v45  ;;  %2885 = vmatpush.msrb.mxu3 %v2338_v28 }
 0x33e   : > { %2855 = vmatpush.msra.mxu2 %v2220_v52  ;;  %2886 = vmatpush.msrb.mxu3 %v2335_v42 }
 0x33f   : > { %3692 = vmatmul.msk.f32.vlgmr.msrb.gmra.mxu2 %vm1878_vm2, %v5365_v16 }
 0x340   : > { %2856 = vmatpush.msra.mxu2 %v2217_v23  ;;  %2887 = vmatpush.msrb.mxu3 %v2332_v46 }
 0x341   : > { %3694 = vmatmul.msk.f32.vlgmr.msra.gmra.mxu3 %vm1878_vm2, %v5365_v16  ;;  %v2467_v16 = vld [vmem:[#allocation14 + $0x828] sm:$0xff]  ;;  %v5477_v43 = vpop.f32.mrf.mxu2  ;;  %v5479_v53 = vpop.f32.mrf.mxu3 }
 0x342   : > { %2857 = vmatpush.msra.mxu2 %v2214_v25  ;;  %2888 = vmatpush.msrb.mxu3 %v2329_v19 }
 0x344   : > { %2858 = vmatpush.msra.mxu2 %v2211_v22  ;;  %2889 = vmatpush.msrb.mxu3 %v2326_v35 }
 0x346   : > { %2859 = vmatpush.msra.mxu2 %v2208_v33  ;;  %2890 = vmatpush.msrb.mxu3 %v2323_v58  ;;  %v3122_v58 = vld [vmem:[%s5858_s9 + $0x178] sm:$0xff] }
 0x347   : > { %3693 = vmatmul.msk.f32.gmra.mxu2 %vm1878_vm2, %v5388_v51 }
 0x348   : > { %2860 = vmatpush.msra.mxu2 %v2205_v3  ;;  %2981 = vmatpush.msra.mxu3 %v2468_v56 }
 0x349   : > { %3695 = vmatmul.msk.f32.gmra.mxu3 %vm1878_vm2, %v5388_v51  ;;  %v2455_v51 = vld [vmem:[#allocation14 + $0x7c8] sm:$0xff]  ;;  %v5485_v12 = vpop.f32.mrf.mxu2 }
 0x34a   : > { %2861 = vmatpush.msra.mxu2 %v2202_v55  ;;  %2982 = vmatpush.msra.mxu3 %v2465_v14  ;;  %v3120_v14 = vld [vmem:[%s5858_s9 + $0x168] sm:$0xff] }
 0x34c   : > { %2958 = vmatpush.msrb.mxu2 %v2467_v16  ;;  %2983 = vmatpush.msra.mxu3 %v2462_v10  ;;  %v3121_v16 = vld [vmem:[%s5858_s9 + $0x170] sm:$0xff] }
 0x34e   : > { %2959 = vmatpush.msrb.mxu2 %v2464_v6  ;;  %2984 = vmatpush.msra.mxu3 %v2459_v59  ;;  %v3118_v59 = vld [vmem:[%s5858_s9 + $0x158] sm:$0xff] }
 0x34f   : > { %3700 = vmatmul.msk.f32.vlgmr.msra.gmra.mxu2 %vm1878_vm2, %v5345_v41  ;;  %v5491_v41 = vpop.f32.mrf.mxu3 }
 0x350   : > { %2960 = vmatpush.msrb.mxu2 %v2461_v0  ;;  %2985 = vmatpush.msra.mxu3 %v2456_v17  ;;  %v3119_v0 = vld [vmem:[%s5858_s9 + $0x160] sm:$0xff] }
 0x351   : > { %3702 = vmatmul.msk.f32.vlgmr.msrb.gmra.mxu3 %vm1878_vm2, %v5403_v5  ;;  %v5493_v5 = vpop.f32.mrf.mxu2 }
 0x352   : > { %2961 = vmatpush.msrb.mxu2 %v2458_v9  ;;  %2986 = vmatpush.msra.mxu3 %v2453_v1  ;;  %v3116_v1 = vld [vmem:[%s5858_s9 + $0x148] sm:$0xff] }
 0x354   : > { %2962 = vmatpush.msrb.mxu2 %v2455_v51  ;;  %2987 = vmatpush.msra.mxu3 %v2450_v20  ;;  %v3117_v51 = vld [vmem:[%s5858_s9 + $0x150] sm:$0xff] }
 0x356   : > { %2963 = vmatpush.msrb.mxu2 %v2452_v24  ;;  %2988 = vmatpush.msra.mxu3 %v2447_v44 }
 0x357   : > { %3701 = vmatmul.msk.f32.gmra.mxu2 %vm1878_vm2, %v5386_v15  ;;  %v5499_v34 = vpop.f32.mrf.mxu3 }
 0x358   : > { %2964 = vmatpush.msrb.mxu2 %v2449_v21  ;;  %3173 = vmatpush.msrb.mxu3 %v3122_v58  ;;  %v3106_v58 = vld [vmem:[%s5858_s9 + $0xf8] sm:$0xff] }
 0x359   : > { %3703 = vmatmul.msk.f32.gmra.mxu3 %vm1878_vm2, %v5420_v48  ;;  %v5501_v36 = vpop.f32.mrf.mxu2 }
 0x35a   : > { %2965 = vmatpush.msrb.mxu2 %v2446_v4  ;;  %3174 = vmatpush.msrb.mxu3 %v3121_v16  ;;  %v3090_v4 = vld [vmem:[%s5858_s9 + $0x78] sm:$0xff]  ;;  %v3115_v16 = vld [vmem:[%s5858_s9 + $0x140] sm:$0xff] }
 0x35b   : > { %3127 = vmatpush.msra.mxu1 %v3090_v4  ;;  %v3087_v4 = vld [vmem:[%s5858_s9 + $0x60] sm:$0xff] }
 0x35c   : > { %3175 = vmatpush.msrb.mxu3 %v3120_v14  ;;  %3150 = vmatpush.msra.mxu2 %v3106_v58  ;;  %v3089_v14 = vld [vmem:[%s5858_s9 + $0x70] sm:$0xff]  ;;  %v3103_v58 = vld [vmem:[%s5858_s9 + $0xe0] sm:$0xff] }
 0x35d   : > { %3128 = vmatpush.msra.mxu1 %v3089_v14 }
 0x35e   : > { %3176 = vmatpush.msrb.mxu3 %v3119_v0 }
 0x35f   : > { %3708 = vmatmul.msk.f32.vlgmr.msrb.gmra.mxu2 %vm1878_vm2, %v5438_v30 }
 0x360   : > { %3177 = vmatpush.msrb.mxu3 %v3118_v59 }
 0x361   : > { %3710 = vmatmul.msk.f32.vlgmr.msra.gmra.mxu3 %vm1878_vm2, %v5438_v30  ;;  %v5509_v48 = vpop.f32.mrf.mxu2 }
 0x362   : > { %3178 = vmatpush.msrb.mxu3 %v3117_v51 }
 0x364   : > { %3179 = vmatpush.msrb.mxu3 %v3116_v1 }
 0x366   : > { %3180 = vmatpush.msrb.mxu3 %v3115_v16  ;;  %v3112_v16 = vld [vmem:[%s5858_s9 + $0x128] sm:$0xff] }
 0x367   : > { %3709 = vmatmul.msk.f32.gmra.mxu2 %vm1878_vm2, %v5451_v37 }
 0x369   : > { %3711 = vmatmul.msk.f32.gmra.mxu3 %vm1878_vm2, %v5451_v37  ;;  %v5507_v15 = vpop.f32.mrf.mxu3  ;;  %v5513_v50 = vpop.f32.mrf.mxu2 }
 0x371   : > { %v2440_v40 = vpop.f32.mrf.mxu3 }
 0x373   : > { %v5511_v38 = vpop.f32.mrf.mxu0 }
 0x379   : > { %v5515_v30 = vpop.f32.mrf.mxu3 }
 0x37c   : > { %v5521_v45 = vpop.f32.mrf.mxu0 }
 0x381   : > { %v5517_v29 = vpop.f32.mrf.mxu2  ;;  %v5519_v60 = vpop.f32.mrf.mxu3 }
 0x384   : > { %v2817_v52 = vpop.f32.mrf.mxu0 }
 0x389   : > { %v5523_v28 = vpop.f32.mrf.mxu2  ;;  %v5525_v37 = vpop.f32.mrf.mxu3 }
 0x38c   : > { %v2742_v42 = vpop.f32.mrf.mxu1 }
 0x38d   : > { %v2743_v59 = vadd.f32 %v2742_v42, %v5427_v8  ;;  %v2818_v8 = vadd.f32 %v2817_v52, %v5477_v43 }
 0x38f   : > { %v3025_v43 = vadd.f32 %v2818_v8, %v2743_v59  ;;  %v3111_v59 = vld [vmem:[%s5858_s9 + $0x120] sm:$0xff] }
 0x391   : > { %v2563_v23 = vpop.f32.mrf.mxu2 }
 0x392   : > { %v2592_v25 = vpop.f32.mrf.mxu3 }
 0x393   : > { %v2593_v42 = vadd.f32 %v2592_v25, %v5285_v13 }
 0x395   : > { %v5527_v46 = vpop.f32.mrf.mxu1  ;;  %v5529_v22 = vpop.f32.mrf.mxu0 }
 0x39a   : > { %v5531_v19 = vpop.f32.mrf.mxu2  ;;  %v5533_v33 = vpop.f32.mrf.mxu3 }
 0x39d   : > { %v5535_v35 = vpop.f32.mrf.mxu1  ;;  %v5537_v3 = vpop.f32.mrf.mxu0 }
 0x3a2   : > { %v5542_v55 = vpop.f32.mrf.mxu2  ;;  %v5544_v56 = vpop.f32.mrf.mxu3 }
 0x3a5   : > { %v5552_v6 = vpop.f32.mrf.mxu1 }
 0x3a6   : > { %v5554_v10 = vpop.f32.mrf.mxu0 }
 0x3aa   : > { %v5562_v9 = vpop.f32.mrf.mxu2 }
 0x3ab   : > { %v5564_v17 = vpop.f32.mrf.mxu3 }
 0x3ad   : > { %v2938_v24 = vpop.f32.mrf.mxu1 }
 0x3ae   : > { %v3013_v20 = vpop.f32.mrf.mxu0  ;;  %v2939_v21 = vadd.f32 %v2938_v24, %v2440_v40  ;;  %v3105_v40 = vld [vmem:[%s5858_s9 + $0xf0] sm:$0xff]  ;;  %v3088_v24 = vld [vmem:[%s5858_s9 + $0x68] sm:$0xff] }
 0x3af   : > { %v3014_v44 = vadd.f32 %v3013_v20, %v2563_v23  ;;  %v3114_v23 = vld [vmem:[%s5858_s9 + $0x138] sm:$0xff]  ;;  %3151 = vmatpush.msra.mxu2 %v3105_v40  ;;  %v3104_v20 = vld [vmem:[%s5858_s9 + $0xe8] sm:$0xff]  ;;  %3129 = vmatpush.msra.mxu1 %v3088_v24  ;;  %v3101_v24 = vld [vmem:[%s5858_s9 + $0xd0] sm:$0xff] }
 0x3b0   : > { %3181 = vmatpush.msrb.mxu3 %v3114_v23  ;;  %v3086_v40 = vld [vmem:[%s5858_s9 + $0x58] sm:$0xff] }
 0x3b1   : > { %v5590_v0 = vadd.f32 %v3014_v44, %v2939_v21  ;;  %v3113_v21 = vld [vmem:[%s5858_s9 + $0x130] sm:$0xff]  ;;  %3152 = vmatpush.msra.mxu2 %v3104_v20  ;;  %3130 = vmatpush.msra.mxu1 %v3087_v4  ;;  %v3102_v23 = vld [vmem:[%s5858_s9 + $0xd8] sm:$0xff] }
 0x3b2   : > { %v2667_v51 = vpop.f32.mrf.mxu2  ;;  %3182 = vmatpush.msrb.mxu3 %v3113_v21  ;;  %v3110_v20 = vld [vmem:[%s5858_s9 + $0x118] sm:$0xff]  ;;  %v3109_v4 = vld [vmem:[%s5858_s9 + $0x110] sm:$0xff] }
 0x3b3   : > { %v5593_v1 = vpop.f32.mrf.mxu3  ;;  %v2668_v44 = vadd.f32 %v2667_v51, %v5368_v61  ;;  %3153 = vmatpush.msra.mxu2 %v3103_v58  ;;  %3131 = vmatpush.msra.mxu1 %v3086_v40  ;;  %v3083_v58 = vld [vmem:[%s5858_s9 + $0x40] sm:$0xff] }
 0x3b4   : > { %3183 = vmatpush.msrb.mxu3 %v3112_v16  ;;  %v3099_v16 = vld [vmem:[%s5858_s9 + $0xc0] sm:$0xff] }
 0x3b5   : > { %v3019_v52 = vadd.f32 %v2668_v44, %v2593_v42  ;;  %v2941_v13 = vpop.f32.mrf.mxu1  ;;  %3154 = vmatpush.msra.mxu2 %v3102_v23  ;;  %v3084_v42 = vld [vmem:[%s5858_s9 + $0x48] sm:$0xff] }
 0x3b6   : > { %v3016_v25 = vpop.f32.mrf.mxu0  ;;  %v2942_v61 = vadd.f32 %v2941_v13, %v5515_v30  ;;  %3184 = vmatpush.msrb.mxu3 %v3111_v59  ;;  %v3100_v44 = vld [vmem:[%s5858_s9 + $0xc8] sm:$0xff]  ;;  %v3098_v13 = vld [vmem:[%s5858_s9 + $0xb8] sm:$0xff] }
 0x3b7   : > { %v3017_v14 = vadd.f32 %v3016_v25, %v5531_v19  ;;  %v5627_v51 = vadd.f32 %v3025_v43, %v3019_v52  ;;  %v3085_v19 = vld [vmem:[%s5858_s9 + $0x50] sm:$0xff]  ;;  %3155 = vmatpush.msra.mxu2 %v3101_v24  ;;  %v3108_v43 = vld [vmem:[%s5858_s9 + $0x108] sm:$0xff]  ;;  %v3082_v52 = vld [vmem:[%s5858_s9 + $0x38] sm:$0xff] }
 0x3b8   : > { %3132 = vmatpush.msra.mxu1 %v3085_v19  ;;  %3185 = vmatpush.msrb.mxu3 %v3110_v20  ;;  %v3107_v25 = vld [vmem:[%s5858_s9 + $0x100] sm:$0xff]  ;;  %v3080_v59 = vld [vmem:[%s5858_s9 + $0x28] sm:$0xff] }
 0x3b9   : > { %v5629_v30 = vadd.f32 %v3017_v14, %v2942_v61  ;;  %3156 = vmatpush.msra.mxu2 %v3100_v44  ;;  %v3081_v61 = vld [vmem:[%s5858_s9 + $0x30] sm:$0xff]  ;;  %v3096_v19 = vld [vmem:[%s5858_s9 + $0xa8] sm:$0xff]  ;;  %v3079_v24 = vld [vmem:[%s5858_s9 + $0x20] sm:$0xff] }
 0x3ba   : > { %v5640_v21 = vpop.f32.mrf.mxu2  ;;  %3133 = vmatpush.msra.mxu1 %v3084_v42  ;;  %3186 = vmatpush.msrb.mxu3 %v3109_v4  ;;  %v3097_v14 = vld [vmem:[%s5858_s9 + $0xb0] sm:$0xff]  ;;  %v3095_v20 = vld [vmem:[%s5858_s9 + $0xa0] sm:$0xff]  ;;  %v3078_v42 = vld [vmem:[%s5858_s9 + $0x18] sm:$0xff] }
 0x3bb   : > { %3157 = vmatpush.msra.mxu2 %v3099_v16  ;;  %v3094_v44 = vld [vmem:[%s5858_s9 + $0x98] sm:$0xff]  ;;  %v3077_v4 = vld [vmem:[%s5858_s9 + $0x10] sm:$0xff] }
 0x3bc   : > { %v5642_v8 = vpop.f32.mrf.mxu3  ;;  %3134 = vmatpush.msra.mxu1 %v3083_v58  ;;  %3187 = vmatpush.msrb.mxu3 %v3108_v43  ;;  %v3093_v58 = vld [vmem:[%s5858_s9 + $0x90] sm:$0xff] }
 0x3bd   : > { %3158 = vmatpush.msra.mxu2 %v3098_v13  ;;  %v3092_v13 = vld [vmem:[%s5858_s9 + $0x88] sm:$0xff] }
 0x3be   : > { %3135 = vmatpush.msra.mxu1 %v3082_v52  ;;  %3188 = vmatpush.msrb.mxu3 %v3107_v25  ;;  %v3076_v52 = vld [vmem:[%s5858_s9 + $0x8] sm:$0xff]  ;;  %v3075_v25 = vld [vmem:[%s5858_s9] sm:$0xff] }
 0x3bf   : > { %3159 = vmatpush.msra.mxu2 %v3097_v14  ;;  %v2639_v14 = vadd.f32 %v5544_v56, %v5333_v49  ;;  %v2642_v49 = vadd.f32 %v5564_v17, %v5360_v47  ;;  %v2841_v47 = vadd.f32 %v5535_v35, %v5479_v53  ;;  %v2691_v17 = vadd.f32 %v5593_v1, %v5382_v39 }
 0x3c0   : > { %3136 = vmatpush.msra.mxu1 %v3081_v61  ;;  %v3091_v61 = vld [vmem:[%s5858_s9 + $0x80] sm:$0xff] }
 0x3c1   : > { %3160 = vmatpush.msra.mxu2 %v3096_v19 }
 0x3c2   : > { %v2765_v40 = vpop.f32.mrf.mxu2  ;;  %3137 = vmatpush.msra.mxu1 %v3080_v59 }
 0x3c3   : > { %3161 = vmatpush.msra.mxu2 %v3095_v20 }
 0x3c4   : > { %v2788_v23 = vpop.f32.mrf.mxu3  ;;  %3138 = vmatpush.msra.mxu1 %v3079_v24  ;;  %v2714_v24 = vadd.f32 %v5511_v38, %v5417_v54  ;;  %v2717_v54 = vadd.f32 %v5521_v45, %v5435_v27  ;;  %v2916_v45 = vadd.f32 %v5537_v3, %v5509_v48 }
 0x3c5   : > { %3162 = vmatpush.msra.mxu2 %v3094_v44  ;;  %v2789_v20 = vadd.f32 %v2788_v23, %v5463_v11  ;;  %v5719_v44 = vld [vmem:[#allocation15] sm:$0x7]  ;;  %v2766_v23 = vadd.f32 %v2765_v40, %v5453_v31 }
 0x3c6   : > { %3139 = vmatpush.msra.mxu1 %v3078_v42 }
 0x3c7   : > { %3163 = vmatpush.msra.mxu2 %v3093_v58 }
 0x3c8   : > { %3140 = vmatpush.msra.mxu1 %v3077_v4  ;;  %v3021_v4 = vadd.f32 %v2714_v24, %v2639_v14  ;;  %v3024_v14 = vadd.f32 %v2717_v54, %v2642_v49  ;;  %v3203_v54 = vld [vmem:[%s5902_s17 + $0x28] sm:$0xff] }
 0x3c9   : > { %3164 = vmatpush.msra.mxu2 %v3092_v13  ;;  %v3053_v13 = vperm.slane %v5719_v44, 2 }
 0x3ca   : > { %v2768_v16 = vpop.f32.mrf.mxu2  ;;  %3141 = vmatpush.msra.mxu1 %v3076_v52 }
 0x3cb   : > { %3165 = vmatpush.msra.mxu2 %v3091_v61  ;;  %v2769_v48 = vadd.f32 %v2768_v16, %v5469_v63 }
 0x3cc   : > { %v2791_v43 = vpop.f32.mrf.mxu3  ;;  %3142 = vmatpush.msra.mxu1 %v3075_v25 }
 0x3cd   : > { %v2792_v11 = vadd.f32 %v2791_v43, %v5471_v26  ;;  %v2616_v26 = vadd.f32 %v5542_v55, %v5312_v2  ;;  %v2671_v2 = vadd.f32 %v5640_v21, %v5395_v57  ;;  %v2694_v57 = vadd.f32 %v5642_v8, %v5406_v18 }
 0x3ce   : > { %v2844_v21 = vadd.f32 %v5552_v6, %v5491_v41  ;;  %v2919_v18 = vadd.f32 %v5554_v10, %v5513_v50 }
 0x3d2   : > { %v2863_v59 = vpop.f32.mrf.mxu2 }
 0x3d3   : > { %v2864_v42 = vadd.f32 %v2863_v59, %v5493_v5 }
 0x3d4   : > { %v2892_v19 = vpop.f32.mrf.mxu3 }
 0x3d5   : > { %v3027_v58 = vadd.f32 %v2864_v42, %v2789_v20  ;;  %v2893_v39 = vadd.f32 %v2892_v19, %v5499_v34  ;;  %v3052_v20 = vperm.slane %v5719_v44, 1  ;;  %v2746_v34 = vadd.f32 %v5527_v46, %v5449_v7 }
 0x3d6   : > { %v2619_v7 = vadd.f32 %v5562_v9, %v5338_v62 }
 0x3d7   : > { %v3039_v52 = vadd.f32 %v3027_v58, %v3021_v4 }
 0x3d9   : > { %v3045_v56 = vadd.f32 %v3039_v52, %v5590_v0  ;;  %v3020_v0 = vadd.f32 %v2691_v17, %v2616_v26  ;;  %v3913_v17 = vld [vmem:[#allocation17] ss:$0 sm:$0xff] }
 0x3da   : > { %v2866_v25 = vpop.f32.mrf.mxu2 }
 0x3db   : > { %v3059_v5 = vadd.f32 %v3053_v13, %v3045_v56  ;;  %v2867_v38 = vadd.f32 %v2866_v25, %v5501_v36  ;;  %v3026_v36 = vadd.f32 %v2841_v47, %v2766_v23  ;;  %v3199_v23 = vld [vmem:[%s5902_s17 + $0x8] sm:$0xff] }
 0x3dc   : > { %v2895_v61 = vpop.f32.mrf.mxu3 }
 0x3dd   : > { %v3065_v59 = vmax.f32 %v3059_v5, 0.0  ;;  %v3030_v24 = vadd.f32 %v2867_v38, %v2792_v11  ;;  %v3038_v55 = vadd.f32 %v3026_v36, %v3020_v0  ;;  %v2896_v41 = vadd.f32 %v2895_v61, %v5507_v15  ;;  %v3202_v11 = vld [vmem:[%s5902_s17 + $0x20] sm:$0xff]  ;;  %v3201_v5 = vld [vmem:[%s5902_s17 + $0x18] sm:$0xff]  ;;  %v3200_v38 = vld [vmem:[%s5902_s17 + $0x10] sm:$0xff] }
 0x3df   : > { %3071 = vst [vmem:[%s5735_s11 + $0x10] sm:$0xff] %v3065_v59  ;;  %v3042_v27 = vadd.f32 %v3030_v24, %v3024_v14  ;;  %3189 = vmatmul.f32.vlgmr.msrb.gmra.mxu3 %v3065_v59  ;;  %v3198_v14 = vld [vmem:[%s5902_s17] sm:$0xff]  ;;  %v3241_v24 = vld [vmem:[#allocation20] sm:$0xff] }
 0x3e0   : > { %v3242_v59 = vld [vmem:[#allocation20 + $0x8] sm:$0xff] }
 0x3e1   : > { %v3048_v31 = vadd.f32 %v3042_v27, %v5629_v30  ;;  %v3051_v30 = vperm.slane %v5719_v44, 0 }
 0x3e2   : > { %v2967_v53 = vpop.f32.mrf.mxu2 }
 0x3e3   : > { %v2968_v1 = vadd.f32 %v2967_v53, %v5517_v29  ;;  %v3062_v43 = vadd.f32 %v3053_v13, %v3048_v31  ;;  %v2821_v29 = vadd.f32 %v5529_v22, %v5485_v12  ;;  %v3029_v12 = vadd.f32 %v2844_v21, %v2769_v48 }
 0x3e4   : > { %v2990_v35 = vpop.f32.mrf.mxu3 }
 0x3e5   : > { %v2991_v40 = vadd.f32 %v2990_v35, %v5519_v60  ;;  %v3031_v3 = vadd.f32 %v2968_v1, %v2893_v39  ;;  %v3068_v4 = vmax.f32 %v3062_v43, 0.0  ;;  %v2596_v60 = vadd.f32 %v5533_v33, %v5296_v32 }
 0x3e6   : > { %v3028_v32 = vadd.f32 %v2821_v29, %v2746_v34  ;;  %v3023_v33 = vadd.f32 %v2694_v57, %v2619_v7 }
 0x3e7   : > { %v3032_v42 = vadd.f32 %v2991_v40, %v2916_v45  ;;  %v3043_v63 = vadd.f32 %v5627_v51, %v3031_v3  ;;  %3074 = vst [vmem:[%s5735_s11 + $0x28] sm:$0xff] %v3068_v4  ;;  %3192 = vmatmul.f32.gmra.mxu3 %v3068_v4  ;;  %v3022_v46 = vadd.f32 %v2671_v2, %v2596_v60 }
 0x3e8   : > { %v3041_v52 = vadd.f32 %v3029_v12, %v3023_v33 }
 0x3e9   : > { %v3044_v16 = vadd.f32 %v3038_v55, %v3032_v42  ;;  %v3057_v22 = vadd.f32 %v3051_v30, %v3043_v63  ;;  %v3040_v9 = vadd.f32 %v3028_v32, %v3022_v46  ;;  %v3914_v55 = vld [vmem:[#allocation18] ss:$0 sm:$0xff] }
 0x3ea   : > { %v2970_v6 = vpop.f32.mrf.mxu2 }
 0x3eb   : > { %v3058_v19 = vadd.f32 %v3052_v20, %v3044_v16  ;;  %v3063_v8 = vmax.f32 %v3057_v22, 0.0  ;;  %v2971_v58 = vadd.f32 %v2970_v6, %v5523_v28  ;;  %v3205_v28 = vld [vmem:[%s5902_s17 + $0x38] sm:$0xff] }
 0x3ec   : > { %v2993_v51 = vpop.f32.mrf.mxu3  ;;  %3224 = vmatpush.msra.mxu0 %v3205_v28 }
 0x3ed   : > { %v3064_v44 = vmax.f32 %v3058_v19, 0.0  ;;  %v2994_v62 = vadd.f32 %v2993_v51, %v5525_v37  ;;  %3069 = vst [vmem:[%s5735_s11] sm:$0xff] %v3063_v8  ;;  %v3034_v13 = vadd.f32 %v2971_v58, %v2896_v41  ;;  %3143 = vmatmul.f32.vlgmr.msra.gmra.mxu1 %v3063_v8  ;;  %v3204_v37 = vld [vmem:[%s5902_s17 + $0x30] sm:$0xff] }
 0x3ee   : > { %3225 = vmatpush.msra.mxu0 %v3204_v37 }
 0x3ef   : > { %v3035_v49 = vadd.f32 %v2994_v62, %v2919_v18  ;;  %3166 = vmatmul.f32.vlgmr.msra.gmra.mxu2 %v3064_v44  ;;  %3070 = vst [vmem:[%s5735_s11 + $0x8] sm:$0xff] %v3064_v44  ;;  %v3046_v50 = vadd.f32 %v3040_v9, %v3034_v13 }
 0x3f0   : > { %3226 = vmatpush.msra.mxu0 %v3203_v54 }
 0x3f1   : > { %v3047_v15 = vadd.f32 %v3041_v52, %v3035_v49  ;;  %v3060_v10 = vadd.f32 %v3051_v30, %v3046_v50 }
 0x3f2   : > { %3227 = vmatpush.msra.mxu0 %v3202_v11 }
 0x3f3   : > { %v3061_v56 = vadd.f32 %v3052_v20, %v3047_v15  ;;  %v3066_v25 = vmax.f32 %v3060_v10, 0.0 }
 0x3f4   : > { %3228 = vmatpush.msra.mxu0 %v3201_v5 }
 0x3f5   : > { %v3067_v61 = vmax.f32 %v3061_v56, 0.0  ;;  %3072 = vst [vmem:[%s5735_s11 + $0x18] sm:$0xff] %v3066_v25  ;;  %3146 = vmatmul.f32.gmra.mxu1 %v3066_v25 }
 0x3f6   : > { %3229 = vmatpush.msra.mxu0 %v3200_v38 }
 0x3f7   : > { %3169 = vmatmul.f32.gmra.mxu2 %v3067_v61  ;;  %3073 = vst [vmem:[%s5735_s11 + $0x20] sm:$0xff] %v3067_v61 }
 0x3f8   : > { %3230 = vmatpush.msra.mxu0 %v3199_v23 }
 0x3fa   : > { %3231 = vmatpush.msra.mxu0 %v3198_v14 }
 0x3fc   : > { %3268 = vmatpush.msrb.mxu0 %v3242_v59 }
 0x3fe   : > { %3269 = vmatpush.msrb.mxu0 %v3241_v24 }
 0x462   : > { %v3190_v26 = vpop.f32.mrf.mxu3 }
 0x46a   : > { %v3144_v47 = vpop.f32.mrf.mxu1  ;;  %v3193_v40 = vpop.f32.mrf.mxu3 }
 0x46b   : > { %v3145_v27 = vadd.f32 %v3913_v17, %v3144_v47 }
 0x472   : > { %v3167_v36 = vpop.f32.mrf.mxu2  ;;  %v3147_v0 = vpop.f32.mrf.mxu1 }
 0x473   : > { %v3168_v31 = vadd.f32 %v3167_v36, %v3145_v27  ;;  %v3148_v35 = vadd.f32 %v3913_v17, %v3147_v0 }
 0x475   : > { %v3191_v45 = vadd.f32 %v3190_v26, %v3168_v31 }
 0x477   : > { %v3196_v53 = vmax.f32 %v3191_v45, 0.0 }
 0x479   : > { %3714 = vmatmul.msk.f32.vlgmr.msra.gmra.mxu0 %vm1878_vm2, %v3196_v53 }
 0x47a   : > { %v3170_v39 = vpop.f32.mrf.mxu2 }
 0x47b   : > { %v3171_v1 = vadd.f32 %v3170_v39, %v3148_v35 }
 0x47d   : > { %v3194_v43 = vadd.f32 %v3193_v40, %v3171_v1 }
 0x47f   : > { %v3197_v2 = vmax.f32 %v3194_v43, 0.0 }
 0x481   : > { %3715 = vmatmul.msk.f32.gmra.mxu0 %vm1878_vm2, %v3197_v2 }
 0x4f6   : > { %v3233_v30 = vpop.f32.mrf.mxu0 }
 0x4f7   : > { %v3234_v20 = vadd.f32 %v3914_v55, %v3233_v30 }
 0x4f9   : > { %v3239_v48 = vmax.f32 %v3234_v20, 0.0 }
 0x4fb   : > { %3716 = vmatmul.msk.f32.vlgmr.msrb.gmra.mxu0 %vm3247_vm3, %v3239_v48 }
 0x4fe   : > { %v3236_v3 = vpop.f32.mrf.mxu0 }
 0x4ff   : > { %v3237_v42 = vadd.f32 %v3914_v55, %v3236_v3 }
 0x501   : > { %v3240_v4 = vmax.f32 %v3237_v42, 0.0 }
 0x503   : > { %3717 = vmatmul.msk.f32.gmra.mxu0 %vm3247_vm3, %v3240_v4 }
 0x504   : > { %4305 = shalt.err (!%p4302_p9)
}
 0x505   : > { %s4419_s11 = smov 384   ;;  %s4420_s4 = smov 24   ;;  %v3915_v34 = vld [vmem:[#allocation21] ss:$0 sm:$0xff] }
 0x506   : > { %3785 = dma.vmem_to_hbm [thread:$0]  (%p4551_p6), %s3316_s27, 768, %s3318_s28, %s3285_s16, %s4419_s11, %s4419_s11, %s4420_s4  }
 0x507   : > { %s3566_s29 = sshll.u32 %s4703_s0, 4  ;;  %s3727_s3 = sshll.u32 %s4529_s25, 4 }
 0x508   : > { %s5905_s18 = sld [smem:[#allocation48_spill]]  ;;  %s834_s21 = scalar_lea.vmem [#allocation23], %s3566_s29 }
 0x509   : > { %s3297_s15 = sshll.u32 %s834_s21, 4  ;;  %s3280_s27 = scalar_lea.sflag [#allocation5], %s4703_s0  ;;  %s3298_s15 = int_to_ptr.vmem [resolvable:$true] %s3297_s15 }
 0x50e   : > { %s3296_s26 = scalar_lea.hbm %s5905_s18, %s3727_s3  ;;  %s4326_s19 = scalar_lea.hbm %s5905_s18, 48 }
 0x50f   : > { %s3299_s2 = sshll.u32 %s3296_s26, 4  ;;  %s3300_s2 = int_to_ptr.hbm [resolvable:$true] %s3299_s2 }
 0x510   : > { %s4320_s28 = sshra.s32 %s3300_s2, 4  ;;  %s4321_s28 = int_to_ptr.hbm [resolvable:$true] %s4320_s28 }
 0x511   : > { %s4322_s25 = scalar_lea.hbm %s4321_s28, 16  ;;  %p4327_p0 = scmp.lt.s32.totalorder %s4321_s28, %s5905_s18 }
 0x512   : > { %p4323_p11 = scmp.ne.s32.totalorder %s4321_s28, %s4322_s25  ;;  %p4328_p1 = scmp.lt.s32.totalorder %s4326_s19, %s4322_s25 }
 0x514   : > { %p4324_p12 = pnand %p4323_p11, %p4551_p6  ;;  %p4329_p2 = por %p4328_p1, %p4327_p0 }
 0x516   : > { %p4325_p13 = pneg %p4324_p12 }
 0x518   : > { %p4330_p3 = pnand %p4329_p2, %p4325_p13 }
 0x578   : > { %v3271_v29 = vpop.f32.mrf.mxu0 }
 0x579   : > { %v3272_v60 = vadd.f32 %v3915_v34, %v3271_v29 }
 0x57b   : > { %3277 = vst [vmem:[%s834_s21] sm:$0xff] %v3272_v60 }
 0x580   : > { %v3274_v57 = vpop.f32.mrf.mxu0 }
 0x581   : > { %v3275_v21 = vadd.f32 %v3915_v34, %v3274_v57 }
 0x583   : > { %3278 = vst [vmem:[%s834_s21 + $0x8] sm:$0xff] %v3275_v21 }
 0x584   : > { %4333 = shalt.err (!%p4330_p3)
}
 0x585   : > { %s4421_s0 = smov 128   ;;  %s4422_s29 = smov 8  }
 0x586   : > { %3784 = dma.vmem_to_hbm [thread:$0]  (%p4551_p6), %s3298_s15, 256, %s3300_s2, %s3280_s27, %s4421_s0, %s4421_s0, %s4422_s29  }
 0x587 PF: > { %s5906_s3 = sld [smem:[#allocation35_spill]]  ;;  %p3856_p4 = scmp.ge.s32.totalorder %s4400_s24, 2 }
 0x589   : > { %p3826_p5 = pnand %p3856_p4, %p4557_p10 }
 0x58b   : > { %p3827_p7 = pneg %p3826_p5 }
 0x58d   : > { %s3332_s1 = sand.u32 1, %s5906_s3  }
 0x58e   : > { %s3333_s26 = scalar_lea.sflag [#allocation5], %s3332_s1 }
 0x58f   : > { %4379 = dma.done.wait (%p3827_p7), %s3333_s26, 256  }
 0x590   : > { %4381 = vsyncadd (%p3827_p7), %s3333_s26, 4294967040  ;;  %s3343_s21 = scalar_lea.sflag [#allocation25], %s3332_s1 }
 0x591   : > { %4383 = dma.done.wait (%p3827_p7), %s3343_s21, 768  }
 0x592   : > { %4385 = vsyncadd (%p3827_p7), %s3343_s21, 4294966528  ;;  %s5908_s24 = sld [smem:[#allocation36_spill]]  ;;  %s5910_s21 = smov %s4392_s22 }
 0x593   : > { %s5909_s30 = sld [smem:[#allocation37_spill]]  ;;  %s5911_s22 = smov %s4396_s23 }
 0x598   : > { %p37_p6 = scmp.ge.s32.totalorder %s5908_s24, 5  }
 0x599   : > { %s5912_s23 = smov %s5909_s30 }
 0x59a   :  { %39 = sbr.rel (!%p37_p6) target bundleno = 23 (0x17), region = 224 }
 0x59f   :  { %3349 = vsyncpa [#allocation4], 1 }
 0x5a0   :  { %3351 = vsyncpa [#allocation4 + $0x1], 1 }
 0x5a1   :  { %3352 = vsyncpa [#allocation7], 1 }
 0x5a2   :  { %3353 = vsyncpa [#allocation10], 1 }
 0x5a3   :  { %3354 = vsyncpa [#allocation13], 1 }
 0x5a4   :  { %3355 = vsyncpa [#allocation16], 1 }
 0x5a5   :  { %3356 = vsyncpa [#allocation19], 1 }
 0x5a6   :  { %3357 = vsyncpa [#allocation22], 1 }
 0x5a7   :  { %3358 = vsyncpa [#allocation5], 1 }
 0x5a8   :  { %3360 = vsyncpa [#allocation5 + $0x1], 1 }
 0x5a9   :  { %3361 = vsyncpa [#allocation25], 1 }
 0x5aa   :  { %3363 = vsyncpa [#allocation25 + $0x1], 1 }

</bundles_post_ra>
